<compile_context>
chip_gen: v7x
topology: tpu7x:2x2x1
jax: 0.10.0
libtpu: 0.0.40
codegen_flags: <defaults>
</compile_context>

<pallas_src>
import numpy as np
import jax
import jax.numpy as jnp
from jax.experimental import pallas as pl
from jax.experimental.pallas import tpu as pltpu

BT = 8  # images per grid step (batch tile)


# ----------------------------------------------------------------------------
# Fused kernel: conv1+pool -> conv2+pool -> fc1+relu -> fc2+log_softmax,
# for BT images stacked along sublanes.
# ----------------------------------------------------------------------------
def _lenet_kernel(x_ref, w1m_ref, b1m_ref, ph1_ref,
                  w2m_ref, b2m_ref, ph2_ref,
                  wf1_ref, bf1_ref, wf2_ref, bf2_ref, o_ref):
    f32, bf16 = jnp.float32, jnp.bfloat16
    bt = o_ref.shape[0]
    R1 = bt * 28 - 4          # valid stacked rows for conv1 taps
    R2 = bt * 12 - 4          # valid stacked rows for conv2 taps

    x = x_ref[...]            # (bt*28, 28) f32, image b occupies rows [28b, 28b+28)

    # ---- conv1 (5x5, 1->20), even/odd pool columns merged in 512 lanes ----------
    # acc1[r, j*20+c]       = conv1(row r, col 2j,   chan c)   (even half, lanes 0:256)
    # acc1[r, 256+j*20+c]   = conv1(row r, col 2j+1, chan c)   (odd  half, lanes 256:512)
    acc1 = jnp.dot(x[0:R1, :].astype(bf16), w1m_ref[0], preferred_element_type=f32)
    for di in range(1, 5):
        acc1 = acc1 + jnp.dot(x[di:di + R1, :].astype(bf16), w1m_ref[di],
                              preferred_element_type=f32)
    z1 = acc1 + b1m_ref[...]
    s1 = jnp.maximum(z1[:, 0:256], 0.0) + jnp.maximum(z1[:, 256:512], 0.0)  # W-pool pairs

    # H-direction pool (0.25 folded in) via one block-diagonal selection matmul.
    pooled1 = jnp.dot(ph1_ref[...], s1, preferred_element_type=f32)  # (bt*12, 256)

    # ---- conv2 (5x5, 20->50 padded to 128 per output column), merged parities ---
    acc2 = jnp.dot(pooled1[0:R2, :].astype(bf16), w2m_ref[0], preferred_element_type=f32)
    for di in range(1, 5):
        acc2 = acc2 + jnp.dot(pooled1[di:di + R2, :].astype(bf16), w2m_ref[di],
                              preferred_element_type=f32)
    z2 = acc2 + b2m_ref[...]
    s2 = jnp.maximum(z2[:, 0:512], 0.0) + jnp.maximum(z2[:, 512:1024], 0.0)  # (R2, 512)

    # ---- pool-H of conv2 + fc1 (800->500 padded 512), M = bt ---------------------
    # pooled2_io[b, jo*128+m] = avgpool2 output at (h=io, w=jo, chan m) of image b;
    # flatten order is folded into wf1, so fc1 is 4 accumulated (bt,512)x(512,512) dots.
    hacc = None
    for io in range(4):
        pooled2_io = jnp.dot(ph2_ref[io], s2, preferred_element_type=f32)   # (bt, 512)
        d = jnp.dot(pooled2_io.astype(bf16), wf1_ref[io], preferred_element_type=f32)
        hacc = d if hacc is None else hacc + d
    h = jnp.maximum(hacc + bf1_ref[...], 0.0)                               # (bt, 512)

    # ---- fc2 (500->10 padded 128) + log_softmax ----------------------------------
    z = jnp.dot(h.astype(bf16), wf2_ref[...], preferred_element_type=f32) + bf2_ref[...]
    lane = jax.lax.broadcasted_iota(jnp.int32, z.shape, 1)
    z = jnp.where(lane < 10, z, -1e30)                 # mask padded logit lanes
    m = jnp.max(z, axis=-1, keepdims=True)
    lse = jnp.log(jnp.sum(jnp.exp(z - m), axis=-1, keepdims=True))
    o_ref[...] = (z - m) - lse                         # (bt, 128)


def _const_spec(shape):
    zeros = (0,) * len(shape)
    return pl.BlockSpec(shape, lambda i, zeros=zeros: zeros)


@jax.jit
def model_forward(kp, x_nchw):
    """x_nchw: (B, 1, 28, 28) float32 (PyTorch NCHW). Returns (B, 10) log-probs."""
    B = x_nchw.shape[0]
    Bp = ((B + BT - 1) // BT) * BT
    x = x_nchw.reshape(B, 28, 28).astype(jnp.float32)
    if Bp != B:
        x = jnp.pad(x, ((0, Bp - B), (0, 0), (0, 0)))
    xr = x.reshape(Bp * 28, 28)                        # images stacked along sublanes

    out = pl.pallas_call(
        _lenet_kernel,
        out_shape=jax.ShapeDtypeStruct((Bp, 128), jnp.float32),
        grid=(Bp // BT,),
        in_specs=[
            pl.BlockSpec((BT * 28, 28), lambda i: (i, 0)),   # image tile
            _const_spec((5, 28, 512)),                       # conv1 banded weights (bf16)
            _const_spec((1, 512)),                           # conv1 bias (tiled, f32)
            _const_spec((BT * 12, BT * 28 - 4)),             # pool-H selection 1 (f32)
            _const_spec((5, 256, 1024)),                     # conv2 banded weights (bf16)
            _const_spec((1, 1024)),                          # conv2 bias (padded, f32)
            _const_spec((4, BT, BT * 12 - 4)),               # pool-H selections 2 (f32)
            _const_spec((4, 512, 512)),                      # fc1 (permuted/padded, bf16)
            _const_spec((1, 512)),                           # fc1 bias (f32)
            _const_spec((512, 128)),                         # fc2 (padded, bf16)
            _const_spec((1, 128)),                           # fc2 bias (f32)
        ],
        out_specs=pl.BlockSpec((BT, 128), lambda i: (i, 0)),
        compiler_params=pltpu.CompilerParams(
            dimension_semantics=("parallel",),
            vmem_limit_bytes=40 * 1024 * 1024,               # bf16 weights ~5MB x2 buf + acts << 64MiB (v7x-safe)
        ),
    )(xr, kp["w1m"], kp["b1m"], kp["ph1"], kp["w2m"], kp["b2m"], kp["ph2"],
      kp["wf1"], kp["bf1"], kp["wf2"], kp["bf2"])

    return out[:B, :10]                                 # strip batch/lane padding


# ----------------------------------------------------------------------------
# Parameter construction (PyTorch-layout weights -> fused kernel constants).
# ----------------------------------------------------------------------------
def init_torch_params(key):
    ks = jax.random.split(key, 8)

    def u(k, shape, fan_in):
        bound = 1.0 / np.sqrt(fan_in)
        return jax.random.uniform(k, shape, jnp.float32, -bound, bound)

    return {
        "conv1_w": u(ks[0], (20, 1, 5, 5), 25),
        "conv1_b": u(ks[1], (20,), 25),
        "conv2_w": u(ks[2], (50, 20, 5, 5), 500),
        "conv2_b": u(ks[3], (50,), 500),
        "fc1_w":   u(ks[4], (500, 800), 800),
        "fc1_b":   u(ks[5], (500,), 800),
        "fc2_w":   u(ks[6], (10, 500), 500),
        "fc2_b":   u(ks[7], (10,), 500),
    }


def build_kernel_params(tp, bt=BT):
    w1 = np.asarray(tp["conv1_w"])[:, 0, :, :]        # (20, 5, 5)   [c, di, dj]
    b1 = np.asarray(tp["conv1_b"])                    # (20,)
    w2 = np.asarray(tp["conv2_w"])                    # (50, 20, 5, 5) [m, c, di, dj]
    b2 = np.asarray(tp["conv2_b"])                    # (50,)
    f1 = np.asarray(tp["fc1_w"])                      # (500, 800)
    g1 = np.asarray(tp["fc1_b"])                      # (500,)
    f2 = np.asarray(tp["fc2_w"])                      # (10, 500)
    g2 = np.asarray(tp["fc2_b"])                      # (10,)

    # conv1 banded weights, even/odd pool columns merged into 128-aligned lane halves.
    # even half lanes [0,240): (j, c); odd half lanes [256, 496): (j, c).
    w1m = np.zeros((5, 28, 512), np.float32)
    for di in range(5):
        for j in range(12):
            for dj in range(5):
                w1m[di, 2 * j + dj,     j * 20:(j + 1) * 20] = w1[:, di, dj]
                w1m[di, 2 * j + 1 + dj, 256 + j * 20:256 + (j + 1) * 20] = w1[:, di, dj]
    b1m = np.zeros((1, 512), np.float32)
    b1m[0, 0:240] = np.tile(b1, 12)
    b1m[0, 256:496] = np.tile(b1, 12)

    # conv2 banded weights: input lanes (j,c) in [0,240); output even half lanes
    # jo*128+m in [0,512), odd half at +512.  m padded 50->128 per jo.
    w2m = np.zeros((5, 256, 1024), np.float32)
    for di in range(5):
        for jo in range(4):
            for dj in range(5):
                blk = w2[:, :, di, dj].T                       # (c=20, m=50)
                je, jd = 2 * jo + dj, 2 * jo + 1 + dj
                w2m[di, je * 20:(je + 1) * 20, jo * 128:jo * 128 + 50] = blk
                w2m[di, jd * 20:(jd + 1) * 20, 512 + jo * 128:512 + jo * 128 + 50] = blk
    b2m = np.zeros((1, 1024), np.float32)
    for jo in range(4):
        b2m[0, jo * 128:jo * 128 + 50] = b2
        b2m[0, 512 + jo * 128:512 + jo * 128 + 50] = b2

    # Block-diagonal H-pool selection for conv1 (0.25 of the 2x2 average folded in).
    ph1 = np.zeros((bt * 12, bt * 28 - 4), np.float32)
    for b in range(bt):
        for i in range(12):
            ph1[b * 12 + i, b * 28 + 2 * i] = 0.25
            ph1[b * 12 + i, b * 28 + 2 * i + 1] = 0.25

    # Per-output-row H-pool selections for conv2: ph2[io] maps stacked s2 rows -> images.
    ph2 = np.zeros((4, bt, bt * 12 - 4), np.float32)
    for io in range(4):
        for b in range(bt):
            ph2[io, b, b * 12 + 2 * io] = 0.25
            ph2[io, b, b * 12 + 2 * io + 1] = 0.25

    # fc1: fold PyTorch's (C,H,W) flatten order + channel padding into the weight.
    wf1 = np.zeros((4, 512, 512), np.float32)
    for io in range(4):
        for jo in range(4):
            idx = np.arange(50) * 16 + io * 4 + jo             # torch flat indices
            wf1[io, jo * 128:jo * 128 + 50, :500] = f1[:, idx].T
    bf1 = np.zeros((1, 512), np.float32)
    bf1[0, :500] = g1

    wf2 = np.zeros((512, 128), np.float32)
    wf2[:500, :10] = f2.T
    bf2 = np.zeros((1, 128), np.float32)
    bf2[0, :10] = g2

    return {
        "w1m": jnp.asarray(w1m, jnp.bfloat16),
        "b1m": jnp.asarray(b1m, jnp.float32),
        "ph1": jnp.asarray(ph1, jnp.float32),
        "w2m": jnp.asarray(w2m, jnp.bfloat16),
        "b2m": jnp.asarray(b2m, jnp.float32),
        "ph2": jnp.asarray(ph2, jnp.float32),
        "wf1": jnp.asarray(wf1, jnp.bfloat16),
        "bf1": jnp.asarray(bf1, jnp.float32),
        "wf2": jnp.asarray(wf2, jnp.bfloat16),
        "bf2": jnp.asarray(bf2, jnp.float32),
    }


# ----------------------------------------------------------------------------
# Pure-XLA reference of the PyTorch forward (for correctness checking).
# ----------------------------------------------------------------------------
def reference_forward(tp, x_nchw):
    dn = ("NCHW", "OIHW", "NCHW")
    y = jax.lax.conv_general_dilated(x_nchw, tp["conv1_w"], (1, 1), "VALID",
                                     dimension_numbers=dn)
    y = jnp.maximum(y + tp["conv1_b"][None, :, None, None], 0.0)
    y = jax.lax.reduce_window(y, 0.0, jax.lax.add, (1, 1, 2, 2), (1, 1, 2, 2), "VALID") * 0.25
    y = jax.lax.conv_general_dilated(y, tp["conv2_w"], (1, 1), "VALID",
                                     dimension_numbers=dn)
    y = jnp.maximum(y + tp["conv2_b"][None, :, None, None], 0.0)
    y = jax.lax.reduce_window(y, 0.0, jax.lax.add, (1, 1, 2, 2), (1, 1, 2, 2), "VALID") * 0.25
    flat = y.reshape(y.shape[0], -1)                  # (B, 800) in torch (C,H,W) order
    h = jnp.maximum(flat @ tp["fc1_w"].T + tp["fc1_b"], 0.0)
    z = h @ tp["fc2_w"].T + tp["fc2_b"]
    return jax.nn.log_softmax(z, axis=1)


if __name__ == "__main__":
    key = jax.random.PRNGKey(0)
    k_p, k_x = jax.random.split(key)
    torch_params = init_torch_params(k_p)
    kernel_params = build_kernel_params(torch_params)
    x = jax.random.normal(k_x, (2, 1, 28, 28), jnp.float32)

    out = jax.block_until_ready(model_forward(kernel_params, x))
    assert out.shape == (2, 10), out.shape

    # log_softmax rows must exponentiate-sum to ~1
    row_sums = jnp.exp(out).sum(axis=1)
    assert bool(jnp.all(jnp.abs(row_sums - 1.0) < 1e-4)), row_sums

    # must match the pure-XLA reference of the PyTorch forward
    ref = reference_forward(torch_params, x)
    max_err = float(jnp.max(jnp.abs(out - ref)))
    assert max_err < 5e-2, max_err

    print("KERNEL_OK")
</pallas_src>

<mosaic_0001>
module attributes {stable_mosaic.version = 11 : i64} {
  func.func @_lenet_kernel(%arg0: i32, %arg1: memref<224x28xf32, #tpu.memory_space<vmem>>, %arg2: memref<5x28x512xbf16, #tpu.memory_space<vmem>>, %arg3: memref<1x512xf32, #tpu.memory_space<vmem>>, %arg4: memref<96x220xf32, #tpu.memory_space<vmem>>, %arg5: memref<5x256x1024xbf16, #tpu.memory_space<vmem>>, %arg6: memref<1x1024xf32, #tpu.memory_space<vmem>>, %arg7: memref<4x8x92xf32, #tpu.memory_space<vmem>>, %arg8: memref<4x512x512xbf16, #tpu.memory_space<vmem>>, %arg9: memref<1x512xf32, #tpu.memory_space<vmem>>, %arg10: memref<512x128xbf16, #tpu.memory_space<vmem>>, %arg11: memref<1x128xf32, #tpu.memory_space<vmem>>, %arg12: memref<8x128xf32, #tpu.memory_space<vmem>>) attributes {dimension_semantics = [#tpu.dimension_semantics<parallel>], iteration_bounds = array<i64: 1>, scalar_prefetch = 0 : i64, scratch_operands = 0 : i64, tpu.core_type = #tpu.core_type<tc>, window_params = [{transform_indices = @transform_0, window_bounds = array<i64: 224, 28>}, {pipeline_mode = #tpu.pipeline_mode<synchronous>, transform_indices = @transform_1, window_bounds = array<i64: 5, 28, 512>}, {pipeline_mode = #tpu.pipeline_mode<synchronous>, transform_indices = @transform_2, window_bounds = array<i64: 1, 512>}, {pipeline_mode = #tpu.pipeline_mode<synchronous>, transform_indices = @transform_3, window_bounds = array<i64: 96, 220>}, {pipeline_mode = #tpu.pipeline_mode<synchronous>, transform_indices = @transform_4, window_bounds = array<i64: 5, 256, 1024>}, {pipeline_mode = #tpu.pipeline_mode<synchronous>, transform_indices = @transform_5, window_bounds = array<i64: 1, 1024>}, {pipeline_mode = #tpu.pipeline_mode<synchronous>, transform_indices = @transform_6, window_bounds = array<i64: 4, 8, 92>}, {pipeline_mode = #tpu.pipeline_mode<synchronous>, transform_indices = @transform_7, window_bounds = array<i64: 4, 512, 512>}, {pipeline_mode = #tpu.pipeline_mode<synchronous>, transform_indices = @transform_8, window_bounds = array<i64: 1, 512>}, {pipeline_mode = #tpu.pipeline_mode<synchronous>, transform_indices = @transform_9, window_bounds = array<i64: 512, 128>}, {pipeline_mode = #tpu.pipeline_mode<synchronous>, transform_indices = @transform_10, window_bounds = array<i64: 1, 128>}, {transform_indices = @transform_11, window_bounds = array<i64: 8, 128>}]} {
    %c0 = arith.constant 0 : index
    %c0_0 = arith.constant 0 : index
    %0 = vector.load %arg1[%c0, %c0_0] : memref<224x28xf32, #tpu.memory_space<vmem>>, vector<224x28xf32>
    %1 = vector.extract_strided_slice %0 {offsets = [0, 0], sizes = [220, 28], strides = [1, 1]} : vector<224x28xf32> to vector<220x28xf32>
    %2 = arith.truncf %1 : vector<220x28xf32> to vector<220x28xbf16>
    %c0_1 = arith.constant 0 : index
    %c0_2 = arith.constant 0 : index
    %c0_3 = arith.constant 0 : index
    %3 = vector.load %arg2[%c0_1, %c0_2, %c0_3] : memref<5x28x512xbf16, #tpu.memory_space<vmem>>, vector<1x28x512xbf16>
    %4 = vector.shape_cast %3 : vector<1x28x512xbf16> to vector<28x512xbf16>
    %cst = arith.constant dense<0.000000e+00> : vector<220x512xf32>
    %5 = tpu.matmul %2, %4, %cst {dimension_numbers = #tpu.dot_dimension_numbers<[1], [0], [0], [1], [0, 0, 1, 1], [], []>} : vector<220x28xbf16>, vector<28x512xbf16>, vector<220x512xf32> -> vector<220x512xf32>
    %6 = vector.extract_strided_slice %0 {offsets = [1, 0], sizes = [220, 28], strides = [1, 1]} : vector<224x28xf32> to vector<220x28xf32>
    %7 = arith.truncf %6 : vector<220x28xf32> to vector<220x28xbf16>
    %c1 = arith.constant 1 : index
    %c0_4 = arith.constant 0 : index
    %c0_5 = arith.constant 0 : index
    %8 = vector.load %arg2[%c1, %c0_4, %c0_5] : memref<5x28x512xbf16, #tpu.memory_space<vmem>>, vector<1x28x512xbf16>
    %9 = vector.shape_cast %8 : vector<1x28x512xbf16> to vector<28x512xbf16>
    %cst_6 = arith.constant dense<0.000000e+00> : vector<220x512xf32>
    %10 = tpu.matmul %7, %9, %cst_6 {dimension_numbers = #tpu.dot_dimension_numbers<[1], [0], [0], [1], [0, 0, 1, 1], [], []>} : vector<220x28xbf16>, vector<28x512xbf16>, vector<220x512xf32> -> vector<220x512xf32>
    %11 = arith.addf %5, %10 : vector<220x512xf32>
    %12 = vector.extract_strided_slice %0 {offsets = [2, 0], sizes = [220, 28], strides = [1, 1]} : vector<224x28xf32> to vector<220x28xf32>
    %13 = arith.truncf %12 : vector<220x28xf32> to vector<220x28xbf16>
    %c2 = arith.constant 2 : index
    %c0_7 = arith.constant 0 : index
    %c0_8 = arith.constant 0 : index
    %14 = vector.load %arg2[%c2, %c0_7, %c0_8] : memref<5x28x512xbf16, #tpu.memory_space<vmem>>, vector<1x28x512xbf16>
    %15 = vector.shape_cast %14 : vector<1x28x512xbf16> to vector<28x512xbf16>
    %cst_9 = arith.constant dense<0.000000e+00> : vector<220x512xf32>
    %16 = tpu.matmul %13, %15, %cst_9 {dimension_numbers = #tpu.dot_dimension_numbers<[1], [0], [0], [1], [0, 0, 1, 1], [], []>} : vector<220x28xbf16>, vector<28x512xbf16>, vector<220x512xf32> -> vector<220x512xf32>
    %17 = arith.addf %11, %16 : vector<220x512xf32>
    %18 = vector.extract_strided_slice %0 {offsets = [3, 0], sizes = [220, 28], strides = [1, 1]} : vector<224x28xf32> to vector<220x28xf32>
    %19 = arith.truncf %18 : vector<220x28xf32> to vector<220x28xbf16>
    %c3 = arith.constant 3 : index
    %c0_10 = arith.constant 0 : index
    %c0_11 = arith.constant 0 : index
    %20 = vector.load %arg2[%c3, %c0_10, %c0_11] : memref<5x28x512xbf16, #tpu.memory_space<vmem>>, vector<1x28x512xbf16>
    %21 = vector.shape_cast %20 : vector<1x28x512xbf16> to vector<28x512xbf16>
    %cst_12 = arith.constant dense<0.000000e+00> : vector<220x512xf32>
    %22 = tpu.matmul %19, %21, %cst_12 {dimension_numbers = #tpu.dot_dimension_numbers<[1], [0], [0], [1], [0, 0, 1, 1], [], []>} : vector<220x28xbf16>, vector<28x512xbf16>, vector<220x512xf32> -> vector<220x512xf32>
    %23 = arith.addf %17, %22 : vector<220x512xf32>
    %24 = vector.extract_strided_slice %0 {offsets = [4, 0], sizes = [220, 28], strides = [1, 1]} : vector<224x28xf32> to vector<220x28xf32>
    %25 = arith.truncf %24 : vector<220x28xf32> to vector<220x28xbf16>
    %c4 = arith.constant 4 : index
    %c0_13 = arith.constant 0 : index
    %c0_14 = arith.constant 0 : index
    %26 = vector.load %arg2[%c4, %c0_13, %c0_14] : memref<5x28x512xbf16, #tpu.memory_space<vmem>>, vector<1x28x512xbf16>
    %27 = vector.shape_cast %26 : vector<1x28x512xbf16> to vector<28x512xbf16>
    %cst_15 = arith.constant dense<0.000000e+00> : vector<220x512xf32>
    %28 = tpu.matmul %25, %27, %cst_15 {dimension_numbers = #tpu.dot_dimension_numbers<[1], [0], [0], [1], [0, 0, 1, 1], [], []>} : vector<220x28xbf16>, vector<28x512xbf16>, vector<220x512xf32> -> vector<220x512xf32>
    %29 = arith.addf %23, %28 : vector<220x512xf32>
    %c0_16 = arith.constant 0 : index
    %c0_17 = arith.constant 0 : index
    %30 = vector.load %arg3[%c0_16, %c0_17] : memref<1x512xf32, #tpu.memory_space<vmem>>, vector<1x512xf32>
    %31 = vector.broadcast %30 : vector<1x512xf32> to vector<220x512xf32>
    %32 = arith.addf %29, %31 : vector<220x512xf32>
    %33 = vector.extract_strided_slice %32 {offsets = [0, 0], sizes = [220, 256], strides = [1, 1]} : vector<220x512xf32> to vector<220x256xf32>
    %cst_18 = arith.constant 0.000000e+00 : f32
    %34 = vector.broadcast %cst_18 : f32 to vector<220x256xf32>
    %35 = arith.maximumf %33, %34 : vector<220x256xf32>
    %36 = vector.extract_strided_slice %32 {offsets = [0, 256], sizes = [220, 256], strides = [1, 1]} : vector<220x512xf32> to vector<220x256xf32>
    %cst_19 = arith.constant 0.000000e+00 : f32
    %37 = vector.broadcast %cst_19 : f32 to vector<220x256xf32>
    %38 = arith.maximumf %36, %37 : vector<220x256xf32>
    %39 = arith.addf %35, %38 : vector<220x256xf32>
    %c0_20 = arith.constant 0 : index
    %c0_21 = arith.constant 0 : index
    %40 = vector.load %arg4[%c0_20, %c0_21] : memref<96x220xf32, #tpu.memory_space<vmem>>, vector<96x220xf32>
    %cst_22 = arith.constant dense<0.000000e+00> : vector<96x256xf32>
    %41 = tpu.matmul %40, %39, %cst_22 {dimension_numbers = #tpu.dot_dimension_numbers<[1], [0], [0], [1], [0, 0, 1, 1], [], []>} : vector<96x220xf32>, vector<220x256xf32>, vector<96x256xf32> -> vector<96x256xf32>
    %42 = vector.extract_strided_slice %41 {offsets = [0, 0], sizes = [92, 256], strides = [1, 1]} : vector<96x256xf32> to vector<92x256xf32>
    %43 = arith.truncf %42 : vector<92x256xf32> to vector<92x256xbf16>
    %c0_23 = arith.constant 0 : index
    %c0_24 = arith.constant 0 : index
    %c0_25 = arith.constant 0 : index
    %44 = vector.load %arg5[%c0_23, %c0_24, %c0_25] : memref<5x256x1024xbf16, #tpu.memory_space<vmem>>, vector<1x256x1024xbf16>
    %45 = vector.shape_cast %44 : vector<1x256x1024xbf16> to vector<256x1024xbf16>
    %cst_26 = arith.constant dense<0.000000e+00> : vector<92x1024xf32>
    %46 = tpu.matmul %43, %45, %cst_26 {dimension_numbers = #tpu.dot_dimension_numbers<[1], [0], [0], [1], [0, 0, 1, 1], [], []>} : vector<92x256xbf16>, vector<256x1024xbf16>, vector<92x1024xf32> -> vector<92x1024xf32>
    %47 = vector.extract_strided_slice %41 {offsets = [1, 0], sizes = [92, 256], strides = [1, 1]} : vector<96x256xf32> to vector<92x256xf32>
    %48 = arith.truncf %47 : vector<92x256xf32> to vector<92x256xbf16>
    %c1_27 = arith.constant 1 : index
    %c0_28 = arith.constant 0 : index
    %c0_29 = arith.constant 0 : index
    %49 = vector.load %arg5[%c1_27, %c0_28, %c0_29] : memref<5x256x1024xbf16, #tpu.memory_space<vmem>>, vector<1x256x1024xbf16>
    %50 = vector.shape_cast %49 : vector<1x256x1024xbf16> to vector<256x1024xbf16>
    %cst_30 = arith.constant dense<0.000000e+00> : vector<92x1024xf32>
    %51 = tpu.matmul %48, %50, %cst_30 {dimension_numbers = #tpu.dot_dimension_numbers<[1], [0], [0], [1], [0, 0, 1, 1], [], []>} : vector<92x256xbf16>, vector<256x1024xbf16>, vector<92x1024xf32> -> vector<92x1024xf32>
    %52 = arith.addf %46, %51 : vector<92x1024xf32>
    %53 = vector.extract_strided_slice %41 {offsets = [2, 0], sizes = [92, 256], strides = [1, 1]} : vector<96x256xf32> to vector<92x256xf32>
    %54 = arith.truncf %53 : vector<92x256xf32> to vector<92x256xbf16>
    %c2_31 = arith.constant 2 : index
    %c0_32 = arith.constant 0 : index
    %c0_33 = arith.constant 0 : index
    %55 = vector.load %arg5[%c2_31, %c0_32, %c0_33] : memref<5x256x1024xbf16, #tpu.memory_space<vmem>>, vector<1x256x1024xbf16>
    %56 = vector.shape_cast %55 : vector<1x256x1024xbf16> to vector<256x1024xbf16>
    %cst_34 = arith.constant dense<0.000000e+00> : vector<92x1024xf32>
    %57 = tpu.matmul %54, %56, %cst_34 {dimension_numbers = #tpu.dot_dimension_numbers<[1], [0], [0], [1], [0, 0, 1, 1], [], []>} : vector<92x256xbf16>, vector<256x1024xbf16>, vector<92x1024xf32> -> vector<92x1024xf32>
    %58 = arith.addf %52, %57 : vector<92x1024xf32>
    %59 = vector.extract_strided_slice %41 {offsets = [3, 0], sizes = [92, 256], strides = [1, 1]} : vector<96x256xf32> to vector<92x256xf32>
    %60 = arith.truncf %59 : vector<92x256xf32> to vector<92x256xbf16>
    %c3_35 = arith.constant 3 : index
    %c0_36 = arith.constant 0 : index
    %c0_37 = arith.constant 0 : index
    %61 = vector.load %arg5[%c3_35, %c0_36, %c0_37] : memref<5x256x1024xbf16, #tpu.memory_space<vmem>>, vector<1x256x1024xbf16>
    %62 = vector.shape_cast %61 : vector<1x256x1024xbf16> to vector<256x1024xbf16>
    %cst_38 = arith.constant dense<0.000000e+00> : vector<92x1024xf32>
    %63 = tpu.matmul %60, %62, %cst_38 {dimension_numbers = #tpu.dot_dimension_numbers<[1], [0], [0], [1], [0, 0, 1, 1], [], []>} : vector<92x256xbf16>, vector<256x1024xbf16>, vector<92x1024xf32> -> vector<92x1024xf32>
    %64 = arith.addf %58, %63 : vector<92x1024xf32>
    %65 = vector.extract_strided_slice %41 {offsets = [4, 0], sizes = [92, 256], strides = [1, 1]} : vector<96x256xf32> to vector<92x256xf32>
    %66 = arith.truncf %65 : vector<92x256xf32> to vector<92x256xbf16>
    %c4_39 = arith.constant 4 : index
    %c0_40 = arith.constant 0 : index
    %c0_41 = arith.constant 0 : index
    %67 = vector.load %arg5[%c4_39, %c0_40, %c0_41] : memref<5x256x1024xbf16, #tpu.memory_space<vmem>>, vector<1x256x1024xbf16>
    %68 = vector.shape_cast %67 : vector<1x256x1024xbf16> to vector<256x1024xbf16>
    %cst_42 = arith.constant dense<0.000000e+00> : vector<92x1024xf32>
    %69 = tpu.matmul %66, %68, %cst_42 {dimension_numbers = #tpu.dot_dimension_numbers<[1], [0], [0], [1], [0, 0, 1, 1], [], []>} : vector<92x256xbf16>, vector<256x1024xbf16>, vector<92x1024xf32> -> vector<92x1024xf32>
    %70 = arith.addf %64, %69 : vector<92x1024xf32>
    %c0_43 = arith.constant 0 : index
    %c0_44 = arith.constant 0 : index
    %71 = vector.load %arg6[%c0_43, %c0_44] : memref<1x1024xf32, #tpu.memory_space<vmem>>, vector<1x1024xf32>
    %72 = vector.broadcast %71 : vector<1x1024xf32> to vector<92x1024xf32>
    %73 = arith.addf %70, %72 : vector<92x1024xf32>
    %74 = vector.extract_strided_slice %73 {offsets = [0, 0], sizes = [92, 512], strides = [1, 1]} : vector<92x1024xf32> to vector<92x512xf32>
    %cst_45 = arith.constant 0.000000e+00 : f32
    %75 = vector.broadcast %cst_45 : f32 to vector<92x512xf32>
    %76 = arith.maximumf %74, %75 : vector<92x512xf32>
    %77 = vector.extract_strided_slice %73 {offsets = [0, 512], sizes = [92, 512], strides = [1, 1]} : vector<92x1024xf32> to vector<92x512xf32>
    %cst_46 = arith.constant 0.000000e+00 : f32
    %78 = vector.broadcast %cst_46 : f32 to vector<92x512xf32>
    %79 = arith.maximumf %77, %78 : vector<92x512xf32>
    %80 = arith.addf %76, %79 : vector<92x512xf32>
    %c0_47 = arith.constant 0 : index
    %c0_48 = arith.constant 0 : index
    %c0_49 = arith.constant 0 : index
    %81 = vector.load %arg7[%c0_47, %c0_48, %c0_49] : memref<4x8x92xf32, #tpu.memory_space<vmem>>, vector<1x8x92xf32>
    %82 = vector.shape_cast %81 : vector<1x8x92xf32> to vector<8x92xf32>
    %cst_50 = arith.constant dense<0.000000e+00> : vector<8x512xf32>
    %83 = tpu.matmul %82, %80, %cst_50 {dimension_numbers = #tpu.dot_dimension_numbers<[1], [0], [0], [1], [0, 0, 1, 1], [], []>} : vector<8x92xf32>, vector<92x512xf32>, vector<8x512xf32> -> vector<8x512xf32>
    %84 = arith.truncf %83 : vector<8x512xf32> to vector<8x512xbf16>
    %c0_51 = arith.constant 0 : index
    %c0_52 = arith.constant 0 : index
    %c0_53 = arith.constant 0 : index
    %85 = vector.load %arg8[%c0_51, %c0_52, %c0_53] : memref<4x512x512xbf16, #tpu.memory_space<vmem>>, vector<1x512x512xbf16>
    %86 = vector.shape_cast %85 : vector<1x512x512xbf16> to vector<512x512xbf16>
    %cst_54 = arith.constant dense<0.000000e+00> : vector<8x512xf32>
    %87 = tpu.matmul %84, %86, %cst_54 {dimension_numbers = #tpu.dot_dimension_numbers<[1], [0], [0], [1], [0, 0, 1, 1], [], []>} : vector<8x512xbf16>, vector<512x512xbf16>, vector<8x512xf32> -> vector<8x512xf32>
    %c1_55 = arith.constant 1 : index
    %c0_56 = arith.constant 0 : index
    %c0_57 = arith.constant 0 : index
    %88 = vector.load %arg7[%c1_55, %c0_56, %c0_57] : memref<4x8x92xf32, #tpu.memory_space<vmem>>, vector<1x8x92xf32>
    %89 = vector.shape_cast %88 : vector<1x8x92xf32> to vector<8x92xf32>
    %cst_58 = arith.constant dense<0.000000e+00> : vector<8x512xf32>
    %90 = tpu.matmul %89, %80, %cst_58 {dimension_numbers = #tpu.dot_dimension_numbers<[1], [0], [0], [1], [0, 0, 1, 1], [], []>} : vector<8x92xf32>, vector<92x512xf32>, vector<8x512xf32> -> vector<8x512xf32>
    %91 = arith.truncf %90 : vector<8x512xf32> to vector<8x512xbf16>
    %c1_59 = arith.constant 1 : index
    %c0_60 = arith.constant 0 : index
    %c0_61 = arith.constant 0 : index
    %92 = vector.load %arg8[%c1_59, %c0_60, %c0_61] : memref<4x512x512xbf16, #tpu.memory_space<vmem>>, vector<1x512x512xbf16>
    %93 = vector.shape_cast %92 : vector<1x512x512xbf16> to vector<512x512xbf16>
    %cst_62 = arith.constant dense<0.000000e+00> : vector<8x512xf32>
    %94 = tpu.matmul %91, %93, %cst_62 {dimension_numbers = #tpu.dot_dimension_numbers<[1], [0], [0], [1], [0, 0, 1, 1], [], []>} : vector<8x512xbf16>, vector<512x512xbf16>, vector<8x512xf32> -> vector<8x512xf32>
    %95 = arith.addf %87, %94 : vector<8x512xf32>
    %c2_63 = arith.constant 2 : index
    %c0_64 = arith.constant 0 : index
    %c0_65 = arith.constant 0 : index
    %96 = vector.load %arg7[%c2_63, %c0_64, %c0_65] : memref<4x8x92xf32, #tpu.memory_space<vmem>>, vector<1x8x92xf32>
    %97 = vector.shape_cast %96 : vector<1x8x92xf32> to vector<8x92xf32>
    %cst_66 = arith.constant dense<0.000000e+00> : vector<8x512xf32>
    %98 = tpu.matmul %97, %80, %cst_66 {dimension_numbers = #tpu.dot_dimension_numbers<[1], [0], [0], [1], [0, 0, 1, 1], [], []>} : vector<8x92xf32>, vector<92x512xf32>, vector<8x512xf32> -> vector<8x512xf32>
    %99 = arith.truncf %98 : vector<8x512xf32> to vector<8x512xbf16>
    %c2_67 = arith.constant 2 : index
    %c0_68 = arith.constant 0 : index
    %c0_69 = arith.constant 0 : index
    %100 = vector.load %arg8[%c2_67, %c0_68, %c0_69] : memref<4x512x512xbf16, #tpu.memory_space<vmem>>, vector<1x512x512xbf16>
    %101 = vector.shape_cast %100 : vector<1x512x512xbf16> to vector<512x512xbf16>
    %cst_70 = arith.constant dense<0.000000e+00> : vector<8x512xf32>
    %102 = tpu.matmul %99, %101, %cst_70 {dimension_numbers = #tpu.dot_dimension_numbers<[1], [0], [0], [1], [0, 0, 1, 1], [], []>} : vector<8x512xbf16>, vector<512x512xbf16>, vector<8x512xf32> -> vector<8x512xf32>
    %103 = arith.addf %95, %102 : vector<8x512xf32>
    %c3_71 = arith.constant 3 : index
    %c0_72 = arith.constant 0 : index
    %c0_73 = arith.constant 0 : index
    %104 = vector.load %arg7[%c3_71, %c0_72, %c0_73] : memref<4x8x92xf32, #tpu.memory_space<vmem>>, vector<1x8x92xf32>
    %105 = vector.shape_cast %104 : vector<1x8x92xf32> to vector<8x92xf32>
    %cst_74 = arith.constant dense<0.000000e+00> : vector<8x512xf32>
    %106 = tpu.matmul %105, %80, %cst_74 {dimension_numbers = #tpu.dot_dimension_numbers<[1], [0], [0], [1], [0, 0, 1, 1], [], []>} : vector<8x92xf32>, vector<92x512xf32>, vector<8x512xf32> -> vector<8x512xf32>
    %107 = arith.truncf %106 : vector<8x512xf32> to vector<8x512xbf16>
    %c3_75 = arith.constant 3 : index
    %c0_76 = arith.constant 0 : index
    %c0_77 = arith.constant 0 : index
    %108 = vector.load %arg8[%c3_75, %c0_76, %c0_77] : memref<4x512x512xbf16, #tpu.memory_space<vmem>>, vector<1x512x512xbf16>
    %109 = vector.shape_cast %108 : vector<1x512x512xbf16> to vector<512x512xbf16>
    %cst_78 = arith.constant dense<0.000000e+00> : vector<8x512xf32>
    %110 = tpu.matmul %107, %109, %cst_78 {dimension_numbers = #tpu.dot_dimension_numbers<[1], [0], [0], [1], [0, 0, 1, 1], [], []>} : vector<8x512xbf16>, vector<512x512xbf16>, vector<8x512xf32> -> vector<8x512xf32>
    %111 = arith.addf %103, %110 : vector<8x512xf32>
    %c0_79 = arith.constant 0 : index
    %c0_80 = arith.constant 0 : index
    %112 = vector.load %arg9[%c0_79, %c0_80] : memref<1x512xf32, #tpu.memory_space<vmem>>, vector<1x512xf32>
    %113 = vector.broadcast %112 : vector<1x512xf32> to vector<8x512xf32>
    %114 = arith.addf %111, %113 : vector<8x512xf32>
    %cst_81 = arith.constant 0.000000e+00 : f32
    %115 = vector.broadcast %cst_81 : f32 to vector<8x512xf32>
    %116 = arith.maximumf %114, %115 : vector<8x512xf32>
    %117 = arith.truncf %116 : vector<8x512xf32> to vector<8x512xbf16>
    %c0_82 = arith.constant 0 : index
    %c0_83 = arith.constant 0 : index
    %118 = vector.load %arg10[%c0_82, %c0_83] : memref<512x128xbf16, #tpu.memory_space<vmem>>, vector<512x128xbf16>
    %cst_84 = arith.constant dense<0.000000e+00> : vector<8x128xf32>
    %119 = tpu.matmul %117, %118, %cst_84 {dimension_numbers = #tpu.dot_dimension_numbers<[1], [0], [0], [1], [0, 0, 1, 1], [], []>} : vector<8x512xbf16>, vector<512x128xbf16>, vector<8x128xf32> -> vector<8x128xf32>
    %c0_85 = arith.constant 0 : index
    %c0_86 = arith.constant 0 : index
    %120 = vector.load %arg11[%c0_85, %c0_86] : memref<1x128xf32, #tpu.memory_space<vmem>>, vector<1x128xf32>
    %121 = vector.broadcast %120 : vector<1x128xf32> to vector<8x128xf32>
    %122 = arith.addf %119, %121 : vector<8x128xf32>
    %123 = tpu.iota {dimensions = array<i32: 1>} : vector<8x128xi32>
    %c10_i32 = arith.constant 10 : i32
    %124 = vector.broadcast %c10_i32 : i32 to vector<8x128xi32>
    %125 = arith.cmpi slt, %123, %124 : vector<8x128xi32>
    %cst_87 = arith.constant -1.000000e+30 : f32
    %126 = vector.broadcast %cst_87 : f32 to vector<8x128xf32>
    %127 = arith.select %125, %122, %126 : vector<8x128xi1>, vector<8x128xf32>
    %cst_88 = arith.constant dense<0xFF800000> : vector<8xf32>
    %128 = vector.multi_reduction <maximumf>, %127, %cst_88 [1] : vector<8x128xf32> to vector<8xf32>
    %129 = vector.shape_cast %128 : vector<8xf32> to vector<8x1xf32>
    %130 = vector.broadcast %129 : vector<8x1xf32> to vector<8x128xf32>
    %131 = arith.subf %127, %130 : vector<8x128xf32>
    %132 = math.exp %131 : vector<8x128xf32>
    %cst_89 = arith.constant dense<0.000000e+00> : vector<8xf32>
    %133 = vector.multi_reduction <add>, %132, %cst_89 [1] : vector<8x128xf32> to vector<8xf32>
    %134 = vector.shape_cast %133 : vector<8xf32> to vector<8x1xf32>
    %135 = math.log %134 : vector<8x1xf32>
    %136 = vector.broadcast %129 : vector<8x1xf32> to vector<8x128xf32>
    %137 = arith.subf %127, %136 : vector<8x128xf32>
    %138 = vector.broadcast %135 : vector<8x1xf32> to vector<8x128xf32>
    %139 = arith.subf %137, %138 : vector<8x128xf32>
    %c0_90 = arith.constant 0 : index
    %c0_91 = arith.constant 0 : index
    %140 = vector.load %arg12[%c0_90, %c0_91] : memref<8x128xf32, #tpu.memory_space<vmem>>, vector<8x128xf32>
    tpu.vector_store %arg12[%c0_90, %c0_91], %139 {strides = array<i32>} : memref<8x128xf32, #tpu.memory_space<vmem>>, vector<8x128xf32>,
    return
  }
  func.func @transform_0(%arg0: i32) -> (i32, i32) {
    %c0_i32 = arith.constant 0 : i32
    %c0_i32_0 = arith.constant 0 : i32
    return %arg0, %c0_i32 : i32, i32
  }
  func.func @transform_1(%arg0: i32) -> (i32, i32, i32) {
    %c0_i32 = arith.constant 0 : i32
    %c0_i32_0 = arith.constant 0 : i32
    %c0_i32_1 = arith.constant 0 : i32
    %c0_i32_2 = arith.constant 0 : i32
    return %c0_i32, %c0_i32_0, %c0_i32_1 : i32, i32, i32
  }
  func.func @transform_2(%arg0: i32) -> (i32, i32) {
    %c0_i32 = arith.constant 0 : i32
    %c0_i32_0 = arith.constant 0 : i32
    %c0_i32_1 = arith.constant 0 : i32
    return %c0_i32, %c0_i32_0 : i32, i32
  }
  func.func @transform_3(%arg0: i32) -> (i32, i32) {
    %c0_i32 = arith.constant 0 : i32
    %c0_i32_0 = arith.constant 0 : i32
    %c0_i32_1 = arith.constant 0 : i32
    return %c0_i32, %c0_i32_0 : i32, i32
  }
  func.func @transform_4(%arg0: i32) -> (i32, i32, i32) {
    %c0_i32 = arith.constant 0 : i32
    %c0_i32_0 = arith.constant 0 : i32
    %c0_i32_1 = arith.constant 0 : i32
    %c0_i32_2 = arith.constant 0 : i32
    return %c0_i32, %c0_i32_0, %c0_i32_1 : i32, i32, i32
  }
  func.func @transform_5(%arg0: i32) -> (i32, i32) {
    %c0_i32 = arith.constant 0 : i32
    %c0_i32_0 = arith.constant 0 : i32
    %c0_i32_1 = arith.constant 0 : i32
    return %c0_i32, %c0_i32_0 : i32, i32
  }
  func.func @transform_6(%arg0: i32) -> (i32, i32, i32) {
    %c0_i32 = arith.constant 0 : i32
    %c0_i32_0 = arith.constant 0 : i32
    %c0_i32_1 = arith.constant 0 : i32
    %c0_i32_2 = arith.constant 0 : i32
    return %c0_i32, %c0_i32_0, %c0_i32_1 : i32, i32, i32
  }
  func.func @transform_7(%arg0: i32) -> (i32, i32, i32) {
    %c0_i32 = arith.constant 0 : i32
    %c0_i32_0 = arith.constant 0 : i32
    %c0_i32_1 = arith.constant 0 : i32
    %c0_i32_2 = arith.constant 0 : i32
    return %c0_i32, %c0_i32_0, %c0_i32_1 : i32, i32, i32
  }
  func.func @transform_8(%arg0: i32) -> (i32, i32) {
    %c0_i32 = arith.constant 0 : i32
    %c0_i32_0 = arith.constant 0 : i32
    %c0_i32_1 = arith.constant 0 : i32
    return %c0_i32, %c0_i32_0 : i32, i32
  }
  func.func @transform_9(%arg0: i32) -> (i32, i32) {
    %c0_i32 = arith.constant 0 : i32
    %c0_i32_0 = arith.constant 0 : i32
    %c0_i32_1 = arith.constant 0 : i32
    return %c0_i32, %c0_i32_0 : i32, i32
  }
  func.func @transform_10(%arg0: i32) -> (i32, i32) {
    %c0_i32 = arith.constant 0 : i32
    %c0_i32_0 = arith.constant 0 : i32
    %c0_i32_1 = arith.constant 0 : i32
    return %c0_i32, %c0_i32_0 : i32, i32
  }
  func.func @transform_11(%arg0: i32) -> (i32, i32) {
    %c0_i32 = arith.constant 0 : i32
    %c0_i32_0 = arith.constant 0 : i32
    return %arg0, %c0_i32 : i32, i32
  }
}

</mosaic_0001>

<bundles_post_ra>
// kernel: model_forward.1
= control target key start
LH: loop header
LB: loop body
LE: loop exit
PB: predicated region body
PF: predicated region fallthrough
CT: control target
= control target key end

     0   :  { %16 = vsyncpa [#allocation3], 0  ;;  %s21032_s0 = inlined_call_operand.vmem [shape: f32[224,28], index: 0, kind: input, shape index: {}]   ;;  %s21033_s1 = inlined_call_operand.hbm [shape: bf16[5,28,512], index: 1, kind: input, shape index: {}]   ;;  %s21034_s2 = inlined_call_operand.hbm [shape: f32[1,512], index: 2, kind: input, shape index: {}]   ;;  %s21035_s3 = inlined_call_operand.hbm [shape: f32[96,220], index: 3, kind: input, shape index: {}]   ;;  %s21036_s4 = inlined_call_operand.hbm [shape: bf16[5,256,1024], index: 4, kind: input, shape index: {}]   ;;  %s21037_s5 = inlined_call_operand.hbm [shape: f32[1,1024], index: 5, kind: input, shape index: {}]   ;;  %s21038_s6 = inlined_call_operand.hbm [shape: f32[4,8,92], index: 6, kind: input, shape index: {}]   ;;  %s21039_s7 = inlined_call_operand.hbm [shape: bf16[4,512,512], index: 7, kind: input, shape index: {}]   ;;  %s21040_s8 = inlined_call_operand.hbm [shape: f32[1,512], index: 8, kind: input, shape index: {}]   ;;  %s21041_s9 = inlined_call_operand.hbm [shape: bf16[512,128], index: 9, kind: input, shape index: {}]   ;;  %s21042_s10 = inlined_call_operand.hbm [shape: f32[1,128], index: 10, kind: input, shape index: {}]   ;;  %s21043_s11 = inlined_call_operand.vmem [shape: f32[8,128], index: 11, kind: output, shape index: {}]  }
   0x1   :  { %17 = vsyncpa [#allocation5], 0 }
   0x2   :  { %18 = vsyncpa [#allocation8], 0 }
   0x3   :  { %19 = vsyncpa [#allocation11], 0 }
   0x4   :  { %20 = vsyncpa [#allocation14], 0 }
   0x5   :  { %21 = vsyncpa [#allocation17], 0  ;;  %s18464_s17 = smov [#allocation4]   ;;  %s18465_s19 = smov [#allocation7]  }
   0x6   :  { %s42_s18 = sshll.u32 %s18464_s17, 4  ;;  %s63_s20 = sshll.u32 %s18465_s19, 4  ;;  %s43_s18 = int_to_ptr.vmem [resolvable:$true] %s42_s18  ;;  %s18545_s20 = int_to_ptr.vmem [resolvable:$true] %s63_s20 }
   0x7   :  { %s18232_s23 = scalar_lea.hbm %s21034_s2, 64 }
   0x8   :  { %p18233_p0 = scmp.ne.s32.totalorder %s21034_s2, %s18232_s23  ;;  %p18236_p1 = scmp.lt.u32.totalorder %s18232_s23, %s21034_s2 }
   0xa   :  { %p18238_p2 = pnand %p18236_p1, %p18233_p0 }
   0xc   :  { %18241 = shalt.err (!%p18238_p2)
}
   0xd   :  { %s18242_s28 = scalar_lea.vmem %s43_s18, 64  ;;  %p18247_p4 = scmp.lt.s32.totalorder %s43_s18, %s43_s18 }
   0xe   :  { %p18243_p3 = scmp.ne.s32.totalorder %s43_s18, %s18242_s28  ;;  %p18248_p5 = scmp.lt.s32.totalorder %s18242_s28, %s18242_s28 }
  0x10   :  { %p18249_p6 = por %p18248_p5, %p18247_p4 }
  0x12   :  { %p18250_p7 = pnand %p18249_p6, %p18243_p3 }
  0x14   :  { %18253 = shalt.err (!%p18250_p7)
}
  0x15   :  { %45 = dma.hbm_to_vmem [thread:$0]  %s21034_s2, 64, %s43_s18, [#allocation5]  }
  0x16   :  { %s18254_s14 = scalar_lea.hbm %s21036_s4, 81920 }
  0x17   :  { %p18255_p8 = scmp.ne.s32.totalorder %s21036_s4, %s18254_s14  ;;  %p18258_p9 = scmp.lt.u32.totalorder %s18254_s14, %s21036_s4 }
  0x19   :  { %p18260_p10 = pnand %p18258_p9, %p18255_p8 }
  0x1b   :  { %18263 = shalt.err (!%p18260_p10)
}
  0x1c   :  { %s18264_s21 = scalar_lea.vmem %s18545_s20, 81920  ;;  %p18269_p12 = scmp.lt.s32.totalorder %s18545_s20, %s18545_s20 }
  0x1d   :  { %p18265_p11 = scmp.ne.s32.totalorder %s18545_s20, %s18264_s21  ;;  %p18270_p13 = scmp.lt.s32.totalorder %s18264_s21, %s18264_s21 }
  0x1f   :  { %p18271_p0 = por %p18270_p13, %p18269_p12 }
  0x21   :  { %p18272_p1 = pnand %p18271_p0, %p18265_p11 }
  0x23   :  { %18275 = shalt.err (!%p18272_p1)
}
  0x24   :  { %s18466_s2 = smov 512   ;;  %s18467_s18 = smov 32  }
  0x25   :  { %69 = dma.hbm_to_vmem [thread:$0]  %s21036_s4, 81920, %s18545_s20, [#allocation8], %s18466_s2, %s18466_s2, %s18467_s18  }
  0x26   :  { %s18468_s24 = smov [#allocation10]   ;;  %s18276_s28 = scalar_lea.hbm %s21038_s6, 512 }
  0x27   :  { %s85_s25 = sshll.u32 %s18468_s24, 4  ;;  %p18277_p2 = scmp.ne.s32.totalorder %s21038_s6, %s18276_s28  ;;  %s86_s25 = int_to_ptr.vmem [resolvable:$true] %s85_s25 }
  0x28   :  { %p18280_p3 = scmp.lt.u32.totalorder %s18276_s28, %s21038_s6 }
  0x2a   :  { %p18282_p4 = pnand %p18280_p3, %p18277_p2 }
  0x2c   :  { %18285 = shalt.err (!%p18282_p4)
}
  0x2d   :  { %s18286_s14 = scalar_lea.vmem %s86_s25, 512  ;;  %p18291_p6 = scmp.lt.s32.totalorder %s86_s25, %s86_s25 }
  0x2e   :  { %p18287_p5 = scmp.ne.s32.totalorder %s86_s25, %s18286_s14  ;;  %p18292_p7 = scmp.lt.s32.totalorder %s18286_s14, %s18286_s14 }
  0x30   :  { %p18293_p8 = por %p18292_p7, %p18291_p6 }
  0x32   :  { %p18294_p9 = pnand %p18293_p8, %p18287_p5 }
  0x34   :  { %18297 = shalt.err (!%p18294_p9)
}
  0x35   :  { %s18469_s4 = smov 128   ;;  %s18470_s20 = smov 8  }
  0x36   :  { %91 = dma.hbm_to_vmem [thread:$0]  %s21038_s6, 512, %s86_s25, [#allocation11], %s18469_s4, %s18469_s4, %s18470_s20  }
  0x37   :  { %s18471_s17 = smov [#allocation13]   ;;  %s18472_s21 = smov [#allocation2]  }
  0x38   :  { %s110_s19 = sshll.u32 %s18471_s17, 4  ;;  %s29_s2 = sshll.u32 %s18472_s21, 4  ;;  %s111_s19 = int_to_ptr.vmem [resolvable:$true] %s110_s19  ;;  %s30_s2 = int_to_ptr.vmem [resolvable:$true] %s29_s2 }
  0x39   :  { %s18298_s23 = scalar_lea.hbm %s21040_s8, 64 }
  0x3a   :  { %p18299_p10 = scmp.ne.s32.totalorder %s21040_s8, %s18298_s23  ;;  %p18302_p11 = scmp.lt.u32.totalorder %s18298_s23, %s21040_s8 }
  0x3c   :  { %p18304_p12 = pnand %p18302_p11, %p18299_p10 }
  0x3e   :  { %18307 = shalt.err (!%p18304_p12)
}
  0x3f   :  { %s18308_s6 = scalar_lea.vmem %s111_s19, 64  ;;  %p18313_p0 = scmp.lt.s32.totalorder %s111_s19, %s111_s19 }
  0x40   :  { %p18309_p13 = scmp.ne.s32.totalorder %s111_s19, %s18308_s6  ;;  %p18314_p1 = scmp.lt.s32.totalorder %s18308_s6, %s18308_s6 }
  0x42   :  { %p18315_p2 = por %p18314_p1, %p18313_p0 }
  0x44   :  { %p18316_p3 = pnand %p18315_p2, %p18309_p13 }
  0x46   :  { %18319 = shalt.err (!%p18316_p3)
}
  0x47   :  { %113 = dma.hbm_to_vmem [thread:$0]  %s21040_s8, 64, %s111_s19, [#allocation14]  }
  0x48   :  { %s18320_s13 = scalar_lea.hbm %s21033_s1, 5120 }
  0x49   :  { %p18321_p4 = scmp.ne.s32.totalorder %s21033_s1, %s18320_s13  ;;  %p18324_p5 = scmp.lt.u32.totalorder %s18320_s13, %s21033_s1 }
  0x4b   :  { %p18326_p6 = pnand %p18324_p5, %p18321_p4 }
  0x4d   :  { %18329 = shalt.err (!%p18326_p6)
}
  0x4e   :  { %s18330_s16 = scalar_lea.vmem %s30_s2, 5120  ;;  %p18335_p8 = scmp.lt.s32.totalorder %s30_s2, %s30_s2 }
  0x4f   :  { %p18331_p7 = scmp.ne.s32.totalorder %s30_s2, %s18330_s16  ;;  %p18336_p9 = scmp.lt.s32.totalorder %s18330_s16, %s18330_s16 }
  0x51   :  { %p18337_p10 = por %p18336_p9, %p18335_p8 }
  0x53   :  { %p18338_p11 = pnand %p18337_p10, %p18331_p7 }
  0x55   :  { %18341 = shalt.err (!%p18338_p11)
}
  0x56   :  { %s18473_s8 = smov 256   ;;  %s18474_s17 = smov 16  }
  0x57   :  { %35 = dma.hbm_to_vmem [thread:$0]  %s21033_s1, 5120, %s30_s2, [#allocation3], %s18473_s8, %s18473_s8, %s18474_s17  }
  0x58   :  { %s18475_s18 = smov [#allocation6]   ;;  %s18476_s23 = smov [#allocation9]  }
  0x59   :  { %s51_s22 = sshll.u32 %s18475_s18, 4  ;;  %s76_s24 = sshll.u32 %s18476_s23, 4  ;;  %s52_s22 = int_to_ptr.vmem [resolvable:$true] %s51_s22  ;;  %s77_s24 = int_to_ptr.vmem [resolvable:$true] %s76_s24 }
  0x5a   :  { %s18342_s28 = scalar_lea.hbm %s21035_s3, 3072 }
  0x5b   :  { %p18343_p12 = scmp.ne.s32.totalorder %s21035_s3, %s18342_s28  ;;  %p18346_p13 = scmp.lt.u32.totalorder %s18342_s28, %s21035_s3 }
  0x5d   :  { %p18348_p0 = pnand %p18346_p13, %p18343_p12 }
  0x5f   :  { %18351 = shalt.err (!%p18348_p0)
}
  0x60   :  { %s18352_s1 = scalar_lea.vmem %s52_s22, 3072  ;;  %p18357_p2 = scmp.lt.s32.totalorder %s52_s22, %s52_s22 }
  0x61   :  { %p18353_p1 = scmp.ne.s32.totalorder %s52_s22, %s18352_s1  ;;  %p18358_p3 = scmp.lt.s32.totalorder %s18352_s1, %s18352_s1 }
  0x63   :  { %p18359_p4 = por %p18358_p3, %p18357_p2 }
  0x65   :  { %p18360_p5 = pnand %p18359_p4, %p18353_p1 }
  0x67   :  { %18363 = shalt.err (!%p18360_p5)
}
  0x68   :  { %57 = dma.hbm_to_vmem [thread:$0]  %s21035_s3, 3072, %s52_s22, [#allocation5], %s18473_s8, %s18473_s8, %s18474_s17  }
  0x69   :  { %s18364_s4 = scalar_lea.hbm %s21037_s5, 128 }
  0x6a   :  { %p18365_p6 = scmp.ne.s32.totalorder %s21037_s5, %s18364_s4  ;;  %p18368_p7 = scmp.lt.u32.totalorder %s18364_s4, %s21037_s5 }
  0x6c   :  { %p18370_p8 = pnand %p18368_p7, %p18365_p6 }
  0x6e   :  { %18373 = shalt.err (!%p18370_p8)
}
  0x6f   :  { %s18374_s21 = scalar_lea.vmem %s77_s24, 128  ;;  %p18379_p10 = scmp.lt.s32.totalorder %s77_s24, %s77_s24 }
  0x70   :  { %p18375_p9 = scmp.ne.s32.totalorder %s77_s24, %s18374_s21  ;;  %p18380_p11 = scmp.lt.s32.totalorder %s18374_s21, %s18374_s21 }
  0x72   :  { %p18381_p12 = por %p18380_p11, %p18379_p10 }
  0x74   :  { %p18382_p13 = pnand %p18381_p12, %p18375_p9 }
  0x76   :  { %18385 = shalt.err (!%p18382_p13)
}
  0x77   :  { %79 = dma.hbm_to_vmem [thread:$0]  %s21037_s5, 128, %s77_s24, [#allocation8]  }
  0x78   :  { %s18477_s22 = smov [#allocation12]   ;;  %s18478_s26 = smov [#allocation15]  }
  0x79   :  { %s97_s23 = sshll.u32 %s18477_s22, 4  ;;  %s119_s27 = sshll.u32 %s18478_s26, 4  ;;  %s98_s23 = int_to_ptr.vmem [resolvable:$true] %s97_s23  ;;  %s120_s27 = int_to_ptr.vmem [resolvable:$true] %s119_s27 }
  0x7a   :  { %s18386_s25 = scalar_lea.hbm %s21039_s7, 65536 }
  0x7b   :  { %p18387_p0 = scmp.ne.s32.totalorder %s21039_s7, %s18386_s25  ;;  %p18390_p1 = scmp.lt.u32.totalorder %s18386_s25, %s21039_s7 }
  0x7d   :  { %p18392_p2 = pnand %p18390_p1, %p18387_p0 }
  0x7f   :  { %18395 = shalt.err (!%p18392_p2)
}
  0x80   :  { %s18396_s5 = scalar_lea.vmem %s98_s23, 65536  ;;  %p18401_p4 = scmp.lt.s32.totalorder %s98_s23, %s98_s23 }
  0x81   :  { %p18397_p3 = scmp.ne.s32.totalorder %s98_s23, %s18396_s5  ;;  %p18402_p5 = scmp.lt.s32.totalorder %s18396_s5, %s18396_s5 }
  0x83   :  { %p18403_p6 = por %p18402_p5, %p18401_p4 }
  0x85   :  { %p18404_p7 = pnand %p18403_p6, %p18397_p3 }
  0x87   :  { %18407 = shalt.err (!%p18404_p7)
}
  0x88   :  { %103 = dma.hbm_to_vmem [thread:$0]  %s21039_s7, 65536, %s98_s23, [#allocation11], %s18473_s8, %s18473_s8, %s18474_s17  }
  0x89   :  { %s18408_s4 = scalar_lea.hbm %s21041_s9, 4096 }
  0x8a   :  { %p18409_p8 = scmp.ne.s32.totalorder %s21041_s9, %s18408_s4  ;;  %p18412_p9 = scmp.lt.u32.totalorder %s18408_s4, %s21041_s9 }
  0x8c   :  { %p18414_p10 = pnand %p18412_p9, %p18409_p8 }
  0x8e   :  { %18417 = shalt.err (!%p18414_p10)
}
  0x8f   :  { %s18418_s21 = scalar_lea.vmem %s120_s27, 4096  ;;  %p18423_p12 = scmp.lt.s32.totalorder %s120_s27, %s120_s27 }
  0x90   :  { %p18419_p11 = scmp.ne.s32.totalorder %s120_s27, %s18418_s21  ;;  %p18424_p13 = scmp.lt.s32.totalorder %s18418_s21, %s18418_s21 }
  0x92   :  { %p18425_p0 = por %p18424_p13, %p18423_p12 }
  0x94   :  { %p18426_p1 = pnand %p18425_p0, %p18419_p11 }
  0x96   :  { %18429 = shalt.err (!%p18426_p1)
}
  0x97   :  { %s18479_s7 = smov 64   ;;  %s18480_s8 = smov 4  }
  0x98   :  { %125 = dma.hbm_to_vmem [thread:$0]  %s21041_s9, 4096, %s120_s27, [#allocation14], %s18479_s7, %s18479_s7, %s18480_s8  }
  0x99   :  { %s18481_s18 = smov [#allocation16]   ;;  %s18430_s28 = scalar_lea.hbm %s21042_s10, 16 }
  0x9a   :  { %s132_s22 = sshll.u32 %s18481_s18, 4  ;;  %p18431_p2 = scmp.ne.s32.totalorder %s21042_s10, %s18430_s28  ;;  %s133_s22 = int_to_ptr.vmem [resolvable:$true] %s132_s22 }
  0x9b   :  { %p18434_p3 = scmp.lt.u32.totalorder %s18430_s28, %s21042_s10 }
  0x9d   :  { %p18436_p4 = pnand %p18434_p3, %p18431_p2 }
  0x9f   :  { %18439 = shalt.err (!%p18436_p4)
}
  0xa0   :  { %s18440_s1 = scalar_lea.vmem %s133_s22, 16  ;;  %s18444_s9 = scalar_lea.vmem %s133_s22, 32 }
  0xa1   :  { %p18441_p5 = scmp.ne.s32.totalorder %s133_s22, %s18440_s1  ;;  %p18445_p6 = scmp.lt.s32.totalorder %s133_s22, %s133_s22 }
  0xa2   :  { %p18446_p7 = scmp.lt.s32.totalorder %s18444_s9, %s18440_s1 }
  0xa4   :  { %p18447_p8 = por %p18446_p7, %p18445_p6 }
  0xa6   :  { %p18448_p9 = pnand %p18447_p8, %p18441_p5 }
  0xa8   :  { %18451 = shalt.err (!%p18448_p9)
}
  0xa9   :  { %135 = dma.hbm_to_vmem [thread:$0]  %s21042_s10, 16, %s133_s22, [#allocation17]  }
  0xaa   :  { %18452 = dma.done.wait [#allocation3], 5120  }
  0xab   :  { %18453 = vsyncadd [#allocation3], 4294962176 }
  0xac   :  { %18454 = dma.done.wait [#allocation5], 3136  }
  0xad   :  { %18455 = vsyncadd [#allocation5], 4294964160 }
  0xae   :  { %18456 = dma.done.wait [#allocation8], 82048  }
  0xaf   :  { %18457 = vsyncadd [#allocation8], 4294885248 }
  0xb0   :  { %18458 = dma.done.wait [#allocation11], 66048  }
  0xb1   :  { %18459 = vsyncadd [#allocation11], 4294901248 }
  0xb2   :  { %18460 = dma.done.wait [#allocation14], 4160  }
  0xb3   :  { %18461 = vsyncadd [#allocation14], 4294963136 }
  0xb4   :  { %18462 = dma.done.wait [#allocation17], 16  }
  0xb5   :  { %18463 = vsyncadd [#allocation17], 4294967280  ;;  %v18482_v0 = vmov 0   ;;  %v17368_v1 = vld [vmem:[#allocation2 + $0x44] ss:$16 sps:$4 sm:$0xff]   ;;  %vm417_vm0 = vcmask 1045504  }
  0xb6   :  { %462 = vmatprep.mubr.bf16.mxu0 %v18482_v0  ;;  %592 = vmatprep.mubr.bf16.mxu1 %v18482_v0  ;;  %v17370_v2 = vld [vmem:[#allocation2 + $0x40] ss:$16 sps:$4 sm:$0xff]   ;;  %v17371_v3 = vld [vmem:[#allocation2 + $0x64] ss:$16 sps:$4 sm:$0x3f]   ;;  %v168_v6 = vld [vmem:[%s21032_s0 + $0x8] sm:$0xff] }
  0xb7   :  { %430 = vmatprep.subr.bf16.mxu0 %v17368_v1  ;;  %16511 = vmatprep.subr.bf16.mxu1 %v17368_v1  ;;  %v17373_v4 = vld [vmem:[#allocation2 + $0x60] ss:$16 sps:$4 sm:$0x3f]   ;;  %v170_v9 = vld [vmem:[%s21032_s0 + $0x18] sm:$0xff]  ;;  %v172_v22 = vld [vmem:[%s21032_s0 + $0x28] sm:$0xff]  ;;  %vm374_vm2 = vcmask 228352  }
  0xb8   :  { %431 = vmatpush1.bf16.msra.mxu0 %v17370_v2  ;;  %16513 = vmatpush1.bf16.msra.mxu1 %v17370_v2  ;;  %v167_v5 = vld [vmem:[%s21032_s0] sm:$0xff]  ;;  %v169_v7 = vld [vmem:[%s21032_s0 + $0x10] sm:$0xff]  ;;  %v419_v8 = vsel %vm417_vm0, %v17373_v4, 0  ;;  %v194_v12 = vld [vmem:[%s21032_s0 + $0xd8] sm:$0xff]  ;;  %vm226_vm1 = vsmask.f32 7424 }
  0xb9   :  { %14796 = vmatprep.subr.msk.bf16.mxu0 %vm417_vm0, %v17371_v3  ;;  %16512 = vmatprep.subr.msk.bf16.mxu1 %vm417_vm0, %v17371_v3  ;;  %v18698_v10 = vpack.c.bf16 %v168_v6, %v167_v5  ;;  %v193_v11 = vld [vmem:[%s21032_s0 + $0xd0] sm:$0xff]  ;;  %v18706_v13 = vpack.c.bf16 %v170_v9, %v169_v7  ;;  %v17376_v17 = vld [vmem:[#allocation2 + $0x4c] ss:$16 sps:$4 sm:$0xff]   ;;  %v171_v18 = vld [vmem:[%s21032_s0 + $0x20] sm:$0xff]  ;;  %vm1806_vm3 = vsmask.f32 6400 }
  0xba   :  { %v18708_v14 = vpack.c.bf16 %v194_v12, %v193_v11  ;;  %v18723_v24 = vpack.c.bf16 %v172_v22, %v171_v18  ;;  %v17377_v27 = vld [vmem:[#allocation2 + $0x6c] ss:$16 sps:$4 sm:$0x3f]   ;;  %v17374_v29 = vld [vmem:[#allocation2 + $0x48] ss:$16 sps:$4 sm:$0xff]   ;;  %v173_v34 = vld [vmem:[%s21032_s0 + $0x30] sm:$0xff] }
  0xbb   :  { %v228_v15 = vshrl.u32 %v18698_v10, 16  ;;  %v230_v16 = vshll.u32 %v18698_v10, 16  ;;  %v235_v19 = vshll.u32 %v18706_v13, 16  ;;  %v239_v30 = vshrl.u32 %v18706_v13, 16  ;;  %v174_v35 = vld [vmem:[%s21032_s0 + $0x38] sm:$0xff]  ;;  %v175_v48 = vld [vmem:[%s21032_s0 + $0x40] sm:$0xff] }
  0xbc   :  { %433 = vmatpush1.bf16.msra.mxu0 %v419_v8  ;;  %16514 = vmatpush1.bf16.msra.mxu1 %v419_v8  ;;  %v331_v20 = vshll.u32 %v18708_v14, 16  ;;  %v335_v21 = vshrl.u32 %v18708_v14, 16  ;;  %v243_v31 = vshll.u32 %v18723_v24, 16  ;;  %v17379_v33 = vld [vmem:[#allocation2 + $0x68] ss:$16 sps:$4 sm:$0x3f]   ;;  %v18755_v41 = vpack.c.bf16 %v174_v35, %v173_v34 }
  0xbd   :  { %v232_v23 = vrot.slane %v230_v16, 1  ;;  %603 = vmatprep.subr.bf16.mxu1 %v17376_v17  ;;  %v237_v25 = vrot.slane %v235_v19, 1  ;;  %v17383_v37 = vld [vmem:[#allocation2] ss:$16 sps:$4 sm:$0xff]   ;;  %v17385_v38 = vld [vmem:[#allocation2 + $0x4] ss:$16 sps:$4 sm:$0xff]  }
  0xbe   :  { %v18729_v26 = vrot.slane %v331_v20, 1  ;;  %v245_v40 = vrot.slane %v243_v31, 1  ;;  %v425_v42 = vsel %vm417_vm0, %v17379_v33, 0  ;;  %v17382_v43 = vld [vmem:[#allocation2 + $0xc] ss:$16 sps:$4 sm:$0xff]   ;;  %852 = vmatprep.subr.bf16.mxu0 %v17385_v38  ;;  %v247_v46 = vshrl.u32 %v18723_v24, 16 }
  0xbf   :  { %v233_v28 = vor.u32 %v232_v23, %v228_v15  ;;  %v241_v39 = vor.u32 %v239_v30, %v237_v25  ;;  %v17380_v45 = vld [vmem:[#allocation2 + $0x8] ss:$16 sps:$4 sm:$0xff]   ;;  %v251_v47 = vshll.u32 %v18755_v41, 16  ;;  %v17386_v50 = vld [vmem:[#allocation2 + $0x2c] ss:$16 sps:$4 sm:$0x3f]  }
  0xc0   :  { %v18738_v32 = vor.u32 %v335_v21, %v18729_v26  ;;  %v176_v49 = vld [vmem:[%s21032_s0 + $0x48] sm:$0xff]  ;;  %v17389_v52 = vld [vmem:[#allocation2 + $0x24] ss:$16 sps:$4 sm:$0x3f]   ;;  %v249_v53 = vor.u32 %v247_v46, %v245_v40  ;;  %v255_v62 = vshrl.u32 %v18755_v41, 16  ;;  %v178_v1 = vld [vmem:[%s21032_s0 + $0x58] sm:$0xff] }
  0xc1   :  { %v238_v36 = vsel %vm226_vm1, %v233_v28, %v237_v25  ;;  %v246_v44 = vsel %vm226_vm1, %v241_v39, %v245_v40  ;;  %v17388_v51 = vld [vmem:[#allocation2 + $0x28] ss:$16 sps:$4 sm:$0x3f]   ;;  %v253_v54 = vrot.slane %v251_v47, 1  ;;  %v18776_v55 = vpack.c.bf16 %v176_v49, %v175_v48  ;;  %v177_v59 = vld [vmem:[%s21032_s0 + $0x50] sm:$0xff]  ;;  %v179_v6 = vld [vmem:[%s21032_s0 + $0x60] sm:$0xff] }
  0xc2   :  { %14797 = vmatmul.mubr.msk.bf16.vlgmr.msra.gmra.mrb[0].mxu0 %vm374_vm2, %v238_v36  ;;  %14810 = vmatmul.mubr.msk.bf16.vlgmr.msra.gmra.mrb[0].mxu1 %vm374_vm2, %v18738_v32  ;;  %v17391_v56 = vld [vmem:[#allocation2 + $0x20] ss:$16 sps:$4 sm:$0x3f]   ;;  %v847_v57 = vsel %vm417_vm0, %v17388_v51, 0  ;;  %v17394_v60 = vld [vmem:[#allocation2 + $0x84] ss:$16 sps:$4 sm:$0xff]   ;;  %v18800_v5 = vpack.c.bf16 %v178_v1, %v177_v59 }
  0xc3   :  { %604 = vmatpush1.bf16.msra.mxu1 %v17374_v29  ;;  %472 = vmatprep.mubr.bf16.mxu0 %v18482_v0  ;;  %v841_v58 = vsel %vm417_vm0, %v17391_v56, 0  ;;  %v254_v61 = vsel %vm226_vm1, %v249_v53, %v253_v54  ;;  %v259_v63 = vshll.u32 %v18776_v55, 16  ;;  %v17397_v2 = vld [vmem:[#allocation2 + $0x8c] ss:$16 sps:$4 sm:$0xff]   ;;  %v257_v3 = vor.u32 %v255_v62, %v253_v54  ;;  %v181_v22 = vld [vmem:[%s21032_s0 + $0x70] sm:$0xff]  ;;  %v183_v35 = vld [vmem:[%s21032_s0 + $0x80] sm:$0xff] }
  0xc4   :  { %14811 = vmatprep.subr.msk.bf16.mxu1 %vm417_vm0, %v17377_v27  ;;  %635 = vmatprep.mubr.bf16.mxu1 %v18482_v0  ;;  %v180_v7 = vld [vmem:[%s21032_s0 + $0x68] sm:$0xff]  ;;  %v263_v9 = vshrl.u32 %v18776_v55, 16  ;;  %v267_v11 = vshll.u32 %v18800_v5, 16  ;;  %v182_v23 = vld [vmem:[%s21032_s0 + $0x78] sm:$0xff]  ;;  %v271_v27 = vshrl.u32 %v18800_v5, 16  ;;  %v187_v54 = vld [vmem:[%s21032_s0 + $0xa0] sm:$0xff] }
  0xc5   :  { %853 = vmatpush1.bf16.msra.mxu0 %v17383_v37  ;;  %v261_v4 = vrot.slane %v259_v63, 1  ;;  %v18819_v18 = vpack.c.bf16 %v180_v7, %v179_v6  ;;  %v18838_v34 = vpack.c.bf16 %v182_v23, %v181_v22  ;;  %v188_v56 = vld [vmem:[%s21032_s0 + $0xa8] sm:$0xff]  ;;  %v191_v22 = vld [vmem:[%s21032_s0 + $0xc0] sm:$0xff]  ;;  %vm1221_vm4 = vcmask 1046528  }
  0xc6   :  { %14834 = vmatprep.subr.msk.bf16.mxu0 %vm417_vm0, %v17389_v52  ;;  %v269_v17 = vrot.slane %v267_v11, 1  ;;  %v18895_v1 = vpack.c.bf16 %v188_v56, %v187_v54  ;;  %v192_v23 = vld [vmem:[%s21032_s0 + $0xc8] sm:$0xff]  ;;  %vm3321_vm5 = vcmask 752640   ;;  %vm3358_vm6 = vcmask 1043456  }
  0xc7   :  { %606 = vmatpush1.bf16.msra.mxu1 %v425_v42  ;;  %v262_v8 = vsel %vm226_vm1, %v257_v3, %v261_v4  ;;  %v265_v12 = vor.u32 %v263_v9, %v261_v4  ;;  %v275_v28 = vshll.u32 %v18819_v18, 16  ;;  %v279_v38 = vshrl.u32 %v18819_v18, 16  ;;  %v190_v3 = vld [vmem:[%s21032_s0 + $0xb8] sm:$0xff] }
  0xc8   :  { %1025 = vmatprep.subr.bf16.mxu1 %v17382_v43  ;;  %v273_v29 = vor.u32 %v271_v27, %v269_v17  ;;  %v283_v39 = vshll.u32 %v18838_v34, 16  ;;  %v287_v49 = vshrl.u32 %v18838_v34, 16  ;;  %v307_v7 = vshll.u32 %v18895_v1, 16 }
  0xc9   :  { %855 = vmatpush1.bf16.msra.mxu0 %v841_v58  ;;  %v270_v25 = vsel %vm226_vm1, %v265_v12, %v269_v17  ;;  %v277_v33 = vrot.slane %v275_v28, 1  ;;  %vm18483_vm7 = vmmov 1  }
  0xca   :  { %14798 = vmatmul.mubr.msk.bf16.gmra.mrb[4].mxu0 %vm374_vm2, %v246_v44  ;;  %14812 = vmatmul.mubr.msk.bf16.vlgmr.msra.gmra.mrb[4].mxu1 %vm374_vm2, %v238_v36  ;;  %v184_v36 = vld [vmem:[%s21032_s0 + $0x88] sm:$0xff]  ;;  %v285_v42 = vrot.slane %v283_v39, 1  ;;  %v309_v12 = vrot.slane %v307_v7, 1  ;;  %vm19603_vm8 = vmpackc.low %vm3358_vm6, %vm18483_vm7 }
  0xcb   :  { %1026 = vmatpush1.bf16.msra.mxu1 %v17380_v45  ;;  %482 = vmatprep.mubr.bf16.mxu0 %v18482_v0  ;;  %v278_v37 = vsel %vm226_vm1, %v273_v29, %v277_v33  ;;  %v281_v40 = vor.u32 %v279_v38, %v277_v33  ;;  %v18857_v43 = vpack.c.bf16 %v184_v36, %v183_v35  ;;  %v186_v45 = vld [vmem:[%s21032_s0 + $0x98] sm:$0xff]  ;;  %v311_v29 = vshrl.u32 %v18895_v1, 16 }
  0xcc   :  { %645 = vmatprep.mubr.bf16.mxu1 %v18482_v0  ;;  %14849 = vmatprep.subr.msk.bf16.mxu1 %vm417_vm0, %v17386_v50  ;;  %v289_v51 = vor.u32 %v287_v49, %v285_v42 }
  0xcd   :  { %1339 = vmatprep.subr.bf16.mxu0 %v17394_v60  ;;  %v286_v48 = vsel %vm226_vm1, %v281_v40, %v285_v42  ;;  %v291_v50 = vshll.u32 %v18857_v43, 16  ;;  %v295_v58 = vshrl.u32 %v18857_v43, 16  ;;  %v313_v35 = vor.u32 %v311_v29, %v309_v12 }
  0xcf   :  { %1028 = vmatpush1.bf16.msra.mxu1 %v847_v57  ;;  %v293_v52 = vrot.slane %v291_v50, 1 }
  0xd0   :  { %1512 = vmatprep.subr.bf16.mxu1 %v17397_v2  ;;  %v189_v2 = vld [vmem:[%s21032_s0 + $0xb0] sm:$0xff] }
  0xd1   :  { %v294_v57 = vsel %vm226_vm1, %v289_v51, %v293_v52  ;;  %v297_v60 = vor.u32 %v295_v58, %v293_v52  ;;  %v18914_v17 = vpack.c.bf16 %v190_v3, %v189_v2  ;;  %v17395_v3 = vld [vmem:[#allocation2 + $0x88] ss:$16 sps:$4 sm:$0xff]  }
  0xd2   :  { %14799 = vmatmul.mubr.msk.bf16.gmra.mrb[8].mxu0 %vm374_vm2, %v254_v61  ;;  %14813 = vmatmul.mubr.msk.bf16.gmra.mrb[8].mxu1 %vm374_vm2, %v246_v44  ;;  %v185_v44 = vld [vmem:[%s21032_s0 + $0x90] sm:$0xff] }
  0xd3   :  { %492 = vmatprep.mubr.bf16.mxu0 %v18482_v0  ;;  %655 = vmatprep.mubr.bf16.mxu1 %v18482_v0  ;;  %v18876_v53 = vpack.c.bf16 %v186_v45, %v185_v44  ;;  %v315_v33 = vshll.u32 %v18914_v17, 16  ;;  %v319_v42 = vshrl.u32 %v18914_v17, 16 }
  0xd5   :  { %v299_v59 = vshll.u32 %v18876_v53, 16  ;;  %v303_v6 = vshrl.u32 %v18876_v53, 16  ;;  %v317_v36 = vrot.slane %v315_v33, 1 }
  0xd7   :  { %v318_v40 = vsel %vm226_vm1, %v313_v35, %v317_v36  ;;  %v321_v45 = vor.u32 %v319_v42, %v317_v36  ;;  %v1810_v35 = vrot.slane %v239_v30, 1 }
  0xda   :  { %14800 = vmatmul.mubr.msk.bf16.gmra.mrb[12].mxu0 %vm374_vm2, %v262_v8  ;;  %14814 = vmatmul.mubr.msk.bf16.gmra.mrb[12].mxu1 %vm374_vm2, %v254_v61  ;;  %v301_v61 = vrot.slane %v299_v59, 1 }
  0xdb   :  { %502 = vmatprep.mubr.bf16.mxu0 %v18482_v0  ;;  %665 = vmatprep.mubr.bf16.mxu1 %v18482_v0 }
  0xdc   :  { %v302_v4 = vsel %vm226_vm1, %v297_v60, %v301_v61  ;;  %v17398_v60 = vld [vmem:[#allocation2 + $0xa4] ss:$16 sps:$4 sm:$0x3f]  }
  0xe2   :  { %14801 = vmatmul.mubr.msk.bf16.gmra.mrb[16].mxu0 %vm374_vm2, %v270_v25  ;;  %14815 = vmatmul.mubr.msk.bf16.gmra.mrb[16].mxu1 %vm374_vm2, %v262_v8  ;;  %v305_v8 = vor.u32 %v303_v6, %v301_v61  ;;  %v17400_v61 = vld [vmem:[#allocation2 + $0xa0] ss:$16 sps:$4 sm:$0x3f]  }
  0xe3   :  { %512 = vmatprep.mubr.bf16.mxu0 %v18482_v0  ;;  %675 = vmatprep.mubr.bf16.mxu1 %v18482_v0  ;;  %v1328_v2 = vsel %vm417_vm0, %v17400_v61, 0  ;;  %v1225_v61 = vrot.slane %v18723_v24, 1 }
  0xea   :  { %14802 = vmatmul.mubr.msk.bf16.gmra.mrb[20].mxu0 %vm374_vm2, %v278_v37  ;;  %14816 = vmatmul.mubr.msk.bf16.gmra.mrb[20].mxu1 %vm374_vm2, %v270_v25  ;;  %v310_v25 = vsel %vm226_vm1, %v305_v8, %v309_v12  ;;  %v17403_v8 = vld [vmem:[#allocation2 + $0xa8] ss:$16 sps:$4 sm:$0x3f]   ;;  %v17409_v12 = vld [vmem:[#allocation2 + $0xcc] ss:$16 sps:$4 sm:$0xff]  }
  0xeb   :  { %522 = vmatprep.mubr.bf16.mxu0 %v18482_v0  ;;  %685 = vmatprep.mubr.bf16.mxu1 %v18482_v0 }
  0xf2   :  { %14803 = vmatmul.mubr.msk.bf16.gmra.mrb[24].mxu0 %vm374_vm2, %v286_v48  ;;  %14817 = vmatmul.mubr.msk.bf16.gmra.mrb[24].mxu1 %vm374_vm2, %v278_v37  ;;  %v18933_v37 = vpack.c.bf16 %v192_v23, %v191_v22  ;;  %v1807_v22 = vrot.slane %v228_v15, 1  ;;  %v1808_v23 = vrot.slane %v230_v16, 2  ;;  %v1222_v16 = vrot.slane %v18698_v10, 1 }
  0xf3   :  { %532 = vmatprep.mubr.bf16.mxu0 %v18482_v0  ;;  %695 = vmatprep.mubr.bf16.mxu1 %v18482_v0 }
  0xf4   :  { %v323_v44 = vshll.u32 %v18933_v37, 16  ;;  %v327_v52 = vshrl.u32 %v18933_v37, 16  ;;  %v1809_v15 = vor.u32 %v1808_v23, %v1807_v22  ;;  %v17415_v22 = vld [vmem:[#allocation2 + $0xe8] ss:$16 sps:$4 sm:$0x3f]   ;;  %v1229_v23 = vrot.slane %v18776_v55, 1 }
  0xfa   :  { %14804 = vmatmul.mubr.msk.bf16.gmra.mrb[28].mxu0 %vm374_vm2, %v294_v57  ;;  %14818 = vmatmul.mubr.msk.bf16.gmra.mrb[28].mxu1 %vm374_vm2, %v286_v48  ;;  %v325_v48 = vrot.slane %v323_v44, 1 }
  0xfb   :  { %542 = vmatprep.mubr.bf16.mxu0 %v18482_v0  ;;  %705 = vmatprep.mubr.bf16.mxu1 %v18482_v0 }
  0xfc   :  { %v326_v51 = vsel %vm226_vm1, %v321_v45, %v325_v48  ;;  %v329_v54 = vor.u32 %v327_v52, %v325_v48  ;;  %v17412_v45 = vld [vmem:[#allocation2 + $0xe0] ss:$16 sps:$4 sm:$0x3f]  }
  0xfe   :  { %v334_v56 = vsel %vm226_vm1, %v329_v54, %v18729_v26  ;;  %v17406_v26 = vld [vmem:[#allocation2 + $0xc4] ss:$16 sps:$4 sm:$0xff]  }
 0x102   :  { %14805 = vmatmul.mubr.msk.bf16.gmra.mrb[32].mxu0 %vm374_vm2, %v302_v4  ;;  %14819 = vmatmul.mubr.msk.bf16.gmra.mrb[32].mxu1 %vm374_vm2, %v294_v57  ;;  %v17392_v57 = vld [vmem:[#allocation2 + $0x80] ss:$16 sps:$4 sm:$0xff]  }
 0x103   :  { %552 = vmatprep.mubr.bf16.mxu0 %v18482_v0  ;;  %715 = vmatprep.mubr.bf16.mxu1 %v18482_v0 }
 0x10a   :  { %14806 = vmatmul.mubr.msk.bf16.gmra.mrb[36].mxu0 %vm374_vm2, %v310_v25  ;;  %14820 = vmatmul.mubr.msk.bf16.gmra.mrb[36].mxu1 %vm374_vm2, %v302_v4  ;;  %v17401_v4 = vld [vmem:[#allocation2 + $0xac] ss:$16 sps:$4 sm:$0x3f]  }
 0x10b   :  { %562 = vmatprep.mubr.bf16.mxu0 %v18482_v0  ;;  %725 = vmatprep.mubr.bf16.mxu1 %v18482_v0 }
 0x112   :  { %14807 = vmatmul.mubr.msk.bf16.gmra.mrb[40].mxu0 %vm374_vm2, %v318_v40  ;;  %14821 = vmatmul.mubr.msk.bf16.gmra.mrb[40].mxu1 %vm374_vm2, %v310_v25  ;;  %v1811_v25 = vrot.slane %v235_v19, 2  ;;  %v1223_v19 = vrot.slane %v18706_v13, 1 }
 0x113   :  { %572 = vmatprep.mubr.bf16.mxu0 %v18482_v0  ;;  %735 = vmatprep.mubr.bf16.mxu1 %v18482_v0 }
 0x114   :  { %v19043_v36 = vor.u32 %v1811_v25, %v1810_v35  ;;  %v1947_v25 = vsel %vm417_vm0, %v17415_v22, 0  ;;  %v17421_v35 = vld [vmem:[#allocation2 + $0x10c] ss:$16 sps:$4 sm:$0xff]   ;;  %v1245_v22 = vrot.slane %v18933_v37, 1 }
 0x11a   :  { %14808 = vmatmul.mubr.msk.bf16.gmra.mrb[44].mxu0 %vm374_vm2, %v326_v51  ;;  %14822 = vmatmul.mubr.msk.bf16.gmra.mrb[44].mxu1 %vm374_vm2, %v318_v40  ;;  %v19047_v40 = vsel %vm1806_vm3, %v1809_v15, %v19043_v36 }
 0x11b   :  { %582 = vmatprep.mubr.bf16.mxu0 %v18482_v0  ;;  %745 = vmatprep.mubr.bf16.mxu1 %v18482_v0 }
 0x122   :  { %14809 = vmatmul.mubr.msk.bf16.gmra.mrb[48].mxu0 %vm374_vm2, %v334_v56  ;;  %14823 = vmatmul.mubr.msk.bf16.gmra.mrb[48].mxu1 %vm374_vm2, %v326_v51  ;;  %v17404_v51 = vld [vmem:[#allocation2 + $0xc0] ss:$16 sps:$4 sm:$0xff]  }
 0x123   :  { %755 = vmatprep.mubr.bf16.mxu1 %v18482_v0  ;;  %884 = vmatprep.mubr.bf16.mxu0 %v18482_v0 }
 0x12a   :  { %14824 = vmatmul.mubr.msk.bf16.gmra.mrb[52].mxu1 %vm374_vm2, %v334_v56  ;;  %14835 = vmatmul.mubr.msk.bf16.vlgmr.msra.gmra.mrb[0].mxu0 %vm374_vm2, %v18698_v10  ;;  %v1224_v56 = vsel %vm1221_vm4, %v1222_v16, %v1223_v19  ;;  %v1231_v16 = vrot.slane %v18800_v5, 1 }
 0x12b   :  { %765 = vmatprep.mubr.bf16.mxu1 %v18482_v0  ;;  %894 = vmatprep.mubr.bf16.mxu0 %v18482_v0 }
 0x12c   :  { %1340 = vmatpush1.bf16.msra.mxu0 %v17392_v57  ;;  %v17410_v57 = vld [vmem:[#allocation2 + $0xe4] ss:$16 sps:$4 sm:$0x3f]  }
 0x12d   :  { %14872 = vmatprep.subr.msk.bf16.mxu0 %vm417_vm0, %v17398_v60 }
 0x130   :  { %1342 = vmatpush1.bf16.msra.mxu0 %v1328_v2  ;;  %v17418_v2 = vld [vmem:[#allocation2 + $0x104] ss:$16 sps:$4 sm:$0xff]  }
 0x131   :  { %1952 = vmatprep.subr.bf16.mxu0 %v17406_v26  ;;  %v1941_v26 = vsel %vm417_vm0, %v17412_v45, 0  ;;  %v1233_v45 = vrot.slane %v18819_v18, 1 }
 0x132   :  { %14825 = vmatmul.mubr.msk.bf16.gmra.mrb[56].mxu1 %vm374_vm2, %v18738_v32  ;;  %14836 = vmatmul.mubr.msk.bf16.gmra.mrb[4].mxu0 %vm374_vm2, %v18706_v13  ;;  %v1334_v32 = vsel %vm417_vm0, %v17403_v8, 0 }
 0x133   :  { %904 = vmatprep.mubr.bf16.mxu0 %v18482_v0  ;;  %1057 = vmatprep.mubr.bf16.mxu1 %v18482_v0 }
 0x13a   :  { %14837 = vmatmul.mubr.msk.bf16.gmra.mrb[8].mxu0 %vm374_vm2, %v18723_v24  ;;  %14850 = vmatmul.mubr.msk.bf16.vlgmr.msra.gmra.mrb[4].mxu1 %vm374_vm2, %v18698_v10 }
 0x13b   :  { %1513 = vmatpush1.bf16.msra.mxu1 %v17395_v3  ;;  %914 = vmatprep.mubr.bf16.mxu0 %v18482_v0  ;;  %v1226_v3 = vsel %vm1221_vm4, %v1223_v19, %v1225_v61  ;;  %v1232_v19 = vsel %vm1221_vm4, %v1229_v23, %v1231_v16 }
 0x13c   :  { %1067 = vmatprep.mubr.bf16.mxu1 %v18482_v0  ;;  %14887 = vmatprep.subr.msk.bf16.mxu1 %vm417_vm0, %v17401_v4  ;;  %v1227_v4 = vrot.slane %v18755_v41, 1 }
 0x13e   :  { %v1228_v8 = vsel %vm1221_vm4, %v1225_v61, %v1227_v4  ;;  %v1230_v15 = vsel %vm1221_vm4, %v1227_v4, %v1229_v23  ;;  %v1237_v61 = vrot.slane %v18857_v43, 1  ;;  %v1241_v4 = vrot.slane %v18895_v1, 1 }
 0x13f   :  { %1515 = vmatpush1.bf16.msra.mxu1 %v1334_v32  ;;  %v17413_v32 = vld [vmem:[#allocation2 + $0xec] ss:$16 sps:$4 sm:$0x3f]  }
 0x140   :  { %2125 = vmatprep.subr.bf16.mxu1 %v17409_v12  ;;  %v17407_v12 = vld [vmem:[#allocation2 + $0xc8] ss:$16 sps:$4 sm:$0xff]  }
 0x142   :  { %14838 = vmatmul.mubr.msk.bf16.gmra.mrb[12].mxu0 %vm374_vm2, %v18755_v41  ;;  %14851 = vmatmul.mubr.msk.bf16.gmra.mrb[8].mxu1 %vm374_vm2, %v18706_v13 }
 0x143   :  { %924 = vmatprep.mubr.bf16.mxu0 %v18482_v0  ;;  %1077 = vmatprep.mubr.bf16.mxu1 %v18482_v0 }
 0x14a   :  { %14839 = vmatmul.mubr.msk.bf16.gmra.mrb[16].mxu0 %vm374_vm2, %v18776_v55  ;;  %14852 = vmatmul.mubr.msk.bf16.gmra.mrb[12].mxu1 %vm374_vm2, %v18723_v24 }
 0x14b   :  { %934 = vmatprep.mubr.bf16.mxu0 %v18482_v0  ;;  %1087 = vmatprep.mubr.bf16.mxu1 %v18482_v0 }
 0x152   :  { %14840 = vmatmul.mubr.msk.bf16.gmra.mrb[20].mxu0 %vm374_vm2, %v18800_v5  ;;  %14853 = vmatmul.mubr.msk.bf16.gmra.mrb[16].mxu1 %vm374_vm2, %v18755_v41 }
 0x153   :  { %944 = vmatprep.mubr.bf16.mxu0 %v18482_v0  ;;  %1097 = vmatprep.mubr.bf16.mxu1 %v18482_v0 }
 0x15a   :  { %14841 = vmatmul.mubr.msk.bf16.gmra.mrb[24].mxu0 %vm374_vm2, %v18819_v18  ;;  %14854 = vmatmul.mubr.msk.bf16.gmra.mrb[20].mxu1 %vm374_vm2, %v18776_v55 }
 0x15b   :  { %954 = vmatprep.mubr.bf16.mxu0 %v18482_v0  ;;  %1107 = vmatprep.mubr.bf16.mxu1 %v18482_v0 }
 0x162   :  { %14842 = vmatmul.mubr.msk.bf16.gmra.mrb[28].mxu0 %vm374_vm2, %v18838_v34  ;;  %14855 = vmatmul.mubr.msk.bf16.gmra.mrb[24].mxu1 %vm374_vm2, %v18800_v5 }
 0x163   :  { %964 = vmatprep.mubr.bf16.mxu0 %v18482_v0  ;;  %1117 = vmatprep.mubr.bf16.mxu1 %v18482_v0 }
 0x16a   :  { %14843 = vmatmul.mubr.msk.bf16.gmra.mrb[32].mxu0 %vm374_vm2, %v18857_v43  ;;  %14856 = vmatmul.mubr.msk.bf16.gmra.mrb[28].mxu1 %vm374_vm2, %v18819_v18 }
 0x16b   :  { %974 = vmatprep.mubr.bf16.mxu0 %v18482_v0  ;;  %1127 = vmatprep.mubr.bf16.mxu1 %v18482_v0 }
 0x172   :  { %14844 = vmatmul.mubr.msk.bf16.gmra.mrb[36].mxu0 %vm374_vm2, %v18876_v53  ;;  %14857 = vmatmul.mubr.msk.bf16.gmra.mrb[32].mxu1 %vm374_vm2, %v18838_v34 }
 0x173   :  { %984 = vmatprep.mubr.bf16.mxu0 %v18482_v0  ;;  %1137 = vmatprep.mubr.bf16.mxu1 %v18482_v0 }
 0x17a   :  { %14845 = vmatmul.mubr.msk.bf16.gmra.mrb[40].mxu0 %vm374_vm2, %v18895_v1  ;;  %14858 = vmatmul.mubr.msk.bf16.gmra.mrb[36].mxu1 %vm374_vm2, %v18857_v43 }
 0x17b   :  { %994 = vmatprep.mubr.bf16.mxu0 %v18482_v0  ;;  %1147 = vmatprep.mubr.bf16.mxu1 %v18482_v0 }
 0x182   :  { %14846 = vmatmul.mubr.msk.bf16.gmra.mrb[44].mxu0 %vm374_vm2, %v18914_v17  ;;  %14859 = vmatmul.mubr.msk.bf16.gmra.mrb[40].mxu1 %vm374_vm2, %v18876_v53 }
 0x183   :  { %1004 = vmatprep.mubr.bf16.mxu0 %v18482_v0  ;;  %1157 = vmatprep.mubr.bf16.mxu1 %v18482_v0 }
 0x18a   :  { %14847 = vmatmul.mubr.msk.bf16.gmra.mrb[48].mxu0 %vm374_vm2, %v18933_v37  ;;  %14860 = vmatmul.mubr.msk.bf16.gmra.mrb[44].mxu1 %vm374_vm2, %v18895_v1 }
 0x18b   :  { %1014 = vmatprep.mubr.bf16.mxu0 %v18482_v0  ;;  %1167 = vmatprep.mubr.bf16.mxu1 %v18482_v0 }
 0x192   :  { %14848 = vmatmul.mubr.msk.bf16.gmra.mrb[52].mxu0 %vm374_vm2, %v18708_v14  ;;  %14861 = vmatmul.mubr.msk.bf16.gmra.mrb[48].mxu1 %vm374_vm2, %v18914_v17 }
 0x193   :  { %1177 = vmatprep.mubr.bf16.mxu1 %v18482_v0  ;;  %1371 = vmatprep.mubr.bf16.mxu0 %v18482_v0 }
 0x195   :  { %v19063_v30 = vpop.f32.mrb[0].mxu1 }
 0x196   :  { %v19065_v48 = vpop.f32.mrb[1].mxu1 }
 0x197   :  { %v19067_v54 = vpop.f32.mrb[2].mxu1 }
 0x198   :  { %v19070_v60 = vpop.f32.mrb[3].mxu1 }
 0x19a   :  { %14862 = vmatmul.mubr.msk.bf16.gmra.mrb[52].mxu1 %vm374_vm2, %v18933_v37  ;;  %14873 = vmatmul.mubr.msk.bf16.vlgmr.msra.gmra.mrb[0].mxu0 %vm374_vm2, %v1224_v56 }
 0x19b   :  { %1187 = vmatprep.mubr.bf16.mxu1 %v18482_v0  ;;  %1381 = vmatprep.mubr.bf16.mxu0 %v18482_v0 }
 0x19c   :  { %1953 = vmatpush1.bf16.msra.mxu0 %v17404_v51  ;;  %v1234_v51 = vsel %vm1221_vm4, %v1231_v16, %v1233_v45  ;;  %v1815_v16 = vrot.slane %v243_v31, 2 }
 0x19d   :  { %14910 = vmatprep.subr.msk.bf16.mxu0 %vm417_vm0, %v17410_v57 }
 0x1a0   :  { %1955 = vmatpush1.bf16.msra.mxu0 %v1941_v26 }
 0x1a1   :  { %2537 = vmatprep.subr.bf16.mxu0 %v17418_v2  ;;  %v1239_v2 = vrot.slane %v18876_v53, 1 }
 0x1a2   :  { %14863 = vmatmul.mubr.msk.bf16.gmra.mrb[56].mxu1 %vm374_vm2, %v18708_v14  ;;  %14874 = vmatmul.mubr.msk.bf16.gmra.mrb[4].mxu0 %vm374_vm2, %v1226_v3 }
 0x1a3   :  { %1391 = vmatprep.mubr.bf16.mxu0 %v18482_v0  ;;  %1544 = vmatprep.mubr.bf16.mxu1 %v18482_v0 }
 0x1aa   :  { %14875 = vmatmul.mubr.msk.bf16.gmra.mrb[8].mxu0 %vm374_vm2, %v1228_v8  ;;  %14888 = vmatmul.mubr.msk.bf16.vlgmr.msra.gmra.mrb[4].mxu1 %vm374_vm2, %v1224_v56  ;;  %v1235_v56 = vrot.slane %v18838_v34, 1 }
 0x1ab   :  { %2126 = vmatpush1.bf16.msra.mxu1 %v17407_v12  ;;  %1401 = vmatprep.mubr.bf16.mxu0 %v18482_v0  ;;  %v1243_v12 = vrot.slane %v18914_v17, 1 }
 0x1ac   :  { %1554 = vmatprep.mubr.bf16.mxu1 %v18482_v0  ;;  %14925 = vmatprep.subr.msk.bf16.mxu1 %vm417_vm0, %v17413_v32  ;;  %v1236_v57 = vsel %vm1221_vm4, %v1233_v45, %v1235_v56  ;;  %v1238_v26 = vsel %vm1221_vm4, %v1235_v56, %v1237_v61  ;;  %v17422_v45 = vld [vmem:[#allocation2 + $0x124] ss:$16 sps:$4 sm:$0x3f]  }
 0x1ad   :  { %v1244_v32 = vsel %vm1221_vm4, %v1241_v4, %v1243_v12  ;;  %v1246_v23 = vsel %vm1221_vm4, %v1243_v12, %v1245_v22 }
 0x1af   :  { %2128 = vmatpush1.bf16.msra.mxu1 %v1947_v25  ;;  %v1247_v25 = vrot.slane %v18708_v14, 1 }
 0x1b0   :  { %2710 = vmatprep.subr.bf16.mxu1 %v17421_v35 }
 0x1b1   :  { %v1248_v35 = vsel %vm1221_vm4, %v1245_v22, %v1247_v25 }
 0x1b2   :  { %14876 = vmatmul.mubr.msk.bf16.gmra.mrb[12].mxu0 %vm374_vm2, %v1230_v15  ;;  %14889 = vmatmul.mubr.msk.bf16.gmra.mrb[8].mxu1 %vm374_vm2, %v1226_v3  ;;  %v1240_v3 = vsel %vm1221_vm4, %v1237_v61, %v1239_v2  ;;  %v1819_v61 = vrot.slane %v251_v47, 2  ;;  %v17425_v47 = vld [vmem:[#allocation2 + $0x12c] ss:$16 sps:$4 sm:$0x3f]  }
 0x1b3   :  { %1411 = vmatprep.mubr.bf16.mxu0 %v18482_v0  ;;  %1564 = vmatprep.mubr.bf16.mxu1 %v18482_v0 }
 0x1ba   :  { %14877 = vmatmul.mubr.msk.bf16.gmra.mrb[16].mxu0 %vm374_vm2, %v1232_v19  ;;  %14890 = vmatmul.mubr.msk.bf16.gmra.mrb[12].mxu1 %vm374_vm2, %v1228_v8  ;;  %v1242_v8 = vsel %vm1221_vm4, %v1239_v2, %v1241_v4  ;;  %v17427_v4 = vld [vmem:[#allocation2 + $0x128] ss:$16 sps:$4 sm:$0x3f]  }
 0x1bb   :  { %1421 = vmatprep.mubr.bf16.mxu0 %v18482_v0  ;;  %1574 = vmatprep.mubr.bf16.mxu1 %v18482_v0 }
 0x1c2   :  { %14878 = vmatmul.mubr.msk.bf16.gmra.mrb[20].mxu0 %vm374_vm2, %v1234_v51  ;;  %14891 = vmatmul.mubr.msk.bf16.gmra.mrb[16].mxu1 %vm374_vm2, %v1230_v15  ;;  %v1814_v15 = vrot.slane %v247_v46, 1 }
 0x1c3   :  { %1431 = vmatprep.mubr.bf16.mxu0 %v18482_v0  ;;  %1584 = vmatprep.mubr.bf16.mxu1 %v18482_v0 }
 0x1c4   :  { %v1816_v56 = vor.u32 %v1815_v16, %v1814_v15  ;;  %v1838_v16 = vrot.slane %v295_v58, 1  ;;  %v1843_v58 = vrot.slane %v299_v59, 2 }
 0x1c6   :  { %v1817_v31 = vsel %vm1806_vm3, %v19043_v36, %v1816_v56  ;;  %v1822_v36 = vrot.slane %v263_v9, 1  ;;  %v2532_v9 = vsel %vm417_vm0, %v17427_v4, 0 }
 0x1ca   :  { %14879 = vmatmul.mubr.msk.bf16.gmra.mrb[24].mxu0 %vm374_vm2, %v1236_v57  ;;  %14892 = vmatmul.mubr.msk.bf16.gmra.mrb[20].mxu1 %vm374_vm2, %v1232_v19  ;;  %v17416_v19 = vld [vmem:[#allocation2 + $0x100] ss:$16 sps:$4 sm:$0xff]  }
 0x1cb   :  { %1441 = vmatprep.mubr.bf16.mxu0 %v18482_v0  ;;  %1594 = vmatprep.mubr.bf16.mxu1 %v18482_v0 }
 0x1d2   :  { %14880 = vmatmul.mubr.msk.bf16.gmra.mrb[28].mxu0 %vm374_vm2, %v1238_v26  ;;  %14893 = vmatmul.mubr.msk.bf16.gmra.mrb[24].mxu1 %vm374_vm2, %v1234_v51  ;;  %v17424_v51 = vld [vmem:[#allocation2 + $0x120] ss:$16 sps:$4 sm:$0x3f]  }
 0x1d3   :  { %1451 = vmatprep.mubr.bf16.mxu0 %v18482_v0  ;;  %1604 = vmatprep.mubr.bf16.mxu1 %v18482_v0  ;;  %v2526_v46 = vsel %vm417_vm0, %v17424_v51, 0 }
 0x1da   :  { %14881 = vmatmul.mubr.msk.bf16.gmra.mrb[32].mxu0 %vm374_vm2, %v1240_v3  ;;  %14894 = vmatmul.mubr.msk.bf16.gmra.mrb[28].mxu1 %vm374_vm2, %v1236_v57  ;;  %v1818_v57 = vrot.slane %v255_v62, 1  ;;  %v1823_v62 = vrot.slane %v259_v63, 2  ;;  %v1826_v63 = vrot.slane %v271_v27, 1  ;;  %v1831_v27 = vrot.slane %v275_v28, 2 }
 0x1db   :  { %1461 = vmatprep.mubr.bf16.mxu0 %v18482_v0  ;;  %1614 = vmatprep.mubr.bf16.mxu1 %v18482_v0 }
 0x1e2   :  { %14882 = vmatmul.mubr.msk.bf16.gmra.mrb[36].mxu0 %vm374_vm2, %v1242_v8  ;;  %14895 = vmatmul.mubr.msk.bf16.gmra.mrb[32].mxu1 %vm374_vm2, %v1238_v26  ;;  %v1820_v26 = vor.u32 %v1819_v61, %v1818_v57  ;;  %v1854_v61 = vrot.slane %v327_v52, 1  ;;  %v1859_v52 = vrot.slane %v331_v20, 2  ;;  %v2420_v20 = vrot.slane %v18698_v10, 2 }
 0x1e3   :  { %1471 = vmatprep.mubr.bf16.mxu0 %v18482_v0  ;;  %1624 = vmatprep.mubr.bf16.mxu1 %v18482_v0  ;;  %v2425_v10 = vrot.slane %v18755_v41, 2  ;;  %v2429_v41 = vrot.slane %v18800_v5, 2  ;;  %v2433_v5 = vrot.slane %v18838_v34, 2  ;;  %v2437_v34 = vrot.slane %v18876_v53, 2 }
 0x1e4   :  { %v1821_v2 = vsel %vm1806_vm3, %v1816_v56, %v1820_v26  ;;  %v1846_v56 = vrot.slane %v311_v29, 1  ;;  %v1851_v29 = vrot.slane %v315_v33, 2  ;;  %v2441_v53 = vrot.slane %v18914_v17, 2 }
 0x1e5   :  { %v2445_v17 = vrot.slane %v18708_v14, 2  ;;  %v21044_v14 = vlaneseq }
 0x1ea   :  { %14883 = vmatmul.mubr.msk.bf16.gmra.mrb[40].mxu0 %vm374_vm2, %v1244_v32  ;;  %14896 = vmatmul.mubr.msk.bf16.gmra.mrb[36].mxu1 %vm374_vm2, %v1240_v3  ;;  %v17419_v3 = vld [vmem:[#allocation2 + $0x108] ss:$16 sps:$4 sm:$0xff]  }
 0x1eb   :  { %1481 = vmatprep.mubr.bf16.mxu0 %v18482_v0  ;;  %1634 = vmatprep.mubr.bf16.mxu1 %v18482_v0 }
 0x1f2   :  { %14884 = vmatmul.mubr.msk.bf16.gmra.mrb[44].mxu0 %vm374_vm2, %v1246_v23  ;;  %14897 = vmatmul.mubr.msk.bf16.gmra.mrb[40].mxu1 %vm374_vm2, %v1242_v8  ;;  %v1824_v8 = vor.u32 %v1823_v62, %v1822_v36  ;;  %v2423_v62 = vrot.slane %v18723_v24, 2  ;;  %v2427_v24 = vrot.slane %v18776_v55, 2  ;;  %v2431_v55 = vrot.slane %v18819_v18, 2 }
 0x1f3   :  { %1491 = vmatprep.mubr.bf16.mxu0 %v18482_v0  ;;  %1644 = vmatprep.mubr.bf16.mxu1 %v18482_v0  ;;  %v2435_v18 = vrot.slane %v18857_v43, 2  ;;  %v2439_v43 = vrot.slane %v18895_v1, 2  ;;  %v2443_v1 = vrot.slane %v18933_v37, 2 }
 0x1f4   :  { %v1825_v12 = vsel %vm1806_vm3, %v1820_v26, %v1824_v8  ;;  %v2428_v4 = vsel %vm417_vm0, %v2425_v10, %v2427_v24 }
 0x1fa   :  { %14885 = vmatmul.mubr.msk.bf16.gmra.mrb[48].mxu0 %vm374_vm2, %v1248_v35  ;;  %14898 = vmatmul.mubr.msk.bf16.gmra.mrb[44].mxu1 %vm374_vm2, %v1244_v32  ;;  %v1827_v32 = vrot.slane %v267_v11, 2 }
 0x1fb   :  { %1501 = vmatprep.mubr.bf16.mxu0 %v18482_v0  ;;  %1654 = vmatprep.mubr.bf16.mxu1 %v18482_v0 }
 0x202   :  { %14886 = vmatmul.mubr.msk.bf16.gmra.mrb[52].mxu0 %vm374_vm2, %v1247_v25  ;;  %14899 = vmatmul.mubr.msk.bf16.gmra.mrb[48].mxu1 %vm374_vm2, %v1246_v23  ;;  %v1830_v23 = vrot.slane %v279_v38, 1  ;;  %v1835_v38 = vrot.slane %v283_v39, 2 }
 0x203   :  { %1664 = vmatprep.mubr.bf16.mxu1 %v18482_v0  ;;  %1984 = vmatprep.mubr.bf16.mxu0 %v18482_v0 }
 0x204   :  { %v1832_v11 = vor.u32 %v1831_v27, %v1830_v23  ;;  %v2444_v23 = vsel %vm417_vm0, %v2441_v53, %v2443_v1  ;;  %v2446_v27 = vsel %vm417_vm0, %v2443_v1, %v2445_v17 }
 0x20a   :  { %14900 = vmatmul.mubr.msk.bf16.gmra.mrb[52].mxu1 %vm374_vm2, %v1248_v35  ;;  %14911 = vmatmul.mubr.msk.bf16.vlgmr.msra.gmra.mrb[0].mxu0 %vm374_vm2, %v19047_v40  ;;  %v1834_v35 = vrot.slane %v287_v49, 1  ;;  %v1839_v49 = vrot.slane %v291_v50, 2 }
 0x20b   :  { %1674 = vmatprep.mubr.bf16.mxu1 %v18482_v0  ;;  %1994 = vmatprep.mubr.bf16.mxu0 %v18482_v0 }
 0x20c   :  { %2538 = vmatpush1.bf16.msra.mxu0 %v17416_v19  ;;  %v1836_v28 = vor.u32 %v1835_v38, %v1834_v35  ;;  %v1840_v39 = vor.u32 %v1839_v49, %v1838_v16  ;;  %v19367_v35 = vshrl.u32 %v21044_v14, 7  ;;  %v2995_v16 = vld [vmem:[#allocation4] sm:$0xf] }
 0x20d   :  { %14948 = vmatprep.subr.msk.bf16.mxu0 %vm417_vm0, %v17422_v45  ;;  %v1842_v45 = vrot.slane %v303_v6, 1  ;;  %v1847_v6 = vrot.slane %v307_v7, 2  ;;  %v3718_v14 = vld [vmem:[#allocation7 + $0x658] sm:$0xff] }
 0x20e   :  { %v1837_v15 = vsel %vm1806_vm3, %v1832_v11, %v1836_v28  ;;  %v1841_v19 = vsel %vm1806_vm3, %v1836_v28, %v1840_v39  ;;  %21068 = vst [vmem:[#allocation24_spill] sm:$0xff] %v19367_v35  ;;  %v3298_v28 = vld [vmem:[#allocation6 + $0x8] sm:$0xff] }
 0x20f   :  { %v1844_v50 = vor.u32 %v1843_v58, %v1842_v45  ;;  %v1848_v59 = vor.u32 %v1847_v6, %v1846_v56  ;;  %v19380_v58 = vsub.s32 3, %v19367_v35 }
 0x210   :  { %2540 = vmatpush1.bf16.msra.mxu0 %v2526_v46 }
 0x211   :  { %v1845_v51 = vsel %vm1806_vm3, %v1840_v39, %v1844_v50  ;;  %v1849_v46 = vsel %vm1806_vm3, %v1844_v50, %v1848_v59  ;;  %21072 = vst [vmem:[#allocation28_spill] sm:$0xff] %v19380_v58 }
 0x212   :  { %14901 = vmatmul.mubr.msk.bf16.gmra.mrb[56].mxu1 %vm374_vm2, %v1247_v25  ;;  %14912 = vmatmul.mubr.msk.bf16.gmra.mrb[4].mxu0 %vm374_vm2, %v1817_v31 }
 0x213   :  { %2004 = vmatprep.mubr.bf16.mxu0 %v18482_v0  ;;  %2157 = vmatprep.mubr.bf16.mxu1 %v18482_v0 }
 0x21a   :  { %14913 = vmatmul.mubr.msk.bf16.gmra.mrb[8].mxu0 %vm374_vm2, %v1821_v2  ;;  %14926 = vmatmul.mubr.msk.bf16.vlgmr.msra.gmra.mrb[4].mxu1 %vm374_vm2, %v19047_v40  ;;  %v1828_v40 = vor.u32 %v1827_v32, %v1826_v63  ;;  %v2436_v63 = vsel %vm417_vm0, %v2433_v5, %v2435_v18  ;;  %v2438_v32 = vsel %vm417_vm0, %v2435_v18, %v2437_v34 }
 0x21b   :  { %2711 = vmatpush1.bf16.msra.mxu1 %v17419_v3  ;;  %2014 = vmatprep.mubr.bf16.mxu0 %v18482_v0 }
 0x21c   :  { %2167 = vmatprep.mubr.bf16.mxu1 %v18482_v0  ;;  %14963 = vmatprep.subr.msk.bf16.mxu1 %vm417_vm0, %v17425_v47  ;;  %v1829_v22 = vsel %vm1806_vm3, %v1824_v8, %v1828_v40  ;;  %v1833_v25 = vsel %vm1806_vm3, %v1828_v40, %v1832_v11  ;;  %v2430_v8 = vsel %vm417_vm0, %v2427_v24, %v2429_v41 }
 0x21d   :  { %v2440_v40 = vsel %vm417_vm0, %v2437_v34, %v2439_v43 }
 0x21f   :  { %2713 = vmatpush1.bf16.msra.mxu1 %v2532_v9  ;;  %v2432_v9 = vsel %vm417_vm0, %v2429_v41, %v2431_v55 }
 0x222   :  { %14914 = vmatmul.mubr.msk.bf16.gmra.mrb[12].mxu0 %vm374_vm2, %v1825_v12  ;;  %14927 = vmatmul.mubr.msk.bf16.gmra.mrb[8].mxu1 %vm374_vm2, %v1817_v31  ;;  %v1850_v31 = vrot.slane %v319_v42, 1  ;;  %v1855_v42 = vrot.slane %v323_v44, 2 }
 0x223   :  { %2024 = vmatprep.mubr.bf16.mxu0 %v18482_v0  ;;  %2177 = vmatprep.mubr.bf16.mxu1 %v18482_v0 }
 0x224   :  { %v1852_v7 = vor.u32 %v1851_v29, %v1850_v31  ;;  %v1856_v33 = vor.u32 %v1855_v42, %v1854_v61 }
 0x226   :  { %v1853_v57 = vsel %vm1806_vm3, %v1848_v59, %v1852_v7  ;;  %v1857_v26 = vsel %vm1806_vm3, %v1852_v7, %v1856_v33  ;;  %v19392_v59 = vrot.slane %v2995_v16, %v19380_v58 }
 0x22a   :  { %14915 = vmatmul.mubr.msk.bf16.gmra.mrb[16].mxu0 %vm374_vm2, %v1829_v22  ;;  %14928 = vmatmul.mubr.msk.bf16.gmra.mrb[12].mxu1 %vm374_vm2, %v1821_v2  ;;  %v1858_v2 = vrot.slane %v335_v21, 1  ;;  %v2421_v21 = vrot.slane %v18706_v13, 2  ;;  %v2426_v13 = vsel %vm417_vm0, %v2423_v62, %v2425_v10 }
 0x22b   :  { %2034 = vmatprep.mubr.bf16.mxu0 %v18482_v0  ;;  %2187 = vmatprep.mubr.bf16.mxu1 %v18482_v0 }
 0x22c   :  { %v1860_v44 = vor.u32 %v1859_v52, %v1858_v2  ;;  %v2422_v36 = vsel %vm417_vm0, %v2420_v20, %v2421_v21  ;;  %v2424_v47 = vsel %vm417_vm0, %v2421_v21, %v2423_v62 }
 0x22e   :  { %v1861_v3 = vsel %vm1806_vm3, %v1856_v33, %v1860_v44 }
 0x232   :  { %14916 = vmatmul.mubr.msk.bf16.gmra.mrb[20].mxu0 %vm374_vm2, %v1833_v25  ;;  %14929 = vmatmul.mubr.msk.bf16.gmra.mrb[16].mxu1 %vm374_vm2, %v1825_v12  ;;  %v2434_v12 = vsel %vm417_vm0, %v2431_v55, %v2433_v5 }
 0x233   :  { %2044 = vmatprep.mubr.bf16.mxu0 %v18482_v0  ;;  %2197 = vmatprep.mubr.bf16.mxu1 %v18482_v0 }
 0x23a   :  { %14917 = vmatmul.mubr.msk.bf16.gmra.mrb[24].mxu0 %vm374_vm2, %v1837_v15  ;;  %14930 = vmatmul.mubr.msk.bf16.gmra.mrb[20].mxu1 %vm374_vm2, %v1829_v22  ;;  %v2442_v22 = vsel %vm417_vm0, %v2439_v43, %v2441_v53 }
 0x23b   :  { %2054 = vmatprep.mubr.bf16.mxu0 %v18482_v0  ;;  %2207 = vmatprep.mubr.bf16.mxu1 %v18482_v0 }
 0x242   :  { %14918 = vmatmul.mubr.msk.bf16.gmra.mrb[28].mxu0 %vm374_vm2, %v1841_v19  ;;  %14931 = vmatmul.mubr.msk.bf16.gmra.mrb[24].mxu1 %vm374_vm2, %v1833_v25 }
 0x243   :  { %2064 = vmatprep.mubr.bf16.mxu0 %v18482_v0  ;;  %2217 = vmatprep.mubr.bf16.mxu1 %v18482_v0 }
 0x24a   :  { %14919 = vmatmul.mubr.msk.bf16.gmra.mrb[32].mxu0 %vm374_vm2, %v1845_v51  ;;  %14932 = vmatmul.mubr.msk.bf16.gmra.mrb[28].mxu1 %vm374_vm2, %v1837_v15  ;;  %v19371_v15 = vsub.s32 0, %v19367_v35 }
 0x24b   :  { %2074 = vmatprep.mubr.bf16.mxu0 %v18482_v0  ;;  %2227 = vmatprep.mubr.bf16.mxu1 %v18482_v0 }
 0x24c   :  { %21069 = vst [vmem:[#allocation25_spill] sm:$0xff] %v19371_v15  ;;  %v19383_v50 = vrot.slane %v2995_v16, %v19371_v15 }
 0x252   :  { %14920 = vmatmul.mubr.msk.bf16.gmra.mrb[36].mxu0 %vm374_vm2, %v1849_v46  ;;  %14933 = vmatmul.mubr.msk.bf16.gmra.mrb[32].mxu1 %vm374_vm2, %v1841_v19  ;;  %v19377_v19 = vsub.s32 2, %v19367_v35 }
 0x253   :  { %2084 = vmatprep.mubr.bf16.mxu0 %v18482_v0  ;;  %2237 = vmatprep.mubr.bf16.mxu1 %v18482_v0 }
 0x254   :  { %21071 = vst [vmem:[#allocation27_spill] sm:$0xff] %v19377_v19  ;;  %v19389_v6 = vrot.slane %v2995_v16, %v19377_v19 }
 0x25a   :  { %14921 = vmatmul.mubr.msk.bf16.gmra.mrb[40].mxu0 %vm374_vm2, %v1853_v57  ;;  %14934 = vmatmul.mubr.msk.bf16.gmra.mrb[36].mxu1 %vm374_vm2, %v1845_v51 }
 0x25b   :  { %2094 = vmatprep.mubr.bf16.mxu0 %v18482_v0  ;;  %2247 = vmatprep.mubr.bf16.mxu1 %v18482_v0 }
 0x262   :  { %14922 = vmatmul.mubr.msk.bf16.gmra.mrb[44].mxu0 %vm374_vm2, %v1857_v26  ;;  %14935 = vmatmul.mubr.msk.bf16.gmra.mrb[40].mxu1 %vm374_vm2, %v1849_v46 }
 0x263   :  { %2104 = vmatprep.mubr.bf16.mxu0 %v18482_v0  ;;  %2257 = vmatprep.mubr.bf16.mxu1 %v18482_v0 }
 0x26a   :  { %14923 = vmatmul.mubr.msk.bf16.gmra.mrb[48].mxu0 %vm374_vm2, %v1861_v3  ;;  %14936 = vmatmul.mubr.msk.bf16.gmra.mrb[44].mxu1 %vm374_vm2, %v1853_v57 }
 0x26b   :  { %2114 = vmatprep.mubr.bf16.mxu0 %v18482_v0  ;;  %2267 = vmatprep.mubr.bf16.mxu1 %v18482_v0 }
 0x272   :  { %14924 = vmatmul.mubr.msk.bf16.gmra.mrb[52].mxu0 %vm374_vm2, %v1860_v44  ;;  %14937 = vmatmul.mubr.msk.bf16.gmra.mrb[48].mxu1 %vm374_vm2, %v1857_v26 }
 0x273   :  { %2277 = vmatprep.mubr.bf16.mxu1 %v18482_v0  ;;  %2569 = vmatprep.mubr.bf16.mxu0 %v18482_v0 }
 0x27a   :  { %14938 = vmatmul.mubr.msk.bf16.gmra.mrb[52].mxu1 %vm374_vm2, %v1861_v3  ;;  %14949 = vmatmul.mubr.msk.bf16.vlgmr.msra.gmra.mrb[0].mxu0 %vm374_vm2, %v2422_v36 }
 0x27b   :  { %2287 = vmatprep.mubr.bf16.mxu1 %v18482_v0  ;;  %2579 = vmatprep.mubr.bf16.mxu0 %v18482_v0 }
 0x282   :  { %14939 = vmatmul.mubr.msk.bf16.gmra.mrb[56].mxu1 %vm374_vm2, %v1860_v44  ;;  %14950 = vmatmul.mubr.msk.bf16.gmra.mrb[4].mxu0 %vm374_vm2, %v2424_v47 }
 0x283   :  { %2589 = vmatprep.mubr.bf16.mxu0 %v18482_v0  ;;  %2742 = vmatprep.mubr.bf16.mxu1 %v18482_v0 }
 0x28a   :  { %14951 = vmatmul.mubr.msk.bf16.gmra.mrb[8].mxu0 %vm374_vm2, %v2426_v13  ;;  %14964 = vmatmul.mubr.msk.bf16.vlgmr.msra.gmra.mrb[4].mxu1 %vm374_vm2, %v2422_v36 }
 0x28b   :  { %2599 = vmatprep.mubr.bf16.mxu0 %v18482_v0  ;;  %2752 = vmatprep.mubr.bf16.mxu1 %v18482_v0 }
 0x292   :  { %14952 = vmatmul.mubr.msk.bf16.gmra.mrb[12].mxu0 %vm374_vm2, %v2428_v4  ;;  %14965 = vmatmul.mubr.msk.bf16.gmra.mrb[8].mxu1 %vm374_vm2, %v2424_v47 }
 0x293   :  { %2609 = vmatprep.mubr.bf16.mxu0 %v18482_v0  ;;  %2762 = vmatprep.mubr.bf16.mxu1 %v18482_v0 }
 0x29a   :  { %14953 = vmatmul.mubr.msk.bf16.gmra.mrb[16].mxu0 %vm374_vm2, %v2430_v8  ;;  %14966 = vmatmul.mubr.msk.bf16.gmra.mrb[12].mxu1 %vm374_vm2, %v2426_v13 }
 0x29b   :  { %2619 = vmatprep.mubr.bf16.mxu0 %v18482_v0  ;;  %2772 = vmatprep.mubr.bf16.mxu1 %v18482_v0 }
 0x2a2   :  { %14954 = vmatmul.mubr.msk.bf16.gmra.mrb[20].mxu0 %vm374_vm2, %v2432_v9  ;;  %14967 = vmatmul.mubr.msk.bf16.gmra.mrb[16].mxu1 %vm374_vm2, %v2428_v4 }
 0x2a3   :  { %2629 = vmatprep.mubr.bf16.mxu0 %v18482_v0  ;;  %2782 = vmatprep.mubr.bf16.mxu1 %v18482_v0 }
 0x2aa   :  { %14955 = vmatmul.mubr.msk.bf16.gmra.mrb[24].mxu0 %vm374_vm2, %v2434_v12  ;;  %14968 = vmatmul.mubr.msk.bf16.gmra.mrb[20].mxu1 %vm374_vm2, %v2430_v8 }
 0x2ab   :  { %2639 = vmatprep.mubr.bf16.mxu0 %v18482_v0  ;;  %2792 = vmatprep.mubr.bf16.mxu1 %v18482_v0 }
 0x2b2   :  { %14956 = vmatmul.mubr.msk.bf16.gmra.mrb[28].mxu0 %vm374_vm2, %v2436_v63  ;;  %14969 = vmatmul.mubr.msk.bf16.gmra.mrb[24].mxu1 %vm374_vm2, %v2432_v9 }
 0x2b3   :  { %2649 = vmatprep.mubr.bf16.mxu0 %v18482_v0  ;;  %2802 = vmatprep.mubr.bf16.mxu1 %v18482_v0 }
 0x2ba   :  { %14957 = vmatmul.mubr.msk.bf16.gmra.mrb[32].mxu0 %vm374_vm2, %v2438_v32  ;;  %14970 = vmatmul.mubr.msk.bf16.gmra.mrb[28].mxu1 %vm374_vm2, %v2434_v12 }
 0x2bb   :  { %2659 = vmatprep.mubr.bf16.mxu0 %v18482_v0  ;;  %2812 = vmatprep.mubr.bf16.mxu1 %v18482_v0 }
 0x2c2   :  { %14958 = vmatmul.mubr.msk.bf16.gmra.mrb[36].mxu0 %vm374_vm2, %v2440_v40  ;;  %14971 = vmatmul.mubr.msk.bf16.gmra.mrb[32].mxu1 %vm374_vm2, %v2436_v63 }
 0x2c3   :  { %2669 = vmatprep.mubr.bf16.mxu0 %v18482_v0  ;;  %2822 = vmatprep.mubr.bf16.mxu1 %v18482_v0 }
 0x2ca   :  { %14959 = vmatmul.mubr.msk.bf16.gmra.mrb[40].mxu0 %vm374_vm2, %v2442_v22  ;;  %14972 = vmatmul.mubr.msk.bf16.gmra.mrb[36].mxu1 %vm374_vm2, %v2438_v32 }
 0x2cb   :  { %2679 = vmatprep.mubr.bf16.mxu0 %v18482_v0  ;;  %2832 = vmatprep.mubr.bf16.mxu1 %v18482_v0 }
 0x2d2   :  { %14960 = vmatmul.mubr.msk.bf16.gmra.mrb[44].mxu0 %vm374_vm2, %v2444_v23  ;;  %14973 = vmatmul.mubr.msk.bf16.gmra.mrb[40].mxu1 %vm374_vm2, %v2440_v40 }
 0x2d3   :  { %2689 = vmatprep.mubr.bf16.mxu0 %v18482_v0  ;;  %2842 = vmatprep.mubr.bf16.mxu1 %v18482_v0 }
 0x2da   :  { %14961 = vmatmul.mubr.msk.bf16.gmra.mrb[48].mxu0 %vm374_vm2, %v2446_v27  ;;  %14974 = vmatmul.mubr.msk.bf16.gmra.mrb[44].mxu1 %vm374_vm2, %v2442_v22 }
 0x2db   :  { %2699 = vmatprep.mubr.bf16.mxu0 %v18482_v0  ;;  %2852 = vmatprep.mubr.bf16.mxu1 %v18482_v0 }
 0x2e2   :  { %14962 = vmatmul.mubr.msk.bf16.gmra.mrb[52].mxu0 %vm374_vm2, %v2445_v17  ;;  %14975 = vmatmul.mubr.msk.bf16.gmra.mrb[48].mxu1 %vm374_vm2, %v2444_v23 }
 0x2e3   :  { %2862 = vmatprep.mubr.bf16.mxu1 %v18482_v0  ;;  %14980 = vmatprep.mubr.msk.f32.mxu0 %vm3321_vm5, %v3298_v28 }
 0x2ea   :  { %14976 = vmatmul.mubr.msk.bf16.gmra.mrb[52].mxu1 %vm374_vm2, %v2446_v27 }
 0x2eb   :  { %2872 = vmatprep.mubr.bf16.mxu1 %v18482_v0  ;;  %v19374_v0 = vsub.s32 1, %v19367_v35 }
 0x2ed   :  { %21070 = vst [vmem:[#allocation26_spill] sm:$0xff] %v19374_v0  ;;  %v19386_v56 = vrot.slane %v2995_v16, %v19374_v0 }
 0x2f2   :  { %14977 = vmatmul.mubr.msk.bf16.gmra.mrb[56].mxu1 %vm374_vm2, %v2445_v17 }
 0x34d   :  { %v2571_v37 = vpop.f32.mrb[0].mxu0 }
 0x34e   :  { %v2573_v11 = vpop.f32.mrb[1].mxu0  ;;  %v3017_v46 = vadd.f32 %v19383_v50, %v2571_v37 }
 0x34f   :  { %v2575_v25 = vpop.f32.mrb[2].mxu0  ;;  %v3018_v31 = vadd.f32 %v19386_v56, %v2573_v11 }
 0x350   :  { %v2577_v38 = vpop.f32.mrb[3].mxu0  ;;  %v3021_v57 = vadd.f32 %v19383_v50, %v2575_v25  ;;  %v3129_v3 = vmax.f32 %v3017_v46, 0.0 }
 0x351   :  { %v3022_v26 = vadd.f32 %v19386_v56, %v2577_v38  ;;  %v3130_v47 = vmax.f32 %v3018_v31, 0.0 }
 0x352   :  { %v3131_v24 = vmax.f32 %v3021_v57, 0.0 }
 0x353   :  { %v3132_v8 = vmax.f32 %v3022_v26, 0.0 }
 0x355   :  { %v2581_v49 = vpop.f32.mrb[4].mxu0 }
 0x356   :  { %v2583_v39 = vpop.f32.mrb[5].mxu0  ;;  %v3025_v5 = vadd.f32 %v19383_v50, %v2581_v49 }
 0x357   :  { %v2585_v45 = vpop.f32.mrb[6].mxu0  ;;  %v3026_v18 = vadd.f32 %v19386_v56, %v2583_v39 }
 0x358   :  { %v2587_v51 = vpop.f32.mrb[7].mxu0  ;;  %v3029_v43 = vadd.f32 %v19383_v50, %v2585_v45  ;;  %v3133_v25 = vmax.f32 %v3025_v5, 0.0 }
 0x359   :  { %v3030_v23 = vadd.f32 %v19386_v56, %v2587_v51  ;;  %v3134_v39 = vmax.f32 %v3026_v18, 0.0 }
 0x35a   :  { %v3135_v31 = vmax.f32 %v3029_v43, 0.0 }
 0x35b   :  { %v3136_v51 = vmax.f32 %v3030_v23, 0.0 }
 0x35d   :  { %v2591_v29 = vpop.f32.mrb[8].mxu0  ;;  %v2744_v7 = vpop.f32.mrb[4].mxu1 }
 0x35e   :  { %v3019_v61 = vadd.f32 %v19389_v6, %v2744_v7  ;;  %v2593_v42 = vpop.f32.mrb[9].mxu0  ;;  %v2746_v33 = vpop.f32.mrb[5].mxu1  ;;  %v3033_v26 = vadd.f32 %v19383_v50, %v2591_v29 }
 0x35f   :  { %v3020_v2 = vadd.f32 %v19392_v59, %v2746_v33  ;;  %v2595_v52 = vpop.f32.mrb[10].mxu0  ;;  %v2748_v44 = vpop.f32.mrb[6].mxu1 }
 0x360   :  { %v3185_v20 = vmax.f32 %v3019_v61, 0.0  ;;  %v3023_v21 = vadd.f32 %v19389_v6, %v2748_v44  ;;  %v2597_v36 = vpop.f32.mrb[11].mxu0  ;;  %v2750_v62 = vpop.f32.mrb[7].mxu1  ;;  %v3034_v44 = vadd.f32 %v19386_v56, %v2593_v42 }
 0x361   :  { %v3186_v10 = vmax.f32 %v3020_v2, 0.0  ;;  %v3024_v13 = vadd.f32 %v19392_v59, %v2750_v62  ;;  %v3037_v62 = vadd.f32 %v19383_v50, %v2595_v52 }
 0x362   :  { %v3241_v4 = vadd.f32 %v3185_v20, %v3129_v3  ;;  %v3187_v41 = vmax.f32 %v3023_v21, 0.0 }
 0x363   :  { %v3242_v55 = vadd.f32 %v3186_v10, %v3130_v47  ;;  %v3188_v9 = vmax.f32 %v3024_v13, 0.0  ;;  %v3139_v43 = vmax.f32 %v3037_v62, 0.0 }
 0x364   :  { %v3243_v12 = vadd.f32 %v3187_v41, %v3131_v24 }
 0x365   :  { %v3244_v63 = vadd.f32 %v3188_v9, %v3132_v8  ;;  %v2601_v34 = vpop.f32.mrb[12].mxu0  ;;  %v2754_v32 = vpop.f32.mrb[8].mxu1  ;;  %v3137_v9 = vmax.f32 %v3033_v26, 0.0 }
 0x366   :  { %v16247_v40 = vpack.c.bf16 %v3243_v12, %v3241_v4  ;;  %v3027_v53 = vadd.f32 %v19389_v6, %v2754_v32  ;;  %v2603_v22 = vpop.f32.mrb[13].mxu0  ;;  %v2756_v1 = vpop.f32.mrb[9].mxu1  ;;  %v3038_v4 = vadd.f32 %v19386_v56, %v2597_v36 }
 0x367   :  { %v3028_v17 = vadd.f32 %v19392_v59, %v2756_v1  ;;  %v2605_v27 = vpop.f32.mrb[14].mxu0  ;;  %v2758_v37 = vpop.f32.mrb[10].mxu1  ;;  %v16245_v11 = vpack.c.bf16 %v3244_v63, %v3242_v55  ;;  %v3138_v63 = vmax.f32 %v3034_v44, 0.0 }
 0x368   :  { %v3189_v38 = vmax.f32 %v3027_v53, 0.0  ;;  %v3031_v28 = vadd.f32 %v19389_v6, %v2758_v37  ;;  %v2607_v16 = vpop.f32.mrb[15].mxu0  ;;  %v2760_v49 = vpop.f32.mrb[11].mxu1  ;;  %v3140_v36 = vmax.f32 %v3038_v4, 0.0 }
 0x369   :  { %v3190_v45 = vmax.f32 %v3028_v17, 0.0  ;;  %v3032_v46 = vadd.f32 %v19392_v59, %v2760_v49  ;;  %16246 = vmatprep.subr.bf16.mxu0 %v16245_v11  ;;  %v3041_v17 = vadd.f32 %v19383_v50, %v2601_v34  ;;  %v3042_v11 = vadd.f32 %v19386_v56, %v2603_v22 }
 0x36a   :  { %v3245_v7 = vadd.f32 %v3189_v38, %v3133_v25  ;;  %v3191_v57 = vmax.f32 %v3031_v28, 0.0  ;;  %16248 = vmatpush1.bf16.msra.mxu0 %v16247_v40  ;;  %v3045_v49 = vadd.f32 %v19383_v50, %v2605_v27 }
 0x36b   :  { %v3246_v61 = vadd.f32 %v3190_v45, %v3134_v39  ;;  %v3192_v33 = vmax.f32 %v3032_v46, 0.0  ;;  %v3142_v44 = vmax.f32 %v3042_v11, 0.0 }
 0x36c   :  { %v3247_v2 = vadd.f32 %v3191_v57, %v3135_v31  ;;  %v3143_v62 = vmax.f32 %v3045_v49, 0.0  ;;  %v3643_v49 = vld [vmem:[#allocation7 + $0x400] sm:$0xff] }
 0x36d   :  { %v3248_v3 = vadd.f32 %v3192_v33, %v3136_v51  ;;  %v2611_v20 = vpop.f32.mrb[16].mxu0  ;;  %v2764_v21 = vpop.f32.mrb[12].mxu1 }
 0x36e   :  { %v16251_v47 = vpack.c.bf16 %v3247_v2, %v3245_v7  ;;  %v3035_v10 = vadd.f32 %v19389_v6, %v2764_v21  ;;  %v2613_v13 = vpop.f32.mrb[17].mxu0  ;;  %v2766_v24 = vpop.f32.mrb[13].mxu1  ;;  %v3046_v7 = vadd.f32 %v19386_v56, %v2607_v16 }
 0x36f   :  { %v3036_v41 = vadd.f32 %v19392_v59, %v2766_v24  ;;  %v2615_v8 = vpop.f32.mrb[18].mxu0  ;;  %v2768_v55 = vpop.f32.mrb[14].mxu1  ;;  %v16249_v29 = vpack.c.bf16 %v3248_v3, %v3246_v61  ;;  %v3141_v61 = vmax.f32 %v3041_v17, 0.0 }
 0x370   :  { %v3193_v5 = vmax.f32 %v3035_v10, 0.0  ;;  %v3039_v42 = vadd.f32 %v19389_v6, %v2768_v55  ;;  %v2617_v12 = vpop.f32.mrb[19].mxu0  ;;  %v2770_v18 = vpop.f32.mrb[15].mxu1  ;;  %v3144_v10 = vmax.f32 %v3046_v7, 0.0 }
 0x371   :  { %v3194_v52 = vmax.f32 %v3036_v41, 0.0  ;;  %v3040_v32 = vadd.f32 %v19392_v59, %v2770_v18  ;;  %16250 = vmatprep.subr.bf16.mxu0 %v16249_v29  ;;  %v3049_v41 = vadd.f32 %v19383_v50, %v2611_v20  ;;  %v3050_v29 = vadd.f32 %v19386_v56, %v2613_v13 }
 0x372   :  { %v3249_v40 = vadd.f32 %v3193_v5, %v3137_v9  ;;  %v3195_v53 = vmax.f32 %v3039_v42, 0.0  ;;  %16252 = vmatpush1.bf16.msra.mxu0 %v16251_v47  ;;  %v3053_v18 = vadd.f32 %v19383_v50, %v2615_v8 }
 0x373   :  { %v3250_v1 = vadd.f32 %v3194_v52, %v3138_v63  ;;  %v3196_v23 = vmax.f32 %v3040_v32, 0.0  ;;  %v3146_v11 = vmax.f32 %v3050_v29, 0.0 }
 0x374   :  { %v3251_v37 = vadd.f32 %v3195_v53, %v3139_v43 }
 0x375   :  { %v3252_v25 = vadd.f32 %v3196_v23, %v3140_v36  ;;  %v19420_v38 = vpop.f32.mrb[20].mxu0  ;;  %v2774_v28 = vpop.f32.mrb[16].mxu1 }
 0x376   :  { %v16255_v39 = vpack.c.bf16 %v3251_v37, %v3249_v40  ;;  %v3043_v45 = vadd.f32 %v19389_v6, %v2774_v28  ;;  %v19424_v46 = vpop.f32.mrb[21].mxu0  ;;  %v2776_v31 = vpop.f32.mrb[17].mxu1  ;;  %v3054_v40 = vadd.f32 %v19386_v56, %v2617_v12  ;;  %v3647_v12 = vld [vmem:[#allocation7 + $0x420] sm:$0xff] }
 0x377   :  { %v3044_v57 = vadd.f32 %v19392_v59, %v2776_v31  ;;  %v19428_v34 = vpop.f32.mrb[22].mxu0  ;;  %v2778_v51 = vpop.f32.mrb[18].mxu1  ;;  %v16253_v22 = vpack.c.bf16 %v3252_v25, %v3250_v1  ;;  %v3145_v1 = vmax.f32 %v3049_v41, 0.0 }
 0x378   :  { %v3197_v33 = vmax.f32 %v3043_v45, 0.0  ;;  %v3047_v26 = vadd.f32 %v19389_v6, %v2778_v51  ;;  %v19431_v2 = vpop.f32.mrb[23].mxu0  ;;  %v2780_v27 = vpop.f32.mrb[19].mxu1  ;;  %v3147_v45 = vmax.f32 %v3053_v18, 0.0  ;;  %v3655_v51 = vld [vmem:[#allocation7 + $0x460] sm:$0xff] }
 0x379   :  { %v3198_v3 = vmax.f32 %v3044_v57, 0.0  ;;  %v3048_v21 = vadd.f32 %v19392_v59, %v2780_v27  ;;  %16254 = vmatprep.subr.bf16.mxu0 %v16253_v22  ;;  %v14992_v57 = vcombine.low %v3643_v49, %v3647_v12  ;;  %v3148_v22 = vmax.f32 %v3054_v40, 0.0 }
 0x37a   :  { %v3253_v16 = vadd.f32 %v3197_v33, %v3141_v61  ;;  %v3199_v47 = vmax.f32 %v3047_v26, 0.0  ;;  %16256 = vmatpush1.bf16.msra.mxu0 %v16255_v39  ;;  %v3651_v39 = vld [vmem:[#allocation7 + $0x440] sm:$0xff]  ;;  %v14993_v26 = vcombine.high %v3643_v49, %v3647_v12  ;;  %v3057_v27 = vadd.f32 %v19383_v50, %v19420_v38 }
 0x37b   :  { %v3254_v24 = vadd.f32 %v3198_v3, %v3142_v44  ;;  %v3200_v4 = vmax.f32 %v3048_v21, 0.0  ;;  %v15001_v3 = vcombine.high %v3651_v39, %v3655_v51  ;;  %v3659_v21 = vld [vmem:[#allocation7 + $0x480] sm:$0xff] }
 0x37c   :  { %v3255_v55 = vadd.f32 %v3199_v47, %v3143_v62  ;;  %v3663_v62 = vld [vmem:[#allocation7 + $0x4a0] sm:$0xff]  ;;  %4517 = vmatprep.subr.bf16.mxu1 %v14993_v26 }
 0x37d   :  { %v3256_v9 = vadd.f32 %v3200_v4, %v3144_v10  ;;  %v19436_v5 = vpop.f32.mrb[24].mxu0  ;;  %v2784_v42 = vpop.f32.mrb[20].mxu1  ;;  %v3061_v4 = vadd.f32 %v19383_v50, %v19428_v34  ;;  %4518 = vmatpush1.bf16.msra.mxu1 %v14992_v57  ;;  %v3149_v34 = vmax.f32 %v3057_v27, 0.0  ;;  %v15008_v49 = vcombine.low %v3659_v21, %v3663_v62 }
 0x37e   :  { %v16259_v63 = vpack.c.bf16 %v3255_v55, %v3253_v16  ;;  %v3051_v52 = vadd.f32 %v19389_v6, %v2784_v42  ;;  %v19440_v32 = vpop.f32.mrb[25].mxu0  ;;  %v2786_v43 = vpop.f32.mrb[21].mxu1  ;;  %v3058_v16 = vadd.f32 %v19386_v56, %v19424_v46  ;;  %v3062_v42 = vadd.f32 %v19386_v56, %v19431_v2  ;;  %4519 = vmatprep.subr.bf16.mxu1 %v15001_v3 }
 0x37f   :  { %v3052_v53 = vadd.f32 %v19392_v59, %v2786_v43  ;;  %v19444_v20 = vpop.f32.mrb[26].mxu0  ;;  %v2788_v36 = vpop.f32.mrb[22].mxu1  ;;  %v16257_v13 = vpack.c.bf16 %v3256_v9, %v3254_v24  ;;  %v15000_v9 = vcombine.low %v3651_v39, %v3655_v51  ;;  %v15009_v43 = vcombine.high %v3659_v21, %v3663_v62  ;;  %v3675_v51 = vld [vmem:[#allocation7 + $0x500] sm:$0xff] }
 0x380   :  { %v3201_v23 = vmax.f32 %v3051_v52, 0.0  ;;  %v3055_v17 = vadd.f32 %v19389_v6, %v2788_v36  ;;  %v19447_v37 = vpop.f32.mrb[27].mxu0  ;;  %v2790_v8 = vpop.f32.mrb[23].mxu1  ;;  %v3152_v12 = vmax.f32 %v3062_v42, 0.0 }
 0x381   :  { %v3202_v25 = vmax.f32 %v3052_v53, 0.0  ;;  %v3056_v28 = vadd.f32 %v19392_v59, %v2790_v8  ;;  %16258 = vmatprep.subr.bf16.mxu0 %v16257_v13  ;;  %4520 = vmatpush1.bf16.msra.mxu1 %v15000_v9 }
 0x382   :  { %v3257_v31 = vadd.f32 %v3201_v23, %v3145_v1  ;;  %v3203_v7 = vmax.f32 %v3055_v17, 0.0  ;;  %16260 = vmatpush1.bf16.msra.mxu0 %v16259_v63  ;;  %v3667_v1 = vld [vmem:[#allocation7 + $0x4c0] sm:$0xff]  ;;  %v3150_v17 = vmax.f32 %v3058_v16, 0.0  ;;  %4521 = vmatprep.subr.bf16.mxu1 %v15009_v43 }
 0x383   :  { %v3258_v61 = vadd.f32 %v3202_v25, %v3146_v11  ;;  %v3204_v33 = vmax.f32 %v3056_v28, 0.0  ;;  %v3671_v23 = vld [vmem:[#allocation7 + $0x4e0] sm:$0xff]  ;;  %v3151_v11 = vmax.f32 %v3061_v4, 0.0 }
 0x384   :  { %v3259_v44 = vadd.f32 %v3203_v7, %v3147_v45  ;;  %v3065_v7 = vadd.f32 %v19383_v50, %v19436_v5  ;;  %v15016_v5 = vcombine.low %v3667_v1, %v3671_v23 }
 0x385   :  { %v3260_v47 = vadd.f32 %v3204_v33, %v3148_v22  ;;  %v19454_v10 = vpop.f32.mrb[28].mxu0  ;;  %v2794_v24 = vpop.f32.mrb[24].mxu1  ;;  %v3679_v22 = vld [vmem:[#allocation7 + $0x520] sm:$0xff]  ;;  %4522 = vmatpush1.bf16.msra.mxu1 %v15008_v49 }
 0x386   :  { %v16263_v41 = vpack.c.bf16 %v3259_v44, %v3257_v31  ;;  %v3059_v55 = vadd.f32 %v19389_v6, %v2794_v24  ;;  %v19459_v29 = vpop.f32.mrb[29].mxu0  ;;  %v2796_v38 = vpop.f32.mrb[25].mxu1  ;;  %v15017_v31 = vcombine.high %v3667_v1, %v3671_v23  ;;  %v3069_v44 = vadd.f32 %v19383_v50, %v19444_v20  ;;  %v3695_v49 = vld [vmem:[#allocation7 + $0x5a0] sm:$0xff] }
 0x387   :  { %v3060_v46 = vadd.f32 %v19392_v59, %v2796_v38  ;;  %v19464_v18 = vpop.f32.mrb[30].mxu0  ;;  %v2798_v63 = vpop.f32.mrb[26].mxu1  ;;  %v16261_v52 = vpack.c.bf16 %v3260_v47, %v3258_v61  ;;  %v3066_v61 = vadd.f32 %v19386_v56, %v19440_v32  ;;  %v3070_v47 = vadd.f32 %v19386_v56, %v19447_v37 }
 0x388   :  { %v3205_v40 = vmax.f32 %v3059_v55, 0.0  ;;  %v3063_v53 = vadd.f32 %v19389_v6, %v2798_v63  ;;  %v19467_v36 = vpop.f32.mrb[31].mxu0  ;;  %v2800_v13 = vpop.f32.mrb[27].mxu1  ;;  %4523 = vmatprep.subr.bf16.mxu1 %v15017_v31  ;;  %v15025_v55 = vcombine.high %v3675_v51, %v3679_v22  ;;  %v3153_v20 = vmax.f32 %v3065_v7, 0.0  ;;  %v3683_v63 = vld [vmem:[#allocation7 + $0x540] sm:$0xff] }
 0x389   :  { %v3206_v8 = vmax.f32 %v3060_v46, 0.0  ;;  %v3064_v2 = vadd.f32 %v19392_v59, %v2800_v13  ;;  %16262 = vmatprep.subr.bf16.mxu0 %v16261_v52  ;;  %v3687_v52 = vld [vmem:[#allocation7 + $0x560] sm:$0xff]  ;;  %v3154_v43 = vmax.f32 %v3066_v61, 0.0  ;;  %4524 = vmatpush1.bf16.msra.mxu1 %v15016_v5  ;;  %v15024_v1 = vcombine.low %v3675_v51, %v3679_v22 }
 0x38a   :  { %v3261_v25 = vadd.f32 %v3205_v40, %v3149_v34  ;;  %v3207_v28 = vmax.f32 %v3063_v53, 0.0  ;;  %16264 = vmatpush1.bf16.msra.mxu0 %v16263_v41  ;;  %v3155_v40 = vmax.f32 %v3069_v44, 0.0  ;;  %v3156_v23 = vmax.f32 %v3070_v47, 0.0  ;;  %4525 = vmatprep.subr.bf16.mxu1 %v15025_v55 }
 0x38b   :  { %v3262_v39 = vadd.f32 %v3206_v8, %v3150_v17  ;;  %v3208_v45 = vmax.f32 %v3064_v2, 0.0  ;;  %v15033_v2 = vcombine.high %v3683_v63, %v3687_v52  ;;  %v3077_v7 = vadd.f32 %v19383_v50, %v19464_v18 }
 0x38c   :  { %v3263_v57 = vadd.f32 %v3207_v28, %v3151_v11  ;;  %v3073_v11 = vadd.f32 %v19383_v50, %v19454_v10  ;;  %v3691_v28 = vld [vmem:[#allocation7 + $0x580] sm:$0xff]  ;;  %v15032_v10 = vcombine.low %v3683_v63, %v3687_v52 }
 0x38d   :  { %v3264_v33 = vadd.f32 %v3208_v45, %v3152_v12  ;;  %v19474_v26 = vpop.f32.mrb[32].mxu0  ;;  %v2804_v27 = vpop.f32.mrb[28].mxu1  ;;  %v3074_v12 = vadd.f32 %v19386_v56, %v19459_v29  ;;  %4526 = vmatpush1.bf16.msra.mxu1 %v15024_v1  ;;  %v15040_v63 = vcombine.low %v3691_v28, %v3695_v49  ;;  %v3711_v1 = vld [vmem:[#allocation7 + $0x620] sm:$0xff] }
 0x38e   :  { %v16267_v3 = vpack.c.bf16 %v3263_v57, %v3261_v25  ;;  %v3067_v21 = vadd.f32 %v19389_v6, %v2804_v27  ;;  %v19479_v62 = vpop.f32.mrb[33].mxu0  ;;  %v2806_v16 = vpop.f32.mrb[29].mxu1  ;;  %4527 = vmatprep.subr.bf16.mxu1 %v15033_v2  ;;  %v3157_v18 = vmax.f32 %v3073_v11, 0.0 }
 0x38f   :  { %v3068_v32 = vadd.f32 %v19392_v59, %v2806_v16  ;;  %v19484_v24 = vpop.f32.mrb[34].mxu0  ;;  %v2808_v4 = vpop.f32.mrb[30].mxu1  ;;  %v16265_v41 = vpack.c.bf16 %v3264_v33, %v3262_v39  ;;  %v3078_v33 = vadd.f32 %v19386_v56, %v19467_v36  ;;  %v3158_v55 = vmax.f32 %v3074_v12, 0.0 }
 0x390   :  { %v3209_v38 = vmax.f32 %v3067_v21, 0.0  ;;  %v3071_v9 = vadd.f32 %v19389_v6, %v2808_v4  ;;  %v19487_v42 = vpop.f32.mrb[35].mxu0  ;;  %v2810_v46 = vpop.f32.mrb[31].mxu1  ;;  %v15041_v21 = vcombine.high %v3691_v28, %v3695_v49  ;;  %v3699_v4 = vld [vmem:[#allocation7 + $0x5c0] sm:$0xff]  ;;  %v3085_v11 = vadd.f32 %v19383_v50, %v19484_v24 }
 0x391   :  { %v3210_v34 = vmax.f32 %v3068_v32, 0.0  ;;  %v3072_v37 = vadd.f32 %v19392_v59, %v2810_v46  ;;  %16266 = vmatprep.subr.bf16.mxu0 %v16265_v41  ;;  %v3703_v41 = vld [vmem:[#allocation7 + $0x5e0] sm:$0xff]  ;;  %4528 = vmatpush1.bf16.msra.mxu1 %v15032_v10  ;;  %v3160_v52 = vmax.f32 %v3078_v33, 0.0 }
 0x392   :  { %v3265_v53 = vadd.f32 %v3209_v38, %v3153_v20  ;;  %v3211_v13 = vmax.f32 %v3071_v9, 0.0  ;;  %16268 = vmatpush1.bf16.msra.mxu0 %v16267_v3  ;;  %v3159_v38 = vmax.f32 %v3077_v7, 0.0  ;;  %4529 = vmatprep.subr.bf16.mxu1 %v15041_v21 }
 0x393   :  { %v3266_v17 = vadd.f32 %v3210_v34, %v3154_v43  ;;  %v3212_v8 = vmax.f32 %v3072_v37, 0.0  ;;  %v15049_v37 = vcombine.high %v3699_v4, %v3703_v41 }
 0x394   :  { %v3267_v25 = vadd.f32 %v3211_v13, %v3155_v40  ;;  %v3081_v40 = vadd.f32 %v19383_v50, %v19474_v26  ;;  %v3707_v13 = vld [vmem:[#allocation7 + $0x600] sm:$0xff]  ;;  %v15048_v26 = vcombine.low %v3699_v4, %v3703_v41 }
 0x395   :  { %v3268_v39 = vadd.f32 %v3212_v8, %v3156_v23  ;;  %v19494_v45 = vpop.f32.mrb[36].mxu0  ;;  %v2814_v31 = vpop.f32.mrb[32].mxu1  ;;  %v3082_v23 = vadd.f32 %v19386_v56, %v19479_v62  ;;  %4530 = vmatpush1.bf16.msra.mxu1 %v15040_v63  ;;  %v15056_v4 = vcombine.low %v3707_v13, %v3711_v1  ;;  %v3727_v63 = vld [vmem:[#allocation7 + $0x6a0] sm:$0xff] }
 0x396   :  { %v16271_v57 = vpack.c.bf16 %v3267_v25, %v3265_v53  ;;  %v3075_v51 = vadd.f32 %v19389_v6, %v2814_v31  ;;  %v19499_v22 = vpop.f32.mrb[37].mxu0  ;;  %v2816_v61 = vpop.f32.mrb[33].mxu1  ;;  %4531 = vmatprep.subr.bf16.mxu1 %v15049_v37  ;;  %v3161_v24 = vmax.f32 %v3081_v40, 0.0 }
 0x397   :  { %v3076_v29 = vadd.f32 %v19392_v59, %v2816_v61  ;;  %v19504_v27 = vpop.f32.mrb[38].mxu0  ;;  %v2818_v44 = vpop.f32.mrb[34].mxu1  ;;  %v16269_v3 = vpack.c.bf16 %v3268_v39, %v3266_v17  ;;  %v3086_v39 = vadd.f32 %v19386_v56, %v19487_v42  ;;  %v3162_v21 = vmax.f32 %v3082_v23, 0.0 }
 0x398   :  { %v3213_v16 = vmax.f32 %v3075_v51, 0.0  ;;  %v3079_v5 = vadd.f32 %v19389_v6, %v2818_v44  ;;  %v19507_v47 = vpop.f32.mrb[39].mxu0  ;;  %v2820_v32 = vpop.f32.mrb[35].mxu1  ;;  %v15057_v51 = vcombine.high %v3707_v13, %v3711_v1  ;;  %v3715_v44 = vld [vmem:[#allocation7 + $0x640] sm:$0xff]  ;;  %v3093_v40 = vadd.f32 %v19383_v50, %v19504_v27 }
 0x399   :  { %v3214_v20 = vmax.f32 %v3076_v29, 0.0  ;;  %v3080_v36 = vadd.f32 %v19392_v59, %v2820_v32  ;;  %16270 = vmatprep.subr.bf16.mxu0 %v16269_v3  ;;  %v3719_v3 = vld [vmem:[#allocation7 + $0x660] sm:$0xff]  ;;  %4532 = vmatpush1.bf16.msra.mxu1 %v15048_v26  ;;  %v3164_v41 = vmax.f32 %v3086_v39, 0.0 }
 0x39a   :  { %v3269_v9 = vadd.f32 %v3213_v16, %v3157_v18  ;;  %v3215_v46 = vmax.f32 %v3079_v5, 0.0  ;;  %16272 = vmatpush1.bf16.msra.mxu0 %v16271_v57  ;;  %v3163_v16 = vmax.f32 %v3085_v11, 0.0  ;;  %4533 = vmatprep.subr.bf16.mxu1 %v15057_v51 }
 0x39b   :  { %v3270_v43 = vadd.f32 %v3214_v20, %v3158_v55  ;;  %v3216_v34 = vmax.f32 %v3080_v36, 0.0  ;;  %v15065_v36 = vcombine.high %v3715_v44, %v3719_v3 }
 0x39c   :  { %v3271_v53 = vadd.f32 %v3215_v46, %v3159_v38  ;;  %v3089_v38 = vadd.f32 %v19383_v50, %v19494_v45  ;;  %v3723_v46 = vld [vmem:[#allocation7 + $0x680] sm:$0xff]  ;;  %v15064_v45 = vcombine.low %v3715_v44, %v3719_v3 }
 0x39d   :  { %v3272_v17 = vadd.f32 %v3216_v34, %v3160_v52  ;;  %v19514_v8 = vpop.f32.mrb[40].mxu0  ;;  %v2824_v2 = vpop.f32.mrb[36].mxu1  ;;  %v3090_v52 = vadd.f32 %v19386_v56, %v19499_v22  ;;  %4534 = vmatpush1.bf16.msra.mxu1 %v15056_v4  ;;  %v15072_v44 = vcombine.low %v3723_v46, %v3727_v63  ;;  %v3743_v4 = vld [vmem:[#allocation7 + $0x720] sm:$0xff] }
 0x39e   :  { %v16275_v25 = vpack.c.bf16 %v3271_v53, %v3269_v9  ;;  %v3083_v28 = vadd.f32 %v19389_v6, %v2824_v2  ;;  %v19519_v49 = vpop.f32.mrb[41].mxu0  ;;  %v2826_v12 = vpop.f32.mrb[37].mxu1  ;;  %4535 = vmatprep.subr.bf16.mxu1 %v15065_v36  ;;  %v3165_v27 = vmax.f32 %v3089_v38, 0.0 }
 0x39f   :  { %v3084_v62 = vadd.f32 %v19392_v59, %v2826_v12  ;;  %v19524_v31 = vpop.f32.mrb[42].mxu0  ;;  %v2828_v7 = vpop.f32.mrb[38].mxu1  ;;  %v16273_v57 = vpack.c.bf16 %v3272_v17, %v3270_v43  ;;  %v3094_v17 = vadd.f32 %v19386_v56, %v19507_v47  ;;  %v3166_v51 = vmax.f32 %v3090_v52, 0.0 }
 0x3a0   :  { %v3217_v61 = vmax.f32 %v3083_v28, 0.0  ;;  %v3087_v10 = vadd.f32 %v19389_v6, %v2828_v7  ;;  %v19527_v33 = vpop.f32.mrb[43].mxu0  ;;  %v2830_v29 = vpop.f32.mrb[39].mxu1  ;;  %v15073_v28 = vcombine.high %v3723_v46, %v3727_v63  ;;  %v3731_v7 = vld [vmem:[#allocation7 + $0x6c0] sm:$0xff]  ;;  %v3101_v38 = vadd.f32 %v19383_v50, %v19524_v31 }
 0x3a1   :  { %v3218_v18 = vmax.f32 %v3084_v62, 0.0  ;;  %v3088_v42 = vadd.f32 %v19392_v59, %v2830_v29  ;;  %16274 = vmatprep.subr.bf16.mxu0 %v16273_v57  ;;  %v3735_v57 = vld [vmem:[#allocation7 + $0x6e0] sm:$0xff]  ;;  %4536 = vmatpush1.bf16.msra.mxu1 %v15064_v45  ;;  %v3168_v3 = vmax.f32 %v3094_v17, 0.0 }
 0x3a2   :  { %v3273_v5 = vadd.f32 %v3217_v61, %v3161_v24  ;;  %v3219_v32 = vmax.f32 %v3087_v10, 0.0  ;;  %16276 = vmatpush1.bf16.msra.mxu0 %v16275_v25  ;;  %v3167_v61 = vmax.f32 %v3093_v40, 0.0  ;;  %4537 = vmatprep.subr.bf16.mxu1 %v15073_v28 }
 0x3a3   :  { %v3274_v55 = vadd.f32 %v3218_v18, %v3162_v21  ;;  %v3220_v20 = vmax.f32 %v3088_v42, 0.0  ;;  %v15081_v42 = vcombine.high %v3731_v7, %v3735_v57 }
 0x3a4   :  { %v3275_v9 = vadd.f32 %v3219_v32, %v3163_v16  ;;  %v3097_v16 = vadd.f32 %v19383_v50, %v19514_v8  ;;  %v3739_v32 = vld [vmem:[#allocation7 + $0x700] sm:$0xff]  ;;  %v15080_v8 = vcombine.low %v3731_v7, %v3735_v57 }
 0x3a5   :  { %v3276_v43 = vadd.f32 %v3220_v20, %v3164_v41  ;;  %v19534_v34 = vpop.f32.mrb[44].mxu0  ;;  %v2834_v37 = vpop.f32.mrb[40].mxu1  ;;  %v3098_v41 = vadd.f32 %v19386_v56, %v19519_v49  ;;  %4538 = vmatpush1.bf16.msra.mxu1 %v15072_v44 }
 0x3a6   :  { %v16279_v53 = vpack.c.bf16 %v3275_v9, %v3273_v5  ;;  %v3091_v13 = vadd.f32 %v19389_v6, %v2834_v37  ;;  %v19539_v1 = vpop.f32.mrb[45].mxu0  ;;  %v2836_v23 = vpop.f32.mrb[41].mxu1  ;;  %4539 = vmatprep.subr.bf16.mxu1 %v15081_v42  ;;  %v3169_v31 = vmax.f32 %v3097_v16, 0.0 }
 0x3a7   :  { %v3092_v22 = vadd.f32 %v19392_v59, %v2836_v23  ;;  %v19544_v2 = vpop.f32.mrb[46].mxu0  ;;  %v2838_v11 = vpop.f32.mrb[42].mxu1  ;;  %v16277_v25 = vpack.c.bf16 %v3276_v43, %v3274_v55  ;;  %v3102_v43 = vadd.f32 %v19386_v56, %v19527_v33  ;;  %v3171_v33 = vmax.f32 %v3101_v38, 0.0 }
 0x3a8   :  { %v3221_v12 = vmax.f32 %v3091_v13, 0.0  ;;  %v3095_v26 = vadd.f32 %v19389_v6, %v2838_v11  ;;  %v19547_v39 = vpop.f32.mrb[47].mxu0  ;;  %v2840_v62 = vpop.f32.mrb[43].mxu1  ;;  %v15089_v13 = vcombine.high %v3739_v32, %v3743_v4  ;;  %v3170_v11 = vmax.f32 %v3098_v41, 0.0 }
 0x3a9   :  { %v3222_v24 = vmax.f32 %v3092_v22, 0.0  ;;  %v3096_v47 = vadd.f32 %v19392_v59, %v2840_v62  ;;  %16278 = vmatprep.subr.bf16.mxu0 %v16277_v25  ;;  %4540 = vmatpush1.bf16.msra.mxu1 %v15080_v8  ;;  %v3172_v62 = vmax.f32 %v3102_v43, 0.0  ;;  %v3109_v44 = vadd.f32 %v19383_v50, %v19544_v2 }
 0x3aa   :  { %v3277_v10 = vadd.f32 %v3221_v12, %v3165_v27  ;;  %v3223_v29 = vmax.f32 %v3095_v26, 0.0  ;;  %16280 = vmatpush1.bf16.msra.mxu0 %v16279_v53  ;;  %v15088_v26 = vcombine.low %v3739_v32, %v3743_v4  ;;  %4541 = vmatprep.subr.bf16.mxu1 %v15089_v13 }
 0x3ab   :  { %v3278_v21 = vadd.f32 %v3222_v24, %v3166_v51  ;;  %v3224_v18 = vmax.f32 %v3096_v47, 0.0  ;;  %v3105_v51 = vadd.f32 %v19383_v50, %v19534_v34  ;;  %v3106_v47 = vadd.f32 %v19386_v56, %v19539_v1 }
 0x3ac   :  { %v3279_v5 = vadd.f32 %v3223_v29, %v3167_v61  ;;  %v3110_v34 = vadd.f32 %v19386_v56, %v19547_v39 }
 0x3ad   :  { %v3280_v55 = vadd.f32 %v3224_v18, %v3168_v3  ;;  %v19554_v20 = vpop.f32.mrb[48].mxu0  ;;  %v2844_v36 = vpop.f32.mrb[44].mxu1  ;;  %4542 = vmatpush1.bf16.msra.mxu1 %v15088_v26 }
 0x3ae   :  { %v16283_v9 = vpack.c.bf16 %v3279_v5, %v3277_v10  ;;  %v3099_v46 = vadd.f32 %v19389_v6, %v2844_v36  ;;  %v19559_v63 = vpop.f32.mrb[49].mxu0  ;;  %v2846_v52 = vpop.f32.mrb[45].mxu1 }
 0x3af   :  { %v3100_v49 = vadd.f32 %v19392_v59, %v2846_v52  ;;  %v19564_v37 = vpop.f32.mrb[50].mxu0  ;;  %v2848_v40 = vpop.f32.mrb[46].mxu1  ;;  %v16281_v53 = vpack.c.bf16 %v3280_v55, %v3278_v21  ;;  %v3173_v55 = vmax.f32 %v3105_v51, 0.0 }
 0x3b0   :  { %v3225_v23 = vmax.f32 %v3099_v46, 0.0  ;;  %v3103_v45 = vadd.f32 %v19389_v6, %v2848_v40  ;;  %v2697_v17 = vpop.f32.mrb[51].mxu0  ;;  %v2850_v22 = vpop.f32.mrb[47].mxu1  ;;  %v3174_v46 = vmax.f32 %v3106_v47, 0.0  ;;  %v3176_v40 = vmax.f32 %v3110_v34, 0.0 }
 0x3b1   :  { %v3226_v25 = vmax.f32 %v3100_v49, 0.0  ;;  %v3104_v28 = vadd.f32 %v19392_v59, %v2850_v22  ;;  %16282 = vmatprep.subr.bf16.mxu0 %v16281_v53 }
 0x3b2   :  { %v3281_v27 = vadd.f32 %v3225_v23, %v3169_v31  ;;  %v3227_v12 = vmax.f32 %v3103_v45, 0.0  ;;  %16284 = vmatpush1.bf16.msra.mxu0 %v16283_v9  ;;  %v3114_v23 = vadd.f32 %v19386_v56, %v19559_v63 }
 0x3b3   :  { %v3282_v7 = vadd.f32 %v3226_v25, %v3170_v11  ;;  %v3228_v57 = vmax.f32 %v3104_v28, 0.0 }
 0x3b4   :  { %v3283_v24 = vadd.f32 %v3227_v12, %v3171_v33  ;;  %v3118_v33 = vadd.f32 %v19386_v56, %v2697_v17 }
 0x3b5   :  { %v3284_v61 = vadd.f32 %v3228_v57, %v3172_v62  ;;  %v2701_v10 = vpop.f32.mrb[52].mxu0  ;;  %v2854_v29 = vpop.f32.mrb[48].mxu1  ;;  %v3178_v57 = vmax.f32 %v3114_v23, 0.0  ;;  %v3652_v23 = vld [vmem:[#allocation7 + $0x448] sm:$0xff] }
 0x3b6   :  { %v16287_v3 = vpack.c.bf16 %v3283_v24, %v3281_v27  ;;  %v16515_v21 = vadd.f32 %v2701_v10, %v19063_v30  ;;  %v3107_v18 = vadd.f32 %v19389_v6, %v2854_v29  ;;  %v2703_v42 = vpop.f32.mrb[53].mxu0  ;;  %v2856_v16 = vpop.f32.mrb[49].mxu1  ;;  %v3180_v10 = vmax.f32 %v3118_v33, 0.0  ;;  %v3664_v33 = vld [vmem:[#allocation7 + $0x4a8] sm:$0xff] }
 0x3b7   :  { %v16516_v5 = vadd.f32 %v2703_v42, %v19065_v48  ;;  %v3108_v1 = vadd.f32 %v19392_v59, %v2856_v16  ;;  %v2705_v32 = vpop.f32.mrb[54].mxu0  ;;  %v2858_v4 = vpop.f32.mrb[50].mxu1  ;;  %v16285_v41 = vpack.c.bf16 %v3284_v61, %v3282_v7  ;;  %v3175_v48 = vmax.f32 %v3109_v44, 0.0 }
 0x3b8   :  { %v3229_v2 = vmax.f32 %v3107_v18, 0.0  ;;  %v16517_v36 = vadd.f32 %v2705_v32, %v19067_v54  ;;  %v3111_v30 = vadd.f32 %v19389_v6, %v2858_v4  ;;  %v2707_v38 = vpop.f32.mrb[55].mxu0  ;;  %v2860_v9 = vpop.f32.mrb[51].mxu1  ;;  %v3113_v54 = vadd.f32 %v19383_v50, %v19554_v20 }
 0x3b9   :  { %v3230_v52 = vmax.f32 %v3108_v1, 0.0  ;;  %v16518_v8 = vadd.f32 %v2707_v38, %v19070_v60  ;;  %v3112_v39 = vadd.f32 %v19392_v59, %v2860_v9  ;;  %16286 = vmatprep.subr.bf16.mxu0 %v16285_v41  ;;  %v3117_v60 = vadd.f32 %v19383_v50, %v19564_v37 }
 0x3ba   :  { %v3285_v43 = vadd.f32 %v3229_v2, %v3173_v55  ;;  %v3231_v49 = vmax.f32 %v3111_v30, 0.0  ;;  %16288 = vmatpush1.bf16.msra.mxu0 %v16287_v3  ;;  %v3177_v20 = vmax.f32 %v3113_v54, 0.0  ;;  %v3121_v44 = vadd.f32 %v16515_v21, %v19383_v50 }
 0x3bb   :  { %v3286_v53 = vadd.f32 %v3230_v52, %v3174_v46  ;;  %v3232_v13 = vmax.f32 %v3112_v39, 0.0  ;;  %v3179_v37 = vmax.f32 %v3117_v60, 0.0  ;;  %v3122_v18 = vadd.f32 %v16516_v5, %v19386_v56 }
 0x3bc   :  { %v3287_v31 = vadd.f32 %v3231_v49, %v3175_v48  ;;  %v3125_v34 = vadd.f32 %v16517_v36, %v19383_v50  ;;  %v3126_v41 = vadd.f32 %v16518_v8, %v19386_v56  ;;  %v3181_v38 = vmax.f32 %v3121_v44, 0.0  ;;  %v3684_v44 = vld [vmem:[#allocation7 + $0x548] sm:$0xff] }
 0x3bd   :  { %v3288_v45 = vadd.f32 %v3232_v13, %v3176_v40  ;;  %v2864_v22 = vpop.f32.mrb[52].mxu1  ;;  %v3182_v5 = vmax.f32 %v3122_v18, 0.0  ;;  %v3644_v40 = vld [vmem:[#allocation7 + $0x408] sm:$0xff]  ;;  %v3305_v18 = vld [vmem:[#allocation6 + $0x40] sm:$0xff] }
 0x3be   :  { %v16291_v11 = vpack.c.bf16 %v3287_v31, %v3285_v43  ;;  %v3115_v25 = vadd.f32 %v19389_v6, %v2864_v22  ;;  %v2866_v28 = vpop.f32.mrb[53].mxu1  ;;  %v3183_v50 = vmax.f32 %v3125_v34, 0.0  ;;  %v3184_v56 = vmax.f32 %v3126_v41, 0.0  ;;  %v3297_v22 = vld [vmem:[#allocation6] sm:$0xff] }
 0x3bf   :  { %v3116_v27 = vadd.f32 %v19392_v59, %v2866_v28  ;;  %v2868_v12 = vpop.f32.mrb[54].mxu1  ;;  %v16289_v26 = vpack.c.bf16 %v3288_v45, %v3286_v53  ;;  %v3648_v53 = vld [vmem:[#allocation7 + $0x428] sm:$0xff] }
 0x3c0   :  { %v3233_v62 = vmax.f32 %v3115_v25, 0.0  ;;  %v3119_v7 = vadd.f32 %v19389_v6, %v2868_v12  ;;  %v2870_v63 = vpop.f32.mrb[55].mxu1  ;;  %v14995_v31 = vcombine.high %v3644_v40, %v3648_v53  ;;  %v3656_v45 = vld [vmem:[#allocation7 + $0x468] sm:$0xff]  ;;  %v14994_v60 = vcombine.low %v3644_v40, %v3648_v53  ;;  %v3316_v53 = vld [vmem:[#allocation6 + $0x98] sm:$0xff] }
 0x3c1   :  { %v3234_v51 = vmax.f32 %v3116_v27, 0.0  ;;  %v3120_v24 = vadd.f32 %v19392_v59, %v2870_v63  ;;  %16290 = vmatprep.subr.bf16.mxu0 %v16289_v26  ;;  %v15003_v25 = vcombine.high %v3652_v23, %v3656_v45  ;;  %v3660_v28 = vld [vmem:[#allocation7 + $0x488] sm:$0xff]  ;;  %v3299_v27 = vld [vmem:[#allocation6 + $0x10] sm:$0xff]  ;;  %v15002_v12 = vcombine.low %v3652_v23, %v3656_v45  ;;  %v3301_v63 = vld [vmem:[#allocation6 + $0x20] sm:$0xff] }
 0x3c2   :  { %v3289_v47 = vadd.f32 %v3233_v62, %v3177_v20  ;;  %v3235_v61 = vmax.f32 %v3119_v7, 0.0  ;;  %16292 = vmatpush1.bf16.msra.mxu0 %v16291_v11  ;;  %v3300_v11 = vld [vmem:[#allocation6 + $0x18] sm:$0xff]  ;;  %v3302_v26 = vld [vmem:[#allocation6 + $0x28] sm:$0xff]  ;;  %v15011_v20 = vcombine.high %v3660_v28, %v3664_v33 }
 0x3c3   :  { %v3290_v17 = vadd.f32 %v3234_v51, %v3178_v57  ;;  %v3236_v29 = vmax.f32 %v3120_v24, 0.0  ;;  %v3668_v62 = vld [vmem:[#allocation7 + $0x4c8] sm:$0xff]  ;;  %v15010_v57 = vcombine.low %v3660_v28, %v3664_v33  ;;  %v3304_v51 = vld [vmem:[#allocation6 + $0x38] sm:$0xff]  ;;  %v3319_v28 = vld [vmem:[#allocation6 + $0xb0] sm:$0xff] }
 0x3c4   :  { %v3291_v3 = vadd.f32 %v3235_v61, %v3179_v37  ;;  %v3672_v7 = vld [vmem:[#allocation7 + $0x4e8] sm:$0xff]  ;;  %v3303_v61 = vld [vmem:[#allocation6 + $0x30] sm:$0xff] }
 0x3c5   :  { %v3292_v42 = vadd.f32 %v3236_v29, %v3180_v10  ;;  %v2874_v16 = vpop.f32.mrb[56].mxu1  ;;  %v15019_v24 = vcombine.high %v3668_v62, %v3672_v7  ;;  %v3676_v37 = vld [vmem:[#allocation7 + $0x508] sm:$0xff]  ;;  %v15018_v10 = vcombine.low %v3668_v62, %v3672_v7 }
 0x3c6   :  { %v16295_v1 = vpack.c.bf16 %v3291_v3, %v3289_v47  ;;  %v3123_v32 = vadd.f32 %v19389_v6, %v2874_v16  ;;  %v2876_v4 = vpop.f32.mrb[57].mxu1  ;;  %v3680_v47 = vld [vmem:[#allocation7 + $0x528] sm:$0xff]  ;;  %v3308_v16 = vld [vmem:[#allocation6 + $0x58] sm:$0xff] }
 0x3c7   :  { %v3124_v55 = vadd.f32 %v19392_v59, %v2876_v4  ;;  %v2878_v2 = vpop.f32.mrb[58].mxu1  ;;  %v16293_v30 = vpack.c.bf16 %v3292_v42, %v3290_v17  ;;  %v3306_v17 = vld [vmem:[#allocation6 + $0x48] sm:$0xff]  ;;  %v15027_v29 = vcombine.high %v3676_v37, %v3680_v47  ;;  %v15026_v42 = vcombine.low %v3676_v37, %v3680_v47  ;;  %v3307_v4 = vld [vmem:[#allocation6 + $0x50] sm:$0xff] }
 0x3c8   :  { %v3237_v9 = vmax.f32 %v3123_v32, 0.0  ;;  %v3127_v21 = vadd.f32 %v19389_v6, %v2878_v2  ;;  %v2880_v46 = vpop.f32.mrb[59].mxu1  ;;  %v21073_v6 = vmov 0  ;;  %v3688_v3 = vld [vmem:[#allocation7 + $0x568] sm:$0xff] }
 0x3c9   :  { %v3238_v52 = vmax.f32 %v3124_v55, 0.0  ;;  %v3128_v39 = vadd.f32 %v19392_v59, %v2880_v46  ;;  %16294 = vmatprep.subr.bf16.mxu0 %v16293_v30  ;;  %v21074_v6 = vsel %vm19603_vm8, 4294967295, %v21073_v6  ;;  %v15035_v34 = vcombine.high %v3684_v44, %v3688_v3  ;;  %v3696_v32 = vld [vmem:[#allocation7 + $0x5a8] sm:$0xff]  ;;  %v3312_v46 = vld [vmem:[#allocation6 + $0x78] sm:$0xff] }
 0x3ca   :  { %v3293_v36 = vadd.f32 %v3237_v9, %v3181_v38  ;;  %v3239_v48 = vmax.f32 %v3127_v21, 0.0  ;;  %16296 = vmatpush1.bf16.msra.mxu0 %v16295_v1  ;;  %21075 = vst [vmem:[#allocation29_spill] sm:$0xff] %v21074_v6  ;;  %v3692_v1 = vld [vmem:[#allocation7 + $0x588] sm:$0xff]  ;;  %v15034_v41 = vcombine.low %v3684_v44, %v3688_v3  ;;  %v3309_v9 = vld [vmem:[#allocation6 + $0x60] sm:$0xff] }
 0x3cb   :  { %v3294_v8 = vadd.f32 %v3238_v52, %v3182_v5  ;;  %v3240_v43 = vmax.f32 %v3128_v39, 0.0  ;;  %v3310_v55 = vld [vmem:[#allocation6 + $0x68] sm:$0xff]  ;;  %v15043_v2 = vcombine.high %v3692_v1, %v3696_v32  ;;  %v15042_v21 = vcombine.low %v3692_v1, %v3696_v32  ;;  %v3759_v44 = vld [vmem:[#allocation7 + $0x7a0] sm:$0xff] }
 0x3cc   :  { %v3295_v49 = vadd.f32 %v3239_v48, %v3183_v50  ;;  %v3700_v30 = vld [vmem:[#allocation7 + $0x5c8] sm:$0xff]  ;;  %v3311_v50 = vld [vmem:[#allocation6 + $0x70] sm:$0xff]  ;;  %v3763_v32 = vld [vmem:[#allocation7 + $0x7c0] sm:$0xff] }
 0x3cd   :  { %v3296_v13 = vadd.f32 %v3240_v43, %v3184_v56  ;;  %v3704_v38 = vld [vmem:[#allocation7 + $0x5e8] sm:$0xff] }
 0x3ce   :  { %v16300_v54 = vpack.c.bf16 %v3295_v49, %v3293_v36  ;;  %v15051_v5 = vcombine.high %v3700_v30, %v3704_v38  ;;  %v3708_v52 = vld [vmem:[#allocation7 + $0x608] sm:$0xff]  ;;  %v15050_v36 = vcombine.low %v3700_v30, %v3704_v38  ;;  %v3313_v49 = vld [vmem:[#allocation6 + $0x80] sm:$0xff] }
 0x3cf   :  { %v16297_v59 = vpack.c.bf16 %v3296_v13, %v3294_v8  ;;  %v3712_v39 = vld [vmem:[#allocation7 + $0x628] sm:$0xff] }
 0x3d0   :  { %v3314_v48 = vld [vmem:[#allocation6 + $0x88] sm:$0xff]  ;;  %v15059_v56 = vcombine.high %v3708_v52, %v3712_v39  ;;  %v15058_v40 = vcombine.low %v3708_v52, %v3712_v39  ;;  %v19630_v39 = vld [vmem:[#allocation7 + $0x438] sm:$0xff] }
 0x3d1   :  { %16299 = vmatprep.subr.msk.bf16.mxu0 %vm19603_vm8, %v16297_v59  ;;  %v3716_v8 = vld [vmem:[#allocation7 + $0x648] sm:$0xff] }
 0x3d2   :  { %16302 = vmatpush1.bf16.msk.msra.mxu0 %vm19603_vm8, %v16300_v54  ;;  %v3720_v43 = vld [vmem:[#allocation7 + $0x668] sm:$0xff] }
 0x3d3   :  { %4610 = vmatprep.subr.bf16.mxu0 %v14995_v31  ;;  %v15067_v13 = vcombine.high %v3716_v8, %v3720_v43  ;;  %v3724_v54 = vld [vmem:[#allocation7 + $0x688] sm:$0xff]  ;;  %v3315_v31 = vld [vmem:[#allocation6 + $0x90] sm:$0xff]  ;;  %v15066_v23 = vcombine.low %v3716_v8, %v3720_v43 }
 0x3d4   :  { %v3728_v59 = vld [vmem:[#allocation7 + $0x6a8] sm:$0xff] }
 0x3d5   :  { %3430 = vmatmul.mubr.f32.vlgmr.msra.gmra.mrb[56].mxu0 %v3297_v22  ;;  %v3318_v45 = vld [vmem:[#allocation6 + $0xa8] sm:$0xff]  ;;  %v15075_v22 = vcombine.high %v3724_v54, %v3728_v59 }
 0x3d6   :  { %14981 = vmatprep.mubr.msk.f32.mxu0 %vm3321_vm5, %v3300_v11  ;;  %4611 = vmatpush1.bf16.msra.mxu0 %v14994_v60  ;;  %v3317_v60 = vld [vmem:[#allocation6 + $0xa0] sm:$0xff]  ;;  %v15074_v11 = vcombine.low %v3724_v54, %v3728_v59  ;;  %v3732_v33 = vld [vmem:[#allocation7 + $0x6c8] sm:$0xff] }
 0x3d7   :  { %4612 = vmatprep.subr.bf16.mxu0 %v15003_v25  ;;  %v3320_v25 = vld [vmem:[#allocation6 + $0xb8] sm:$0xff]  ;;  %v3744_v62 = vld [vmem:[#allocation7 + $0x728] sm:$0xff] }
 0x3d8   :  { %v3756_v3 = vld [vmem:[#allocation7 + $0x788] sm:$0xff] }
 0x3d9   :  { %3436 = vmatmul.mubr.f32.gmra.mrb[58].mxu0 %v3299_v27  ;;  %v3736_v27 = vld [vmem:[#allocation7 + $0x6e8] sm:$0xff] }
 0x3da   :  { %14982 = vmatprep.mubr.msk.f32.mxu0 %vm3321_vm5, %v3302_v26  ;;  %4613 = vmatpush1.bf16.msra.mxu0 %v15002_v12  ;;  %v15083_v12 = vcombine.high %v3732_v33, %v3736_v27  ;;  %v15082_v26 = vcombine.low %v3732_v33, %v3736_v27  ;;  %v3768_v30 = vld [vmem:[#allocation7 + $0x7e8] sm:$0xff] }
 0x3db   :  { %4614 = vmatprep.subr.bf16.mxu0 %v15011_v20  ;;  %v3740_v20 = vld [vmem:[#allocation7 + $0x708] sm:$0xff] }
 0x3dc   :  { %v15091_v7 = vcombine.high %v3740_v20, %v3744_v62 }
 0x3dd   :  { %3442 = vmatmul.mubr.f32.gmra.mrb[60].mxu0 %v3301_v63  ;;  %v15090_v63 = vcombine.low %v3740_v20, %v3744_v62 }
 0x3de   :  { %14983 = vmatprep.mubr.msk.f32.mxu0 %vm3321_vm5, %v3304_v51  ;;  %4615 = vmatpush1.bf16.msra.mxu0 %v15010_v57  ;;  %v3747_v57 = vld [vmem:[#allocation7 + $0x740] sm:$0xff] }
 0x3df   :  { %4616 = vmatprep.subr.bf16.mxu0 %v15019_v24  ;;  %v3751_v51 = vld [vmem:[#allocation7 + $0x760] sm:$0xff]  ;;  %v3748_v24 = vld [vmem:[#allocation7 + $0x748] sm:$0xff] }
 0x3e0   :  { %v15096_v37 = vcombine.low %v3747_v57, %v3751_v51  ;;  %v15097_v47 = vcombine.high %v3747_v57, %v3751_v51 }
 0x3e1   :  { %3448 = vmatmul.mubr.f32.gmra.mrb[62].mxu0 %v3303_v61  ;;  %v3752_v61 = vld [vmem:[#allocation7 + $0x768] sm:$0xff] }
 0x3e2   :  { %14984 = vmatprep.mubr.msk.f32.mxu0 %vm3321_vm5, %v3306_v17  ;;  %4617 = vmatpush1.bf16.msra.mxu0 %v15018_v10  ;;  %v15098_v10 = vcombine.low %v3748_v24, %v3752_v61  ;;  %v15099_v17 = vcombine.high %v3748_v24, %v3752_v61  ;;  %v3653_v24 = vld [vmem:[#allocation7 + $0x450] sm:$0xff] }
 0x3e3   :  { %4618 = vmatprep.subr.bf16.mxu0 %v15027_v29  ;;  %4543 = vmatprep.subr.bf16.mxu1 %v15097_v47  ;;  %v3755_v29 = vld [vmem:[#allocation7 + $0x780] sm:$0xff] }
 0x3e4   :  { %4544 = vmatpush1.bf16.msra.mxu1 %v15096_v37  ;;  %v3657_v37 = vld [vmem:[#allocation7 + $0x470] sm:$0xff] }
 0x3e5   :  { %3454 = vmatmul.mubr.f32.gmra.mrb[64].mxu0 %v3305_v18  ;;  %v15105_v18 = vcombine.high %v3755_v29, %v3759_v44 }
 0x3e6   :  { %14985 = vmatprep.mubr.msk.f32.mxu0 %vm3321_vm5, %v3308_v16  ;;  %4619 = vmatpush1.bf16.msra.mxu0 %v15026_v42  ;;  %v3760_v42 = vld [vmem:[#allocation7 + $0x7a8] sm:$0xff]  ;;  %v15104_v16 = vcombine.low %v3755_v29, %v3759_v44  ;;  %v3658_v29 = vld [vmem:[#allocation7 + $0x478] sm:$0xff] }
 0x3e7   :  { %4620 = vmatprep.subr.bf16.mxu0 %v15035_v34  ;;  %v15106_v34 = vcombine.low %v3756_v3, %v3760_v42  ;;  %v15107_v1 = vcombine.high %v3756_v3, %v3760_v42  ;;  %4545 = vmatprep.subr.bf16.mxu1 %v15105_v18 }
 0x3e8   :  { %4546 = vmatpush1.bf16.msra.mxu1 %v15104_v16  ;;  %v15005_v16 = vcombine.high %v3653_v24, %v3657_v37 }
 0x3e9   :  { %3460 = vmatmul.mubr.f32.gmra.mrb[66].mxu0 %v3307_v4  ;;  %v3767_v4 = vld [vmem:[#allocation7 + $0x7e0] sm:$0xff] }
 0x3ea   :  { %14986 = vmatprep.mubr.msk.f32.mxu0 %vm3321_vm5, %v3310_v55  ;;  %4621 = vmatpush1.bf16.msra.mxu0 %v15034_v41  ;;  %v3764_v41 = vld [vmem:[#allocation7 + $0x7c8] sm:$0xff]  ;;  %v15112_v55 = vcombine.low %v3763_v32, %v3767_v4 }
 0x3eb   :  { %4622 = vmatprep.subr.bf16.mxu0 %v15043_v2  ;;  %v15113_v2 = vcombine.high %v3763_v32, %v3767_v4  ;;  %v15114_v38 = vcombine.low %v3764_v41, %v3768_v30 }
 0x3ed   :  { %3466 = vmatmul.mubr.f32.gmra.mrb[68].mxu0 %v3309_v9  ;;  %v15115_v9 = vcombine.high %v3764_v41, %v3768_v30  ;;  %4547 = vmatprep.subr.bf16.mxu1 %v15113_v2  ;;  %v19671_v41 = vld [vmem:[#allocation7 + $0x4b0] sm:$0xff]  ;;  %v19675_v2 = vld [vmem:[#allocation7 + $0x4b8] sm:$0xff] }
 0x3ee   :  { %14987 = vmatprep.mubr.msk.f32.mxu0 %vm3321_vm5, %v3312_v46  ;;  %4623 = vmatpush1.bf16.msra.mxu0 %v15042_v21  ;;  %v19622_v21 = vld [vmem:[#allocation7 + $0x410] sm:$0xff] }
 0x3ef   :  { %4624 = vmatprep.subr.bf16.mxu0 %v15051_v5  ;;  %4548 = vmatpush1.bf16.msra.mxu1 %v15112_v55  ;;  %v19624_v46 = vld [vmem:[#allocation7 + $0x430] sm:$0xff]  ;;  %v19626_v5 = vld [vmem:[#allocation7 + $0x418] sm:$0xff] }
 0x3f0   :  { %v14997_v52 = vcombine.high %v19622_v21, %v19624_v46  ;;  %v19673_v55 = vld [vmem:[#allocation7 + $0x498] sm:$0xff] }
 0x3f1   :  { %3472 = vmatmul.mubr.f32.gmra.mrb[70].mxu0 %v3311_v50  ;;  %v14996_v50 = vcombine.low %v19622_v21, %v19624_v46 }
 0x3f2   :  { %14988 = vmatprep.mubr.msk.f32.mxu0 %vm3321_vm5, %v3314_v48  ;;  %4625 = vmatpush1.bf16.msra.mxu0 %v15050_v36  ;;  %v14998_v36 = vcombine.low %v19626_v5, %v19630_v39  ;;  %v14999_v48 = vcombine.high %v19626_v5, %v19630_v39  ;;  %v19704_v5 = vld [vmem:[#allocation7 + $0x4d8] sm:$0xff] }
 0x3f3   :  { %4626 = vmatprep.subr.bf16.mxu0 %v15059_v56  ;;  %4703 = vmatprep.subr.bf16.mxu1 %v14997_v52  ;;  %v19706_v39 = vld [vmem:[#allocation7 + $0x4f8] sm:$0xff] }
 0x3f5   :  { %3478 = vmatmul.mubr.f32.gmra.mrb[72].mxu0 %v3313_v49 }
 0x3f6   :  { %14989 = vmatprep.mubr.msk.f32.mxu0 %vm3321_vm5, %v3316_v53  ;;  %4627 = vmatpush1.bf16.msra.mxu0 %v15058_v40 }
 0x3f7   :  { %4628 = vmatprep.subr.bf16.mxu0 %v15067_v13 }
 0x3f9   :  { %3484 = vmatmul.mubr.f32.gmra.mrb[74].mxu0 %v3315_v31 }
 0x3fa   :  { %14990 = vmatprep.mubr.msk.f32.mxu0 %vm3321_vm5, %v3318_v45  ;;  %4629 = vmatpush1.bf16.msra.mxu0 %v15066_v23 }
 0x3fb   :  { %4630 = vmatprep.subr.bf16.mxu0 %v15075_v22 }
 0x3fd   :  { %3490 = vmatmul.mubr.f32.gmra.mrb[76].mxu0 %v3317_v60 }
 0x3fe   :  { %14991 = vmatprep.mubr.msk.f32.mxu0 %vm3321_vm5, %v3320_v25  ;;  %4631 = vmatpush1.bf16.msra.mxu0 %v15074_v11 }
 0x3ff   :  { %4632 = vmatprep.subr.bf16.mxu0 %v15083_v12 }
 0x401   :  { %3496 = vmatmul.mubr.f32.gmra.mrb[78].mxu0 %v3319_v28 }
 0x402   :  { %4633 = vmatpush1.bf16.msra.mxu0 %v15082_v26 }
 0x403   :  { %4634 = vmatprep.subr.bf16.mxu0 %v15091_v7 }
 0x406   :  { %4635 = vmatpush1.bf16.msra.mxu0 %v15090_v63 }
 0x407   :  { %4636 = vmatprep.subr.bf16.mxu0 %v15099_v17  ;;  %v3654_v17 = vld [vmem:[#allocation7 + $0x458] sm:$0xff] }
 0x408   :  { %v15007_v4 = vcombine.high %v3654_v17, %v3658_v29 }
 0x40a   :  { %4637 = vmatpush1.bf16.msra.mxu0 %v15098_v10 }
 0x40b   :  { %4638 = vmatprep.subr.bf16.mxu0 %v15107_v1 }
 0x40e   :  { %4639 = vmatpush1.bf16.msra.mxu0 %v15106_v34  ;;  %v19666_v34 = vld [vmem:[#allocation7 + $0x490] sm:$0xff] }
 0x40f   :  { %4640 = vmatprep.subr.bf16.mxu0 %v15115_v9 }
 0x412   :  { %4641 = vmatpush1.bf16.msra.mxu0 %v15114_v38 }
 0x413   :  { %4796 = vmatprep.subr.bf16.mxu0 %v14999_v48 }
 0x4a8   :  { %v3431_v56 = vpop.f32.mrb[56].mxu0 }
 0x4a9   :  { %v3433_v8 = vpop.f32.mrb[57].mxu0 }
 0x4ac   :  { %v3437_v43 = vpop.f32.mrb[58].mxu0 }
 0x4ad   :  { %v19638_v49 = vpack.c.bf16 %v3437_v43, %v3431_v56  ;;  %v3439_v40 = vpop.f32.mrb[59].mxu0 }
 0x4ae   :  { %v19640_v53 = vpack.c.bf16 %v3439_v40, %v3433_v8  ;;  %v15004_v40 = vcombine.low %v3653_v24, %v3657_v37  ;;  %v15014_v37 = vcombine.low %v19673_v55, %v19675_v2 }
 0x4af   :  { %v3772_v13 = vshrl.u32 %v19638_v49, 16  ;;  %v3774_v54 = vshll.u32 %v19638_v49, 16 }
 0x4b0   :  { %v3443_v59 = vpop.f32.mrb[60].mxu0  ;;  %v3784_v31 = vshrl.u32 %v19640_v53, 16  ;;  %v3786_v23 = vshll.u32 %v19640_v53, 16 }
 0x4b1   :  { %v3445_v45 = vpop.f32.mrb[61].mxu0  ;;  %v19650_v11 = vrot.slane %v3772_v13, 1  ;;  %v19652_v25 = vrot.slane %v3774_v54, 2  ;;  %v3776_v7 = vrot.slane %v3774_v54, 1  ;;  %v15013_v54 = vcombine.high %v19666_v34, %v19671_v41 }
 0x4b2   :  { %v19646_v22 = vrot.slane %v3784_v31, 1  ;;  %v19648_v60 = vrot.slane %v3786_v23, 2  ;;  %v3788_v20 = vrot.slane %v3786_v23, 1  ;;  %v19699_v23 = vld [vmem:[#allocation7 + $0x4d0] sm:$0xff] }
 0x4b3   :  { %v7315_v62 = vor.u32 %v19652_v25, %v19650_v11  ;;  %v3777_v42 = vor.u32 %v3776_v7, %v3772_v13  ;;  %v15006_v13 = vcombine.low %v3654_v17, %v3658_v29  ;;  %v15023_v17 = vcombine.high %v19704_v5, %v19706_v39 }
 0x4b4   :  { %v3449_v28 = vpop.f32.mrb[62].mxu0  ;;  %v7322_v12 = vor.u32 %v19648_v60, %v19646_v22  ;;  %v3789_v3 = vor.u32 %v3788_v20, %v3784_v31  ;;  %v15022_v11 = vcombine.low %v19704_v5, %v19706_v39 }
 0x4b5   :  { %v19654_v33 = vpack.c.bf16 %v3449_v28, %v3443_v59  ;;  %v3451_v27 = vpop.f32.mrb[63].mxu0  ;;  %v15015_v59 = vcombine.high %v19673_v55, %v19675_v2 }
 0x4b6   :  { %v19658_v26 = vpack.c.bf16 %v3451_v27, %v3445_v45  ;;  %v19701_v45 = vld [vmem:[#allocation7 + $0x4f0] sm:$0xff] }
 0x4b7   :  { %v3779_v63 = vshll.u32 %v19654_v33, 16  ;;  %v3795_v44 = vshrl.u32 %v19654_v33, 16  ;;  %v15020_v22 = vcombine.low %v19699_v23, %v19701_v45 }
 0x4b8   :  { %v3455_v57 = vpop.f32.mrb[64].mxu0  ;;  %v3791_v51 = vshll.u32 %v19658_v26, 16  ;;  %v3803_v47 = vshrl.u32 %v19658_v26, 16 }
 0x4b9   :  { %v3457_v61 = vpop.f32.mrb[65].mxu0  ;;  %v3781_v10 = vrot.slane %v3779_v63, 1  ;;  %v7316_v56 = vrot.slane %v3795_v44, 1  ;;  %v7317_v8 = vrot.slane %v3779_v63, 2 }
 0x4ba   :  { %v3793_v18 = vrot.slane %v3791_v51, 1  ;;  %v7323_v30 = vrot.slane %v3803_v47, 1  ;;  %v7324_v38 = vrot.slane %v3791_v51, 2  ;;  %v15012_v51 = vcombine.low %v19666_v34, %v19671_v41  ;;  %v3682_v41 = vld [vmem:[#allocation7 + $0x538] sm:$0xff] }
 0x4bb   :  { %v19682_v48 = vsel %vm226_vm1, %v3777_v42, %v3781_v10  ;;  %v19710_v7 = vor.u32 %v7317_v8, %v7316_v56  ;;  %v3797_v24 = vor.u32 %v3795_v44, %v3781_v10  ;;  %v19726_v44 = vld [vmem:[#allocation7 + $0x510] sm:$0xff] }
 0x4bc   :  { %v3461_v1 = vpop.f32.mrb[66].mxu0  ;;  %v19669_v32 = vsel %vm226_vm1, %v3789_v3, %v3793_v18  ;;  %v7325_v28 = vor.u32 %v7324_v38, %v7323_v30  ;;  %v3805_v63 = vor.u32 %v3803_v47, %v3793_v18  ;;  %v19728_v18 = vld [vmem:[#allocation7 + $0x530] sm:$0xff] }
 0x4bd   :  { %v19677_v9 = vpack.c.bf16 %v3461_v1, %v3455_v57  ;;  %v3463_v52 = vpop.f32.mrb[67].mxu0  ;;  %4549 = vmatprep.mubr.bf16.mxu1 %v19669_v32  ;;  %4642 = vmatprep.mubr.bf16.mxu0 %v19669_v32  ;;  %v19747_v2 = vsel %vm1806_vm3, %v7315_v62, %v19710_v7  ;;  %v15029_v25 = vcombine.high %v19726_v44, %v19728_v18 }
 0x4be   :  { %v19684_v43 = vpack.c.bf16 %v3463_v52, %v3457_v61  ;;  %4550 = vmatmul.mubr.bf16.vlgmr.msra.gmra.mrb[60].mxu1 %v19682_v48  ;;  %4643 = vmatmul.mubr.bf16.vlgmr.msra.gmra.mrb[80].mxu0 %v19682_v48  ;;  %v15021_v61 = vcombine.high %v19699_v23, %v19701_v45  ;;  %v19740_v55 = vsel %vm1806_vm3, %v7322_v12, %v7325_v28  ;;  %v3689_v23 = vld [vmem:[#allocation7 + $0x570] sm:$0xff]  ;;  %v3686_v45 = vld [vmem:[#allocation7 + $0x558] sm:$0xff] }
 0x4bf   :  { %4704 = vmatpush1.bf16.msra.mxu1 %v14996_v50  ;;  %4797 = vmatpush1.bf16.msra.mxu0 %v14998_v36  ;;  %v3799_v31 = vshll.u32 %v19677_v9, 16  ;;  %v3811_v36 = vshrl.u32 %v19677_v9, 16 }
 0x4c0   :  { %4705 = vmatprep.subr.bf16.mxu1 %v15005_v16  ;;  %4798 = vmatprep.subr.bf16.mxu0 %v15007_v4  ;;  %v3467_v21 = vpop.f32.mrb[68].mxu0  ;;  %v3807_v46 = vshll.u32 %v19684_v43, 16  ;;  %v3819_v50 = vshrl.u32 %v19684_v43, 16  ;;  %v19734_v4 = vld [vmem:[#allocation7 + $0x518] sm:$0xff] }
 0x4c1   :  { %v3469_v27 = vpop.f32.mrb[69].mxu0  ;;  %v3801_v20 = vrot.slane %v3799_v31, 1  ;;  %v7327_v16 = vrot.slane %v3811_v36, 1  ;;  %v7328_v30 = vrot.slane %v3799_v31, 2 }
 0x4c2   :  { %v3809_v57 = vrot.slane %v3807_v46, 1  ;;  %v7331_v29 = vrot.slane %v3819_v50, 1  ;;  %v7332_v42 = vrot.slane %v3807_v46, 2 }
 0x4c3   :  { %4706 = vmatpush1.bf16.msra.mxu1 %v15004_v40  ;;  %4799 = vmatpush1.bf16.msra.mxu0 %v15006_v13  ;;  %v19724_v10 = vsel %vm226_vm1, %v3797_v24, %v3801_v20  ;;  %v3813_v12 = vor.u32 %v3811_v36, %v3801_v20  ;;  %v15031_v40 = vcombine.high %v19734_v4, %v3682_v41  ;;  %v19764_v13 = vld [vmem:[#allocation7 + $0x550] sm:$0xff] }
 0x4c4   :  { %v3473_v3 = vpop.f32.mrb[70].mxu0  ;;  %v19721_v47 = vsel %vm226_vm1, %v3805_v63, %v3809_v57  ;;  %4707 = vmatprep.subr.bf16.mxu1 %v15013_v54  ;;  %4800 = vmatprep.subr.bf16.mxu0 %v15015_v59  ;;  %v19755_v60 = vor.u32 %v7332_v42, %v7331_v29  ;;  %v3821_v56 = vor.u32 %v3819_v50, %v3809_v57 }
 0x4c5   :  { %v19730_v34 = vpack.c.bf16 %v3473_v3, %v3467_v21  ;;  %v3475_v1 = vpop.f32.mrb[71].mxu0  ;;  %4559 = vmatprep.mubr.bf16.mxu1 %v19721_v47  ;;  %4652 = vmatprep.mubr.bf16.mxu0 %v19721_v47  ;;  %v3690_v21 = vld [vmem:[#allocation7 + $0x578] sm:$0xff]  ;;  %v19772_v39 = vor.u32 %v7328_v30, %v7327_v16  ;;  %v15028_v36 = vcombine.low %v19726_v44, %v19728_v18 }
 0x4c6   :  { %v19749_v38 = vpack.c.bf16 %v3475_v1, %v3469_v27  ;;  %4560 = vmatmul.mubr.bf16.gmra.mrb[64].mxu1 %v19724_v10  ;;  %4653 = vmatmul.mubr.bf16.gmra.mrb[84].mxu0 %v19724_v10  ;;  %v19770_v5 = vsel %vm1806_vm3, %v7325_v28, %v19755_v60  ;;  %v15030_v27 = vcombine.low %v19734_v4, %v3682_v41  ;;  %v19792_v44 = vld [vmem:[#allocation7 + $0x598] sm:$0xff] }
 0x4c7   :  { %4708 = vmatpush1.bf16.msra.mxu1 %v15012_v51  ;;  %4801 = vmatpush1.bf16.msra.mxu0 %v15014_v37  ;;  %v3815_v62 = vshll.u32 %v19730_v34, 16  ;;  %v3827_v46 = vshrl.u32 %v19730_v34, 16  ;;  %v15037_v28 = vcombine.high %v19764_v13, %v3689_v23  ;;  %v15039_v24 = vcombine.high %v3686_v45, %v3690_v21  ;;  %v19784_v37 = vld [vmem:[#allocation7 + $0x590] sm:$0xff]  ;;  %v19794_v18 = vld [vmem:[#allocation7 + $0x5b8] sm:$0xff] }
 0x4c8   :  { %4709 = vmatprep.subr.bf16.mxu1 %v15021_v61  ;;  %4802 = vmatprep.subr.bf16.mxu0 %v15023_v17  ;;  %v3479_v52 = vpop.f32.mrb[72].mxu0  ;;  %v3823_v8 = vshll.u32 %v19749_v38, 16  ;;  %v3835_v54 = vshrl.u32 %v19749_v38, 16  ;;  %v19786_v61 = vld [vmem:[#allocation7 + $0x5b0] sm:$0xff]  ;;  %v19799_v42 = vsel %vm1806_vm3, %v19710_v7, %v19772_v39  ;;  %v15036_v4 = vcombine.low %v19764_v13, %v3689_v23  ;;  %v3702_v23 = vld [vmem:[#allocation7 + $0x5d8] sm:$0xff] }
 0x4c9   :  { %v3481_v59 = vpop.f32.mrb[73].mxu0  ;;  %v3817_v31 = vrot.slane %v3815_v62, 1  ;;  %v7335_v16 = vrot.slane %v3827_v46, 1  ;;  %v7336_v30 = vrot.slane %v3815_v62, 2  ;;  %v19816_v62 = vld [vmem:[#allocation7 + $0x5f0] sm:$0xff] }
 0x4ca   :  { %v3825_v50 = vrot.slane %v3823_v8, 1  ;;  %v7339_v63 = vrot.slane %v3835_v54, 1  ;;  %v7340_v17 = vrot.slane %v3823_v8, 2  ;;  %v15047_v8 = vcombine.high %v19792_v44, %v19794_v18 }
 0x4cb   :  { %4710 = vmatpush1.bf16.msra.mxu1 %v15020_v22  ;;  %4803 = vmatpush1.bf16.msra.mxu0 %v15022_v11  ;;  %v19778_v20 = vsel %vm226_vm1, %v3813_v12, %v3817_v31  ;;  %v15038_v22 = vcombine.low %v3686_v45, %v3690_v21  ;;  %v15045_v11 = vcombine.high %v19784_v37, %v19786_v61  ;;  %v3706_v45 = vld [vmem:[#allocation7 + $0x5f8] sm:$0xff] }
 0x4cc   :  { %v3485_v57 = vpop.f32.mrb[74].mxu0  ;;  %v19781_v51 = vsel %vm226_vm1, %v3821_v56, %v3825_v50  ;;  %4711 = vmatprep.subr.bf16.mxu1 %v15029_v25  ;;  %4804 = vmatprep.subr.bf16.mxu0 %v15031_v40  ;;  %v19806_v41 = vor.u32 %v7340_v17, %v7339_v63  ;;  %v3829_v7 = vor.u32 %v3827_v46, %v3817_v31  ;;  %v19814_v40 = vld [vmem:[#allocation7 + $0x5d0] sm:$0xff] }
 0x4cd   :  { %v19788_v29 = vpack.c.bf16 %v3485_v57, %v3479_v52  ;;  %v3487_v3 = vpop.f32.mrb[75].mxu0  ;;  %4569 = vmatprep.mubr.bf16.mxu1 %v19781_v51  ;;  %4662 = vmatprep.mubr.bf16.mxu0 %v19781_v51  ;;  %v3837_v52 = vor.u32 %v3835_v54, %v3825_v50  ;;  %v19826_v21 = vor.u32 %v7336_v30, %v7335_v16  ;;  %v19834_v63 = vld [vmem:[#allocation7 + $0x630] sm:$0xff] }
 0x4ce   :  { %v19801_v1 = vpack.c.bf16 %v3487_v3, %v3481_v59  ;;  %4570 = vmatmul.mubr.bf16.gmra.mrb[68].mxu1 %v19778_v20  ;;  %4663 = vmatmul.mubr.bf16.gmra.mrb[88].mxu0 %v19778_v20  ;;  %v19824_v54 = vsel %vm1806_vm3, %v19755_v60, %v19806_v41  ;;  %v15044_v50 = vcombine.low %v19784_v37, %v19786_v61 }
 0x4cf   :  { %4712 = vmatpush1.bf16.msra.mxu1 %v15028_v36  ;;  %4805 = vmatpush1.bf16.msra.mxu0 %v15030_v27  ;;  %v21045_v25 = vshll.u32 %v19788_v29, 16  ;;  %v15046_v36 = vcombine.low %v19792_v44, %v19794_v18  ;;  %v19832_v27 = vld [vmem:[#allocation7 + $0x610] sm:$0xff]  ;;  %v15052_v60 = vcombine.low %v19814_v40, %v19816_v62  ;;  %v15054_v17 = vcombine.low %v3702_v23, %v3706_v45  ;;  %v3710_v44 = vld [vmem:[#allocation7 + $0x618] sm:$0xff] }
 0x4d0   :  { %4713 = vmatprep.subr.bf16.mxu1 %v15037_v28  ;;  %4806 = vmatprep.subr.bf16.mxu0 %v15039_v24  ;;  %v3491_v12 = vpop.f32.mrb[76].mxu0  ;;  %v3839_v56 = vshll.u32 %v19801_v1, 16  ;;  %v3851_v13 = vshrl.u32 %v19801_v1, 16  ;;  %v15053_v28 = vcombine.high %v19814_v40, %v19816_v62  ;;  %v15055_v3 = vcombine.high %v3702_v23, %v3706_v45  ;;  %v3714_v18 = vld [vmem:[#allocation7 + $0x638] sm:$0xff]  ;;  %v3717_v23 = vld [vmem:[#allocation7 + $0x650] sm:$0xff] }
 0x4d1   :  { %v3493_v59 = vpop.f32.mrb[77].mxu0  ;;  %v3833_v31 = vrot.slane %v21045_v25, 1 }
 0x4d2   :  { %v3841_v46 = vrot.slane %v3839_v56, 1  ;;  %v7347_v24 = vrot.slane %v3851_v13, 1  ;;  %v7348_v16 = vrot.slane %v3839_v56, 2 }
 0x4d3   :  { %4714 = vmatpush1.bf16.msra.mxu1 %v15036_v4  ;;  %4807 = vmatpush1.bf16.msra.mxu0 %v15038_v22  ;;  %v19837_v57 = vsel %vm226_vm1, %v3829_v7, %v3833_v31  ;;  %v15061_v22 = vcombine.high %v19832_v27, %v19834_v63  ;;  %v3843_v7 = vshrl.u32 %v19788_v29, 16 }
 0x4d4   :  { %v3497_v37 = vpop.f32.mrb[78].mxu0  ;;  %v19844_v61 = vsel %vm226_vm1, %v3837_v52, %v3841_v46  ;;  %4715 = vmatprep.subr.bf16.mxu1 %v15045_v11  ;;  %4808 = vmatprep.subr.bf16.mxu0 %v15047_v8  ;;  %v19856_v11 = vsel %vm1806_vm3, %v19772_v39, %v19826_v21  ;;  %v19864_v56 = vor.u32 %v7348_v16, %v7347_v24  ;;  %v3721_v39 = vld [vmem:[#allocation7 + $0x670] sm:$0xff] }
 0x4d5   :  { %v19846_v4 = vpack.c.bf16 %v3497_v37, %v3491_v12  ;;  %v3499_v30 = vpop.f32.mrb[79].mxu0  ;;  %4579 = vmatprep.mubr.bf16.mxu1 %v19844_v61  ;;  %4672 = vmatprep.mubr.bf16.mxu0 %v19844_v61  ;;  %v15060_v12 = vcombine.low %v19832_v27, %v19834_v63  ;;  %v15062_v8 = vcombine.low %v3710_v44, %v3714_v18  ;;  %v3722_v27 = vld [vmem:[#allocation7 + $0x678] sm:$0xff]  ;;  %v7343_v6 = vrot.slane %v3843_v7, 1 }
 0x4d6   :  { %v19858_v52 = vpack.c.bf16 %v3499_v30, %v3493_v59  ;;  %4580 = vmatmul.mubr.bf16.gmra.mrb[72].mxu1 %v19837_v57  ;;  %4673 = vmatmul.mubr.bf16.gmra.mrb[92].mxu0 %v19837_v57  ;;  %v3845_v40 = vor.u32 %v3843_v7, %v3833_v31  ;;  %v3853_v45 = vor.u32 %v3851_v13, %v3841_v46 }
 0x4d7   :  { %4716 = vmatpush1.bf16.msra.mxu1 %v15044_v50  ;;  %4809 = vmatpush1.bf16.msra.mxu0 %v15046_v36  ;;  %v3847_v62 = vshll.u32 %v19846_v4, 16  ;;  %v3859_v59 = vshrl.u32 %v19846_v4, 16  ;;  %v15063_v30 = vcombine.high %v3710_v44, %v3714_v18  ;;  %v19873_v31 = vsel %vm1806_vm3, %v19806_v41, %v19864_v56  ;;  %v3725_v41 = vld [vmem:[#allocation7 + $0x690] sm:$0xff] }
 0x4d8   :  { %4717 = vmatprep.subr.bf16.mxu1 %v15053_v28  ;;  %4810 = vmatprep.subr.bf16.mxu0 %v15055_v3  ;;  %v3855_v37 = vshll.u32 %v19858_v52, 16  ;;  %v3862_v63 = vshrl.u32 %v19858_v52, 16  ;;  %v15069_v28 = vcombine.high %v3717_v23, %v3721_v39  ;;  %v15071_v46 = vcombine.high %v3718_v14, %v3722_v27 }
 0x4d9   :  { %v3849_v50 = vrot.slane %v3847_v62, 1  ;;  %v7352_v36 = vrot.slane %v3847_v62, 2  ;;  %v7351_v24 = vrot.slane %v3859_v59, 1 }
 0x4da   :  { %v3857_v16 = vrot.slane %v3855_v37, 1  ;;  %v7356_v25 = vrot.slane %v3855_v37, 2  ;;  %v7355_v3 = vrot.slane %v3862_v63, 1  ;;  %v21076_v37 = vshll.u32 %v19788_v29, 16 }
 0x4db   :  { %4718 = vmatpush1.bf16.msra.mxu1 %v15052_v60  ;;  %4811 = vmatpush1.bf16.msra.mxu0 %v15054_v17  ;;  %v19876_v13 = vsel %vm226_vm1, %v3845_v40, %v3849_v50  ;;  %v19878_v44 = vor.u32 %v7352_v36, %v7351_v24  ;;  %v3729_v17 = vld [vmem:[#allocation7 + $0x6b0] sm:$0xff]  ;;  %v3726_v40 = vld [vmem:[#allocation7 + $0x698] sm:$0xff]  ;;  %v19897_v24 = vor.u32 %v3859_v59, %v3849_v50 }
 0x4dc   :  { %v19881_v18 = vsel %vm226_vm1, %v3853_v45, %v3857_v16  ;;  %4719 = vmatprep.subr.bf16.mxu1 %v15061_v22  ;;  %4812 = vmatprep.subr.bf16.mxu0 %v15063_v30  ;;  %v19883_v62 = vor.u32 %v7356_v25, %v7355_v3  ;;  %v7344_v35 = vrot.slane %v21076_v37, 2  ;;  %v19889_v60 = vor.u32 %v3862_v63, %v3857_v16  ;;  %v3730_v36 = vld [vmem:[#allocation7 + $0x6b8] sm:$0xff]  ;;  %v3733_v63 = vld [vmem:[#allocation7 + $0x6d0] sm:$0xff] }
 0x4dd   :  { %4589 = vmatprep.mubr.bf16.mxu1 %v19881_v18  ;;  %4682 = vmatprep.mubr.bf16.mxu0 %v19881_v18  ;;  %v15068_v25 = vcombine.low %v3717_v23, %v3721_v39  ;;  %v15070_v22 = vcombine.low %v3718_v14, %v3722_v27  ;;  %v15077_v7 = vcombine.high %v3725_v41, %v3729_v17  ;;  %v3737_v16 = vld [vmem:[#allocation7 + $0x6f0] sm:$0xff]  ;;  %v3734_v3 = vld [vmem:[#allocation7 + $0x6d8] sm:$0xff] }
 0x4de   :  { %4590 = vmatmul.mubr.bf16.gmra.mrb[76].mxu1 %v19876_v13  ;;  %4683 = vmatmul.mubr.bf16.gmra.mrb[96].mxu0 %v19876_v13  ;;  %v15079_v45 = vcombine.high %v3726_v40, %v3730_v36  ;;  %v19893_v30 = vor.u32 %v7344_v35, %v7343_v6  ;;  %v3738_v37 = vld [vmem:[#allocation7 + $0x6f8] sm:$0xff]  ;;  %v15078_v35 = vcombine.low %v3726_v40, %v3730_v36  ;;  %v3741_v6 = vld [vmem:[#allocation7 + $0x710] sm:$0xff] }
 0x4df   :  { %4720 = vmatpush1.bf16.msra.mxu1 %v15060_v12  ;;  %4813 = vmatpush1.bf16.msra.mxu0 %v15062_v8  ;;  %v15076_v12 = vcombine.low %v3725_v41, %v3729_v17  ;;  %v15085_v8 = vcombine.high %v3733_v63, %v3737_v16  ;;  %v15087_v23 = vcombine.high %v3734_v3, %v3738_v37  ;;  %v3745_v39 = vld [vmem:[#allocation7 + $0x730] sm:$0xff]  ;;  %v3742_v59 = vld [vmem:[#allocation7 + $0x718] sm:$0xff] }
 0x4e0   :  { %4721 = vmatprep.subr.bf16.mxu1 %v15069_v28  ;;  %4814 = vmatprep.subr.bf16.mxu0 %v15071_v46  ;;  %v19902_v14 = vsel %vm1806_vm3, %v19826_v21, %v19893_v30  ;;  %v3746_v27 = vld [vmem:[#allocation7 + $0x738] sm:$0xff]  ;;  %v15084_v21 = vcombine.low %v3733_v63, %v3737_v16  ;;  %v15086_v50 = vcombine.low %v3734_v3, %v3738_v37  ;;  %v3749_v41 = vld [vmem:[#allocation7 + $0x750] sm:$0xff] }
 0x4e1   :  { %4599 = vmatprep.mubr.bf16.mxu1 %v19889_v60  ;;  %4692 = vmatprep.mubr.bf16.mxu0 %v19889_v60  ;;  %v15093_v28 = vcombine.high %v3741_v6, %v3745_v39  ;;  %v15095_v46 = vcombine.high %v3742_v59, %v3746_v27  ;;  %v3753_v17 = vld [vmem:[#allocation7 + $0x770] sm:$0xff]  ;;  %v3750_v40 = vld [vmem:[#allocation7 + $0x758] sm:$0xff] }
 0x4e2   :  { %v3754_v36 = vld [vmem:[#allocation7 + $0x778] sm:$0xff]  ;;  %v3757_v63 = vld [vmem:[#allocation7 + $0x790] sm:$0xff]  ;;  %v15100_v37 = vcombine.low %v3749_v41, %v3753_v17 }
 0x4e3   :  { %4722 = vmatpush1.bf16.msra.mxu1 %v15068_v25  ;;  %4815 = vmatpush1.bf16.msra.mxu0 %v15070_v22  ;;  %v15092_v25 = vcombine.low %v3741_v6, %v3745_v39  ;;  %v15094_v22 = vcombine.low %v3742_v59, %v3746_v27  ;;  %v3761_v16 = vld [vmem:[#allocation7 + $0x7b0] sm:$0xff]  ;;  %v3758_v3 = vld [vmem:[#allocation7 + $0x798] sm:$0xff] }
 0x4e4   :  { %4723 = vmatprep.subr.bf16.mxu1 %v15077_v7  ;;  %4816 = vmatprep.subr.bf16.mxu0 %v15079_v45  ;;  %v15101_v7 = vcombine.high %v3749_v41, %v3753_v17  ;;  %v15103_v45 = vcombine.high %v3750_v40, %v3754_v36  ;;  %v3766_v6 = vld [vmem:[#allocation7 + $0x7d8] sm:$0xff]  ;;  %v15108_v59 = vcombine.low %v3757_v63, %v3761_v16  ;;  %v3515_v41 = vld [vmem:[#allocation7 + $0x8] sm:$0xff] }
 0x4e5   :  { %v3770_v39 = vld [vmem:[#allocation7 + $0x7f8] sm:$0xff]  ;;  %v3519_v17 = vld [vmem:[#allocation7 + $0x28] sm:$0xff] }
 0x4e6   :  { %4600 = vmatmul.mubr.bf16.gmra.mrb[80].mxu1 %v19897_v24  ;;  %4693 = vmatmul.mubr.bf16.gmra.mrb[100].mxu0 %v19897_v24 }
 0x4e7   :  { %4724 = vmatpush1.bf16.msra.mxu1 %v15076_v12  ;;  %4817 = vmatpush1.bf16.msra.mxu0 %v15078_v35  ;;  %v15102_v12 = vcombine.low %v3750_v40, %v3754_v36  ;;  %v15109_v35 = vcombine.high %v3757_v63, %v3761_v16  ;;  %v15118_v36 = vcombine.low %v3766_v6, %v3770_v39  ;;  %v3523_v63 = vld [vmem:[#allocation7 + $0x48] sm:$0xff] }
 0x4e8   :  { %4735 = vmatprep.mubr.bf16.mxu1 %v19669_v32  ;;  %4828 = vmatprep.mubr.bf16.mxu0 %v19669_v32  ;;  %v3762_v32 = vld [vmem:[#allocation7 + $0x7b8] sm:$0xff]  ;;  %v3527_v16 = vld [vmem:[#allocation7 + $0x68] sm:$0xff] }
 0x4e9   :  { %4725 = vmatprep.subr.bf16.mxu1 %v15085_v8  ;;  %4818 = vmatprep.subr.bf16.mxu0 %v15087_v23  ;;  %v15111_v8 = vcombine.high %v3758_v3, %v3762_v32  ;;  %v3765_v23 = vld [vmem:[#allocation7 + $0x7d0] sm:$0xff]  ;;  %v15110_v27 = vcombine.low %v3758_v3, %v3762_v32  ;;  %v15122_v32 = vcombine.low %v3515_v41, %v3519_v17 }
 0x4eb   :  { %4726 = vmatpush1.bf16.msra.mxu1 %v15084_v21  ;;  %4819 = vmatpush1.bf16.msra.mxu0 %v15086_v50  ;;  %v3769_v21 = vld [vmem:[#allocation7 + $0x7f0] sm:$0xff] }
 0x4ec   :  { %4727 = vmatprep.subr.bf16.mxu1 %v15093_v28  ;;  %4820 = vmatprep.subr.bf16.mxu0 %v15095_v46  ;;  %v15117_v50 = vcombine.high %v3765_v23, %v3769_v21  ;;  %v15119_v28 = vcombine.high %v3766_v6, %v3770_v39  ;;  %v3514_v46 = vld [vmem:[#allocation7] sm:$0xff]  ;;  %v15116_v40 = vcombine.low %v3765_v23, %v3769_v21  ;;  %v3531_v21 = vld [vmem:[#allocation7 + $0x88] sm:$0xff] }
 0x4ed   :  { %v3534_v23 = vld [vmem:[#allocation7 + $0xa0] sm:$0xff]  ;;  %v3535_v6 = vld [vmem:[#allocation7 + $0xa8] sm:$0xff] }
 0x4ef   :  { %4728 = vmatpush1.bf16.msra.mxu1 %v15092_v25  ;;  %4821 = vmatpush1.bf16.msra.mxu0 %v15094_v22  ;;  %v3518_v25 = vld [vmem:[#allocation7 + $0x20] sm:$0xff] }
 0x4f0   :  { %4729 = vmatprep.subr.bf16.mxu1 %v15101_v7  ;;  %4822 = vmatprep.subr.bf16.mxu0 %v15103_v45  ;;  %v15121_v22 = vcombine.high %v3514_v46, %v3518_v25  ;;  %v15123_v7 = vcombine.high %v3515_v41, %v3519_v17  ;;  %v3522_v45 = vld [vmem:[#allocation7 + $0x40] sm:$0xff]  ;;  %v15120_v3 = vcombine.low %v3514_v46, %v3518_v25  ;;  %v3539_v25 = vld [vmem:[#allocation7 + $0xc8] sm:$0xff] }
 0x4f1   :  { %v3542_v46 = vld [vmem:[#allocation7 + $0xe0] sm:$0xff]  ;;  %v3543_v41 = vld [vmem:[#allocation7 + $0xe8] sm:$0xff]  ;;  %v15138_v17 = vcombine.low %v3531_v21, %v3535_v6 }
 0x4f3   :  { %4730 = vmatpush1.bf16.msra.mxu1 %v15100_v37  ;;  %4823 = vmatpush1.bf16.msra.mxu0 %v15102_v12  ;;  %v3526_v37 = vld [vmem:[#allocation7 + $0x60] sm:$0xff] }
 0x4f4   :  { %4731 = vmatprep.subr.bf16.mxu1 %v15109_v35  ;;  %4824 = vmatprep.subr.bf16.mxu0 %v15111_v8  ;;  %v15129_v12 = vcombine.high %v3522_v45, %v3526_v37  ;;  %v15131_v35 = vcombine.high %v3523_v63, %v3527_v16  ;;  %v3530_v8 = vld [vmem:[#allocation7 + $0x80] sm:$0xff]  ;;  %v15128_v39 = vcombine.low %v3522_v45, %v3526_v37  ;;  %v3551_v45 = vld [vmem:[#allocation7 + $0x128] sm:$0xff] }
 0x4f7   :  { %4732 = vmatpush1.bf16.msra.mxu1 %v15108_v59  ;;  %4825 = vmatpush1.bf16.msra.mxu0 %v15110_v27  ;;  %v15130_v59 = vcombine.low %v3523_v63, %v3527_v16  ;;  %v15137_v27 = vcombine.high %v3530_v8, %v3534_v23  ;;  %v15146_v63 = vcombine.low %v3539_v25, %v3543_v41 }
 0x4f8   :  { %4733 = vmatprep.subr.bf16.mxu1 %v15117_v50  ;;  %4826 = vmatprep.subr.bf16.mxu0 %v15119_v28  ;;  %v15139_v50 = vcombine.high %v3531_v21, %v3535_v6  ;;  %v3538_v28 = vld [vmem:[#allocation7 + $0xc0] sm:$0xff] }
 0x4f9   :  { %v15144_v37 = vcombine.low %v3538_v28, %v3542_v46  ;;  %v3562_v6 = vld [vmem:[#allocation7 + $0x180] sm:$0xff] }
 0x4fb   :  { %4734 = vmatpush1.bf16.msra.mxu1 %v15116_v40  ;;  %4827 = vmatpush1.bf16.msra.mxu0 %v15118_v36  ;;  %v15145_v40 = vcombine.high %v3538_v28, %v3542_v46  ;;  %v3546_v36 = vld [vmem:[#allocation7 + $0x100] sm:$0xff] }
 0x4fc   :  { %5529 = vmatprep.subr.bf16.mxu1 %v15121_v22  ;;  %5622 = vmatprep.subr.bf16.mxu0 %v15123_v7  ;;  %v3550_v22 = vld [vmem:[#allocation7 + $0x120] sm:$0xff]  ;;  %v3547_v7 = vld [vmem:[#allocation7 + $0x108] sm:$0xff] }
 0x4fd   :  { %v15153_v16 = vcombine.high %v3546_v36, %v3550_v22 }
 0x4fe   :  { %4736 = vmatmul.mubr.bf16.vlgmr.msra.gmra.mrb[84].mxu1 %v19682_v48  ;;  %4829 = vmatmul.mubr.bf16.vlgmr.msra.gmra.mrb[104].mxu0 %v19682_v48  ;;  %v15136_v48 = vcombine.low %v3530_v8, %v3534_v23  ;;  %v3559_v8 = vld [vmem:[#allocation7 + $0x168] sm:$0xff]  ;;  %v15154_v23 = vcombine.low %v3547_v7, %v3551_v45 }
 0x4ff   :  { %4745 = vmatprep.mubr.bf16.mxu1 %v19721_v47  ;;  %4838 = vmatprep.mubr.bf16.mxu0 %v19721_v47  ;;  %v15147_v47 = vcombine.high %v3539_v25, %v3543_v41  ;;  %v3570_v41 = vld [vmem:[#allocation7 + $0x1c0] sm:$0xff] }
 0x500   :  { %5530 = vmatpush1.bf16.msra.mxu1 %v15120_v3  ;;  %5623 = vmatpush1.bf16.msra.mxu0 %v15122_v32  ;;  %v15155_v3 = vcombine.high %v3547_v7, %v3551_v45  ;;  %v3554_v32 = vld [vmem:[#allocation7 + $0x140] sm:$0xff]  ;;  %v3579_v45 = vld [vmem:[#allocation7 + $0x208] sm:$0xff] }
 0x501   :  { %5531 = vmatprep.subr.bf16.mxu1 %v15129_v12  ;;  %5624 = vmatprep.subr.bf16.mxu0 %v15131_v35  ;;  %v3558_v12 = vld [vmem:[#allocation7 + $0x160] sm:$0xff]  ;;  %v3555_v35 = vld [vmem:[#allocation7 + $0x148] sm:$0xff] }
 0x502   :  { %v15161_v21 = vcombine.high %v3554_v32, %v3558_v12  ;;  %v15162_v28 = vcombine.low %v3555_v35, %v3559_v8  ;;  %v3582_v7 = vld [vmem:[#allocation7 + $0x220] sm:$0xff] }
 0x504   :  { %5532 = vmatpush1.bf16.msra.mxu1 %v15128_v39  ;;  %5625 = vmatpush1.bf16.msra.mxu0 %v15130_v59  ;;  %v3566_v39 = vld [vmem:[#allocation7 + $0x1a0] sm:$0xff]  ;;  %v3563_v59 = vld [vmem:[#allocation7 + $0x188] sm:$0xff] }
 0x505   :  { %5533 = vmatprep.subr.bf16.mxu1 %v15137_v27  ;;  %5626 = vmatprep.subr.bf16.mxu0 %v15139_v50  ;;  %v3567_v27 = vld [vmem:[#allocation7 + $0x1a8] sm:$0xff]  ;;  %v15160_v50 = vcombine.low %v3554_v32, %v3558_v12  ;;  %v15169_v46 = vcombine.high %v3562_v6, %v3566_v39  ;;  %v3586_v12 = vld [vmem:[#allocation7 + $0x240] sm:$0xff] }
 0x506   :  { %4746 = vmatmul.mubr.bf16.gmra.mrb[88].mxu1 %v19724_v10  ;;  %4839 = vmatmul.mubr.bf16.gmra.mrb[108].mxu0 %v19724_v10  ;;  %v15152_v10 = vcombine.low %v3546_v36, %v3550_v22  ;;  %v15171_v25 = vcombine.high %v3563_v59, %v3567_v27  ;;  %v3578_v22 = vld [vmem:[#allocation7 + $0x200] sm:$0xff] }
 0x507   :  { %4755 = vmatprep.mubr.bf16.mxu1 %v19781_v51  ;;  %4848 = vmatprep.mubr.bf16.mxu0 %v19781_v51  ;;  %v15163_v51 = vcombine.high %v3555_v35, %v3559_v8  ;;  %v3590_v35 = vld [vmem:[#allocation7 + $0x260] sm:$0xff]  ;;  %v3587_v8 = vld [vmem:[#allocation7 + $0x248] sm:$0xff] }
 0x508   :  { %5534 = vmatpush1.bf16.msra.mxu1 %v15136_v48  ;;  %5627 = vmatpush1.bf16.msra.mxu0 %v15138_v17  ;;  %v3574_v48 = vld [vmem:[#allocation7 + $0x1e0] sm:$0xff]  ;;  %v3571_v17 = vld [vmem:[#allocation7 + $0x1c8] sm:$0xff] }
 0x509   :  { %5535 = vmatprep.subr.bf16.mxu1 %v15145_v40  ;;  %5628 = vmatprep.subr.bf16.mxu0 %v15147_v47  ;;  %v3575_v40 = vld [vmem:[#allocation7 + $0x1e8] sm:$0xff]  ;;  %v15170_v47 = vcombine.low %v3563_v59, %v3567_v27  ;;  %v15177_v36 = vcombine.high %v3570_v41, %v3574_v48  ;;  %v15192_v27 = vcombine.low %v3586_v12, %v3590_v35 }
 0x50a   :  { %v3599_v59 = vld [vmem:[#allocation7 + $0x2a8] sm:$0xff] }
 0x50c   :  { %5536 = vmatpush1.bf16.msra.mxu1 %v15144_v37  ;;  %5629 = vmatpush1.bf16.msra.mxu0 %v15146_v63  ;;  %v3583_v37 = vld [vmem:[#allocation7 + $0x228] sm:$0xff]  ;;  %v15176_v63 = vcombine.low %v3570_v41, %v3574_v48  ;;  %v3606_v41 = vld [vmem:[#allocation7 + $0x2e0] sm:$0xff] }
 0x50d   :  { %5537 = vmatprep.subr.bf16.mxu1 %v15153_v16  ;;  %5630 = vmatprep.subr.bf16.mxu0 %v15155_v3  ;;  %v15178_v16 = vcombine.low %v3571_v17, %v3575_v40  ;;  %v15185_v3 = vcombine.high %v3578_v22, %v3582_v7  ;;  %v15187_v32 = vcombine.high %v3579_v45, %v3583_v37  ;;  %v3603_v48 = vld [vmem:[#allocation7 + $0x2c8] sm:$0xff] }
 0x50e   :  { %4756 = vmatmul.mubr.bf16.gmra.mrb[92].mxu1 %v19778_v20  ;;  %4849 = vmatmul.mubr.bf16.gmra.mrb[112].mxu0 %v19778_v20  ;;  %v15168_v20 = vcombine.low %v3562_v6, %v3566_v39  ;;  %v3598_v6 = vld [vmem:[#allocation7 + $0x2a0] sm:$0xff]  ;;  %v3595_v39 = vld [vmem:[#allocation7 + $0x288] sm:$0xff] }
 0x50f   :  { %4765 = vmatprep.mubr.bf16.mxu1 %v19844_v61  ;;  %4858 = vmatprep.mubr.bf16.mxu0 %v19844_v61  ;;  %v15179_v61 = vcombine.high %v3571_v17, %v3575_v40  ;;  %v3607_v17 = vld [vmem:[#allocation7 + $0x2e8] sm:$0xff]  ;;  %v15202_v40 = vcombine.low %v3595_v39, %v3599_v59 }
 0x510   :  { %5538 = vmatpush1.bf16.msra.mxu1 %v15152_v10  ;;  %5631 = vmatpush1.bf16.msra.mxu0 %v15154_v23  ;;  %v3591_v10 = vld [vmem:[#allocation7 + $0x268] sm:$0xff]  ;;  %v15186_v23 = vcombine.low %v3579_v45, %v3583_v37  ;;  %v15210_v45 = vcombine.low %v3603_v48, %v3607_v17 }
 0x511   :  { %5539 = vmatprep.subr.bf16.mxu1 %v15161_v21  ;;  %5632 = vmatprep.subr.bf16.mxu0 %v15163_v51  ;;  %v15193_v21 = vcombine.high %v3586_v12, %v3590_v35  ;;  %v3594_v51 = vld [vmem:[#allocation7 + $0x280] sm:$0xff]  ;;  %v3623_v12 = vld [vmem:[#allocation7 + $0x368] sm:$0xff] }
 0x514   :  { %5540 = vmatpush1.bf16.msra.mxu1 %v15160_v50  ;;  %5633 = vmatpush1.bf16.msra.mxu0 %v15162_v28  ;;  %v15194_v50 = vcombine.low %v3587_v8, %v3591_v10  ;;  %v15201_v28 = vcombine.high %v3594_v51, %v3598_v6 }
 0x515   :  { %5541 = vmatprep.subr.bf16.mxu1 %v15169_v46  ;;  %5634 = vmatprep.subr.bf16.mxu0 %v15171_v25  ;;  %v15203_v46 = vcombine.high %v3595_v39, %v3599_v59  ;;  %v3602_v25 = vld [vmem:[#allocation7 + $0x2c0] sm:$0xff] }
 0x516   :  { %4766 = vmatmul.mubr.bf16.gmra.mrb[96].mxu1 %v19837_v57  ;;  %4859 = vmatmul.mubr.bf16.gmra.mrb[116].mxu0 %v19837_v57  ;;  %v15184_v57 = vcombine.low %v3578_v22, %v3582_v7  ;;  %v3615_v22 = vld [vmem:[#allocation7 + $0x328] sm:$0xff]  ;;  %v15208_v7 = vcombine.low %v3602_v25, %v3606_v41 }
 0x517   :  { %4775 = vmatprep.mubr.bf16.mxu1 %v19881_v18  ;;  %4868 = vmatprep.mubr.bf16.mxu0 %v19881_v18  ;;  %v15195_v18 = vcombine.high %v3587_v8, %v3591_v10 }
 0x518   :  { %5542 = vmatpush1.bf16.msra.mxu1 %v15168_v20  ;;  %5635 = vmatpush1.bf16.msra.mxu0 %v15170_v47  ;;  %v15209_v20 = vcombine.high %v3602_v25, %v3606_v41  ;;  %v3610_v47 = vld [vmem:[#allocation7 + $0x300] sm:$0xff] }
 0x519   :  { %5543 = vmatprep.subr.bf16.mxu1 %v15177_v36  ;;  %5636 = vmatprep.subr.bf16.mxu0 %v15179_v61  ;;  %v3614_v36 = vld [vmem:[#allocation7 + $0x320] sm:$0xff]  ;;  %v3611_v61 = vld [vmem:[#allocation7 + $0x308] sm:$0xff] }
 0x51a   :  { %v15217_v37 = vcombine.high %v3610_v47, %v3614_v36  ;;  %v15218_v35 = vcombine.low %v3611_v61, %v3615_v22 }
 0x51c   :  { %5544 = vmatpush1.bf16.msra.mxu1 %v15176_v63  ;;  %5637 = vmatpush1.bf16.msra.mxu0 %v15178_v16  ;;  %v15219_v63 = vcombine.high %v3611_v61, %v3615_v22  ;;  %v3618_v16 = vld [vmem:[#allocation7 + $0x340] sm:$0xff] }
 0x51d   :  { %5545 = vmatprep.subr.bf16.mxu1 %v15185_v3  ;;  %5638 = vmatprep.subr.bf16.mxu0 %v15187_v32  ;;  %v3622_v3 = vld [vmem:[#allocation7 + $0x360] sm:$0xff]  ;;  %v3619_v32 = vld [vmem:[#allocation7 + $0x348] sm:$0xff] }
 0x51e   :  { %4776 = vmatmul.mubr.bf16.gmra.mrb[100].mxu1 %v19876_v13  ;;  %4869 = vmatmul.mubr.bf16.gmra.mrb[120].mxu0 %v19876_v13  ;;  %v15200_v13 = vcombine.low %v3594_v51, %v3598_v6  ;;  %v15225_v8 = vcombine.high %v3618_v16, %v3622_v3  ;;  %v15227_v10 = vcombine.high %v3619_v32, %v3623_v12 }
 0x51f   :  { %4785 = vmatprep.mubr.bf16.mxu1 %v19889_v60  ;;  %4878 = vmatprep.mubr.bf16.mxu0 %v19889_v60  ;;  %v15211_v60 = vcombine.high %v3603_v48, %v3607_v17  ;;  %v15224_v51 = vcombine.low %v3618_v16, %v3622_v3  ;;  %v15226_v6 = vcombine.low %v3619_v32, %v3623_v12 }
 0x520   :  { %5546 = vmatpush1.bf16.msra.mxu1 %v15184_v57  ;;  %5639 = vmatpush1.bf16.msra.mxu0 %v15186_v23  ;;  %v3626_v57 = vld [vmem:[#allocation7 + $0x380] sm:$0xff] }
 0x521   :  { %5547 = vmatprep.subr.bf16.mxu1 %v15193_v21  ;;  %5640 = vmatprep.subr.bf16.mxu0 %v15195_v18  ;;  %v3630_v23 = vld [vmem:[#allocation7 + $0x3a0] sm:$0xff]  ;;  %v3627_v21 = vld [vmem:[#allocation7 + $0x388] sm:$0xff] }
 0x522   :  { %v3631_v18 = vld [vmem:[#allocation7 + $0x3a8] sm:$0xff]  ;;  %v15233_v39 = vcombine.high %v3626_v57, %v3630_v23  ;;  %v15232_v25 = vcombine.low %v3626_v57, %v3630_v23 }
 0x523   :  { %v15235_v59 = vcombine.high %v3627_v21, %v3631_v18  ;;  %v15234_v41 = vcombine.low %v3627_v21, %v3631_v18 }
 0x524   :  { %5548 = vmatpush1.bf16.msra.mxu1 %v15192_v27  ;;  %5641 = vmatpush1.bf16.msra.mxu0 %v15194_v50  ;;  %v3634_v27 = vld [vmem:[#allocation7 + $0x3c0] sm:$0xff] }
 0x525   :  { %5549 = vmatprep.subr.bf16.mxu1 %v15201_v28  ;;  %5642 = vmatprep.subr.bf16.mxu0 %v15203_v46  ;;  %v3638_v50 = vld [vmem:[#allocation7 + $0x3e0] sm:$0xff]  ;;  %v3635_v28 = vld [vmem:[#allocation7 + $0x3c8] sm:$0xff] }
 0x526   :  { %4786 = vmatmul.mubr.bf16.gmra.mrb[104].mxu1 %v19897_v24  ;;  %4879 = vmatmul.mubr.bf16.gmra.mrb[124].mxu0 %v19897_v24  ;;  %v15216_v24 = vcombine.low %v3610_v47, %v3614_v36  ;;  %v3639_v46 = vld [vmem:[#allocation7 + $0x3e8] sm:$0xff]  ;;  %v15241_v48 = vcombine.high %v3634_v27, %v3638_v50  ;;  %v15240_v47 = vcombine.low %v3634_v27, %v3638_v50 }
 0x527   :  { %5561 = vmatprep.mubr.bf16.mxu1 %v19640_v53  ;;  %5654 = vmatprep.mubr.bf16.mxu0 %v19640_v53  ;;  %v15243_v17 = vcombine.high %v3635_v28, %v3639_v46  ;;  %v15242_v36 = vcombine.low %v3635_v28, %v3639_v46 }
 0x528   :  { %5550 = vmatpush1.bf16.msra.mxu1 %v15200_v13  ;;  %5643 = vmatpush1.bf16.msra.mxu0 %v15202_v40  ;;  %v3516_v13 = vld [vmem:[#allocation7 + $0x10] sm:$0xff] }
 0x529   :  { %5551 = vmatprep.subr.bf16.mxu1 %v15209_v20  ;;  %5644 = vmatprep.subr.bf16.mxu0 %v15211_v60  ;;  %v3520_v40 = vld [vmem:[#allocation7 + $0x30] sm:$0xff]  ;;  %v3517_v20 = vld [vmem:[#allocation7 + $0x18] sm:$0xff] }
 0x52a   :  { %v3521_v60 = vld [vmem:[#allocation7 + $0x38] sm:$0xff]  ;;  %v15125_v61 = vcombine.high %v3516_v13, %v3520_v40  ;;  %v15124_v16 = vcombine.low %v3516_v13, %v3520_v40 }
 0x52b   :  { %v15127_v22 = vcombine.high %v3517_v20, %v3521_v60  ;;  %v15126_v3 = vcombine.low %v3517_v20, %v3521_v60 }
 0x52c   :  { %5552 = vmatpush1.bf16.msra.mxu1 %v15208_v7  ;;  %5645 = vmatpush1.bf16.msra.mxu0 %v15210_v45  ;;  %v3524_v7 = vld [vmem:[#allocation7 + $0x50] sm:$0xff] }
 0x52d   :  { %5553 = vmatprep.subr.bf16.mxu1 %v15217_v37  ;;  %5646 = vmatprep.subr.bf16.mxu0 %v15219_v63  ;;  %v3528_v45 = vld [vmem:[#allocation7 + $0x70] sm:$0xff]  ;;  %v3525_v37 = vld [vmem:[#allocation7 + $0x58] sm:$0xff] }
 0x52e   :  { %v3529_v63 = vld [vmem:[#allocation7 + $0x78] sm:$0xff]  ;;  %v15133_v32 = vcombine.high %v3524_v7, %v3528_v45  ;;  %v15132_v57 = vcombine.low %v3524_v7, %v3528_v45 }
 0x52f   :  { %v15135_v12 = vcombine.high %v3525_v37, %v3529_v63  ;;  %v15134_v23 = vcombine.low %v3525_v37, %v3529_v63 }
 0x530   :  { %5554 = vmatpush1.bf16.msra.mxu1 %v15216_v24  ;;  %5647 = vmatpush1.bf16.msra.mxu0 %v15218_v35  ;;  %v3532_v24 = vld [vmem:[#allocation7 + $0x90] sm:$0xff] }
 0x531   :  { %5555 = vmatprep.subr.bf16.mxu1 %v15225_v8  ;;  %5648 = vmatprep.subr.bf16.mxu0 %v15227_v10  ;;  %v3536_v35 = vld [vmem:[#allocation7 + $0xb0] sm:$0xff]  ;;  %v3533_v8 = vld [vmem:[#allocation7 + $0x98] sm:$0xff] }
 0x532   :  { %v3537_v10 = vld [vmem:[#allocation7 + $0xb8] sm:$0xff]  ;;  %v15141_v21 = vcombine.high %v3532_v24, %v3536_v35  ;;  %v15140_v27 = vcombine.low %v3532_v24, %v3536_v35 }
 0x533   :  { %v15143_v18 = vcombine.high %v3533_v8, %v3537_v10  ;;  %v15142_v50 = vcombine.low %v3533_v8, %v3537_v10 }
 0x534   :  { %5556 = vmatpush1.bf16.msra.mxu1 %v15224_v51  ;;  %5649 = vmatpush1.bf16.msra.mxu0 %v15226_v6  ;;  %v3540_v51 = vld [vmem:[#allocation7 + $0xd0] sm:$0xff] }
 0x535   :  { %5557 = vmatprep.subr.bf16.mxu1 %v15233_v39  ;;  %5650 = vmatprep.subr.bf16.mxu0 %v15235_v59  ;;  %v3544_v6 = vld [vmem:[#allocation7 + $0xf0] sm:$0xff]  ;;  %v3541_v39 = vld [vmem:[#allocation7 + $0xd8] sm:$0xff] }
 0x536   :  { %v3545_v59 = vld [vmem:[#allocation7 + $0xf8] sm:$0xff]  ;;  %v15149_v28 = vcombine.high %v3540_v51, %v3544_v6  ;;  %v15148_v13 = vcombine.low %v3540_v51, %v3544_v6 }
 0x537   :  { %v15151_v46 = vcombine.high %v3541_v39, %v3545_v59  ;;  %v15150_v40 = vcombine.low %v3541_v39, %v3545_v59 }
 0x538   :  { %5558 = vmatpush1.bf16.msra.mxu1 %v15232_v25  ;;  %5651 = vmatpush1.bf16.msra.mxu0 %v15234_v41  ;;  %v3548_v25 = vld [vmem:[#allocation7 + $0x110] sm:$0xff] }
 0x539   :  { %5559 = vmatprep.subr.bf16.mxu1 %v15241_v48  ;;  %5652 = vmatprep.subr.bf16.mxu0 %v15243_v17  ;;  %v3552_v41 = vld [vmem:[#allocation7 + $0x130] sm:$0xff]  ;;  %v3549_v48 = vld [vmem:[#allocation7 + $0x118] sm:$0xff] }
 0x53a   :  { %v3553_v17 = vld [vmem:[#allocation7 + $0x138] sm:$0xff]  ;;  %v15157_v20 = vcombine.high %v3548_v25, %v3552_v41  ;;  %v15156_v7 = vcombine.low %v3548_v25, %v3552_v41 }
 0x53b   :  { %v15159_v60 = vcombine.high %v3549_v48, %v3553_v17  ;;  %v15158_v45 = vcombine.low %v3549_v48, %v3553_v17 }
 0x53c   :  { %5560 = vmatpush1.bf16.msra.mxu1 %v15240_v47  ;;  %5653 = vmatpush1.bf16.msra.mxu0 %v15242_v36  ;;  %v3556_v47 = vld [vmem:[#allocation7 + $0x150] sm:$0xff] }
 0x53d   :  { %5715 = vmatprep.subr.bf16.mxu1 %v15125_v61  ;;  %5808 = vmatprep.subr.bf16.mxu0 %v15127_v22  ;;  %v3560_v36 = vld [vmem:[#allocation7 + $0x170] sm:$0xff]  ;;  %v3557_v61 = vld [vmem:[#allocation7 + $0x158] sm:$0xff] }
 0x53e   :  { %v3561_v22 = vld [vmem:[#allocation7 + $0x178] sm:$0xff]  ;;  %v15165_v37 = vcombine.high %v3556_v47, %v3560_v36  ;;  %v15164_v24 = vcombine.low %v3556_v47, %v3560_v36 }
 0x53f   :  { %5562 = vmatmul.mubr.bf16.vlgmr.msra.gmra.mrb[60].mxu1 %v19638_v49  ;;  %5655 = vmatmul.mubr.bf16.vlgmr.msra.gmra.mrb[80].mxu0 %v19638_v49  ;;  %v15167_v63 = vcombine.high %v3557_v61, %v3561_v22  ;;  %v15166_v35 = vcombine.low %v3557_v61, %v3561_v22 }
 0x540   :  { %5571 = vmatprep.mubr.bf16.mxu1 %v19658_v26  ;;  %5664 = vmatprep.mubr.bf16.mxu0 %v19658_v26 }
 0x541   :  { %5716 = vmatpush1.bf16.msra.mxu1 %v15124_v16  ;;  %5809 = vmatpush1.bf16.msra.mxu0 %v15126_v3  ;;  %v3564_v16 = vld [vmem:[#allocation7 + $0x190] sm:$0xff] }
 0x542   :  { %5717 = vmatprep.subr.bf16.mxu1 %v15133_v32  ;;  %5810 = vmatprep.subr.bf16.mxu0 %v15135_v12  ;;  %v3568_v3 = vld [vmem:[#allocation7 + $0x1b0] sm:$0xff]  ;;  %v3565_v32 = vld [vmem:[#allocation7 + $0x198] sm:$0xff] }
 0x543   :  { %v3569_v12 = vld [vmem:[#allocation7 + $0x1b8] sm:$0xff]  ;;  %v15173_v8 = vcombine.high %v3564_v16, %v3568_v3  ;;  %v15172_v51 = vcombine.low %v3564_v16, %v3568_v3 }
 0x544   :  { %v15175_v10 = vcombine.high %v3565_v32, %v3569_v12  ;;  %v15174_v6 = vcombine.low %v3565_v32, %v3569_v12 }
 0x545   :  { %5718 = vmatpush1.bf16.msra.mxu1 %v15132_v57  ;;  %5811 = vmatpush1.bf16.msra.mxu0 %v15134_v23  ;;  %v3572_v57 = vld [vmem:[#allocation7 + $0x1d0] sm:$0xff] }
 0x546   :  { %5719 = vmatprep.subr.bf16.mxu1 %v15141_v21  ;;  %5812 = vmatprep.subr.bf16.mxu0 %v15143_v18  ;;  %v3576_v23 = vld [vmem:[#allocation7 + $0x1f0] sm:$0xff]  ;;  %v3573_v21 = vld [vmem:[#allocation7 + $0x1d8] sm:$0xff] }
 0x547   :  { %5572 = vmatmul.mubr.bf16.gmra.mrb[64].mxu1 %v19654_v33  ;;  %5665 = vmatmul.mubr.bf16.gmra.mrb[84].mxu0 %v19654_v33  ;;  %v3577_v18 = vld [vmem:[#allocation7 + $0x1f8] sm:$0xff]  ;;  %v15181_v39 = vcombine.high %v3572_v57, %v3576_v23  ;;  %v15180_v25 = vcombine.low %v3572_v57, %v3576_v23 }
 0x548   :  { %5581 = vmatprep.mubr.bf16.mxu1 %v19684_v43  ;;  %5674 = vmatprep.mubr.bf16.mxu0 %v19684_v43  ;;  %v15183_v59 = vcombine.high %v3573_v21, %v3577_v18  ;;  %v15182_v41 = vcombine.low %v3573_v21, %v3577_v18 }
 0x549   :  { %5720 = vmatpush1.bf16.msra.mxu1 %v15140_v27  ;;  %5813 = vmatpush1.bf16.msra.mxu0 %v15142_v50  ;;  %v3580_v27 = vld [vmem:[#allocation7 + $0x210] sm:$0xff] }
 0x54a   :  { %5721 = vmatprep.subr.bf16.mxu1 %v15149_v28  ;;  %5814 = vmatprep.subr.bf16.mxu0 %v15151_v46  ;;  %v3584_v50 = vld [vmem:[#allocation7 + $0x230] sm:$0xff]  ;;  %v3581_v28 = vld [vmem:[#allocation7 + $0x218] sm:$0xff] }
 0x54b   :  { %v3585_v46 = vld [vmem:[#allocation7 + $0x238] sm:$0xff]  ;;  %v15189_v48 = vcombine.high %v3580_v27, %v3584_v50  ;;  %v15188_v47 = vcombine.low %v3580_v27, %v3584_v50 }
 0x54c   :  { %v15191_v17 = vcombine.high %v3581_v28, %v3585_v46  ;;  %v15190_v36 = vcombine.low %v3581_v28, %v3585_v46 }
 0x54d   :  { %5722 = vmatpush1.bf16.msra.mxu1 %v15148_v13  ;;  %5815 = vmatpush1.bf16.msra.mxu0 %v15150_v40  ;;  %v3588_v13 = vld [vmem:[#allocation7 + $0x250] sm:$0xff] }
 0x54e   :  { %5723 = vmatprep.subr.bf16.mxu1 %v15157_v20  ;;  %5816 = vmatprep.subr.bf16.mxu0 %v15159_v60  ;;  %v3592_v40 = vld [vmem:[#allocation7 + $0x270] sm:$0xff]  ;;  %v3589_v20 = vld [vmem:[#allocation7 + $0x258] sm:$0xff] }
 0x54f   :  { %5582 = vmatmul.mubr.bf16.gmra.mrb[68].mxu1 %v19677_v9  ;;  %5675 = vmatmul.mubr.bf16.gmra.mrb[88].mxu0 %v19677_v9  ;;  %v3593_v60 = vld [vmem:[#allocation7 + $0x278] sm:$0xff]  ;;  %v15197_v61 = vcombine.high %v3588_v13, %v3592_v40  ;;  %v15196_v16 = vcombine.low %v3588_v13, %v3592_v40 }
 0x550   :  { %5591 = vmatprep.mubr.bf16.mxu1 %v19749_v38  ;;  %5684 = vmatprep.mubr.bf16.mxu0 %v19749_v38  ;;  %v15199_v22 = vcombine.high %v3589_v20, %v3593_v60  ;;  %v15198_v3 = vcombine.low %v3589_v20, %v3593_v60 }
 0x551   :  { %5724 = vmatpush1.bf16.msra.mxu1 %v15156_v7  ;;  %5817 = vmatpush1.bf16.msra.mxu0 %v15158_v45  ;;  %v3596_v7 = vld [vmem:[#allocation7 + $0x290] sm:$0xff] }
 0x552   :  { %5725 = vmatprep.subr.bf16.mxu1 %v15165_v37  ;;  %5818 = vmatprep.subr.bf16.mxu0 %v15167_v63  ;;  %v3600_v45 = vld [vmem:[#allocation7 + $0x2b0] sm:$0xff]  ;;  %v3597_v37 = vld [vmem:[#allocation7 + $0x298] sm:$0xff] }
 0x553   :  { %v3601_v63 = vld [vmem:[#allocation7 + $0x2b8] sm:$0xff]  ;;  %v15205_v32 = vcombine.high %v3596_v7, %v3600_v45  ;;  %v15204_v57 = vcombine.low %v3596_v7, %v3600_v45 }
 0x554   :  { %v15207_v12 = vcombine.high %v3597_v37, %v3601_v63  ;;  %v15206_v23 = vcombine.low %v3597_v37, %v3601_v63 }
 0x555   :  { %5726 = vmatpush1.bf16.msra.mxu1 %v15164_v24  ;;  %5819 = vmatpush1.bf16.msra.mxu0 %v15166_v35  ;;  %v3604_v24 = vld [vmem:[#allocation7 + $0x2d0] sm:$0xff] }
 0x556   :  { %5727 = vmatprep.subr.bf16.mxu1 %v15173_v8  ;;  %5820 = vmatprep.subr.bf16.mxu0 %v15175_v10  ;;  %v3608_v35 = vld [vmem:[#allocation7 + $0x2f0] sm:$0xff]  ;;  %v3605_v8 = vld [vmem:[#allocation7 + $0x2d8] sm:$0xff] }
 0x557   :  { %5592 = vmatmul.mubr.bf16.gmra.mrb[72].mxu1 %v19730_v34  ;;  %5685 = vmatmul.mubr.bf16.gmra.mrb[92].mxu0 %v19730_v34  ;;  %v3609_v10 = vld [vmem:[#allocation7 + $0x2f8] sm:$0xff]  ;;  %v15213_v21 = vcombine.high %v3604_v24, %v3608_v35  ;;  %v15212_v27 = vcombine.low %v3604_v24, %v3608_v35 }
 0x558   :  { %5601 = vmatprep.mubr.bf16.mxu1 %v19801_v1  ;;  %5694 = vmatprep.mubr.bf16.mxu0 %v19801_v1  ;;  %v15215_v18 = vcombine.high %v3605_v8, %v3609_v10  ;;  %v15214_v50 = vcombine.low %v3605_v8, %v3609_v10 }
 0x559   :  { %5728 = vmatpush1.bf16.msra.mxu1 %v15172_v51  ;;  %5821 = vmatpush1.bf16.msra.mxu0 %v15174_v6  ;;  %v3612_v51 = vld [vmem:[#allocation7 + $0x310] sm:$0xff] }
 0x55a   :  { %5729 = vmatprep.subr.bf16.mxu1 %v15181_v39  ;;  %5822 = vmatprep.subr.bf16.mxu0 %v15183_v59  ;;  %v3616_v6 = vld [vmem:[#allocation7 + $0x330] sm:$0xff]  ;;  %v3613_v39 = vld [vmem:[#allocation7 + $0x318] sm:$0xff] }
 0x55b   :  { %v3617_v59 = vld [vmem:[#allocation7 + $0x338] sm:$0xff]  ;;  %v15221_v28 = vcombine.high %v3612_v51, %v3616_v6  ;;  %v15220_v13 = vcombine.low %v3612_v51, %v3616_v6 }
 0x55c   :  { %v15223_v46 = vcombine.high %v3613_v39, %v3617_v59  ;;  %v15222_v40 = vcombine.low %v3613_v39, %v3617_v59 }
 0x55d   :  { %5730 = vmatpush1.bf16.msra.mxu1 %v15180_v25  ;;  %5823 = vmatpush1.bf16.msra.mxu0 %v15182_v41  ;;  %v3620_v25 = vld [vmem:[#allocation7 + $0x350] sm:$0xff] }
 0x55e   :  { %5731 = vmatprep.subr.bf16.mxu1 %v15189_v48  ;;  %5824 = vmatprep.subr.bf16.mxu0 %v15191_v17  ;;  %v3624_v41 = vld [vmem:[#allocation7 + $0x370] sm:$0xff]  ;;  %v3621_v48 = vld [vmem:[#allocation7 + $0x358] sm:$0xff] }
 0x55f   :  { %5602 = vmatmul.mubr.bf16.gmra.mrb[76].mxu1 %v19788_v29  ;;  %5695 = vmatmul.mubr.bf16.gmra.mrb[96].mxu0 %v19788_v29  ;;  %v3625_v17 = vld [vmem:[#allocation7 + $0x378] sm:$0xff]  ;;  %v15229_v20 = vcombine.high %v3620_v25, %v3624_v41  ;;  %v15228_v7 = vcombine.low %v3620_v25, %v3624_v41 }
 0x560   :  { %5611 = vmatprep.mubr.bf16.mxu1 %v19858_v52  ;;  %5704 = vmatprep.mubr.bf16.mxu0 %v19858_v52  ;;  %v15231_v60 = vcombine.high %v3621_v48, %v3625_v17  ;;  %v15230_v45 = vcombine.low %v3621_v48, %v3625_v17 }
 0x561   :  { %5732 = vmatpush1.bf16.msra.mxu1 %v15188_v47  ;;  %5825 = vmatpush1.bf16.msra.mxu0 %v15190_v36  ;;  %v3628_v47 = vld [vmem:[#allocation7 + $0x390] sm:$0xff] }
 0x562   :  { %5733 = vmatprep.subr.bf16.mxu1 %v15197_v61  ;;  %5826 = vmatprep.subr.bf16.mxu0 %v15199_v22  ;;  %v3632_v36 = vld [vmem:[#allocation7 + $0x3b0] sm:$0xff]  ;;  %v3629_v61 = vld [vmem:[#allocation7 + $0x398] sm:$0xff] }
 0x563   :  { %v3633_v22 = vld [vmem:[#allocation7 + $0x3b8] sm:$0xff]  ;;  %v15237_v37 = vcombine.high %v3628_v47, %v3632_v36  ;;  %v15236_v24 = vcombine.low %v3628_v47, %v3632_v36 }
 0x564   :  { %v15239_v63 = vcombine.high %v3629_v61, %v3633_v22  ;;  %v15238_v35 = vcombine.low %v3629_v61, %v3633_v22 }
 0x565   :  { %5734 = vmatpush1.bf16.msra.mxu1 %v15196_v16  ;;  %5827 = vmatpush1.bf16.msra.mxu0 %v15198_v3  ;;  %v3636_v16 = vld [vmem:[#allocation7 + $0x3d0] sm:$0xff] }
 0x566   :  { %5735 = vmatprep.subr.bf16.mxu1 %v15205_v32  ;;  %5828 = vmatprep.subr.bf16.mxu0 %v15207_v12  ;;  %v3640_v3 = vld [vmem:[#allocation7 + $0x3f0] sm:$0xff]  ;;  %v3637_v32 = vld [vmem:[#allocation7 + $0x3d8] sm:$0xff] }
 0x567   :  { %5612 = vmatmul.mubr.bf16.gmra.mrb[80].mxu1 %v19846_v4  ;;  %5705 = vmatmul.mubr.bf16.gmra.mrb[100].mxu0 %v19846_v4  ;;  %v3641_v12 = vld [vmem:[#allocation7 + $0x3f8] sm:$0xff]  ;;  %v15245_v8 = vcombine.high %v3636_v16, %v3640_v3  ;;  %v15244_v51 = vcombine.low %v3636_v16, %v3640_v3 }
 0x568   :  { %5747 = vmatprep.mubr.bf16.mxu1 %v19640_v53  ;;  %5840 = vmatprep.mubr.bf16.mxu0 %v19640_v53  ;;  %v15247_v10 = vcombine.high %v3637_v32, %v3641_v12  ;;  %v15246_v6 = vcombine.low %v3637_v32, %v3641_v12 }
 0x569   :  { %5736 = vmatpush1.bf16.msra.mxu1 %v15204_v57  ;;  %5829 = vmatpush1.bf16.msra.mxu0 %v15206_v23  ;;  %v5902_v57 = vld [vmem:[#allocation7 + $0x800] sm:$0xff] }
 0x56a   :  { %5737 = vmatprep.subr.bf16.mxu1 %v15213_v21  ;;  %5830 = vmatprep.subr.bf16.mxu0 %v15215_v18  ;;  %v5906_v23 = vld [vmem:[#allocation7 + $0x820] sm:$0xff]  ;;  %v5903_v21 = vld [vmem:[#allocation7 + $0x808] sm:$0xff] }
 0x56b   :  { %v5907_v18 = vld [vmem:[#allocation7 + $0x828] sm:$0xff]  ;;  %v15249_v39 = vcombine.high %v5902_v57, %v5906_v23  ;;  %v15248_v25 = vcombine.low %v5902_v57, %v5906_v23 }
 0x56c   :  { %v15251_v59 = vcombine.high %v5903_v21, %v5907_v18  ;;  %v15250_v41 = vcombine.low %v5903_v21, %v5907_v18 }
 0x56d   :  { %5738 = vmatpush1.bf16.msra.mxu1 %v15212_v27  ;;  %5831 = vmatpush1.bf16.msra.mxu0 %v15214_v50  ;;  %v5910_v27 = vld [vmem:[#allocation7 + $0x840] sm:$0xff] }
 0x56e   :  { %5739 = vmatprep.subr.bf16.mxu1 %v15221_v28  ;;  %5832 = vmatprep.subr.bf16.mxu0 %v15223_v46  ;;  %v5914_v50 = vld [vmem:[#allocation7 + $0x860] sm:$0xff]  ;;  %v5911_v28 = vld [vmem:[#allocation7 + $0x848] sm:$0xff] }
 0x56f   :  { %v5915_v46 = vld [vmem:[#allocation7 + $0x868] sm:$0xff]  ;;  %v15257_v48 = vcombine.high %v5910_v27, %v5914_v50  ;;  %v15256_v47 = vcombine.low %v5910_v27, %v5914_v50 }
 0x570   :  { %v15259_v17 = vcombine.high %v5911_v28, %v5915_v46  ;;  %v15258_v36 = vcombine.low %v5911_v28, %v5915_v46 }
 0x571   :  { %5740 = vmatpush1.bf16.msra.mxu1 %v15220_v13  ;;  %5833 = vmatpush1.bf16.msra.mxu0 %v15222_v40  ;;  %v5918_v13 = vld [vmem:[#allocation7 + $0x880] sm:$0xff] }
 0x572   :  { %5741 = vmatprep.subr.bf16.mxu1 %v15229_v20  ;;  %5834 = vmatprep.subr.bf16.mxu0 %v15231_v60  ;;  %v5922_v40 = vld [vmem:[#allocation7 + $0x8a0] sm:$0xff]  ;;  %v5919_v20 = vld [vmem:[#allocation7 + $0x888] sm:$0xff] }
 0x573   :  { %v5923_v60 = vld [vmem:[#allocation7 + $0x8a8] sm:$0xff]  ;;  %v15265_v61 = vcombine.high %v5918_v13, %v5922_v40  ;;  %v15264_v16 = vcombine.low %v5918_v13, %v5922_v40 }
 0x574   :  { %v15267_v22 = vcombine.high %v5919_v20, %v5923_v60  ;;  %v15266_v3 = vcombine.low %v5919_v20, %v5923_v60 }
 0x575   :  { %5742 = vmatpush1.bf16.msra.mxu1 %v15228_v7  ;;  %5835 = vmatpush1.bf16.msra.mxu0 %v15230_v45  ;;  %v5926_v7 = vld [vmem:[#allocation7 + $0x8c0] sm:$0xff] }
 0x576   :  { %5743 = vmatprep.subr.bf16.mxu1 %v15237_v37  ;;  %5836 = vmatprep.subr.bf16.mxu0 %v15239_v63  ;;  %v5930_v45 = vld [vmem:[#allocation7 + $0x8e0] sm:$0xff]  ;;  %v5927_v37 = vld [vmem:[#allocation7 + $0x8c8] sm:$0xff] }
 0x577   :  { %v5931_v63 = vld [vmem:[#allocation7 + $0x8e8] sm:$0xff]  ;;  %v15273_v32 = vcombine.high %v5926_v7, %v5930_v45  ;;  %v15272_v57 = vcombine.low %v5926_v7, %v5930_v45 }
 0x578   :  { %v15275_v12 = vcombine.high %v5927_v37, %v5931_v63  ;;  %v15274_v23 = vcombine.low %v5927_v37, %v5931_v63 }
 0x579   :  { %5744 = vmatpush1.bf16.msra.mxu1 %v15236_v24  ;;  %5837 = vmatpush1.bf16.msra.mxu0 %v15238_v35  ;;  %v5934_v24 = vld [vmem:[#allocation7 + $0x900] sm:$0xff] }
 0x57a   :  { %5745 = vmatprep.subr.bf16.mxu1 %v15245_v8  ;;  %5838 = vmatprep.subr.bf16.mxu0 %v15247_v10  ;;  %v5938_v35 = vld [vmem:[#allocation7 + $0x920] sm:$0xff]  ;;  %v5935_v8 = vld [vmem:[#allocation7 + $0x908] sm:$0xff] }
 0x57b   :  { %v5939_v10 = vld [vmem:[#allocation7 + $0x928] sm:$0xff]  ;;  %v15281_v21 = vcombine.high %v5934_v24, %v5938_v35  ;;  %v15280_v27 = vcombine.low %v5934_v24, %v5938_v35 }
 0x57c   :  { %v15283_v18 = vcombine.high %v5935_v8, %v5939_v10  ;;  %v15282_v50 = vcombine.low %v5935_v8, %v5939_v10 }
 0x57d   :  { %5746 = vmatpush1.bf16.msra.mxu1 %v15244_v51  ;;  %5839 = vmatpush1.bf16.msra.mxu0 %v15246_v6  ;;  %v5942_v51 = vld [vmem:[#allocation7 + $0x940] sm:$0xff] }
 0x57e   :  { %6716 = vmatprep.subr.bf16.mxu1 %v15249_v39  ;;  %6809 = vmatprep.subr.bf16.mxu0 %v15251_v59  ;;  %v5946_v6 = vld [vmem:[#allocation7 + $0x960] sm:$0xff]  ;;  %v5943_v39 = vld [vmem:[#allocation7 + $0x948] sm:$0xff] }
 0x57f   :  { %v5947_v59 = vld [vmem:[#allocation7 + $0x968] sm:$0xff]  ;;  %v15289_v28 = vcombine.high %v5942_v51, %v5946_v6  ;;  %v15288_v13 = vcombine.low %v5942_v51, %v5946_v6 }
 0x580   :  { %5748 = vmatmul.mubr.bf16.vlgmr.msra.gmra.mrb[84].mxu1 %v19638_v49  ;;  %5841 = vmatmul.mubr.bf16.vlgmr.msra.gmra.mrb[104].mxu0 %v19638_v49  ;;  %v15291_v46 = vcombine.high %v5943_v39, %v5947_v59  ;;  %v15290_v40 = vcombine.low %v5943_v39, %v5947_v59 }
 0x581   :  { %5757 = vmatprep.mubr.bf16.mxu1 %v19658_v26  ;;  %5850 = vmatprep.mubr.bf16.mxu0 %v19658_v26 }
 0x582   :  { %6717 = vmatpush1.bf16.msra.mxu1 %v15248_v25  ;;  %6810 = vmatpush1.bf16.msra.mxu0 %v15250_v41  ;;  %v5950_v25 = vld [vmem:[#allocation7 + $0x980] sm:$0xff] }
 0x583   :  { %6718 = vmatprep.subr.bf16.mxu1 %v15257_v48  ;;  %6811 = vmatprep.subr.bf16.mxu0 %v15259_v17  ;;  %v5954_v41 = vld [vmem:[#allocation7 + $0x9a0] sm:$0xff]  ;;  %v5951_v48 = vld [vmem:[#allocation7 + $0x988] sm:$0xff] }
 0x584   :  { %v5955_v17 = vld [vmem:[#allocation7 + $0x9a8] sm:$0xff]  ;;  %v15297_v20 = vcombine.high %v5950_v25, %v5954_v41  ;;  %v15296_v7 = vcombine.low %v5950_v25, %v5954_v41 }
 0x585   :  { %v15299_v60 = vcombine.high %v5951_v48, %v5955_v17  ;;  %v15298_v45 = vcombine.low %v5951_v48, %v5955_v17 }
 0x586   :  { %6719 = vmatpush1.bf16.msra.mxu1 %v15256_v47  ;;  %6812 = vmatpush1.bf16.msra.mxu0 %v15258_v36  ;;  %v5958_v47 = vld [vmem:[#allocation7 + $0x9c0] sm:$0xff] }
 0x587   :  { %6720 = vmatprep.subr.bf16.mxu1 %v15265_v61  ;;  %6813 = vmatprep.subr.bf16.mxu0 %v15267_v22  ;;  %v5962_v36 = vld [vmem:[#allocation7 + $0x9e0] sm:$0xff]  ;;  %v5959_v61 = vld [vmem:[#allocation7 + $0x9c8] sm:$0xff] }
 0x588   :  { %5758 = vmatmul.mubr.bf16.gmra.mrb[88].mxu1 %v19654_v33  ;;  %5851 = vmatmul.mubr.bf16.gmra.mrb[108].mxu0 %v19654_v33  ;;  %v5963_v22 = vld [vmem:[#allocation7 + $0x9e8] sm:$0xff]  ;;  %v15305_v37 = vcombine.high %v5958_v47, %v5962_v36  ;;  %v15304_v24 = vcombine.low %v5958_v47, %v5962_v36 }
 0x589   :  { %5767 = vmatprep.mubr.bf16.mxu1 %v19684_v43  ;;  %5860 = vmatprep.mubr.bf16.mxu0 %v19684_v43  ;;  %v15307_v63 = vcombine.high %v5959_v61, %v5963_v22  ;;  %v15306_v35 = vcombine.low %v5959_v61, %v5963_v22  ;;  %v5995_v47 = vld [vmem:[#allocation7 + $0xae8] sm:$0xff]  ;;  %v6045_v22 = vrot.slane %v19640_v53, 1 }
 0x58a   :  { %6721 = vmatpush1.bf16.msra.mxu1 %v15264_v16  ;;  %6814 = vmatpush1.bf16.msra.mxu0 %v15266_v3  ;;  %v5966_v16 = vld [vmem:[#allocation7 + $0xa00] sm:$0xff] }
 0x58b   :  { %6722 = vmatprep.subr.bf16.mxu1 %v15273_v32  ;;  %6815 = vmatprep.subr.bf16.mxu0 %v15275_v12  ;;  %v5970_v3 = vld [vmem:[#allocation7 + $0xa20] sm:$0xff]  ;;  %v5967_v32 = vld [vmem:[#allocation7 + $0xa08] sm:$0xff] }
 0x58c   :  { %v5971_v12 = vld [vmem:[#allocation7 + $0xa28] sm:$0xff]  ;;  %v15313_v8 = vcombine.high %v5966_v16, %v5970_v3  ;;  %v15312_v51 = vcombine.low %v5966_v16, %v5970_v3  ;;  %v6002_v16 = vld [vmem:[#allocation7 + $0xb20] sm:$0xff] }
 0x58d   :  { %v15315_v10 = vcombine.high %v5967_v32, %v5971_v12  ;;  %v15314_v6 = vcombine.low %v5967_v32, %v5971_v12  ;;  %v5999_v3 = vld [vmem:[#allocation7 + $0xb08] sm:$0xff] }
 0x58e   :  { %6723 = vmatpush1.bf16.msra.mxu1 %v15272_v57  ;;  %6816 = vmatpush1.bf16.msra.mxu0 %v15274_v23  ;;  %v5974_v57 = vld [vmem:[#allocation7 + $0xa40] sm:$0xff]  ;;  %v6003_v32 = vld [vmem:[#allocation7 + $0xb28] sm:$0xff] }
 0x58f   :  { %6724 = vmatprep.subr.bf16.mxu1 %v15281_v21  ;;  %6817 = vmatprep.subr.bf16.mxu0 %v15283_v18  ;;  %v5978_v23 = vld [vmem:[#allocation7 + $0xa60] sm:$0xff]  ;;  %v5975_v21 = vld [vmem:[#allocation7 + $0xa48] sm:$0xff] }
 0x590   :  { %5768 = vmatmul.mubr.bf16.gmra.mrb[92].mxu1 %v19677_v9  ;;  %5861 = vmatmul.mubr.bf16.gmra.mrb[112].mxu0 %v19677_v9  ;;  %v5979_v18 = vld [vmem:[#allocation7 + $0xa68] sm:$0xff]  ;;  %v15321_v39 = vcombine.high %v5974_v57, %v5978_v23  ;;  %v15320_v25 = vcombine.low %v5974_v57, %v5978_v23  ;;  %v6010_v57 = vld [vmem:[#allocation7 + $0xb60] sm:$0xff] }
 0x591   :  { %5777 = vmatprep.mubr.bf16.mxu1 %v19749_v38  ;;  %5870 = vmatprep.mubr.bf16.mxu0 %v19749_v38  ;;  %v15323_v59 = vcombine.high %v5975_v21, %v5979_v18  ;;  %v15322_v41 = vcombine.low %v5975_v21, %v5979_v18  ;;  %v6007_v23 = vld [vmem:[#allocation7 + $0xb48] sm:$0xff] }
 0x592   :  { %6725 = vmatpush1.bf16.msra.mxu1 %v15280_v27  ;;  %6818 = vmatpush1.bf16.msra.mxu0 %v15282_v50  ;;  %v5982_v27 = vld [vmem:[#allocation7 + $0xa80] sm:$0xff]  ;;  %v6011_v21 = vld [vmem:[#allocation7 + $0xb68] sm:$0xff] }
 0x593   :  { %6726 = vmatprep.subr.bf16.mxu1 %v15289_v28  ;;  %6819 = vmatprep.subr.bf16.mxu0 %v15291_v46  ;;  %v5986_v50 = vld [vmem:[#allocation7 + $0xaa0] sm:$0xff]  ;;  %v5983_v28 = vld [vmem:[#allocation7 + $0xa88] sm:$0xff] }
 0x594   :  { %v5987_v46 = vld [vmem:[#allocation7 + $0xaa8] sm:$0xff]  ;;  %v15329_v48 = vcombine.high %v5982_v27, %v5986_v50  ;;  %v15328_v36 = vcombine.low %v5982_v27, %v5986_v50  ;;  %v6018_v27 = vld [vmem:[#allocation7 + $0xba0] sm:$0xff] }
 0x595   :  { %v15331_v17 = vcombine.high %v5983_v28, %v5987_v46  ;;  %v15330_v61 = vcombine.low %v5983_v28, %v5987_v46  ;;  %v6015_v50 = vld [vmem:[#allocation7 + $0xb88] sm:$0xff] }
 0x596   :  { %6727 = vmatpush1.bf16.msra.mxu1 %v15288_v13  ;;  %6820 = vmatpush1.bf16.msra.mxu0 %v15290_v40  ;;  %v5990_v13 = vld [vmem:[#allocation7 + $0xac0] sm:$0xff]  ;;  %v6046_v40 = vrot.slane %v19658_v26, 1  ;;  %v6019_v28 = vld [vmem:[#allocation7 + $0xba8] sm:$0xff] }
 0x597   :  { %6728 = vmatprep.subr.bf16.mxu1 %v15297_v20  ;;  %6821 = vmatprep.subr.bf16.mxu0 %v15299_v60  ;;  %v5994_v20 = vld [vmem:[#allocation7 + $0xae0] sm:$0xff]  ;;  %v5991_v60 = vld [vmem:[#allocation7 + $0xac8] sm:$0xff] }
 0x598   :  { %5778 = vmatmul.mubr.bf16.gmra.mrb[96].mxu1 %v19730_v34  ;;  %5871 = vmatmul.mubr.bf16.gmra.mrb[116].mxu0 %v19730_v34  ;;  %v15336_v12 = vcombine.low %v5990_v13, %v5994_v20 }
 0x599   :  { %5787 = vmatprep.mubr.bf16.mxu1 %v19801_v1  ;;  %5880 = vmatprep.mubr.bf16.mxu0 %v19801_v1 }
 0x59a   :  { %6729 = vmatpush1.bf16.msra.mxu1 %v15296_v7  ;;  %6822 = vmatpush1.bf16.msra.mxu0 %v15298_v45  ;;  %v15337_v7 = vcombine.high %v5990_v13, %v5994_v20  ;;  %v15339_v45 = vcombine.high %v5991_v60, %v5995_v47  ;;  %v6026_v13 = vld [vmem:[#allocation7 + $0xbe0] sm:$0xff]  ;;  %v6023_v20 = vld [vmem:[#allocation7 + $0xbc8] sm:$0xff] }
 0x59b   :  { %6730 = vmatprep.subr.bf16.mxu1 %v15305_v37  ;;  %6823 = vmatprep.subr.bf16.mxu0 %v15307_v63  ;;  %v5998_v37 = vld [vmem:[#allocation7 + $0xb00] sm:$0xff]  ;;  %v19983_v63 = vsel %vm1221_vm4, %v6045_v22, %v6046_v40 }
 0x59c   :  { %v15344_v18 = vcombine.low %v5998_v37, %v6002_v16 }
 0x59e   :  { %6731 = vmatpush1.bf16.msra.mxu1 %v15304_v24  ;;  %6824 = vmatpush1.bf16.msra.mxu0 %v15306_v35  ;;  %v15338_v24 = vcombine.low %v5991_v60, %v5995_v47  ;;  %v15345_v35 = vcombine.high %v5998_v37, %v6002_v16  ;;  %v6027_v60 = vld [vmem:[#allocation7 + $0xbe8] sm:$0xff]  ;;  %v5905_v37 = vld [vmem:[#allocation7 + $0x818] sm:$0xff] }
 0x59f   :  { %6732 = vmatprep.subr.bf16.mxu1 %v15313_v8  ;;  %6825 = vmatprep.subr.bf16.mxu0 %v15315_v10  ;;  %v15347_v8 = vcombine.high %v5999_v3, %v6003_v32  ;;  %v6006_v10 = vld [vmem:[#allocation7 + $0xb40] sm:$0xff]  ;;  %v15371_v22 = vcombine.high %v6023_v20, %v6027_v60  ;;  %v5909_v16 = vld [vmem:[#allocation7 + $0x838] sm:$0xff] }
 0x5a0   :  { %5788 = vmatmul.mubr.bf16.gmra.mrb[100].mxu1 %v19788_v29  ;;  %5881 = vmatmul.mubr.bf16.gmra.mrb[120].mxu0 %v19788_v29  ;;  %v15352_v46 = vcombine.low %v6006_v10, %v6010_v57 }
 0x5a1   :  { %5797 = vmatprep.mubr.bf16.mxu1 %v19858_v52  ;;  %5890 = vmatprep.mubr.bf16.mxu0 %v19858_v52 }
 0x5a2   :  { %6733 = vmatpush1.bf16.msra.mxu1 %v15312_v51  ;;  %6826 = vmatpush1.bf16.msra.mxu0 %v15314_v6  ;;  %v15346_v51 = vcombine.low %v5999_v3, %v6003_v32  ;;  %v15353_v6 = vcombine.high %v6006_v10, %v6010_v57  ;;  %v15370_v32 = vcombine.low %v6023_v20, %v6027_v60  ;;  %v6050_v10 = vrot.slane %v19684_v43, 1  ;;  %v5916_v57 = vld [vmem:[#allocation7 + $0x870] sm:$0xff] }
 0x5a3   :  { %6734 = vmatprep.subr.bf16.mxu1 %v15321_v39  ;;  %6827 = vmatprep.subr.bf16.mxu0 %v15323_v59  ;;  %v15355_v39 = vcombine.high %v6007_v23, %v6011_v21  ;;  %v6014_v59 = vld [vmem:[#allocation7 + $0xb80] sm:$0xff] }
 0x5a4   :  { %v15360_v47 = vcombine.low %v6014_v59, %v6018_v27 }
 0x5a6   :  { %6735 = vmatpush1.bf16.msra.mxu1 %v15320_v25  ;;  %6828 = vmatpush1.bf16.msra.mxu0 %v15322_v41  ;;  %v15354_v25 = vcombine.low %v6007_v23, %v6011_v21  ;;  %v15361_v41 = vcombine.high %v6014_v59, %v6018_v27  ;;  %v5913_v23 = vld [vmem:[#allocation7 + $0x858] sm:$0xff] }
 0x5a7   :  { %6736 = vmatprep.subr.bf16.mxu1 %v15329_v48  ;;  %6829 = vmatprep.subr.bf16.mxu0 %v15331_v17  ;;  %v15363_v48 = vcombine.high %v6015_v50, %v6019_v28  ;;  %v6022_v17 = vld [vmem:[#allocation7 + $0xbc0] sm:$0xff]  ;;  %v5917_v21 = vld [vmem:[#allocation7 + $0x878] sm:$0xff] }
 0x5a8   :  { %5798 = vmatmul.mubr.bf16.gmra.mrb[104].mxu1 %v19846_v4  ;;  %5891 = vmatmul.mubr.bf16.gmra.mrb[124].mxu0 %v19846_v4  ;;  %v15368_v3 = vcombine.low %v6022_v17, %v6026_v13  ;;  %v15263_v27 = vcombine.high %v5913_v23, %v5917_v21 }
 0x5a9   :  { %6748 = vmatprep.mubr.bf16.mxu1 %v19983_v63  ;;  %6841 = vmatprep.mubr.bf16.mxu0 %v19983_v63 }
 0x5aa   :  { %6737 = vmatpush1.bf16.msra.mxu1 %v15328_v36  ;;  %6830 = vmatpush1.bf16.msra.mxu0 %v15330_v61  ;;  %v15362_v36 = vcombine.low %v6015_v50, %v6019_v28  ;;  %v15369_v61 = vcombine.high %v6022_v17, %v6026_v13  ;;  %v5920_v50 = vld [vmem:[#allocation7 + $0x890] sm:$0xff]  ;;  %v19998_v28 = vsel %vm1221_vm4, %v6046_v40, %v6050_v10  ;;  %v6048_v13 = vrot.slane %v19677_v9, 1 }
 0x5ab   :  { %6738 = vmatprep.subr.bf16.mxu1 %v15337_v7  ;;  %6831 = vmatprep.subr.bf16.mxu0 %v15339_v45  ;;  %v5904_v7 = vld [vmem:[#allocation7 + $0x810] sm:$0xff]  ;;  %v15262_v17 = vcombine.low %v5913_v23, %v5917_v21  ;;  %v6054_v40 = vrot.slane %v19749_v38, 1  ;;  %v6052_v21 = vrot.slane %v19730_v34, 1 }
 0x5ac   :  { %v5908_v45 = vld [vmem:[#allocation7 + $0x830] sm:$0xff] }
 0x5ae   :  { %6739 = vmatpush1.bf16.msra.mxu1 %v15336_v12  ;;  %6832 = vmatpush1.bf16.msra.mxu0 %v15338_v24  ;;  %v15253_v12 = vcombine.high %v5904_v7, %v5908_v45  ;;  %v15255_v24 = vcombine.high %v5905_v37, %v5909_v16 }
 0x5af   :  { %6740 = vmatprep.subr.bf16.mxu1 %v15345_v35  ;;  %6833 = vmatprep.subr.bf16.mxu0 %v15347_v8  ;;  %v6043_v35 = vrot.slane %v19654_v33, 1  ;;  %v5912_v8 = vld [vmem:[#allocation7 + $0x850] sm:$0xff] }
 0x5b0   :  { %v15261_v59 = vcombine.high %v5912_v8, %v5916_v57 }
 0x5b2   :  { %6741 = vmatpush1.bf16.msra.mxu1 %v15344_v18  ;;  %6834 = vmatpush1.bf16.msra.mxu0 %v15346_v51  ;;  %v6042_v18 = vrot.slane %v19638_v49, 1  ;;  %v15252_v51 = vcombine.low %v5904_v7, %v5908_v45 }
 0x5b3   :  { %6742 = vmatprep.subr.bf16.mxu1 %v15353_v6  ;;  %6835 = vmatprep.subr.bf16.mxu0 %v15355_v39  ;;  %v15254_v6 = vcombine.low %v5905_v37, %v5909_v16  ;;  %v20005_v37 = vsel %vm1221_vm4, %v6043_v35, %v6048_v13 }
 0x5b4   :  { %v19991_v39 = vsel %vm1221_vm4, %v6042_v18, %v6043_v35 }
 0x5b6   :  { %6743 = vmatpush1.bf16.msra.mxu1 %v15352_v46  ;;  %6836 = vmatpush1.bf16.msra.mxu0 %v15354_v25  ;;  %v5924_v46 = vld [vmem:[#allocation7 + $0x8b0] sm:$0xff]  ;;  %v5921_v25 = vld [vmem:[#allocation7 + $0x898] sm:$0xff] }
 0x5b7   :  { %6744 = vmatprep.subr.bf16.mxu1 %v15361_v41  ;;  %6837 = vmatprep.subr.bf16.mxu0 %v15363_v48  ;;  %v5925_v41 = vld [vmem:[#allocation7 + $0x8b8] sm:$0xff]  ;;  %v15260_v48 = vcombine.low %v5912_v8, %v5916_v57  ;;  %v15269_v20 = vcombine.high %v5920_v50, %v5924_v46  ;;  %v15268_v7 = vcombine.low %v5920_v50, %v5924_v46 }
 0x5b8   :  { %v15271_v60 = vcombine.high %v5921_v25, %v5925_v41  ;;  %v15270_v45 = vcombine.low %v5921_v25, %v5925_v41  ;;  %v5937_v8 = vld [vmem:[#allocation7 + $0x918] sm:$0xff]  ;;  %v20017_v41 = vsel %vm1221_vm4, %v6048_v13, %v6052_v21 }
 0x5b9   :  { %v5941_v57 = vld [vmem:[#allocation7 + $0x938] sm:$0xff] }
 0x5ba   :  { %6745 = vmatpush1.bf16.msra.mxu1 %v15360_v47  ;;  %6838 = vmatpush1.bf16.msra.mxu0 %v15362_v36  ;;  %v5928_v47 = vld [vmem:[#allocation7 + $0x8d0] sm:$0xff]  ;;  %v5949_v50 = vld [vmem:[#allocation7 + $0x978] sm:$0xff]  ;;  %v15286_v25 = vcombine.low %v5937_v8, %v5941_v57 }
 0x5bb   :  { %6746 = vmatprep.subr.bf16.mxu1 %v15369_v61  ;;  %6839 = vmatprep.subr.bf16.mxu0 %v15371_v22  ;;  %v5932_v36 = vld [vmem:[#allocation7 + $0x8f0] sm:$0xff]  ;;  %v5929_v61 = vld [vmem:[#allocation7 + $0x8d8] sm:$0xff] }
 0x5bc   :  { %v5933_v22 = vld [vmem:[#allocation7 + $0x8f8] sm:$0xff]  ;;  %v15277_v16 = vcombine.high %v5928_v47, %v5932_v36  ;;  %v15276_v35 = vcombine.low %v5928_v47, %v5932_v36  ;;  %v5956_v47 = vld [vmem:[#allocation7 + $0x9b0] sm:$0xff] }
 0x5bd   :  { %v15278_v23 = vcombine.low %v5929_v61, %v5933_v22  ;;  %v5953_v36 = vld [vmem:[#allocation7 + $0x998] sm:$0xff] }
 0x5be   :  { %6747 = vmatpush1.bf16.msra.mxu1 %v15368_v3  ;;  %6840 = vmatpush1.bf16.msra.mxu0 %v15370_v32  ;;  %v15279_v3 = vcombine.high %v5929_v61, %v5933_v22  ;;  %v5936_v32 = vld [vmem:[#allocation7 + $0x910] sm:$0xff]  ;;  %v5957_v61 = vld [vmem:[#allocation7 + $0x9b8] sm:$0xff] }
 0x5bf   :  { %6902 = vmatprep.subr.bf16.mxu1 %v15253_v12  ;;  %6995 = vmatprep.subr.bf16.mxu0 %v15255_v24  ;;  %v20010_v12 = vsel %vm1221_vm4, %v6050_v10, %v6054_v40  ;;  %v5940_v24 = vld [vmem:[#allocation7 + $0x930] sm:$0xff]  ;;  %v6058_v10 = vrot.slane %v19801_v1, 1 }
 0x5c0   :  { %v15285_v18 = vcombine.high %v5936_v32, %v5940_v24  ;;  %v15284_v46 = vcombine.low %v5936_v32, %v5940_v24  ;;  %v5964_v32 = vld [vmem:[#allocation7 + $0x9f0] sm:$0xff]  ;;  %v5961_v24 = vld [vmem:[#allocation7 + $0x9d8] sm:$0xff] }
 0x5c1   :  { %6749 = vmatmul.mubr.bf16.vlgmr.msra.gmra.mrb[60].mxu1 %v19991_v39  ;;  %6842 = vmatmul.mubr.bf16.vlgmr.msra.gmra.mrb[80].mxu0 %v19991_v39 }
 0x5c2   :  { %6758 = vmatprep.mubr.bf16.mxu1 %v19998_v28  ;;  %6851 = vmatprep.mubr.bf16.mxu0 %v19998_v28 }
 0x5c3   :  { %6903 = vmatpush1.bf16.msra.mxu1 %v15252_v51  ;;  %6996 = vmatpush1.bf16.msra.mxu0 %v15254_v6  ;;  %v15287_v51 = vcombine.high %v5937_v8, %v5941_v57  ;;  %v5944_v6 = vld [vmem:[#allocation7 + $0x950] sm:$0xff]  ;;  %v5965_v8 = vld [vmem:[#allocation7 + $0x9f8] sm:$0xff] }
 0x5c4   :  { %6904 = vmatprep.subr.bf16.mxu1 %v15261_v59  ;;  %6997 = vmatprep.subr.bf16.mxu0 %v15263_v27  ;;  %v5948_v59 = vld [vmem:[#allocation7 + $0x970] sm:$0xff]  ;;  %v5945_v27 = vld [vmem:[#allocation7 + $0x958] sm:$0xff] }
 0x5c5   :  { %v15292_v13 = vcombine.low %v5944_v6, %v5948_v59  ;;  %v15294_v22 = vcombine.low %v5945_v27, %v5949_v50 }
 0x5c7   :  { %6905 = vmatpush1.bf16.msra.mxu1 %v15260_v48  ;;  %6998 = vmatpush1.bf16.msra.mxu0 %v15262_v17  ;;  %v15293_v48 = vcombine.high %v5944_v6, %v5948_v59  ;;  %v15295_v17 = vcombine.high %v5945_v27, %v5949_v50  ;;  %v5968_v6 = vld [vmem:[#allocation7 + $0xa10] sm:$0xff]  ;;  %v5969_v50 = vld [vmem:[#allocation7 + $0xa18] sm:$0xff] }
 0x5c8   :  { %6906 = vmatprep.subr.bf16.mxu1 %v15269_v20  ;;  %6999 = vmatprep.subr.bf16.mxu0 %v15271_v60  ;;  %v5952_v20 = vld [vmem:[#allocation7 + $0x990] sm:$0xff]  ;;  %v20022_v60 = vsel %vm1221_vm4, %v6054_v40, %v6058_v10  ;;  %v20028_v40 = vrot.slane %v19858_v52, 1 }
 0x5c9   :  { %6759 = vmatmul.mubr.bf16.gmra.mrb[64].mxu1 %v20005_v37  ;;  %6852 = vmatmul.mubr.bf16.gmra.mrb[84].mxu0 %v20005_v37  ;;  %v15300_v57 = vcombine.low %v5952_v20, %v5956_v47  ;;  %v5972_v27 = vld [vmem:[#allocation7 + $0xa30] sm:$0xff] }
 0x5ca   :  { %6768 = vmatprep.mubr.bf16.mxu1 %v20010_v12  ;;  %6861 = vmatprep.mubr.bf16.mxu0 %v20010_v12  ;;  %v20037_v59 = vsel %vm1221_vm4, %v6058_v10, %v20028_v40  ;;  %v5976_v10 = vld [vmem:[#allocation7 + $0xa50] sm:$0xff] }
 0x5cb   :  { %6907 = vmatpush1.bf16.msra.mxu1 %v15268_v7  ;;  %7000 = vmatpush1.bf16.msra.mxu0 %v15270_v45  ;;  %v6056_v7 = vrot.slane %v19788_v29, 1  ;;  %v15301_v45 = vcombine.high %v5952_v20, %v5956_v47  ;;  %v5980_v47 = vld [vmem:[#allocation7 + $0xa70] sm:$0xff] }
 0x5cc   :  { %6908 = vmatprep.subr.bf16.mxu1 %v15277_v16  ;;  %7001 = vmatprep.subr.bf16.mxu0 %v15279_v3  ;;  %v15303_v16 = vcombine.high %v5953_v36, %v5957_v61  ;;  %v5960_v3 = vld [vmem:[#allocation7 + $0x9d0] sm:$0xff] }
 0x5cf   :  { %6909 = vmatpush1.bf16.msra.mxu1 %v15276_v35  ;;  %7002 = vmatpush1.bf16.msra.mxu0 %v15278_v23  ;;  %v15302_v35 = vcombine.low %v5953_v36, %v5957_v61  ;;  %v20031_v23 = vsel %vm1221_vm4, %v6052_v21, %v6056_v7  ;;  %v15308_v21 = vcombine.low %v5960_v3, %v5964_v32  ;;  %v5977_v36 = vld [vmem:[#allocation7 + $0xa58] sm:$0xff] }
 0x5d0   :  { %6910 = vmatprep.subr.bf16.mxu1 %v15285_v18  ;;  %7003 = vmatprep.subr.bf16.mxu0 %v15287_v51  ;;  %v15309_v18 = vcombine.high %v5960_v3, %v5964_v32  ;;  %v15311_v51 = vcombine.high %v5961_v24, %v5965_v8  ;;  %v5981_v61 = vld [vmem:[#allocation7 + $0xa78] sm:$0xff]  ;;  %v5984_v32 = vld [vmem:[#allocation7 + $0xa90] sm:$0xff] }
 0x5d1   :  { %6769 = vmatmul.mubr.bf16.gmra.mrb[68].mxu1 %v20017_v41  ;;  %6862 = vmatmul.mubr.bf16.gmra.mrb[88].mxu0 %v20017_v41  ;;  %v15327_v3 = vcombine.high %v5977_v36, %v5981_v61 }
 0x5d2   :  { %6778 = vmatprep.mubr.bf16.mxu1 %v20022_v60  ;;  %6871 = vmatprep.mubr.bf16.mxu0 %v20022_v60 }
 0x5d3   :  { %6911 = vmatpush1.bf16.msra.mxu1 %v15284_v46  ;;  %7004 = vmatpush1.bf16.msra.mxu0 %v15286_v25  ;;  %v5973_v46 = vld [vmem:[#allocation7 + $0xa38] sm:$0xff]  ;;  %v15310_v25 = vcombine.low %v5961_v24, %v5965_v8  ;;  %v5988_v24 = vld [vmem:[#allocation7 + $0xab0] sm:$0xff] }
 0x5d4   :  { %6912 = vmatprep.subr.bf16.mxu1 %v15293_v48  ;;  %7005 = vmatprep.subr.bf16.mxu0 %v15295_v17  ;;  %v20042_v48 = vrot.slane %v19846_v4, 1  ;;  %v15317_v17 = vcombine.high %v5968_v6, %v5972_v27  ;;  %v15319_v20 = vcombine.high %v5969_v50, %v5973_v46  ;;  %v5985_v8 = vld [vmem:[#allocation7 + $0xa98] sm:$0xff] }
 0x5d7   :  { %6913 = vmatpush1.bf16.msra.mxu1 %v15292_v13  ;;  %7006 = vmatpush1.bf16.msra.mxu0 %v15294_v22  ;;  %v15316_v13 = vcombine.low %v5968_v6, %v5972_v27  ;;  %v15318_v22 = vcombine.low %v5969_v50, %v5973_v46  ;;  %v5992_v6 = vld [vmem:[#allocation7 + $0xad0] sm:$0xff]  ;;  %v5993_v50 = vld [vmem:[#allocation7 + $0xad8] sm:$0xff] }
 0x5d8   :  { %6914 = vmatprep.subr.bf16.mxu1 %v15301_v45  ;;  %7007 = vmatprep.subr.bf16.mxu0 %v15303_v16  ;;  %v20046_v45 = vsel %vm1221_vm4, %v6056_v7, %v20042_v48  ;;  %v15325_v16 = vcombine.high %v5976_v10, %v5980_v47  ;;  %v15324_v7 = vcombine.low %v5976_v10, %v5980_v47  ;;  %v5996_v27 = vld [vmem:[#allocation7 + $0xaf0] sm:$0xff]  ;;  %v5997_v46 = vld [vmem:[#allocation7 + $0xaf8] sm:$0xff] }
 0x5d9   :  { %6779 = vmatmul.mubr.bf16.gmra.mrb[72].mxu1 %v20031_v23  ;;  %6872 = vmatmul.mubr.bf16.gmra.mrb[92].mxu0 %v20031_v23  ;;  %v6004_v10 = vld [vmem:[#allocation7 + $0xb30] sm:$0xff]  ;;  %v6001_v47 = vld [vmem:[#allocation7 + $0xb18] sm:$0xff] }
 0x5da   :  { %6788 = vmatprep.mubr.bf16.mxu1 %v20037_v59  ;;  %6881 = vmatprep.mubr.bf16.mxu0 %v20037_v59 }
 0x5db   :  { %6915 = vmatpush1.bf16.msra.mxu1 %v15300_v57  ;;  %7008 = vmatpush1.bf16.msra.mxu0 %v15302_v35  ;;  %v5989_v57 = vld [vmem:[#allocation7 + $0xab8] sm:$0xff]  ;;  %v15326_v35 = vcombine.low %v5977_v36, %v5981_v61  ;;  %v15340_v61 = vcombine.low %v5992_v6, %v5996_v27 }
 0x5dc   :  { %6916 = vmatprep.subr.bf16.mxu1 %v15309_v18  ;;  %7009 = vmatprep.subr.bf16.mxu0 %v15311_v51  ;;  %v15333_v18 = vcombine.high %v5984_v32, %v5988_v24  ;;  %v15335_v51 = vcombine.high %v5985_v8, %v5989_v57  ;;  %v6005_v36 = vld [vmem:[#allocation7 + $0xb38] sm:$0xff] }
 0x5df   :  { %6917 = vmatpush1.bf16.msra.mxu1 %v15308_v21  ;;  %7010 = vmatpush1.bf16.msra.mxu0 %v15310_v25  ;;  %v15332_v21 = vcombine.low %v5984_v32, %v5988_v24  ;;  %v15334_v25 = vcombine.low %v5985_v8, %v5989_v57  ;;  %v6008_v32 = vld [vmem:[#allocation7 + $0xb50] sm:$0xff]  ;;  %v6009_v8 = vld [vmem:[#allocation7 + $0xb58] sm:$0xff] }
 0x5e0   :  { %6918 = vmatprep.subr.bf16.mxu1 %v15317_v17  ;;  %7011 = vmatprep.subr.bf16.mxu0 %v15319_v20  ;;  %v15341_v17 = vcombine.high %v5992_v6, %v5996_v27  ;;  %v15343_v20 = vcombine.high %v5993_v50, %v5997_v46  ;;  %v6012_v24 = vld [vmem:[#allocation7 + $0xb70] sm:$0xff]  ;;  %v6013_v57 = vld [vmem:[#allocation7 + $0xb78] sm:$0xff] }
 0x5e1   :  { %6789 = vmatmul.mubr.bf16.gmra.mrb[76].mxu1 %v20046_v45  ;;  %6882 = vmatmul.mubr.bf16.gmra.mrb[96].mxu0 %v20046_v45  ;;  %v6017_v6 = vld [vmem:[#allocation7 + $0xb98] sm:$0xff] }
 0x5e2   :  { %6798 = vmatprep.mubr.bf16.mxu1 %v20028_v40  ;;  %6891 = vmatprep.mubr.bf16.mxu0 %v20028_v40  ;;  %v6021_v27 = vld [vmem:[#allocation7 + $0xbb8] sm:$0xff] }
 0x5e3   :  { %6919 = vmatpush1.bf16.msra.mxu1 %v15316_v13  ;;  %7012 = vmatpush1.bf16.msra.mxu0 %v15318_v22  ;;  %v6000_v13 = vld [vmem:[#allocation7 + $0xb10] sm:$0xff]  ;;  %v15342_v22 = vcombine.low %v5993_v50, %v5997_v46  ;;  %v15356_v50 = vcombine.low %v6008_v32, %v6012_v24  ;;  %v15358_v46 = vcombine.low %v6009_v8, %v6013_v57 }
 0x5e4   :  { %6920 = vmatprep.subr.bf16.mxu1 %v15325_v16  ;;  %7013 = vmatprep.subr.bf16.mxu0 %v15327_v3  ;;  %v15349_v16 = vcombine.high %v6000_v13, %v6004_v10  ;;  %v15351_v3 = vcombine.high %v6001_v47, %v6005_v36 }
 0x5e7   :  { %6921 = vmatpush1.bf16.msra.mxu1 %v15324_v7  ;;  %7014 = vmatpush1.bf16.msra.mxu0 %v15326_v35  ;;  %v15348_v7 = vcombine.low %v6000_v13, %v6004_v10  ;;  %v15350_v35 = vcombine.low %v6001_v47, %v6005_v36  ;;  %v6025_v13 = vld [vmem:[#allocation7 + $0xbd8] sm:$0xff]  ;;  %v15366_v36 = vcombine.low %v6017_v6, %v6021_v27 }
 0x5e8   :  { %6922 = vmatprep.subr.bf16.mxu1 %v15333_v18  ;;  %7015 = vmatprep.subr.bf16.mxu0 %v15335_v51  ;;  %v15357_v18 = vcombine.high %v6008_v32, %v6012_v24  ;;  %v6016_v51 = vld [vmem:[#allocation7 + $0xb90] sm:$0xff]  ;;  %v6029_v10 = vld [vmem:[#allocation7 + $0xbf8] sm:$0xff]  ;;  %v7186_v32 = vld [vmem:[#allocation7 + $0xc08] sm:$0xff] }
 0x5e9   :  { %6799 = vmatmul.mubr.bf16.gmra.mrb[80].mxu1 %v20042_v48  ;;  %6892 = vmatmul.mubr.bf16.gmra.mrb[100].mxu0 %v20042_v48  ;;  %v7190_v24 = vld [vmem:[#allocation7 + $0xc28] sm:$0xff] }
 0x5ea   :  { %6934 = vmatprep.mubr.bf16.mxu1 %v19983_v63  ;;  %7027 = vmatprep.mubr.bf16.mxu0 %v19983_v63  ;;  %v15359_v63 = vcombine.high %v6009_v8, %v6013_v57  ;;  %v15374_v57 = vcombine.low %v6025_v13, %v6029_v10 }
 0x5eb   :  { %6923 = vmatpush1.bf16.msra.mxu1 %v15332_v21  ;;  %7016 = vmatpush1.bf16.msra.mxu0 %v15334_v25  ;;  %v6020_v21 = vld [vmem:[#allocation7 + $0xbb0] sm:$0xff] }
 0x5ec   :  { %6924 = vmatprep.subr.bf16.mxu1 %v15341_v17  ;;  %7017 = vmatprep.subr.bf16.mxu0 %v15343_v20  ;;  %v15365_v25 = vcombine.high %v6016_v51, %v6020_v21  ;;  %v15367_v17 = vcombine.high %v6017_v6, %v6021_v27  ;;  %v6024_v20 = vld [vmem:[#allocation7 + $0xbd0] sm:$0xff]  ;;  %v15364_v47 = vcombine.low %v6016_v51, %v6020_v21  ;;  %v7194_v51 = vld [vmem:[#allocation7 + $0xc48] sm:$0xff] }
 0x5ed   :  { %v7198_v21 = vld [vmem:[#allocation7 + $0xc68] sm:$0xff]  ;;  %v15378_v27 = vcombine.low %v7186_v32, %v7190_v24 }
 0x5ef   :  { %6925 = vmatpush1.bf16.msra.mxu1 %v15340_v61  ;;  %7018 = vmatpush1.bf16.msra.mxu0 %v15342_v22  ;;  %v6028_v61 = vld [vmem:[#allocation7 + $0xbf0] sm:$0xff] }
 0x5f0   :  { %6926 = vmatprep.subr.bf16.mxu1 %v15349_v16  ;;  %7019 = vmatprep.subr.bf16.mxu0 %v15351_v3  ;;  %v15373_v22 = vcombine.high %v6024_v20, %v6028_v61  ;;  %v15375_v16 = vcombine.high %v6025_v13, %v6029_v10  ;;  %v7185_v3 = vld [vmem:[#allocation7 + $0xc00] sm:$0xff]  ;;  %v15372_v8 = vcombine.low %v6024_v20, %v6028_v61  ;;  %v7202_v61 = vld [vmem:[#allocation7 + $0xc88] sm:$0xff] }
 0x5f1   :  { %v7205_v20 = vld [vmem:[#allocation7 + $0xca0] sm:$0xff]  ;;  %v7206_v13 = vld [vmem:[#allocation7 + $0xca8] sm:$0xff] }
 0x5f3   :  { %6927 = vmatpush1.bf16.msra.mxu1 %v15348_v7  ;;  %7020 = vmatpush1.bf16.msra.mxu0 %v15350_v35  ;;  %v7189_v7 = vld [vmem:[#allocation7 + $0xc20] sm:$0xff] }
 0x5f4   :  { %6928 = vmatprep.subr.bf16.mxu1 %v15357_v18  ;;  %7021 = vmatprep.subr.bf16.mxu0 %v15359_v63  ;;  %v15377_v35 = vcombine.high %v7185_v3, %v7189_v7  ;;  %v15379_v18 = vcombine.high %v7186_v32, %v7190_v24  ;;  %v7193_v63 = vld [vmem:[#allocation7 + $0xc40] sm:$0xff]  ;;  %v15376_v6 = vcombine.low %v7185_v3, %v7189_v7  ;;  %v7210_v7 = vld [vmem:[#allocation7 + $0xcc8] sm:$0xff] }
 0x5f5   :  { %v7213_v3 = vld [vmem:[#allocation7 + $0xce0] sm:$0xff]  ;;  %v7214_v32 = vld [vmem:[#allocation7 + $0xce8] sm:$0xff]  ;;  %v15394_v24 = vcombine.low %v7202_v61, %v7206_v13 }
 0x5f7   :  { %6929 = vmatpush1.bf16.msra.mxu1 %v15356_v50  ;;  %7022 = vmatpush1.bf16.msra.mxu0 %v15358_v46  ;;  %v7197_v50 = vld [vmem:[#allocation7 + $0xc60] sm:$0xff] }
 0x5f8   :  { %6930 = vmatprep.subr.bf16.mxu1 %v15365_v25  ;;  %7023 = vmatprep.subr.bf16.mxu0 %v15367_v17  ;;  %v15385_v46 = vcombine.high %v7193_v63, %v7197_v50  ;;  %v15387_v25 = vcombine.high %v7194_v51, %v7198_v21  ;;  %v7201_v17 = vld [vmem:[#allocation7 + $0xc80] sm:$0xff]  ;;  %v15384_v10 = vcombine.low %v7193_v63, %v7197_v50  ;;  %v7222_v63 = vld [vmem:[#allocation7 + $0xd28] sm:$0xff] }
 0x5fb   :  { %6931 = vmatpush1.bf16.msra.mxu1 %v15364_v47  ;;  %7024 = vmatpush1.bf16.msra.mxu0 %v15366_v36  ;;  %v15386_v47 = vcombine.low %v7194_v51, %v7198_v21  ;;  %v15393_v36 = vcombine.high %v7201_v17, %v7205_v20  ;;  %v15402_v51 = vcombine.low %v7210_v7, %v7214_v32 }
 0x5fc   :  { %6932 = vmatprep.subr.bf16.mxu1 %v15373_v22  ;;  %7025 = vmatprep.subr.bf16.mxu0 %v15375_v16  ;;  %v15395_v22 = vcombine.high %v7202_v61, %v7206_v13  ;;  %v7209_v16 = vld [vmem:[#allocation7 + $0xcc0] sm:$0xff] }
 0x5fd   :  { %v15400_v50 = vcombine.low %v7209_v16, %v7213_v3  ;;  %v7233_v13 = vld [vmem:[#allocation7 + $0xd80] sm:$0xff] }
 0x5ff   :  { %6933 = vmatpush1.bf16.msra.mxu1 %v15372_v8  ;;  %7026 = vmatpush1.bf16.msra.mxu0 %v15374_v57  ;;  %v15401_v8 = vcombine.high %v7209_v16, %v7213_v3  ;;  %v7217_v57 = vld [vmem:[#allocation7 + $0xd00] sm:$0xff] }
 0x600   :  { %8011 = vmatprep.subr.bf16.mxu1 %v15377_v35  ;;  %8104 = vmatprep.subr.bf16.mxu0 %v15379_v18  ;;  %v7221_v35 = vld [vmem:[#allocation7 + $0xd20] sm:$0xff]  ;;  %v7218_v18 = vld [vmem:[#allocation7 + $0xd08] sm:$0xff] }
 0x601   :  { %v15409_v21 = vcombine.high %v7217_v57, %v7221_v35 }
 0x602   :  { %6935 = vmatmul.mubr.bf16.vlgmr.msra.gmra.mrb[84].mxu1 %v19991_v39  ;;  %7028 = vmatmul.mubr.bf16.vlgmr.msra.gmra.mrb[104].mxu0 %v19991_v39  ;;  %v15392_v39 = vcombine.low %v7201_v17, %v7205_v20  ;;  %v7230_v17 = vld [vmem:[#allocation7 + $0xd68] sm:$0xff]  ;;  %v15410_v20 = vcombine.low %v7218_v18, %v7222_v63 }
 0x603   :  { %6944 = vmatprep.mubr.bf16.mxu1 %v19998_v28  ;;  %7037 = vmatprep.mubr.bf16.mxu0 %v19998_v28  ;;  %v15403_v28 = vcombine.high %v7210_v7, %v7214_v32  ;;  %v7241_v32 = vld [vmem:[#allocation7 + $0xdc0] sm:$0xff] }
 0x604   :  { %8012 = vmatpush1.bf16.msra.mxu1 %v15376_v6  ;;  %8105 = vmatpush1.bf16.msra.mxu0 %v15378_v27  ;;  %v15411_v6 = vcombine.high %v7218_v18, %v7222_v63  ;;  %v7225_v27 = vld [vmem:[#allocation7 + $0xd40] sm:$0xff]  ;;  %v7250_v63 = vld [vmem:[#allocation7 + $0xe08] sm:$0xff] }
 0x605   :  { %8013 = vmatprep.subr.bf16.mxu1 %v15385_v46  ;;  %8106 = vmatprep.subr.bf16.mxu0 %v15387_v25  ;;  %v7229_v46 = vld [vmem:[#allocation7 + $0xd60] sm:$0xff]  ;;  %v7226_v25 = vld [vmem:[#allocation7 + $0xd48] sm:$0xff] }
 0x606   :  { %v15417_v61 = vcombine.high %v7225_v27, %v7229_v46  ;;  %v15418_v16 = vcombine.low %v7226_v25, %v7230_v17  ;;  %v7253_v18 = vld [vmem:[#allocation7 + $0xe20] sm:$0xff] }
 0x608   :  { %8014 = vmatpush1.bf16.msra.mxu1 %v15384_v10  ;;  %8107 = vmatpush1.bf16.msra.mxu0 %v15386_v47  ;;  %v7237_v10 = vld [vmem:[#allocation7 + $0xda0] sm:$0xff]  ;;  %v7234_v47 = vld [vmem:[#allocation7 + $0xd88] sm:$0xff] }
 0x609   :  { %8015 = vmatprep.subr.bf16.mxu1 %v15393_v36  ;;  %8108 = vmatprep.subr.bf16.mxu0 %v15395_v22  ;;  %v7238_v36 = vld [vmem:[#allocation7 + $0xda8] sm:$0xff]  ;;  %v15416_v22 = vcombine.low %v7225_v27, %v7229_v46  ;;  %v15425_v3 = vcombine.high %v7233_v13, %v7237_v10  ;;  %v7257_v46 = vld [vmem:[#allocation7 + $0xe40] sm:$0xff] }
 0x60a   :  { %6945 = vmatmul.mubr.bf16.gmra.mrb[88].mxu1 %v20005_v37  ;;  %7038 = vmatmul.mubr.bf16.gmra.mrb[108].mxu0 %v20005_v37  ;;  %v15408_v37 = vcombine.low %v7217_v57, %v7221_v35  ;;  %v15427_v7 = vcombine.high %v7234_v47, %v7238_v36  ;;  %v7249_v35 = vld [vmem:[#allocation7 + $0xe00] sm:$0xff] }
 0x60b   :  { %6954 = vmatprep.mubr.bf16.mxu1 %v20010_v12  ;;  %7047 = vmatprep.mubr.bf16.mxu0 %v20010_v12  ;;  %v15419_v12 = vcombine.high %v7226_v25, %v7230_v17  ;;  %v7261_v25 = vld [vmem:[#allocation7 + $0xe60] sm:$0xff]  ;;  %v7258_v17 = vld [vmem:[#allocation7 + $0xe48] sm:$0xff] }
 0x60c   :  { %8016 = vmatpush1.bf16.msra.mxu1 %v15392_v39  ;;  %8109 = vmatpush1.bf16.msra.mxu0 %v15394_v24  ;;  %v7245_v39 = vld [vmem:[#allocation7 + $0xde0] sm:$0xff]  ;;  %v7242_v24 = vld [vmem:[#allocation7 + $0xdc8] sm:$0xff] }
 0x60d   :  { %8017 = vmatprep.subr.bf16.mxu1 %v15401_v8  ;;  %8110 = vmatprep.subr.bf16.mxu0 %v15403_v28  ;;  %v7246_v8 = vld [vmem:[#allocation7 + $0xde8] sm:$0xff]  ;;  %v15426_v28 = vcombine.low %v7234_v47, %v7238_v36  ;;  %v15433_v57 = vcombine.high %v7241_v32, %v7245_v39  ;;  %v15448_v36 = vcombine.low %v7257_v46, %v7261_v25 }
 0x60e   :  { %v7270_v47 = vld [vmem:[#allocation7 + $0xea8] sm:$0xff] }
 0x610   :  { %8018 = vmatpush1.bf16.msra.mxu1 %v15400_v50  ;;  %8111 = vmatpush1.bf16.msra.mxu0 %v15402_v51  ;;  %v7254_v50 = vld [vmem:[#allocation7 + $0xe28] sm:$0xff]  ;;  %v15432_v51 = vcombine.low %v7241_v32, %v7245_v39  ;;  %v7277_v32 = vld [vmem:[#allocation7 + $0xee0] sm:$0xff] }
 0x611   :  { %8019 = vmatprep.subr.bf16.mxu1 %v15409_v21  ;;  %8112 = vmatprep.subr.bf16.mxu0 %v15411_v6  ;;  %v15434_v21 = vcombine.low %v7242_v24, %v7246_v8  ;;  %v15441_v6 = vcombine.high %v7249_v35, %v7253_v18  ;;  %v15443_v27 = vcombine.high %v7250_v63, %v7254_v50  ;;  %v7274_v39 = vld [vmem:[#allocation7 + $0xec8] sm:$0xff] }
 0x612   :  { %6955 = vmatmul.mubr.bf16.gmra.mrb[92].mxu1 %v20017_v41  ;;  %7048 = vmatmul.mubr.bf16.gmra.mrb[112].mxu0 %v20017_v41  ;;  %v15424_v41 = vcombine.low %v7233_v13, %v7237_v10  ;;  %v7269_v13 = vld [vmem:[#allocation7 + $0xea0] sm:$0xff]  ;;  %v7266_v10 = vld [vmem:[#allocation7 + $0xe88] sm:$0xff] }
 0x613   :  { %6964 = vmatprep.mubr.bf16.mxu1 %v20022_v60  ;;  %7057 = vmatprep.mubr.bf16.mxu0 %v20022_v60  ;;  %v15435_v60 = vcombine.high %v7242_v24, %v7246_v8  ;;  %v7278_v24 = vld [vmem:[#allocation7 + $0xee8] sm:$0xff]  ;;  %v15458_v8 = vcombine.low %v7266_v10, %v7270_v47 }
 0x614   :  { %8020 = vmatpush1.bf16.msra.mxu1 %v15408_v37  ;;  %8113 = vmatpush1.bf16.msra.mxu0 %v15410_v20  ;;  %v7262_v37 = vld [vmem:[#allocation7 + $0xe68] sm:$0xff]  ;;  %v15442_v20 = vcombine.low %v7250_v63, %v7254_v50  ;;  %v15466_v63 = vcombine.low %v7274_v39, %v7278_v24 }
 0x615   :  { %8021 = vmatprep.subr.bf16.mxu1 %v15417_v61  ;;  %8114 = vmatprep.subr.bf16.mxu0 %v15419_v12  ;;  %v15449_v61 = vcombine.high %v7257_v46, %v7261_v25  ;;  %v7265_v12 = vld [vmem:[#allocation7 + $0xe80] sm:$0xff]  ;;  %v7294_v46 = vld [vmem:[#allocation7 + $0xf68] sm:$0xff] }
 0x618   :  { %8022 = vmatpush1.bf16.msra.mxu1 %v15416_v22  ;;  %8115 = vmatpush1.bf16.msra.mxu0 %v15418_v16  ;;  %v15450_v22 = vcombine.low %v7258_v17, %v7262_v37  ;;  %v15457_v16 = vcombine.high %v7265_v12, %v7269_v13 }
 0x619   :  { %8023 = vmatprep.subr.bf16.mxu1 %v15425_v3  ;;  %8116 = vmatprep.subr.bf16.mxu0 %v15427_v7  ;;  %v15459_v3 = vcombine.high %v7266_v10, %v7270_v47  ;;  %v7273_v7 = vld [vmem:[#allocation7 + $0xec0] sm:$0xff] }
 0x61a   :  { %6965 = vmatmul.mubr.bf16.gmra.mrb[96].mxu1 %v20031_v23  ;;  %7058 = vmatmul.mubr.bf16.gmra.mrb[116].mxu0 %v20031_v23  ;;  %v15440_v23 = vcombine.low %v7249_v35, %v7253_v18  ;;  %v7286_v35 = vld [vmem:[#allocation7 + $0xf28] sm:$0xff]  ;;  %v15464_v18 = vcombine.low %v7273_v7, %v7277_v32 }
 0x61b   :  { %6974 = vmatprep.mubr.bf16.mxu1 %v20037_v59  ;;  %7067 = vmatprep.mubr.bf16.mxu0 %v20037_v59  ;;  %v15451_v59 = vcombine.high %v7258_v17, %v7262_v37 }
 0x61c   :  { %8024 = vmatpush1.bf16.msra.mxu1 %v15424_v41  ;;  %8117 = vmatpush1.bf16.msra.mxu0 %v15426_v28  ;;  %v15465_v41 = vcombine.high %v7273_v7, %v7277_v32  ;;  %v7281_v28 = vld [vmem:[#allocation7 + $0xf00] sm:$0xff] }
 0x61d   :  { %8025 = vmatprep.subr.bf16.mxu1 %v15433_v57  ;;  %8118 = vmatprep.subr.bf16.mxu0 %v15435_v60  ;;  %v7285_v57 = vld [vmem:[#allocation7 + $0xf20] sm:$0xff]  ;;  %v7282_v60 = vld [vmem:[#allocation7 + $0xf08] sm:$0xff] }
 0x61e   :  { %v15473_v50 = vcombine.high %v7281_v28, %v7285_v57  ;;  %v15474_v25 = vcombine.low %v7282_v60, %v7286_v35 }
 0x620   :  { %8026 = vmatpush1.bf16.msra.mxu1 %v15432_v51  ;;  %8119 = vmatpush1.bf16.msra.mxu0 %v15434_v21  ;;  %v15475_v51 = vcombine.high %v7282_v60, %v7286_v35  ;;  %v7289_v21 = vld [vmem:[#allocation7 + $0xf40] sm:$0xff] }
 0x621   :  { %8027 = vmatprep.subr.bf16.mxu1 %v15441_v6  ;;  %8120 = vmatprep.subr.bf16.mxu0 %v15443_v27  ;;  %v7293_v6 = vld [vmem:[#allocation7 + $0xf60] sm:$0xff]  ;;  %v7290_v27 = vld [vmem:[#allocation7 + $0xf48] sm:$0xff] }
 0x622   :  { %6975 = vmatmul.mubr.bf16.gmra.mrb[100].mxu1 %v20046_v45  ;;  %7068 = vmatmul.mubr.bf16.gmra.mrb[120].mxu0 %v20046_v45  ;;  %v15456_v45 = vcombine.low %v7265_v12, %v7269_v13  ;;  %v15481_v17 = vcombine.high %v7289_v21, %v7293_v6  ;;  %v15483_v37 = vcombine.high %v7290_v27, %v7294_v46 }
 0x623   :  { %6984 = vmatprep.mubr.bf16.mxu1 %v20028_v40  ;;  %7077 = vmatprep.mubr.bf16.mxu0 %v20028_v40  ;;  %v15467_v40 = vcombine.high %v7274_v39, %v7278_v24  ;;  %v15480_v12 = vcombine.low %v7289_v21, %v7293_v6  ;;  %v15482_v13 = vcombine.low %v7290_v27, %v7294_v46 }
 0x624   :  { %8028 = vmatpush1.bf16.msra.mxu1 %v15440_v23  ;;  %8121 = vmatpush1.bf16.msra.mxu0 %v15442_v20  ;;  %v7297_v23 = vld [vmem:[#allocation7 + $0xf80] sm:$0xff] }
 0x625   :  { %8029 = vmatprep.subr.bf16.mxu1 %v15449_v61  ;;  %8122 = vmatprep.subr.bf16.mxu0 %v15451_v59  ;;  %v7301_v20 = vld [vmem:[#allocation7 + $0xfa0] sm:$0xff]  ;;  %v7298_v61 = vld [vmem:[#allocation7 + $0xf88] sm:$0xff] }
 0x626   :  { %v7302_v59 = vld [vmem:[#allocation7 + $0xfa8] sm:$0xff]  ;;  %v15489_v10 = vcombine.high %v7297_v23, %v7301_v20  ;;  %v15488_v7 = vcombine.low %v7297_v23, %v7301_v20 }
 0x627   :  { %v15491_v47 = vcombine.high %v7298_v61, %v7302_v59  ;;  %v15490_v32 = vcombine.low %v7298_v61, %v7302_v59 }
 0x628   :  { %8030 = vmatpush1.bf16.msra.mxu1 %v15448_v36  ;;  %8123 = vmatpush1.bf16.msra.mxu0 %v15450_v22  ;;  %v7305_v36 = vld [vmem:[#allocation7 + $0xfc0] sm:$0xff] }
 0x629   :  { %8031 = vmatprep.subr.bf16.mxu1 %v15457_v16  ;;  %8124 = vmatprep.subr.bf16.mxu0 %v15459_v3  ;;  %v7309_v22 = vld [vmem:[#allocation7 + $0xfe0] sm:$0xff]  ;;  %v7306_v16 = vld [vmem:[#allocation7 + $0xfc8] sm:$0xff] }
 0x62a   :  { %6985 = vmatmul.mubr.bf16.gmra.mrb[104].mxu1 %v20042_v48  ;;  %7078 = vmatmul.mubr.bf16.gmra.mrb[124].mxu0 %v20042_v48  ;;  %v15472_v48 = vcombine.low %v7281_v28, %v7285_v57  ;;  %v7310_v3 = vld [vmem:[#allocation7 + $0xfe8] sm:$0xff]  ;;  %v15497_v39 = vcombine.high %v7305_v36, %v7309_v22  ;;  %v15496_v28 = vcombine.low %v7305_v36, %v7309_v22 }
 0x62b   :  { %8043 = vmatprep.mubr.bf16.mxu1 %v19740_v55  ;;  %8136 = vmatprep.mubr.bf16.mxu0 %v19740_v55  ;;  %v15499_v24 = vcombine.high %v7306_v16, %v7310_v3  ;;  %v15498_v57 = vcombine.low %v7306_v16, %v7310_v3 }
 0x62c   :  { %8032 = vmatpush1.bf16.msra.mxu1 %v15456_v45  ;;  %8125 = vmatpush1.bf16.msra.mxu0 %v15458_v8  ;;  %v7187_v45 = vld [vmem:[#allocation7 + $0xc10] sm:$0xff] }
 0x62d   :  { %8033 = vmatprep.subr.bf16.mxu1 %v15465_v41  ;;  %8126 = vmatprep.subr.bf16.mxu0 %v15467_v40  ;;  %v7191_v8 = vld [vmem:[#allocation7 + $0xc30] sm:$0xff]  ;;  %v7188_v41 = vld [vmem:[#allocation7 + $0xc18] sm:$0xff] }
 0x62e   :  { %v7192_v40 = vld [vmem:[#allocation7 + $0xc38] sm:$0xff]  ;;  %v15381_v60 = vcombine.high %v7187_v45, %v7191_v8  ;;  %v15380_v21 = vcombine.low %v7187_v45, %v7191_v8 }
 0x62f   :  { %v15383_v35 = vcombine.high %v7188_v41, %v7192_v40  ;;  %v15382_v6 = vcombine.low %v7188_v41, %v7192_v40 }
 0x630   :  { %8034 = vmatpush1.bf16.msra.mxu1 %v15464_v18  ;;  %8127 = vmatpush1.bf16.msra.mxu0 %v15466_v63  ;;  %v7195_v18 = vld [vmem:[#allocation7 + $0xc50] sm:$0xff] }
 0x631   :  { %8035 = vmatprep.subr.bf16.mxu1 %v15473_v50  ;;  %8128 = vmatprep.subr.bf16.mxu0 %v15475_v51  ;;  %v7199_v63 = vld [vmem:[#allocation7 + $0xc70] sm:$0xff]  ;;  %v7196_v50 = vld [vmem:[#allocation7 + $0xc58] sm:$0xff] }
 0x632   :  { %v7200_v51 = vld [vmem:[#allocation7 + $0xc78] sm:$0xff]  ;;  %v15389_v27 = vcombine.high %v7195_v18, %v7199_v63  ;;  %v15388_v23 = vcombine.low %v7195_v18, %v7199_v63 }
 0x633   :  { %v15391_v46 = vcombine.high %v7196_v50, %v7200_v51  ;;  %v15390_v20 = vcombine.low %v7196_v50, %v7200_v51 }
 0x634   :  { %8036 = vmatpush1.bf16.msra.mxu1 %v15472_v48  ;;  %8129 = vmatpush1.bf16.msra.mxu0 %v15474_v25  ;;  %v7203_v48 = vld [vmem:[#allocation7 + $0xc90] sm:$0xff] }
 0x635   :  { %8037 = vmatprep.subr.bf16.mxu1 %v15481_v17  ;;  %8130 = vmatprep.subr.bf16.mxu0 %v15483_v37  ;;  %v7207_v25 = vld [vmem:[#allocation7 + $0xcb0] sm:$0xff]  ;;  %v7204_v17 = vld [vmem:[#allocation7 + $0xc98] sm:$0xff] }
 0x636   :  { %v7208_v37 = vld [vmem:[#allocation7 + $0xcb8] sm:$0xff]  ;;  %v15397_v61 = vcombine.high %v7203_v48, %v7207_v25  ;;  %v15396_v36 = vcombine.low %v7203_v48, %v7207_v25 }
 0x637   :  { %v15399_v59 = vcombine.high %v7204_v17, %v7208_v37  ;;  %v15398_v22 = vcombine.low %v7204_v17, %v7208_v37 }
 0x638   :  { %8038 = vmatpush1.bf16.msra.mxu1 %v15480_v12  ;;  %8131 = vmatpush1.bf16.msra.mxu0 %v15482_v13  ;;  %v7211_v12 = vld [vmem:[#allocation7 + $0xcd0] sm:$0xff] }
 0x639   :  { %8039 = vmatprep.subr.bf16.mxu1 %v15489_v10  ;;  %8132 = vmatprep.subr.bf16.mxu0 %v15491_v47  ;;  %v7215_v13 = vld [vmem:[#allocation7 + $0xcf0] sm:$0xff]  ;;  %v7212_v10 = vld [vmem:[#allocation7 + $0xcd8] sm:$0xff] }
 0x63a   :  { %v7216_v47 = vld [vmem:[#allocation7 + $0xcf8] sm:$0xff]  ;;  %v15405_v16 = vcombine.high %v7211_v12, %v7215_v13  ;;  %v15404_v45 = vcombine.low %v7211_v12, %v7215_v13 }
 0x63b   :  { %v15407_v3 = vcombine.high %v7212_v10, %v7216_v47  ;;  %v15406_v8 = vcombine.low %v7212_v10, %v7216_v47 }
 0x63c   :  { %8040 = vmatpush1.bf16.msra.mxu1 %v15488_v7  ;;  %8133 = vmatpush1.bf16.msra.mxu0 %v15490_v32  ;;  %v7219_v7 = vld [vmem:[#allocation7 + $0xd10] sm:$0xff] }
 0x63d   :  { %8041 = vmatprep.subr.bf16.mxu1 %v15497_v39  ;;  %8134 = vmatprep.subr.bf16.mxu0 %v15499_v24  ;;  %v7223_v32 = vld [vmem:[#allocation7 + $0xd30] sm:$0xff]  ;;  %v7220_v39 = vld [vmem:[#allocation7 + $0xd18] sm:$0xff] }
 0x63e   :  { %v7224_v24 = vld [vmem:[#allocation7 + $0xd38] sm:$0xff]  ;;  %v15413_v41 = vcombine.high %v7219_v7, %v7223_v32  ;;  %v15412_v18 = vcombine.low %v7219_v7, %v7223_v32 }
 0x63f   :  { %v15415_v40 = vcombine.high %v7220_v39, %v7224_v24  ;;  %v15414_v63 = vcombine.low %v7220_v39, %v7224_v24  ;;  %v7256_v7 = vld [vmem:[#allocation7 + $0xe38] sm:$0xff] }
 0x640   :  { %8042 = vmatpush1.bf16.msra.mxu1 %v15496_v28  ;;  %8135 = vmatpush1.bf16.msra.mxu0 %v15498_v57  ;;  %v7227_v28 = vld [vmem:[#allocation7 + $0xd50] sm:$0xff] }
 0x641   :  { %8197 = vmatprep.subr.bf16.mxu1 %v15381_v60  ;;  %8290 = vmatprep.subr.bf16.mxu0 %v15383_v35  ;;  %v7231_v57 = vld [vmem:[#allocation7 + $0xd70] sm:$0xff]  ;;  %v7228_v60 = vld [vmem:[#allocation7 + $0xd58] sm:$0xff] }
 0x642   :  { %v7232_v35 = vld [vmem:[#allocation7 + $0xd78] sm:$0xff]  ;;  %v15421_v50 = vcombine.high %v7227_v28, %v7231_v57  ;;  %v15420_v48 = vcombine.low %v7227_v28, %v7231_v57 }
 0x643   :  { %8044 = vmatmul.mubr.bf16.vlgmr.msra.gmra.mrb[60].mxu1 %v19747_v2  ;;  %8137 = vmatmul.mubr.bf16.vlgmr.msra.gmra.mrb[80].mxu0 %v19747_v2  ;;  %v15423_v51 = vcombine.high %v7228_v60, %v7232_v35  ;;  %v15422_v25 = vcombine.low %v7228_v60, %v7232_v35  ;;  %v20104_v60 = vsel %vm1806_vm3, %v19893_v30, %v19878_v44 }
 0x644   :  { %8053 = vmatprep.mubr.bf16.mxu1 %v19770_v5  ;;  %8146 = vmatprep.mubr.bf16.mxu0 %v19770_v5 }
 0x645   :  { %8198 = vmatpush1.bf16.msra.mxu1 %v15380_v21  ;;  %8291 = vmatpush1.bf16.msra.mxu0 %v15382_v6  ;;  %v7235_v21 = vld [vmem:[#allocation7 + $0xd90] sm:$0xff] }
 0x646   :  { %8199 = vmatprep.subr.bf16.mxu1 %v15389_v27  ;;  %8292 = vmatprep.subr.bf16.mxu0 %v15391_v46  ;;  %v7239_v6 = vld [vmem:[#allocation7 + $0xdb0] sm:$0xff]  ;;  %v7236_v27 = vld [vmem:[#allocation7 + $0xd98] sm:$0xff] }
 0x647   :  { %v7240_v46 = vld [vmem:[#allocation7 + $0xdb8] sm:$0xff]  ;;  %v15429_v17 = vcombine.high %v7235_v21, %v7239_v6  ;;  %v15428_v12 = vcombine.low %v7235_v21, %v7239_v6 }
 0x648   :  { %v15431_v37 = vcombine.high %v7236_v27, %v7240_v46  ;;  %v15430_v13 = vcombine.low %v7236_v27, %v7240_v46  ;;  %v7272_v21 = vld [vmem:[#allocation7 + $0xeb8] sm:$0xff] }
 0x649   :  { %8200 = vmatpush1.bf16.msra.mxu1 %v15388_v23  ;;  %8293 = vmatpush1.bf16.msra.mxu0 %v15390_v20  ;;  %v7243_v23 = vld [vmem:[#allocation7 + $0xdd0] sm:$0xff] }
 0x64a   :  { %8201 = vmatprep.subr.bf16.mxu1 %v15397_v61  ;;  %8294 = vmatprep.subr.bf16.mxu0 %v15399_v59  ;;  %v7247_v20 = vld [vmem:[#allocation7 + $0xdf0] sm:$0xff]  ;;  %v7244_v61 = vld [vmem:[#allocation7 + $0xdd8] sm:$0xff] }
 0x64b   :  { %8054 = vmatmul.mubr.bf16.gmra.mrb[64].mxu1 %v19799_v42  ;;  %8147 = vmatmul.mubr.bf16.gmra.mrb[84].mxu0 %v19799_v42  ;;  %v7248_v59 = vld [vmem:[#allocation7 + $0xdf8] sm:$0xff]  ;;  %v15437_v10 = vcombine.high %v7243_v23, %v7247_v20  ;;  %v15436_v32 = vcombine.low %v7243_v23, %v7247_v20 }
 0x64c   :  { %8063 = vmatprep.mubr.bf16.mxu1 %v19824_v54  ;;  %8156 = vmatprep.mubr.bf16.mxu0 %v19824_v54  ;;  %v15439_v47 = vcombine.high %v7244_v61, %v7248_v59  ;;  %v15438_v39 = vcombine.low %v7244_v61, %v7248_v59 }
 0x64d   :  { %8202 = vmatpush1.bf16.msra.mxu1 %v15396_v36  ;;  %8295 = vmatpush1.bf16.msra.mxu0 %v15398_v22  ;;  %v7251_v36 = vld [vmem:[#allocation7 + $0xe10] sm:$0xff]  ;;  %v20097_v22 = vsel %vm1806_vm3, %v19864_v56, %v19883_v62  ;;  %v7264_v56 = vld [vmem:[#allocation7 + $0xe78] sm:$0xff] }
 0x64e   :  { %8203 = vmatprep.subr.bf16.mxu1 %v15405_v16  ;;  %8296 = vmatprep.subr.bf16.mxu0 %v15407_v3  ;;  %v7255_v16 = vld [vmem:[#allocation7 + $0xe30] sm:$0xff]  ;;  %v7252_v3 = vld [vmem:[#allocation7 + $0xe18] sm:$0xff] }
 0x64f   :  { %v15445_v24 = vcombine.high %v7251_v36, %v7255_v16  ;;  %v15444_v28 = vcombine.low %v7251_v36, %v7255_v16  ;;  %v15446_v57 = vcombine.low %v7252_v3, %v7256_v7 }
 0x651   :  { %8204 = vmatpush1.bf16.msra.mxu1 %v15404_v45  ;;  %8297 = vmatpush1.bf16.msra.mxu0 %v15406_v8  ;;  %v15447_v45 = vcombine.high %v7252_v3, %v7256_v7  ;;  %v7259_v8 = vld [vmem:[#allocation7 + $0xe50] sm:$0xff] }
 0x652   :  { %8205 = vmatprep.subr.bf16.mxu1 %v15413_v41  ;;  %8298 = vmatprep.subr.bf16.mxu0 %v15415_v40  ;;  %v7263_v41 = vld [vmem:[#allocation7 + $0xe70] sm:$0xff]  ;;  %v7260_v40 = vld [vmem:[#allocation7 + $0xe58] sm:$0xff] }
 0x653   :  { %8064 = vmatmul.mubr.bf16.gmra.mrb[68].mxu1 %v19856_v11  ;;  %8157 = vmatmul.mubr.bf16.gmra.mrb[88].mxu0 %v19856_v11  ;;  %v15453_v35 = vcombine.high %v7259_v8, %v7263_v41  ;;  %v15452_v30 = vcombine.low %v7259_v8, %v7263_v41  ;;  %v15454_v6 = vcombine.low %v7260_v40, %v7264_v56 }
 0x654   :  { %8073 = vmatprep.mubr.bf16.mxu1 %v19873_v31  ;;  %8166 = vmatprep.mubr.bf16.mxu0 %v19873_v31 }
 0x655   :  { %8206 = vmatpush1.bf16.msra.mxu1 %v15412_v18  ;;  %8299 = vmatpush1.bf16.msra.mxu0 %v15414_v63  ;;  %v15455_v18 = vcombine.high %v7260_v40, %v7264_v56  ;;  %v7267_v63 = vld [vmem:[#allocation7 + $0xe90] sm:$0xff] }
 0x656   :  { %8207 = vmatprep.subr.bf16.mxu1 %v15421_v50  ;;  %8300 = vmatprep.subr.bf16.mxu0 %v15423_v51  ;;  %v7271_v50 = vld [vmem:[#allocation7 + $0xeb0] sm:$0xff]  ;;  %v7268_v51 = vld [vmem:[#allocation7 + $0xe98] sm:$0xff] }
 0x657   :  { %v15461_v27 = vcombine.high %v7267_v63, %v7271_v50  ;;  %v15463_v46 = vcombine.high %v7268_v51, %v7272_v21  ;;  %v15460_v23 = vcombine.low %v7267_v63, %v7271_v50  ;;  %v15462_v20 = vcombine.low %v7268_v51, %v7272_v21  ;;  %v7299_v56 = vld [vmem:[#allocation7 + $0xf90] sm:$0xff] }
 0x658   :  { %v7307_v21 = vld [vmem:[#allocation7 + $0xfd0] sm:$0xff] }
 0x659   :  { %8208 = vmatpush1.bf16.msra.mxu1 %v15420_v48  ;;  %8301 = vmatpush1.bf16.msra.mxu0 %v15422_v25  ;;  %v7275_v48 = vld [vmem:[#allocation7 + $0xed0] sm:$0xff] }
 0x65a   :  { %8209 = vmatprep.subr.bf16.mxu1 %v15429_v17  ;;  %8302 = vmatprep.subr.bf16.mxu0 %v15431_v37  ;;  %v7279_v25 = vld [vmem:[#allocation7 + $0xef0] sm:$0xff]  ;;  %v7276_v17 = vld [vmem:[#allocation7 + $0xed8] sm:$0xff] }
 0x65b   :  { %8074 = vmatmul.mubr.bf16.gmra.mrb[72].mxu1 %v19902_v14  ;;  %8167 = vmatmul.mubr.bf16.gmra.mrb[92].mxu0 %v19902_v14  ;;  %v7280_v37 = vld [vmem:[#allocation7 + $0xef8] sm:$0xff]  ;;  %v15469_v61 = vcombine.high %v7275_v48, %v7279_v25  ;;  %v15468_v36 = vcombine.low %v7275_v48, %v7279_v25 }
 0x65c   :  { %8083 = vmatprep.mubr.bf16.mxu1 %v20097_v22  ;;  %8176 = vmatprep.mubr.bf16.mxu0 %v20097_v22  ;;  %v15471_v59 = vcombine.high %v7276_v17, %v7280_v37  ;;  %v15470_v16 = vcombine.low %v7276_v17, %v7280_v37  ;;  %v8480_v37 = vld [vmem:[#allocation7 + $0x1000] sm:$0xff] }
 0x65d   :  { %8210 = vmatpush1.bf16.msra.mxu1 %v15428_v12  ;;  %8303 = vmatpush1.bf16.msra.mxu0 %v15430_v13  ;;  %v7283_v12 = vld [vmem:[#allocation7 + $0xf10] sm:$0xff] }
 0x65e   :  { %8211 = vmatprep.subr.bf16.mxu1 %v15437_v10  ;;  %8304 = vmatprep.subr.bf16.mxu0 %v15439_v47  ;;  %v7287_v13 = vld [vmem:[#allocation7 + $0xf30] sm:$0xff]  ;;  %v7284_v10 = vld [vmem:[#allocation7 + $0xf18] sm:$0xff] }
 0x65f   :  { %v7288_v47 = vld [vmem:[#allocation7 + $0xf38] sm:$0xff]  ;;  %v15477_v3 = vcombine.high %v7283_v12, %v7287_v13  ;;  %v15476_v8 = vcombine.low %v7283_v12, %v7287_v13 }
 0x660   :  { %v15479_v7 = vcombine.high %v7284_v10, %v7288_v47  ;;  %v15478_v41 = vcombine.low %v7284_v10, %v7288_v47  ;;  %v8488_v47 = vld [vmem:[#allocation7 + $0x1040] sm:$0xff] }
 0x661   :  { %8212 = vmatpush1.bf16.msra.mxu1 %v15436_v32  ;;  %8305 = vmatpush1.bf16.msra.mxu0 %v15438_v39  ;;  %v7291_v32 = vld [vmem:[#allocation7 + $0xf50] sm:$0xff] }
 0x662   :  { %8213 = vmatprep.subr.bf16.mxu1 %v15445_v24  ;;  %8306 = vmatprep.subr.bf16.mxu0 %v15447_v45  ;;  %v7295_v39 = vld [vmem:[#allocation7 + $0xf70] sm:$0xff]  ;;  %v7292_v24 = vld [vmem:[#allocation7 + $0xf58] sm:$0xff] }
 0x663   :  { %8084 = vmatmul.mubr.bf16.gmra.mrb[76].mxu1 %v20104_v60  ;;  %8177 = vmatmul.mubr.bf16.gmra.mrb[96].mxu0 %v20104_v60  ;;  %v7296_v45 = vld [vmem:[#allocation7 + $0xf78] sm:$0xff]  ;;  %v15485_v40 = vcombine.high %v7291_v32, %v7295_v39 }
 0x664   :  { %8093 = vmatprep.mubr.bf16.mxu1 %v19883_v62  ;;  %8186 = vmatprep.mubr.bf16.mxu0 %v19883_v62  ;;  %v15486_v63 = vcombine.low %v7292_v24, %v7296_v45 }
 0x665   :  { %8214 = vmatpush1.bf16.msra.mxu1 %v15444_v28  ;;  %8307 = vmatpush1.bf16.msra.mxu0 %v15446_v57  ;;  %v7303_v28 = vld [vmem:[#allocation7 + $0xfb0] sm:$0xff]  ;;  %v7300_v57 = vld [vmem:[#allocation7 + $0xf98] sm:$0xff] }
 0x666   :  { %8215 = vmatprep.subr.bf16.mxu1 %v15453_v35  ;;  %8308 = vmatprep.subr.bf16.mxu0 %v15455_v18  ;;  %v7304_v35 = vld [vmem:[#allocation7 + $0xfb8] sm:$0xff]  ;;  %v15484_v18 = vcombine.low %v7291_v32, %v7295_v39  ;;  %v15493_v50 = vcombine.high %v7299_v56, %v7303_v28 }
 0x667   :  { %v15495_v51 = vcombine.high %v7300_v57, %v7304_v35  ;;  %v15494_v48 = vcombine.low %v7300_v57, %v7304_v35  ;;  %v8504_v35 = vld [vmem:[#allocation7 + $0x10c0] sm:$0xff] }
 0x669   :  { %8216 = vmatpush1.bf16.msra.mxu1 %v15452_v30  ;;  %8309 = vmatpush1.bf16.msra.mxu0 %v15454_v6  ;;  %v7311_v30 = vld [vmem:[#allocation7 + $0xff0] sm:$0xff]  ;;  %v7308_v6 = vld [vmem:[#allocation7 + $0xfd8] sm:$0xff] }
 0x66a   :  { %8217 = vmatprep.subr.bf16.mxu1 %v15461_v27  ;;  %8310 = vmatprep.subr.bf16.mxu0 %v15463_v46  ;;  %v7312_v27 = vld [vmem:[#allocation7 + $0xff8] sm:$0xff]  ;;  %v15492_v46 = vcombine.low %v7299_v56, %v7303_v28  ;;  %v15501_v25 = vcombine.high %v7307_v21, %v7311_v30 }
 0x66b   :  { %8094 = vmatmul.mubr.bf16.gmra.mrb[80].mxu1 %v19878_v44  ;;  %8187 = vmatmul.mubr.bf16.gmra.mrb[100].mxu0 %v19878_v44  ;;  %v15503_v17 = vcombine.high %v7308_v6, %v7312_v27  ;;  %v15502_v12 = vcombine.low %v7308_v6, %v7312_v27  ;;  %v8516_v6 = vld [vmem:[#allocation7 + $0x1120] sm:$0xff]  ;;  %v8513_v27 = vld [vmem:[#allocation7 + $0x1108] sm:$0xff] }
 0x66c   :  { %8229 = vmatprep.mubr.bf16.mxu1 %v19740_v55  ;;  %8322 = vmatprep.mubr.bf16.mxu0 %v19740_v55  ;;  %v15487_v55 = vcombine.high %v7292_v24, %v7296_v45  ;;  %v8496_v45 = vld [vmem:[#allocation7 + $0x1080] sm:$0xff] }
 0x66d   :  { %8218 = vmatpush1.bf16.msra.mxu1 %v15460_v23  ;;  %8311 = vmatpush1.bf16.msra.mxu0 %v15462_v20  ;;  %v8484_v23 = vld [vmem:[#allocation7 + $0x1020] sm:$0xff]  ;;  %v8481_v20 = vld [vmem:[#allocation7 + $0x1008] sm:$0xff] }
 0x66e   :  { %8219 = vmatprep.subr.bf16.mxu1 %v15469_v61  ;;  %8312 = vmatprep.subr.bf16.mxu0 %v15471_v59  ;;  %v8485_v61 = vld [vmem:[#allocation7 + $0x1028] sm:$0xff]  ;;  %v15500_v59 = vcombine.low %v7307_v21, %v7311_v30  ;;  %v15505_v13 = vcombine.high %v8480_v37, %v8484_v23  ;;  %v8512_v30 = vld [vmem:[#allocation7 + $0x1100] sm:$0xff] }
 0x66f   :  { %v15507_v10 = vcombine.high %v8481_v20, %v8485_v61  ;;  %v15506_v32 = vcombine.low %v8481_v20, %v8485_v61  ;;  %v8524_v20 = vld [vmem:[#allocation7 + $0x1160] sm:$0xff]  ;;  %v8521_v61 = vld [vmem:[#allocation7 + $0x1148] sm:$0xff] }
 0x671   :  { %8220 = vmatpush1.bf16.msra.mxu1 %v15468_v36  ;;  %8313 = vmatpush1.bf16.msra.mxu0 %v15470_v16  ;;  %v8492_v36 = vld [vmem:[#allocation7 + $0x1060] sm:$0xff]  ;;  %v8489_v16 = vld [vmem:[#allocation7 + $0x1048] sm:$0xff] }
 0x672   :  { %8221 = vmatprep.subr.bf16.mxu1 %v15477_v3  ;;  %8314 = vmatprep.subr.bf16.mxu0 %v15479_v7  ;;  %v8493_v3 = vld [vmem:[#allocation7 + $0x1068] sm:$0xff]  ;;  %v15504_v7 = vcombine.low %v8480_v37, %v8484_v23  ;;  %v15513_v39 = vcombine.high %v8488_v47, %v8492_v36  ;;  %v8520_v23 = vld [vmem:[#allocation7 + $0x1140] sm:$0xff] }
 0x673   :  { %v15515_v24 = vcombine.high %v8489_v16, %v8493_v3  ;;  %v15514_v56 = vcombine.low %v8489_v16, %v8493_v3  ;;  %v8533_v16 = vld [vmem:[#allocation7 + $0x11a8] sm:$0xff]  ;;  %v15544_v3 = vcombine.low %v8520_v23, %v8524_v20 }
 0x675   :  { %8222 = vmatpush1.bf16.msra.mxu1 %v15476_v8  ;;  %8315 = vmatpush1.bf16.msra.mxu0 %v15478_v41  ;;  %v8500_v8 = vld [vmem:[#allocation7 + $0x10a0] sm:$0xff]  ;;  %v8497_v41 = vld [vmem:[#allocation7 + $0x1088] sm:$0xff] }
 0x676   :  { %8223 = vmatprep.subr.bf16.mxu1 %v15485_v40  ;;  %8316 = vmatprep.subr.bf16.mxu0 %v15487_v55  ;;  %v8501_v40 = vld [vmem:[#allocation7 + $0x10a8] sm:$0xff]  ;;  %v15512_v55 = vcombine.low %v8488_v47, %v8492_v36  ;;  %v15521_v28 = vcombine.high %v8496_v45, %v8500_v8  ;;  %v8532_v47 = vld [vmem:[#allocation7 + $0x11a0] sm:$0xff] }
 0x677   :  { %v15523_v57 = vcombine.high %v8497_v41, %v8501_v40  ;;  %v8529_v36 = vld [vmem:[#allocation7 + $0x1188] sm:$0xff] }
 0x679   :  { %8224 = vmatpush1.bf16.msra.mxu1 %v15484_v18  ;;  %8317 = vmatpush1.bf16.msra.mxu0 %v15486_v63  ;;  %v8508_v18 = vld [vmem:[#allocation7 + $0x10e0] sm:$0xff]  ;;  %v8505_v63 = vld [vmem:[#allocation7 + $0x10c8] sm:$0xff] }
 0x67a   :  { %8225 = vmatprep.subr.bf16.mxu1 %v15493_v50  ;;  %8318 = vmatprep.subr.bf16.mxu0 %v15495_v51  ;;  %v8509_v50 = vld [vmem:[#allocation7 + $0x10e8] sm:$0xff]  ;;  %v15522_v51 = vcombine.low %v8497_v41, %v8501_v40  ;;  %v15529_v21 = vcombine.high %v8504_v35, %v8508_v18  ;;  %v15554_v40 = vcombine.low %v8529_v36, %v8533_v16 }
 0x67b   :  { %v8541_v41 = vld [vmem:[#allocation7 + $0x11e8] sm:$0xff] }
 0x67d   :  { %8226 = vmatpush1.bf16.msra.mxu1 %v15492_v46  ;;  %8319 = vmatpush1.bf16.msra.mxu0 %v15494_v48  ;;  %v8517_v46 = vld [vmem:[#allocation7 + $0x1128] sm:$0xff]  ;;  %v15528_v48 = vcombine.low %v8504_v35, %v8508_v18 }
 0x67e   :  { %8227 = vmatprep.subr.bf16.mxu1 %v15501_v25  ;;  %8320 = vmatprep.subr.bf16.mxu0 %v15503_v17  ;;  %v15530_v25 = vcombine.low %v8505_v63, %v8509_v50  ;;  %v15537_v17 = vcombine.high %v8512_v30, %v8516_v6  ;;  %v15539_v37 = vcombine.high %v8513_v27, %v8517_v46  ;;  %v8549_v35 = vld [vmem:[#allocation7 + $0x1228] sm:$0xff] }
 0x681   :  { %8228 = vmatpush1.bf16.msra.mxu1 %v15500_v59  ;;  %8321 = vmatpush1.bf16.msra.mxu0 %v15502_v12  ;;  %v8525_v59 = vld [vmem:[#allocation7 + $0x1168] sm:$0xff]  ;;  %v15538_v12 = vcombine.low %v8513_v27, %v8517_v46  ;;  %v8560_v46 = vld [vmem:[#allocation7 + $0x1280] sm:$0xff] }
 0x682   :  { %9282 = vmatprep.subr.bf16.mxu1 %v15505_v13  ;;  %9375 = vmatprep.subr.bf16.mxu0 %v15507_v10  ;;  %v15545_v13 = vcombine.high %v8520_v23, %v8524_v20  ;;  %v8528_v10 = vld [vmem:[#allocation7 + $0x1180] sm:$0xff] }
 0x684   :  { %8230 = vmatmul.mubr.bf16.vlgmr.msra.gmra.mrb[84].mxu1 %v19747_v2  ;;  %8323 = vmatmul.mubr.bf16.vlgmr.msra.gmra.mrb[104].mxu0 %v19747_v2  ;;  %v15520_v2 = vcombine.low %v8496_v45, %v8500_v8  ;;  %v8540_v45 = vld [vmem:[#allocation7 + $0x11e0] sm:$0xff]  ;;  %v8537_v8 = vld [vmem:[#allocation7 + $0x11c8] sm:$0xff] }
 0x685   :  { %8239 = vmatprep.mubr.bf16.mxu1 %v19770_v5  ;;  %8332 = vmatprep.mubr.bf16.mxu0 %v19770_v5  ;;  %v15531_v5 = vcombine.high %v8505_v63, %v8509_v50  ;;  %v15562_v63 = vcombine.low %v8537_v8, %v8541_v41 }
 0x686   :  { %9283 = vmatpush1.bf16.msra.mxu1 %v15504_v7  ;;  %9376 = vmatpush1.bf16.msra.mxu0 %v15506_v32  ;;  %v15546_v7 = vcombine.low %v8521_v61, %v8525_v59  ;;  %v15553_v32 = vcombine.high %v8528_v10, %v8532_v47 }
 0x687   :  { %9284 = vmatprep.subr.bf16.mxu1 %v15513_v39  ;;  %9377 = vmatprep.subr.bf16.mxu0 %v15515_v24  ;;  %v15555_v39 = vcombine.high %v8529_v36, %v8533_v16  ;;  %v8536_v24 = vld [vmem:[#allocation7 + $0x11c0] sm:$0xff] }
 0x688   :  { %v15560_v18 = vcombine.low %v8536_v24, %v8540_v45  ;;  %v8576_v16 = vld [vmem:[#allocation7 + $0x1300] sm:$0xff] }
 0x68a   :  { %9285 = vmatpush1.bf16.msra.mxu1 %v15512_v55  ;;  %9378 = vmatpush1.bf16.msra.mxu0 %v15514_v56  ;;  %v15561_v55 = vcombine.high %v8536_v24, %v8540_v45  ;;  %v8544_v56 = vld [vmem:[#allocation7 + $0x1200] sm:$0xff] }
 0x68b   :  { %9286 = vmatprep.subr.bf16.mxu1 %v15521_v28  ;;  %9379 = vmatprep.subr.bf16.mxu0 %v15523_v57  ;;  %v8548_v28 = vld [vmem:[#allocation7 + $0x1220] sm:$0xff]  ;;  %v8545_v57 = vld [vmem:[#allocation7 + $0x1208] sm:$0xff] }
 0x68c   :  { %8240 = vmatmul.mubr.bf16.gmra.mrb[88].mxu1 %v19799_v42  ;;  %8333 = vmatmul.mubr.bf16.gmra.mrb[108].mxu0 %v19799_v42  ;;  %v15536_v42 = vcombine.low %v8512_v30, %v8516_v6  ;;  %v15569_v50 = vcombine.high %v8544_v56, %v8548_v28  ;;  %v8557_v30 = vld [vmem:[#allocation7 + $0x1268] sm:$0xff]  ;;  %v15570_v6 = vcombine.low %v8545_v57, %v8549_v35 }
 0x68d   :  { %8249 = vmatprep.mubr.bf16.mxu1 %v19824_v54  ;;  %8342 = vmatprep.mubr.bf16.mxu0 %v19824_v54  ;;  %v15547_v54 = vcombine.high %v8521_v61, %v8525_v59  ;;  %v8568_v59 = vld [vmem:[#allocation7 + $0x12c0] sm:$0xff] }
 0x68e   :  { %9287 = vmatpush1.bf16.msra.mxu1 %v15520_v2  ;;  %9380 = vmatpush1.bf16.msra.mxu0 %v15522_v51  ;;  %v15571_v2 = vcombine.high %v8545_v57, %v8549_v35  ;;  %v8552_v51 = vld [vmem:[#allocation7 + $0x1240] sm:$0xff] }
 0x68f   :  { %9288 = vmatprep.subr.bf16.mxu1 %v15529_v21  ;;  %9381 = vmatprep.subr.bf16.mxu0 %v15531_v5  ;;  %v8556_v21 = vld [vmem:[#allocation7 + $0x1260] sm:$0xff]  ;;  %v8553_v5 = vld [vmem:[#allocation7 + $0x1248] sm:$0xff] }
 0x690   :  { %v15577_v27 = vcombine.high %v8552_v51, %v8556_v21  ;;  %v15578_v23 = vcombine.low %v8553_v5, %v8557_v30  ;;  %v8592_v57 = vld [vmem:[#allocation7 + $0x1380] sm:$0xff] }
 0x691   :  { %v8596_v35 = vld [vmem:[#allocation7 + $0x13a0] sm:$0xff] }
 0x692   :  { %9289 = vmatpush1.bf16.msra.mxu1 %v15528_v48  ;;  %9382 = vmatpush1.bf16.msra.mxu0 %v15530_v25  ;;  %v8564_v48 = vld [vmem:[#allocation7 + $0x12a0] sm:$0xff]  ;;  %v8561_v25 = vld [vmem:[#allocation7 + $0x1288] sm:$0xff] }
 0x693   :  { %9290 = vmatprep.subr.bf16.mxu1 %v15537_v17  ;;  %9383 = vmatprep.subr.bf16.mxu0 %v15539_v37  ;;  %v8565_v17 = vld [vmem:[#allocation7 + $0x12a8] sm:$0xff]  ;;  %v15576_v37 = vcombine.low %v8552_v51, %v8556_v21  ;;  %v15585_v20 = vcombine.high %v8560_v46, %v8564_v48  ;;  %v15617_v51 = vcombine.high %v8592_v57, %v8596_v35 }
 0x694   :  { %8250 = vmatmul.mubr.bf16.gmra.mrb[92].mxu1 %v19856_v11  ;;  %8343 = vmatmul.mubr.bf16.gmra.mrb[112].mxu0 %v19856_v11  ;;  %v15552_v11 = vcombine.low %v8528_v10, %v8532_v47  ;;  %v15587_v61 = vcombine.high %v8561_v25, %v8565_v17  ;;  %v15586_v10 = vcombine.low %v8561_v25, %v8565_v17  ;;  %v8482_v25 = vld [vmem:[#allocation7 + $0x1010] sm:$0xff] }
 0x695   :  { %8259 = vmatprep.mubr.bf16.mxu1 %v19873_v31  ;;  %8352 = vmatprep.mubr.bf16.mxu0 %v19873_v31  ;;  %v15563_v31 = vcombine.high %v8537_v8, %v8541_v41  ;;  %v8584_v8 = vld [vmem:[#allocation7 + $0x1340] sm:$0xff]  ;;  %v8486_v17 = vld [vmem:[#allocation7 + $0x1030] sm:$0xff] }
 0x696   :  { %9291 = vmatpush1.bf16.msra.mxu1 %v15536_v42  ;;  %9384 = vmatpush1.bf16.msra.mxu0 %v15538_v12  ;;  %v8612_v42 = vrot.slane %v19658_v26, 2  ;;  %v8572_v12 = vld [vmem:[#allocation7 + $0x12e0] sm:$0xff] }
 0x697   :  { %9292 = vmatprep.subr.bf16.mxu1 %v15545_v13  ;;  %9385 = vmatprep.subr.bf16.mxu0 %v15547_v54  ;;  %v8573_v13 = vld [vmem:[#allocation7 + $0x12e8] sm:$0xff]  ;;  %v15584_v54 = vcombine.low %v8560_v46, %v8564_v48  ;;  %v15593_v47 = vcombine.high %v8568_v59, %v8572_v12  ;;  %v8588_v41 = vld [vmem:[#allocation7 + $0x1360] sm:$0xff] }
 0x69a   :  { %9293 = vmatpush1.bf16.msra.mxu1 %v15544_v3  ;;  %9386 = vmatpush1.bf16.msra.mxu0 %v15546_v7  ;;  %v8580_v7 = vld [vmem:[#allocation7 + $0x1320] sm:$0xff] }
 0x69b   :  { %9294 = vmatprep.subr.bf16.mxu1 %v15553_v32  ;;  %9387 = vmatprep.subr.bf16.mxu0 %v15555_v39  ;;  %v8577_v32 = vld [vmem:[#allocation7 + $0x1308] sm:$0xff]  ;;  %v15601_v45 = vcombine.high %v8576_v16, %v8580_v7 }
 0x69c   :  { %8260 = vmatmul.mubr.bf16.gmra.mrb[96].mxu1 %v19902_v14  ;;  %8353 = vmatmul.mubr.bf16.gmra.mrb[116].mxu0 %v19902_v14  ;;  %v15568_v14 = vcombine.low %v8544_v56, %v8548_v28  ;;  %v8581_v39 = vld [vmem:[#allocation7 + $0x1328] sm:$0xff]  ;;  %v15609_v56 = vcombine.high %v8584_v8, %v8588_v41 }
 0x69d   :  { %8269 = vmatprep.mubr.bf16.mxu1 %v20097_v22  ;;  %8362 = vmatprep.mubr.bf16.mxu0 %v20097_v22  ;;  %v15579_v22 = vcombine.high %v8553_v5, %v8557_v30  ;;  %v8600_v5 = vld [vmem:[#allocation7 + $0x13c0] sm:$0xff] }
 0x69e   :  { %9295 = vmatpush1.bf16.msra.mxu1 %v15552_v11  ;;  %9388 = vmatpush1.bf16.msra.mxu0 %v15554_v40  ;;  %v8585_v11 = vld [vmem:[#allocation7 + $0x1348] sm:$0xff]  ;;  %v8604_v30 = vld [vmem:[#allocation7 + $0x13e0] sm:$0xff] }
 0x69f   :  { %9296 = vmatprep.subr.bf16.mxu1 %v15561_v55  ;;  %9389 = vmatprep.subr.bf16.mxu0 %v15563_v31  ;;  %v8589_v40 = vld [vmem:[#allocation7 + $0x1368] sm:$0xff]  ;;  %v15600_v55 = vcombine.low %v8576_v16, %v8580_v7  ;;  %v15602_v31 = vcombine.low %v8577_v32, %v8581_v39  ;;  %v15625_v46 = vcombine.high %v8600_v5, %v8604_v30 }
 0x6a0   :  { %v15611_v28 = vcombine.high %v8585_v11, %v8589_v40  ;;  %v15508_v16 = vcombine.low %v8482_v25, %v8486_v17 }
 0x6a2   :  { %9297 = vmatpush1.bf16.msra.mxu1 %v15560_v18  ;;  %9390 = vmatpush1.bf16.msra.mxu0 %v15562_v63  ;;  %v8593_v18 = vld [vmem:[#allocation7 + $0x1388] sm:$0xff] }
 0x6a3   :  { %9298 = vmatprep.subr.bf16.mxu1 %v15569_v50  ;;  %9391 = vmatprep.subr.bf16.mxu0 %v15571_v2  ;;  %v8597_v63 = vld [vmem:[#allocation7 + $0x13a8] sm:$0xff]  ;;  %v15608_v50 = vcombine.low %v8584_v8, %v8588_v41  ;;  %v15610_v2 = vcombine.low %v8585_v11, %v8589_v40  ;;  %v8614_v41 = vrot.slane %v19677_v9, 2  ;;  %v8506_v40 = vld [vmem:[#allocation7 + $0x10d0] sm:$0xff] }
 0x6a4   :  { %8270 = vmatmul.mubr.bf16.gmra.mrb[100].mxu1 %v20104_v60  ;;  %8363 = vmatmul.mubr.bf16.gmra.mrb[120].mxu0 %v20104_v60  ;;  %v8569_v60 = vld [vmem:[#allocation7 + $0x12c8] sm:$0xff]  ;;  %v15619_v21 = vcombine.high %v8593_v18, %v8597_v63  ;;  %v8514_v9 = vld [vmem:[#allocation7 + $0x1110] sm:$0xff] }
 0x6a5   :  { %8279 = vmatprep.mubr.bf16.mxu1 %v19883_v62  ;;  %8372 = vmatprep.mubr.bf16.mxu0 %v19883_v62  ;;  %v8611_v62 = vrot.slane %v19640_v53, 2  ;;  %v15595_v36 = vcombine.high %v8569_v60, %v8573_v13  ;;  %v15592_v53 = vcombine.low %v8568_v59, %v8572_v12  ;;  %v15594_v24 = vcombine.low %v8569_v60, %v8573_v13  ;;  %v8490_v13 = vld [vmem:[#allocation7 + $0x1050] sm:$0xff] }
 0x6a6   :  { %9299 = vmatpush1.bf16.msra.mxu1 %v15568_v14  ;;  %9392 = vmatpush1.bf16.msra.mxu0 %v15570_v6  ;;  %v8601_v14 = vld [vmem:[#allocation7 + $0x13c8] sm:$0xff]  ;;  %v15509_v59 = vcombine.high %v8482_v25, %v8486_v17  ;;  %v8609_v60 = vrot.slane %v19654_v33, 2  ;;  %v8498_v33 = vld [vmem:[#allocation7 + $0x1090] sm:$0xff]  ;;  %v8527_v25 = vld [vmem:[#allocation7 + $0x1178] sm:$0xff] }
 0x6a7   :  { %9300 = vmatprep.subr.bf16.mxu1 %v15577_v27  ;;  %9393 = vmatprep.subr.bf16.mxu0 %v15579_v22  ;;  %v20141_v3 = vsel %vm417_vm0, %v8611_v62, %v8612_v42  ;;  %v8605_v6 = vld [vmem:[#allocation7 + $0x13e8] sm:$0xff]  ;;  %v15616_v27 = vcombine.low %v8592_v57, %v8596_v35  ;;  %v15618_v22 = vcombine.low %v8593_v18, %v8597_v63  ;;  %v8491_v62 = vld [vmem:[#allocation7 + $0x1058] sm:$0xff] }
 0x6a8   :  { %v15627_v48 = vcombine.high %v8601_v14, %v8605_v6  ;;  %v20163_v35 = vsel %vm417_vm0, %v8609_v60, %v8614_v41 }
 0x6aa   :  { %9301 = vmatpush1.bf16.msra.mxu1 %v15576_v37  ;;  %9394 = vmatpush1.bf16.msra.mxu0 %v15578_v23  ;;  %v8483_v37 = vld [vmem:[#allocation7 + $0x1018] sm:$0xff] }
 0x6ab   :  { %9302 = vmatprep.subr.bf16.mxu1 %v15585_v20  ;;  %9395 = vmatprep.subr.bf16.mxu0 %v15587_v61  ;;  %v8487_v23 = vld [vmem:[#allocation7 + $0x1038] sm:$0xff]  ;;  %v15624_v20 = vcombine.low %v8600_v5, %v8604_v30  ;;  %v15626_v61 = vcombine.low %v8601_v14, %v8605_v6  ;;  %v8618_v30 = vrot.slane %v19730_v34, 2  ;;  %v8530_v34 = vld [vmem:[#allocation7 + $0x1190] sm:$0xff] }
 0x6ac   :  { %8280 = vmatmul.mubr.bf16.gmra.mrb[104].mxu1 %v19878_v44  ;;  %8373 = vmatmul.mubr.bf16.gmra.mrb[124].mxu0 %v19878_v44  ;;  %v15603_v44 = vcombine.high %v8577_v32, %v8581_v39  ;;  %v15511_v12 = vcombine.high %v8483_v37, %v8487_v23  ;;  %v15510_v7 = vcombine.low %v8483_v37, %v8487_v23 }
 0x6ad   :  { %9314 = vmatprep.mubr.bf16.mxu1 %v20141_v3  ;;  %9407 = vmatprep.mubr.bf16.mxu0 %v20141_v3  ;;  %v20175_v23 = vsel %vm417_vm0, %v8614_v41, %v8618_v30  ;;  %v8547_v41 = vld [vmem:[#allocation7 + $0x1218] sm:$0xff] }
 0x6ae   :  { %9303 = vmatpush1.bf16.msra.mxu1 %v15584_v54  ;;  %9396 = vmatpush1.bf16.msra.mxu0 %v15586_v10  ;;  %v8616_v54 = vrot.slane %v19684_v43, 2  ;;  %v8494_v10 = vld [vmem:[#allocation7 + $0x1070] sm:$0xff] }
 0x6af   :  { %9304 = vmatprep.subr.bf16.mxu1 %v15593_v47  ;;  %9397 = vmatprep.subr.bf16.mxu0 %v15595_v36  ;;  %v8495_v47 = vld [vmem:[#allocation7 + $0x1078] sm:$0xff]  ;;  %v8608_v36 = vrot.slane %v19638_v49, 2  ;;  %v15517_v39 = vcombine.high %v8490_v13, %v8494_v10  ;;  %v8502_v49 = vld [vmem:[#allocation7 + $0x10b0] sm:$0xff] }
 0x6b0   :  { %v20156_v43 = vsel %vm417_vm0, %v8612_v42, %v8616_v54  ;;  %v15518_v8 = vcombine.low %v8491_v62, %v8495_v47  ;;  %v15525_v11 = vcombine.high %v8498_v33, %v8502_v49  ;;  %v8620_v42 = vrot.slane %v19749_v38, 2 }
 0x6b1   :  { %v20149_v32 = vsel %vm417_vm0, %v8608_v36, %v8609_v60  ;;  %v8535_v60 = vld [vmem:[#allocation7 + $0x11b8] sm:$0xff]  ;;  %v8538_v36 = vld [vmem:[#allocation7 + $0x11d0] sm:$0xff] }
 0x6b2   :  { %9305 = vmatpush1.bf16.msra.mxu1 %v15592_v53  ;;  %9398 = vmatpush1.bf16.msra.mxu0 %v15594_v24  ;;  %v15519_v53 = vcombine.high %v8491_v62, %v8495_v47  ;;  %v8499_v24 = vld [vmem:[#allocation7 + $0x1098] sm:$0xff]  ;;  %v20168_v38 = vsel %vm417_vm0, %v8616_v54, %v8620_v42 }
 0x6b3   :  { %9306 = vmatprep.subr.bf16.mxu1 %v15601_v45  ;;  %9399 = vmatprep.subr.bf16.mxu0 %v15603_v44  ;;  %v8503_v45 = vld [vmem:[#allocation7 + $0x10b8] sm:$0xff]  ;;  %v15516_v44 = vcombine.low %v8490_v13, %v8494_v10  ;;  %v8622_v10 = vrot.slane %v19788_v29, 2 }
 0x6b4   :  { %v15527_v26 = vcombine.high %v8499_v24, %v8503_v45  ;;  %v15526_v57 = vcombine.low %v8499_v24, %v8503_v45 }
 0x6b5   :  { %v20189_v24 = vsel %vm417_vm0, %v8618_v30, %v8622_v10  ;;  %v8567_v30 = vld [vmem:[#allocation7 + $0x12b8] sm:$0xff] }
 0x6b6   :  { %9307 = vmatpush1.bf16.msra.mxu1 %v15600_v55  ;;  %9400 = vmatpush1.bf16.msra.mxu0 %v15602_v31  ;;  %v8510_v55 = vld [vmem:[#allocation7 + $0x10f0] sm:$0xff]  ;;  %v8507_v31 = vld [vmem:[#allocation7 + $0x10d8] sm:$0xff] }
 0x6b7   :  { %9308 = vmatprep.subr.bf16.mxu1 %v15609_v56  ;;  %9401 = vmatprep.subr.bf16.mxu0 %v15611_v28  ;;  %v8511_v56 = vld [vmem:[#allocation7 + $0x10f8] sm:$0xff]  ;;  %v15524_v28 = vcombine.low %v8498_v33, %v8502_v49  ;;  %v15533_v18 = vcombine.high %v8506_v40, %v8510_v55 }
 0x6b8   :  { %v15535_v63 = vcombine.high %v8507_v31, %v8511_v56  ;;  %v15534_v5 = vcombine.low %v8507_v31, %v8511_v56  ;;  %v8554_v56 = vld [vmem:[#allocation7 + $0x1250] sm:$0xff] }
 0x6ba   :  { %9309 = vmatpush1.bf16.msra.mxu1 %v15608_v50  ;;  %9402 = vmatpush1.bf16.msra.mxu0 %v15610_v2  ;;  %v8518_v50 = vld [vmem:[#allocation7 + $0x1130] sm:$0xff]  ;;  %v8515_v2 = vld [vmem:[#allocation7 + $0x1118] sm:$0xff] }
 0x6bb   :  { %9310 = vmatprep.subr.bf16.mxu1 %v15617_v51  ;;  %9403 = vmatprep.subr.bf16.mxu0 %v15619_v21  ;;  %v8519_v51 = vld [vmem:[#allocation7 + $0x1138] sm:$0xff]  ;;  %v15532_v21 = vcombine.low %v8506_v40, %v8510_v55  ;;  %v15541_v14 = vcombine.high %v8514_v9, %v8518_v50  ;;  %v15540_v17 = vcombine.low %v8514_v9, %v8518_v50 }
 0x6bc   :  { %v15543_v6 = vcombine.high %v8515_v2, %v8519_v51  ;;  %v15542_v37 = vcombine.low %v8515_v2, %v8519_v51 }
 0x6be   :  { %9311 = vmatpush1.bf16.msra.mxu1 %v15616_v27  ;;  %9404 = vmatpush1.bf16.msra.mxu0 %v15618_v22  ;;  %v8522_v27 = vld [vmem:[#allocation7 + $0x1150] sm:$0xff]  ;;  %v8624_v22 = vrot.slane %v19801_v1, 2 }
 0x6bf   :  { %9312 = vmatprep.subr.bf16.mxu1 %v15625_v46  ;;  %9405 = vmatprep.subr.bf16.mxu0 %v15627_v48  ;;  %v8526_v46 = vld [vmem:[#allocation7 + $0x1170] sm:$0xff]  ;;  %v8523_v48 = vld [vmem:[#allocation7 + $0x1158] sm:$0xff] }
 0x6c0   :  { %v20180_v1 = vsel %vm417_vm0, %v8620_v42, %v8624_v22  ;;  %v15548_v13 = vcombine.low %v8522_v27, %v8526_v46  ;;  %v15550_v54 = vcombine.low %v8523_v48, %v8527_v25  ;;  %v20200_v42 = vrot.slane %v19846_v4, 2  ;;  %v8562_v4 = vld [vmem:[#allocation7 + $0x1290] sm:$0xff] }
 0x6c2   :  { %9313 = vmatpush1.bf16.msra.mxu1 %v15624_v20  ;;  %9406 = vmatpush1.bf16.msra.mxu0 %v15626_v61  ;;  %v15549_v20 = vcombine.high %v8522_v27, %v8526_v46  ;;  %v15551_v61 = vcombine.high %v8523_v48, %v8527_v25  ;;  %v20204_v50 = vsel %vm417_vm0, %v8622_v10, %v20200_v42  ;;  %v8570_v46 = vld [vmem:[#allocation7 + $0x12d0] sm:$0xff]  ;;  %v8571_v25 = vld [vmem:[#allocation7 + $0x12d8] sm:$0xff] }
 0x6c3   :  { %9468 = vmatprep.subr.bf16.mxu1 %v15509_v59  ;;  %9561 = vmatprep.subr.bf16.mxu0 %v15511_v12  ;;  %v8534_v59 = vld [vmem:[#allocation7 + $0x11b0] sm:$0xff]  ;;  %v8531_v12 = vld [vmem:[#allocation7 + $0x1198] sm:$0xff] }
 0x6c4   :  { %v15557_v62 = vcombine.high %v8530_v34, %v8534_v59  ;;  %v15559_v47 = vcombine.high %v8531_v12, %v8535_v60  ;;  %v15556_v33 = vcombine.low %v8530_v34, %v8534_v59  ;;  %v15558_v49 = vcombine.low %v8531_v12, %v8535_v60  ;;  %v8574_v48 = vld [vmem:[#allocation7 + $0x12f0] sm:$0xff]  ;;  %v8579_v60 = vld [vmem:[#allocation7 + $0x1318] sm:$0xff] }
 0x6c5   :  { %9315 = vmatmul.mubr.bf16.vlgmr.msra.gmra.mrb[60].mxu1 %v20149_v32  ;;  %9408 = vmatmul.mubr.bf16.vlgmr.msra.gmra.mrb[80].mxu0 %v20149_v32  ;;  %v8578_v59 = vld [vmem:[#allocation7 + $0x1310] sm:$0xff] }
 0x6c6   :  { %9324 = vmatprep.mubr.bf16.mxu1 %v20156_v43  ;;  %9417 = vmatprep.mubr.bf16.mxu0 %v20156_v43  ;;  %v8582_v12 = vld [vmem:[#allocation7 + $0x1330] sm:$0xff] }
 0x6c7   :  { %9469 = vmatpush1.bf16.msra.mxu1 %v15508_v16  ;;  %9562 = vmatpush1.bf16.msra.mxu0 %v15510_v7  ;;  %v20186_v16 = vrot.slane %v19858_v52, 2  ;;  %v8542_v7 = vld [vmem:[#allocation7 + $0x11f0] sm:$0xff] }
 0x6c8   :  { %9470 = vmatprep.subr.bf16.mxu1 %v15517_v39  ;;  %9563 = vmatprep.subr.bf16.mxu0 %v15519_v53  ;;  %v8539_v39 = vld [vmem:[#allocation7 + $0x11d8] sm:$0xff]  ;;  %v15565_v45 = vcombine.high %v8538_v36, %v8542_v7 }
 0x6c9   :  { %v8543_v53 = vld [vmem:[#allocation7 + $0x11f8] sm:$0xff]  ;;  %v20195_v52 = vsel %vm417_vm0, %v8624_v22, %v20186_v16 }
 0x6ca   :  { %v15567_v29 = vcombine.high %v8539_v39, %v8543_v53  ;;  %v15566_v40 = vcombine.low %v8539_v39, %v8543_v53  ;;  %v8587_v39 = vld [vmem:[#allocation7 + $0x1358] sm:$0xff] }
 0x6cb   :  { %9471 = vmatpush1.bf16.msra.mxu1 %v15516_v44  ;;  %9564 = vmatpush1.bf16.msra.mxu0 %v15518_v8  ;;  %v8546_v44 = vld [vmem:[#allocation7 + $0x1210] sm:$0xff]  ;;  %v8591_v53 = vld [vmem:[#allocation7 + $0x1378] sm:$0xff] }
 0x6cc   :  { %9472 = vmatprep.subr.bf16.mxu1 %v15525_v11  ;;  %9565 = vmatprep.subr.bf16.mxu0 %v15527_v26  ;;  %v8550_v8 = vld [vmem:[#allocation7 + $0x1230] sm:$0xff]  ;;  %v8551_v11 = vld [vmem:[#allocation7 + $0x1238] sm:$0xff]  ;;  %v15564_v26 = vcombine.low %v8538_v36, %v8542_v7 }
 0x6cd   :  { %9325 = vmatmul.mubr.bf16.gmra.mrb[64].mxu1 %v20163_v35  ;;  %9418 = vmatmul.mubr.bf16.gmra.mrb[84].mxu0 %v20163_v35  ;;  %v15573_v55 = vcombine.high %v8546_v44, %v8550_v8  ;;  %v15575_v31 = vcombine.high %v8547_v41, %v8551_v11  ;;  %v15574_v9 = vcombine.low %v8547_v41, %v8551_v11  ;;  %v8586_v36 = vld [vmem:[#allocation7 + $0x1350] sm:$0xff]  ;;  %v8599_v41 = vld [vmem:[#allocation7 + $0x13b8] sm:$0xff] }
 0x6ce   :  { %9334 = vmatprep.mubr.bf16.mxu1 %v20168_v38  ;;  %9427 = vmatprep.mubr.bf16.mxu0 %v20168_v38  ;;  %v8590_v7 = vld [vmem:[#allocation7 + $0x1370] sm:$0xff] }
 0x6cf   :  { %9473 = vmatpush1.bf16.msra.mxu1 %v15524_v28  ;;  %9566 = vmatpush1.bf16.msra.mxu0 %v15526_v57  ;;  %v8558_v28 = vld [vmem:[#allocation7 + $0x1270] sm:$0xff]  ;;  %v8555_v57 = vld [vmem:[#allocation7 + $0x1258] sm:$0xff]  ;;  %v15612_v11 = vcombine.low %v8586_v36, %v8590_v7 }
 0x6d0   :  { %9474 = vmatprep.subr.bf16.mxu1 %v15533_v18  ;;  %9567 = vmatprep.subr.bf16.mxu0 %v15535_v63  ;;  %v8559_v18 = vld [vmem:[#allocation7 + $0x1278] sm:$0xff]  ;;  %v15572_v63 = vcombine.low %v8546_v44, %v8550_v8  ;;  %v15581_v2 = vcombine.high %v8554_v56, %v8558_v28  ;;  %v8598_v44 = vld [vmem:[#allocation7 + $0x13b0] sm:$0xff] }
 0x6d1   :  { %v15583_v51 = vcombine.high %v8555_v57, %v8559_v18  ;;  %v8595_v8 = vld [vmem:[#allocation7 + $0x1398] sm:$0xff] }
 0x6d3   :  { %9475 = vmatpush1.bf16.msra.mxu1 %v15532_v21  ;;  %9568 = vmatpush1.bf16.msra.mxu0 %v15534_v5  ;;  %v8566_v21 = vld [vmem:[#allocation7 + $0x12b0] sm:$0xff]  ;;  %v8563_v5 = vld [vmem:[#allocation7 + $0x1298] sm:$0xff] }
 0x6d4   :  { %9476 = vmatprep.subr.bf16.mxu1 %v15541_v14  ;;  %9569 = vmatprep.subr.bf16.mxu0 %v15543_v6  ;;  %v15580_v14 = vcombine.low %v8554_v56, %v8558_v28  ;;  %v15582_v6 = vcombine.low %v8555_v57, %v8559_v18  ;;  %v15589_v27 = vcombine.high %v8562_v4, %v8566_v21  ;;  %v8606_v56 = vld [vmem:[#allocation7 + $0x13f0] sm:$0xff]  ;;  %v8603_v28 = vld [vmem:[#allocation7 + $0x13d8] sm:$0xff] }
 0x6d5   :  { %9335 = vmatmul.mubr.bf16.gmra.mrb[68].mxu1 %v20175_v23  ;;  %9428 = vmatmul.mubr.bf16.gmra.mrb[88].mxu0 %v20175_v23  ;;  %v15591_v22 = vcombine.high %v8563_v5, %v8567_v30  ;;  %v8607_v57 = vld [vmem:[#allocation7 + $0x13f8] sm:$0xff] }
 0x6d6   :  { %9344 = vmatprep.mubr.bf16.mxu1 %v20180_v1  ;;  %9437 = vmatprep.mubr.bf16.mxu0 %v20180_v1 }
 0x6d7   :  { %9477 = vmatpush1.bf16.msra.mxu1 %v15540_v17  ;;  %9570 = vmatpush1.bf16.msra.mxu0 %v15542_v37  ;;  %v8575_v17 = vld [vmem:[#allocation7 + $0x12f8] sm:$0xff]  ;;  %v15588_v37 = vcombine.low %v8562_v4, %v8566_v21  ;;  %v15630_v4 = vcombine.low %v8603_v28, %v8607_v57 }
 0x6d8   :  { %9478 = vmatprep.subr.bf16.mxu1 %v15549_v20  ;;  %9571 = vmatprep.subr.bf16.mxu0 %v15551_v61  ;;  %v15590_v20 = vcombine.low %v8563_v5, %v8567_v30  ;;  %v15597_v61 = vcombine.high %v8570_v46, %v8574_v48  ;;  %v15599_v34 = vcombine.high %v8571_v25, %v8575_v17 }
 0x6d9   :  { %v15598_v10 = vcombine.low %v8571_v25, %v8575_v17 }
 0x6db   :  { %9479 = vmatpush1.bf16.msra.mxu1 %v15548_v13  ;;  %9572 = vmatpush1.bf16.msra.mxu0 %v15550_v54  ;;  %v8583_v13 = vld [vmem:[#allocation7 + $0x1338] sm:$0xff]  ;;  %v15596_v54 = vcombine.low %v8570_v46, %v8574_v48 }
 0x6dc   :  { %9480 = vmatprep.subr.bf16.mxu1 %v15557_v62  ;;  %9573 = vmatprep.subr.bf16.mxu0 %v15559_v47  ;;  %v15605_v62 = vcombine.high %v8578_v59, %v8582_v12  ;;  %v15607_v47 = vcombine.high %v8579_v60, %v8583_v13 }
 0x6dd   :  { %9345 = vmatmul.mubr.bf16.gmra.mrb[72].mxu1 %v20189_v24  ;;  %9438 = vmatmul.mubr.bf16.gmra.mrb[92].mxu0 %v20189_v24 }
 0x6de   :  { %9354 = vmatprep.mubr.bf16.mxu1 %v20195_v52  ;;  %9447 = vmatprep.mubr.bf16.mxu0 %v20195_v52 }
 0x6df   :  { %9481 = vmatpush1.bf16.msra.mxu1 %v15556_v33  ;;  %9574 = vmatpush1.bf16.msra.mxu0 %v15558_v49  ;;  %v15604_v33 = vcombine.low %v8578_v59, %v8582_v12  ;;  %v15606_v49 = vcombine.low %v8579_v60, %v8583_v13 }
 0x6e0   :  { %9482 = vmatprep.subr.bf16.mxu1 %v15565_v45  ;;  %9575 = vmatprep.subr.bf16.mxu0 %v15567_v29  ;;  %v15613_v45 = vcombine.high %v8586_v36, %v8590_v7  ;;  %v8594_v29 = vld [vmem:[#allocation7 + $0x1390] sm:$0xff] }
 0x6e1   :  { %v15620_v18 = vcombine.low %v8594_v29, %v8598_v44 }
 0x6e3   :  { %9483 = vmatpush1.bf16.msra.mxu1 %v15564_v26  ;;  %9576 = vmatpush1.bf16.msra.mxu0 %v15566_v40  ;;  %v15614_v26 = vcombine.low %v8587_v39, %v8591_v53  ;;  %v15621_v40 = vcombine.high %v8594_v29, %v8598_v44 }
 0x6e4   :  { %9484 = vmatprep.subr.bf16.mxu1 %v15573_v55  ;;  %9577 = vmatprep.subr.bf16.mxu0 %v15575_v31  ;;  %v15623_v55 = vcombine.high %v8595_v8, %v8599_v41  ;;  %v8602_v31 = vld [vmem:[#allocation7 + $0x13d0] sm:$0xff] }
 0x6e5   :  { %9355 = vmatmul.mubr.bf16.gmra.mrb[76].mxu1 %v20204_v50  ;;  %9448 = vmatmul.mubr.bf16.gmra.mrb[96].mxu0 %v20204_v50 }
 0x6e6   :  { %9364 = vmatprep.mubr.bf16.mxu1 %v20186_v16  ;;  %9457 = vmatprep.mubr.bf16.mxu0 %v20186_v16 }
 0x6e7   :  { %9485 = vmatpush1.bf16.msra.mxu1 %v15572_v63  ;;  %9578 = vmatpush1.bf16.msra.mxu0 %v15574_v9  ;;  %v15622_v63 = vcombine.low %v8595_v8, %v8599_v41  ;;  %v15629_v9 = vcombine.high %v8602_v31, %v8606_v56 }
 0x6e8   :  { %9486 = vmatprep.subr.bf16.mxu1 %v15581_v2  ;;  %9579 = vmatprep.subr.bf16.mxu0 %v15583_v51  ;;  %v15631_v2 = vcombine.high %v8603_v28, %v8607_v57  ;;  %v15628_v51 = vcombine.low %v8602_v31, %v8606_v56 }
 0x6eb   :  { %9487 = vmatpush1.bf16.msra.mxu1 %v15580_v14  ;;  %9580 = vmatpush1.bf16.msra.mxu0 %v15582_v6 }
 0x6ec   :  { %9488 = vmatprep.subr.bf16.mxu1 %v15589_v27  ;;  %9581 = vmatprep.subr.bf16.mxu0 %v15591_v22 }
 0x6ed   :  { %9365 = vmatmul.mubr.bf16.gmra.mrb[80].mxu1 %v20200_v42  ;;  %9458 = vmatmul.mubr.bf16.gmra.mrb[100].mxu0 %v20200_v42 }
 0x6ee   :  { %9500 = vmatprep.mubr.bf16.mxu1 %v20141_v3  ;;  %9593 = vmatprep.mubr.bf16.mxu0 %v20141_v3  ;;  %v15615_v3 = vcombine.high %v8587_v39, %v8591_v53 }
 0x6ef   :  { %9489 = vmatpush1.bf16.msra.mxu1 %v15588_v37  ;;  %9582 = vmatpush1.bf16.msra.mxu0 %v15590_v20 }
 0x6f0   :  { %9490 = vmatprep.subr.bf16.mxu1 %v15597_v61  ;;  %9583 = vmatprep.subr.bf16.mxu0 %v15599_v34 }
 0x6f3   :  { %9491 = vmatpush1.bf16.msra.mxu1 %v15596_v54  ;;  %9584 = vmatpush1.bf16.msra.mxu0 %v15598_v10 }
 0x6f4   :  { %9492 = vmatprep.subr.bf16.mxu1 %v15605_v62  ;;  %9585 = vmatprep.subr.bf16.mxu0 %v15607_v47 }
 0x6f7   :  { %9493 = vmatpush1.bf16.msra.mxu1 %v15604_v33  ;;  %9586 = vmatpush1.bf16.msra.mxu0 %v15606_v49 }
 0x6f8   :  { %9494 = vmatprep.subr.bf16.mxu1 %v15613_v45  ;;  %9587 = vmatprep.subr.bf16.mxu0 %v15615_v3  ;;  %v9750_v3 = vld [vmem:[#allocation9] sm:$0xff] }
 0x6f9   :  { %v20315_v8 = vrot.slane %v9750_v3, %v19371_v15  ;;  %v20318_v41 = vrot.slane %v9750_v3, %v19377_v19 }
 0x6fb   :  { %9495 = vmatpush1.bf16.msra.mxu1 %v15612_v11  ;;  %9588 = vmatpush1.bf16.msra.mxu0 %v15614_v26 }
 0x6fc   :  { %9496 = vmatprep.subr.bf16.mxu1 %v15621_v40  ;;  %9589 = vmatprep.subr.bf16.mxu0 %v15623_v55  ;;  %v20325_v40 = vrot.slane %v9750_v3, %v19374_v0  ;;  %v20328_v55 = vrot.slane %v9750_v3, %v19380_v58 }
 0x6ff   :  { %9497 = vmatpush1.bf16.msra.mxu1 %v15620_v18  ;;  %9590 = vmatpush1.bf16.msra.mxu0 %v15622_v63  ;;  %v21079_v18 = vld [vmem:[#allocation24_spill] sm:$0xff] }
 0x700   :  { %9498 = vmatprep.subr.bf16.mxu1 %v15629_v9  ;;  %9591 = vmatprep.subr.bf16.mxu0 %v15631_v2  ;;  %v9770_v63 = vsub.s32 4, %v21079_v18  ;;  %v9778_v9 = vsub.s32 6, %v21079_v18  ;;  %v9774_v2 = vsub.s32 5, %v21079_v18 }
 0x702   :  { %v20354_v0 = vrot.slane %v9750_v3, %v9770_v63  ;;  %v20356_v15 = vrot.slane %v9750_v3, %v9778_v9 }
 0x703   :  { %9499 = vmatpush1.bf16.msra.mxu1 %v15628_v51  ;;  %9592 = vmatpush1.bf16.msra.mxu0 %v15630_v4  ;;  %v9782_v51 = vsub.s32 7, %v21079_v18 }
 0x706   :  { %9501 = vmatmul.mubr.bf16.vlgmr.msra.gmra.mrb[84].mxu1 %v20149_v32  ;;  %9594 = vmatmul.mubr.bf16.vlgmr.msra.gmra.mrb[104].mxu0 %v20149_v32  ;;  %v21050_v32 = vmov 0.0  }
 0x707   :  { %9510 = vmatprep.mubr.bf16.mxu1 %v20156_v43  ;;  %9603 = vmatprep.mubr.bf16.mxu0 %v20156_v43 }
 0x70e   :  { %9511 = vmatmul.mubr.bf16.gmra.mrb[88].mxu1 %v20163_v35  ;;  %9604 = vmatmul.mubr.bf16.gmra.mrb[108].mxu0 %v20163_v35 }
 0x70f   :  { %9520 = vmatprep.mubr.bf16.mxu1 %v20168_v38  ;;  %9613 = vmatprep.mubr.bf16.mxu0 %v20168_v38 }
 0x716   :  { %9521 = vmatmul.mubr.bf16.gmra.mrb[92].mxu1 %v20175_v23  ;;  %9614 = vmatmul.mubr.bf16.gmra.mrb[112].mxu0 %v20175_v23 }
 0x717   :  { %9530 = vmatprep.mubr.bf16.mxu1 %v20180_v1  ;;  %9623 = vmatprep.mubr.bf16.mxu0 %v20180_v1 }
 0x71e   :  { %9531 = vmatmul.mubr.bf16.gmra.mrb[96].mxu1 %v20189_v24  ;;  %9624 = vmatmul.mubr.bf16.gmra.mrb[116].mxu0 %v20189_v24 }
 0x71f   :  { %9540 = vmatprep.mubr.bf16.mxu1 %v20195_v52  ;;  %9633 = vmatprep.mubr.bf16.mxu0 %v20195_v52 }
 0x726   :  { %9541 = vmatmul.mubr.bf16.gmra.mrb[100].mxu1 %v20204_v50  ;;  %9634 = vmatmul.mubr.bf16.gmra.mrb[120].mxu0 %v20204_v50 }
 0x727   :  { %9550 = vmatprep.mubr.bf16.mxu1 %v20186_v16  ;;  %9643 = vmatprep.mubr.bf16.mxu0 %v20186_v16 }
 0x72e   :  { %9551 = vmatmul.mubr.bf16.gmra.mrb[104].mxu1 %v20200_v42  ;;  %9644 = vmatmul.mubr.bf16.gmra.mrb[124].mxu0 %v20200_v42 }
 0x72f   :  { %10462 = vmatprep.mubr.f32.mxu0 %v21050_v32  ;;  %10112 = vmatprep.mubr.f32.mxu1 %v21050_v32 }
 0x798   :  { %v9316_v43 = vpop.f32.mrb[60].mxu1  ;;  %v9409_v35 = vpop.f32.mrb[80].mxu0 }
 0x799   :  { %v9318_v38 = vpop.f32.mrb[61].mxu1  ;;  %v9411_v23 = vpop.f32.mrb[81].mxu0  ;;  %v20343_v4 = vadd.f32 %v20315_v8, %v9316_v43  ;;  %v20346_v32 = vadd.f32 %v20318_v41, %v9409_v35 }
 0x79a   :  { %v20238_v1 = vpop.f32.mrb[62].mxu1  ;;  %v20240_v24 = vpop.f32.mrb[82].mxu0  ;;  %v20349_v58 = vadd.f32 %v20325_v40, %v9318_v38  ;;  %v20352_v19 = vadd.f32 %v20328_v55, %v9411_v23 }
 0x79b   :  { %v20242_v52 = vpop.f32.mrb[63].mxu1  ;;  %v20244_v16 = vpop.f32.mrb[83].mxu0  ;;  %v20366_v35 = vadd.f32 %v20315_v8, %v20238_v1  ;;  %v20370_v38 = vadd.f32 %v20318_v41, %v20240_v24 }
 0x79c   :  { %v20380_v9 = vadd.f32 %v20328_v55, %v20244_v16 }
 0x7a0   :  { %v20246_v50 = vpop.f32.mrb[64].mxu1  ;;  %v20248_v42 = vpop.f32.mrb[84].mxu0 }
 0x7a1   :  { %v20250_v21 = vpop.f32.mrb[65].mxu1  ;;  %v20252_v5 = vpop.f32.mrb[85].mxu0  ;;  %v20384_v1 = vadd.f32 %v20315_v8, %v20246_v50  ;;  %v20388_v24 = vadd.f32 %v20318_v41, %v20248_v42 }
 0x7a2   :  { %v20254_v30 = vpop.f32.mrb[66].mxu1  ;;  %v20256_v14 = vpop.f32.mrb[86].mxu0 }
 0x7a3   :  { %v20258_v6 = vpop.f32.mrb[67].mxu1  ;;  %v20260_v27 = vpop.f32.mrb[87].mxu0  ;;  %v20400_v16 = vadd.f32 %v20315_v8, %v20254_v30  ;;  %v20404_v50 = vadd.f32 %v20318_v41, %v20256_v14 }
 0x7a4   :  { %v20408_v42 = vadd.f32 %v20325_v40, %v20258_v6 }
 0x7a8   :  { %v20262_v22 = vpop.f32.mrb[68].mxu1  ;;  %v20264_v46 = vpop.f32.mrb[88].mxu0 }
 0x7a9   :  { %v20266_v48 = vpop.f32.mrb[69].mxu1  ;;  %v20268_v25 = vpop.f32.mrb[89].mxu0  ;;  %v20418_v30 = vadd.f32 %v20315_v8, %v20262_v22  ;;  %v20422_v14 = vadd.f32 %v20318_v41, %v20264_v46 }
 0x7aa   :  { %v20270_v17 = vpop.f32.mrb[70].mxu1  ;;  %v20272_v37 = vpop.f32.mrb[90].mxu0 }
 0x7ab   :  { %v20274_v20 = vpop.f32.mrb[71].mxu1  ;;  %v20276_v61 = vpop.f32.mrb[91].mxu0  ;;  %v20450_v23 = vadd.f32 %v20318_v41, %v20272_v37 }
 0x7ac   :  { %v20456_v18 = vadd.f32 %v20325_v40, %v20274_v20  ;;  %v20460_v43 = vadd.f32 %v20328_v55, %v20276_v61 }
 0x7b0   :  { %v20278_v34 = vpop.f32.mrb[72].mxu1  ;;  %v20280_v59 = vpop.f32.mrb[92].mxu0 }
 0x7b1   :  { %v20282_v12 = vpop.f32.mrb[73].mxu1  ;;  %v20284_v60 = vpop.f32.mrb[93].mxu0  ;;  %v20468_v37 = vadd.f32 %v20318_v41, %v20280_v59 }
 0x7b2   :  { %v20286_v13 = vpop.f32.mrb[74].mxu1  ;;  %v20288_v54 = vpop.f32.mrb[94].mxu0  ;;  %v20472_v63 = vadd.f32 %v20325_v40, %v20282_v12  ;;  %v20476_v20 = vadd.f32 %v20328_v55, %v20284_v60 }
 0x7b3   :  { %v20290_v10 = vpop.f32.mrb[75].mxu1  ;;  %v20292_v62 = vpop.f32.mrb[95].mxu0  ;;  %21081 = vst [vmem:[#allocation32_spill] sm:$0xff] %v20468_v37  ;;  %v20480_v61 = vadd.f32 %v20315_v8, %v20286_v13 }
 0x7b4   :  { %21082 = vst [vmem:[#allocation33_spill] sm:$0xff] %v20472_v63  ;;  %21083 = vst [vmem:[#allocation34_spill] sm:$0xff] %v20476_v20  ;;  %v20488_v59 = vadd.f32 %v20325_v40, %v20290_v10  ;;  %v20492_v12 = vadd.f32 %v20328_v55, %v20292_v62 }
 0x7b5   :  { %21084 = vst [vmem:[#allocation35_spill] sm:$0xff] %v20480_v61 }
 0x7b6   :  { %21086 = vst [vmem:[#allocation37_spill] sm:$0xff] %v20488_v59  ;;  %21087 = vst [vmem:[#allocation38_spill] sm:$0xff] %v20492_v12 }
 0x7b8   :  { %v20294_v47 = vpop.f32.mrb[76].mxu1  ;;  %v20296_v36 = vpop.f32.mrb[96].mxu0 }
 0x7b9   :  { %v20298_v7 = vpop.f32.mrb[77].mxu1  ;;  %v20300_v39 = vpop.f32.mrb[97].mxu0  ;;  %v20498_v13 = vadd.f32 %v20315_v8, %v20294_v47 }
 0x7ba   :  { %v20302_v53 = vpop.f32.mrb[78].mxu1  ;;  %v20304_v33 = vpop.f32.mrb[98].mxu0  ;;  %v20508_v62 = vadd.f32 %v20325_v40, %v20298_v7  ;;  %v20512_v6 = vadd.f32 %v20328_v55, %v20300_v39 }
 0x7bb   :  { %v20306_v49 = vpop.f32.mrb[79].mxu1  ;;  %v20308_v45 = vpop.f32.mrb[99].mxu0  ;;  %21088 = vst [vmem:[#allocation39_spill] sm:$0xff] %v20498_v13  ;;  %v20526_v60 = vadd.f32 %v20315_v8, %v20302_v53 }
 0x7bc   :  { %21090 = vst [vmem:[#allocation41_spill] sm:$0xff] %v20508_v62  ;;  %21091 = vst [vmem:[#allocation42_spill] sm:$0xff] %v20512_v6  ;;  %v20538_v53 = vadd.f32 %v20325_v40, %v20306_v49 }
 0x7c0   :  { %v20310_v29 = vpop.f32.mrb[80].mxu1  ;;  %v20312_v44 = vpop.f32.mrb[100].mxu0 }
 0x7c1   :  { %v20320_v11 = vpop.f32.mrb[81].mxu1  ;;  %v20322_v26 = vpop.f32.mrb[101].mxu0 }
 0x7c2   :  { %v20330_v31 = vpop.f32.mrb[82].mxu1  ;;  %v20332_v56 = vpop.f32.mrb[102].mxu0 }
 0x7c3   :  { %v20334_v28 = vpop.f32.mrb[83].mxu1  ;;  %v20336_v57 = vpop.f32.mrb[103].mxu0 }
 0x7c4   :  { %21077 = vst [vmem:[#allocation30_spill] sm:$0xff] %v20334_v28  ;;  %21078 = vst [vmem:[#allocation31_spill] sm:$0xff] %v20336_v57  ;;  %v20358_v57 = vrot.slane %v9750_v3, %v9774_v2  ;;  %v20360_v28 = vrot.slane %v9750_v3, %v9782_v51  ;;  %v20376_v3 = vadd.f32 %v20325_v40, %v20242_v52 }
 0x7c5   :  { %v20392_v2 = vadd.f32 %v20325_v40, %v20250_v21  ;;  %v20396_v52 = vadd.f32 %v20328_v55, %v20252_v5  ;;  %v20412_v21 = vadd.f32 %v20328_v55, %v20260_v27  ;;  %v20428_v27 = vadd.f32 %v20325_v40, %v20266_v48 }
 0x7c6   :  { %v20432_v51 = vadd.f32 %v20328_v55, %v20268_v25  ;;  %v20446_v5 = vadd.f32 %v20315_v8, %v20270_v17  ;;  %v20464_v17 = vadd.f32 %v20315_v8, %v20278_v34  ;;  %v20484_v34 = vadd.f32 %v20318_v41, %v20288_v54 }
 0x7c7   :  { %v20502_v54 = vadd.f32 %v20318_v41, %v20296_v36  ;;  %v20530_v48 = vadd.f32 %v20318_v41, %v20304_v33  ;;  %v20542_v33 = vadd.f32 %v20328_v55, %v20308_v45 }
 0x7c8   :  { %21080 = vst [vmem:[#allocation24_spill] sm:$0xff] %v20464_v17  ;;  %21085 = vst [vmem:[#allocation36_spill] sm:$0xff] %v20484_v34 }
 0x7c9   :  { %21089 = vst [vmem:[#allocation40_spill] sm:$0xff] %v20502_v54 }
 0x7d9   :  { %v9502_v36 = vpop.f32.mrb[84].mxu1  ;;  %v9595_v25 = vpop.f32.mrb[104].mxu0 }
 0x7da   :  { %v9796_v7 = vadd.f32 %v20354_v0, %v9502_v36  ;;  %v9798_v22 = vadd.f32 %v20356_v15, %v9595_v25  ;;  %v9504_v47 = vpop.f32.mrb[85].mxu1  ;;  %v9597_v39 = vpop.f32.mrb[105].mxu0 }
 0x7db   :  { %v9797_v54 = vadd.f32 %v20358_v57, %v9504_v47  ;;  %v9799_v10 = vadd.f32 %v20360_v28, %v9597_v39  ;;  %v9506_v62 = vpop.f32.mrb[86].mxu1  ;;  %v9599_v46 = vpop.f32.mrb[106].mxu0  ;;  %v21092_v47 = vmax.f32 %v20343_v4, 0.0  ;;  %v21093_v39 = vmax.f32 %v20346_v32, 0.0 }
 0x7dc   :  { %v9936_v6 = vmax.f32 %v9796_v7, 0.0  ;;  %v9938_v36 = vmax.f32 %v9798_v22, 0.0  ;;  %v9804_v25 = vadd.f32 %v20354_v0, %v9506_v62  ;;  %v9806_v13 = vadd.f32 %v20356_v15, %v9599_v46  ;;  %v9508_v12 = vpop.f32.mrb[87].mxu1  ;;  %v9601_v59 = vpop.f32.mrb[107].mxu0 }
 0x7dd   :  { %v9937_v49 = vmax.f32 %v9797_v54, 0.0  ;;  %v9939_v34 = vmax.f32 %v9799_v10, 0.0  ;;  %v9805_v61 = vadd.f32 %v20358_v57, %v9508_v12  ;;  %v9807_v45 = vadd.f32 %v20360_v28, %v9601_v59 }
 0x7de   :  { %v9984_v20 = vadd.f32 %v9936_v6, %v21092_v47  ;;  %v9986_v63 = vadd.f32 %v9938_v36, %v21093_v39  ;;  %v9940_v7 = vmax.f32 %v9804_v25, 0.0  ;;  %v9942_v22 = vmax.f32 %v9806_v13, 0.0 }
 0x7df   :  { %v21094_v62 = vmax.f32 %v20349_v58, 0.0  ;;  %v21095_v46 = vmax.f32 %v20352_v19, 0.0  ;;  %v9941_v54 = vmax.f32 %v9805_v61, 0.0  ;;  %v9943_v10 = vmax.f32 %v9807_v45, 0.0 }
 0x7e0   :  { %v9924_v12 = vmax.f32 %v20526_v60, 0.0  ;;  %v9926_v59 = vmax.f32 %v20530_v48, 0.0  ;;  %v21096_v4 = vmax.f32 %v20366_v35, 0.0  ;;  %v21097_v32 = vmax.f32 %v20370_v38, 0.0 }
 0x7e1   :  { %v9985_v37 = vadd.f32 %v9937_v49, %v21094_v62  ;;  %v9987_v17 = vadd.f32 %v9939_v34, %v21095_v46  ;;  %v9925_v13 = vmax.f32 %v20538_v53, 0.0  ;;  %v9927_v58 = vmax.f32 %v20542_v33, 0.0  ;;  %v9512_v49 = vpop.f32.mrb[88].mxu1  ;;  %v9605_v45 = vpop.f32.mrb[108].mxu0 }
 0x7e2   :  { %v9988_v6 = vadd.f32 %v9940_v7, %v21096_v4  ;;  %v9990_v36 = vadd.f32 %v9942_v22, %v21097_v32  ;;  %v21098_v25 = vmax.f32 %v20376_v3, 0.0  ;;  %v21099_v61 = vmax.f32 %v20380_v9, 0.0  ;;  %v9514_v7 = vpop.f32.mrb[89].mxu1  ;;  %v9607_v22 = vpop.f32.mrb[109].mxu0 }
 0x7e3   :  { %v9812_v35 = vadd.f32 %v20354_v0, %v9512_v49  ;;  %v9814_v38 = vadd.f32 %v20356_v15, %v9605_v45  ;;  %v9813_v3 = vadd.f32 %v20358_v57, %v9514_v7  ;;  %v9815_v9 = vadd.f32 %v20360_v28, %v9607_v22 }
 0x7e4   :  { %v9989_v19 = vadd.f32 %v9941_v54, %v21098_v25  ;;  %v9991_v34 = vadd.f32 %v9943_v10, %v21099_v61  ;;  %v20570_v47 = vpack.c.bf16 %v9988_v6, %v9984_v20  ;;  %v20572_v39 = vpack.c.bf16 %v9990_v36, %v9986_v63  ;;  %v9516_v54 = vpop.f32.mrb[90].mxu1  ;;  %v9609_v10 = vpop.f32.mrb[110].mxu0 }
 0x7e5   :  { %v9944_v20 = vmax.f32 %v9812_v35, 0.0  ;;  %v9946_v4 = vmax.f32 %v9814_v38, 0.0  ;;  %v9820_v63 = vadd.f32 %v20354_v0, %v9516_v54  ;;  %v9822_v6 = vadd.f32 %v20356_v15, %v9609_v10  ;;  %v9518_v32 = vpop.f32.mrb[91].mxu1  ;;  %v9611_v36 = vpop.f32.mrb[111].mxu0 }
 0x7e6   :  { %v20576_v62 = vpack.c.bf16 %v9989_v19, %v9985_v37  ;;  %v20578_v46 = vpack.c.bf16 %v9991_v34, %v9987_v17  ;;  %v9945_v25 = vmax.f32 %v9813_v3, 0.0  ;;  %v9947_v61 = vmax.f32 %v9815_v9, 0.0 }
 0x7e7   :  { %v9821_v37 = vadd.f32 %v20358_v57, %v9518_v32  ;;  %v9823_v17 = vadd.f32 %v20360_v28, %v9611_v36  ;;  %v21100_v19 = vmax.f32 %v20384_v1, 0.0  ;;  %v21101_v49 = vmax.f32 %v20388_v24, 0.0 }
 0x7e8   :  { %16304 = vmatprep.subr.bf16.mxu1 %v20576_v62  ;;  %16382 = vmatprep.subr.bf16.mxu0 %v20578_v46  ;;  %v9948_v35 = vmax.f32 %v9820_v63, 0.0  ;;  %v9950_v38 = vmax.f32 %v9822_v6, 0.0  ;;  %v21102_v7 = vmax.f32 %v20392_v2, 0.0  ;;  %v21103_v3 = vmax.f32 %v20396_v52, 0.0 }
 0x7e9   :  { %v9992_v34 = vadd.f32 %v9944_v20, %v21100_v19  ;;  %v9994_v45 = vadd.f32 %v9946_v4, %v21101_v49  ;;  %16306 = vmatpush1.bf16.msra.mxu1 %v20570_v47  ;;  %16384 = vmatpush1.bf16.msra.mxu0 %v20572_v39  ;;  %v9949_v54 = vmax.f32 %v9821_v37, 0.0  ;;  %v9951_v10 = vmax.f32 %v9823_v17, 0.0 }
 0x7ea   :  { %v9993_v22 = vadd.f32 %v9945_v25, %v21102_v7  ;;  %v9995_v9 = vadd.f32 %v9947_v61, %v21103_v3  ;;  %v20600_v1 = vadd.f32 %v20315_v8, %v20310_v29  ;;  %v20604_v24 = vadd.f32 %v20318_v41, %v20312_v44  ;;  %v9522_v25 = vpop.f32.mrb[92].mxu1 }
 0x7eb   :  { %v21104_v20 = vmax.f32 %v20400_v16, 0.0  ;;  %v21105_v63 = vmax.f32 %v20404_v50, 0.0  ;;  %v20612_v52 = vadd.f32 %v20325_v40, %v20320_v11  ;;  %v20616_v6 = vadd.f32 %v20328_v55, %v20322_v26  ;;  %v9615_v16 = vpop.f32.mrb[112].mxu0  ;;  %v9524_v17 = vpop.f32.mrb[93].mxu1 }
 0x7ec   :  { %v21106_v29 = vmax.f32 %v20408_v42, 0.0  ;;  %v21107_v44 = vmax.f32 %v20412_v21, 0.0  ;;  %v9828_v37 = vadd.f32 %v20354_v0, %v9522_v25  ;;  %v9830_v11 = vadd.f32 %v20356_v15, %v9615_v16  ;;  %v9617_v19 = vpop.f32.mrb[113].mxu0 }
 0x7ed   :  { %v9996_v4 = vadd.f32 %v9948_v35, %v21104_v20  ;;  %v9998_v2 = vadd.f32 %v9950_v38, %v21105_v63  ;;  %v9829_v42 = vadd.f32 %v20358_v57, %v9524_v17  ;;  %v9831_v21 = vadd.f32 %v20360_v28, %v9617_v19  ;;  %v9526_v35 = vpop.f32.mrb[94].mxu1  ;;  %v9619_v38 = vpop.f32.mrb[114].mxu0 }
 0x7ee   :  { %v9997_v32 = vadd.f32 %v9949_v54, %v21106_v29  ;;  %v9999_v36 = vadd.f32 %v9951_v10, %v21107_v44  ;;  %v9954_v7 = vmax.f32 %v9830_v11, 0.0  ;;  %v9838_v3 = vadd.f32 %v20356_v15, %v9619_v38  ;;  %v9528_v54 = vpop.f32.mrb[95].mxu1  ;;  %v9621_v10 = vpop.f32.mrb[115].mxu0 }
 0x7ef   :  { %v20622_v61 = vpack.c.bf16 %v9996_v4, %v9992_v34  ;;  %v20624_v50 = vpack.c.bf16 %v9998_v2, %v9994_v45  ;;  %v9952_v34 = vmax.f32 %v9828_v37, 0.0  ;;  %v9836_v45 = vadd.f32 %v20354_v0, %v9526_v35 }
 0x7f0   :  { %v20628_v26 = vpack.c.bf16 %v9997_v32, %v9993_v22  ;;  %v20630_v49 = vpack.c.bf16 %v9999_v36, %v9995_v9  ;;  %v9953_v20 = vmax.f32 %v9829_v42, 0.0  ;;  %v9955_v4 = vmax.f32 %v9831_v21, 0.0 }
 0x7f1   :  { %v9837_v22 = vadd.f32 %v20358_v57, %v9528_v54  ;;  %v9839_v9 = vadd.f32 %v20360_v28, %v9621_v10  ;;  %v21108_v63 = vmax.f32 %v20418_v30, 0.0  ;;  %v21109_v29 = vmax.f32 %v20422_v14, 0.0  ;;  %v9532_v54 = vpop.f32.mrb[96].mxu1 }
 0x7f2   :  { %16308 = vmatprep.subr.bf16.mxu1 %v20628_v26  ;;  %16386 = vmatprep.subr.bf16.mxu0 %v20630_v49  ;;  %v9956_v44 = vmax.f32 %v9836_v45, 0.0  ;;  %v9958_v36 = vmax.f32 %v9838_v3, 0.0  ;;  %v21110_v25 = vmax.f32 %v20428_v27, 0.0  ;;  %v21111_v37 = vmax.f32 %v20432_v51, 0.0 }
 0x7f3   :  { %v10000_v2 = vadd.f32 %v9952_v34, %v21108_v63  ;;  %v10002_v32 = vadd.f32 %v9954_v7, %v21109_v29  ;;  %16310 = vmatpush1.bf16.msra.mxu1 %v20622_v61  ;;  %16388 = vmatpush1.bf16.msra.mxu0 %v20624_v50  ;;  %v9957_v17 = vmax.f32 %v9837_v22, 0.0  ;;  %v9959_v19 = vmax.f32 %v9839_v9, 0.0 }
 0x7f4   :  { %v10001_v16 = vadd.f32 %v9953_v20, %v21110_v25  ;;  %v10003_v11 = vadd.f32 %v9955_v4, %v21111_v37  ;;  %v9928_v30 = vmax.f32 %v20600_v1, 0.0  ;;  %v9930_v42 = vmax.f32 %v20604_v24, 0.0 }
 0x7f5   :  { %v21112_v14 = vmax.f32 %v20446_v5, 0.0  ;;  %v21113_v35 = vmax.f32 %v20450_v23, 0.0  ;;  %v20658_v34 = vadd.f32 %v20315_v8, %v20330_v31  ;;  %v20662_v51 = vadd.f32 %v20318_v41, %v20332_v56  ;;  %v9625_v5 = vpop.f32.mrb[116].mxu0  ;;  %v9534_v31 = vpop.f32.mrb[97].mxu1 }
 0x7f6   :  { %v21114_v27 = vmax.f32 %v20456_v18, 0.0  ;;  %v21115_v45 = vmax.f32 %v20460_v43, 0.0  ;;  %v9844_v20 = vadd.f32 %v20354_v0, %v9532_v54  ;;  %v9846_v8 = vadd.f32 %v20356_v15, %v9625_v5  ;;  %v9627_v4 = vpop.f32.mrb[117].mxu0  ;;  %v9536_v22 = vpop.f32.mrb[98].mxu1  ;;  %v21122_v5 = vld [vmem:[#allocation34_spill] sm:$0xff] }
 0x7f7   :  { %v10004_v21 = vadd.f32 %v9956_v44, %v21112_v14  ;;  %v10006_v38 = vadd.f32 %v9958_v36, %v21113_v35  ;;  %v9845_v18 = vadd.f32 %v20358_v57, %v9534_v31  ;;  %v9847_v43 = vadd.f32 %v20360_v28, %v9627_v4  ;;  %v9629_v9 = vpop.f32.mrb[118].mxu0  ;;  %v9538_v44 = vpop.f32.mrb[99].mxu1 }
 0x7f8   :  { %v10005_v7 = vadd.f32 %v9957_v17, %v21114_v27  ;;  %v10007_v3 = vadd.f32 %v9959_v19, %v21115_v45  ;;  %v9960_v63 = vmax.f32 %v9844_v20, 0.0  ;;  %v9852_v29 = vadd.f32 %v20354_v0, %v9536_v22  ;;  %v9631_v36 = vpop.f32.mrb[119].mxu0  ;;  %v21116_v17 = vld [vmem:[#allocation24_spill] sm:$0xff]  ;;  %v21120_v45 = vld [vmem:[#allocation33_spill] sm:$0xff]  ;;  %v21124_v22 = vld [vmem:[#allocation35_spill] sm:$0xff] }
 0x7f9   :  { %v20668_v10 = vpack.c.bf16 %v10004_v21, %v10000_v2  ;;  %v20670_v23 = vpack.c.bf16 %v10006_v38, %v10002_v32  ;;  %v9962_v2 = vmax.f32 %v9846_v8, 0.0  ;;  %v9854_v32 = vadd.f32 %v20356_v15, %v9629_v9  ;;  %v21118_v21 = vld [vmem:[#allocation32_spill] sm:$0xff] }
 0x7fa   :  { %v20674_v41 = vpack.c.bf16 %v10005_v7, %v10001_v16  ;;  %v20676_v56 = vpack.c.bf16 %v10007_v3, %v10003_v11  ;;  %v9961_v25 = vmax.f32 %v9845_v18, 0.0  ;;  %v9963_v37 = vmax.f32 %v9847_v43, 0.0 }
 0x7fb   :  { %v9853_v16 = vadd.f32 %v20358_v57, %v9538_v44  ;;  %v9855_v11 = vadd.f32 %v20360_v28, %v9631_v36  ;;  %v21117_v19 = vmax.f32 %v21116_v17, 0.0  ;;  %v21119_v35 = vmax.f32 %v21118_v21, 0.0  ;;  %v21128_v44 = vld [vmem:[#allocation30_spill] sm:$0xff] }
 0x7fc   :  { %16312 = vmatprep.subr.bf16.mxu1 %v20674_v41  ;;  %16390 = vmatprep.subr.bf16.mxu0 %v20676_v56  ;;  %v9964_v27 = vmax.f32 %v9852_v29, 0.0  ;;  %v9966_v7 = vmax.f32 %v9854_v32, 0.0  ;;  %v21121_v3 = vmax.f32 %v21120_v45, 0.0  ;;  %v21123_v20 = vmax.f32 %v21122_v5, 0.0  ;;  %v9542_v45 = vpop.f32.mrb[100].mxu1 }
 0x7fd   :  { %v10008_v14 = vadd.f32 %v9960_v63, %v21117_v19  ;;  %v10010_v38 = vadd.f32 %v9962_v2, %v21119_v35  ;;  %16314 = vmatpush1.bf16.msra.mxu1 %v20668_v10  ;;  %16392 = vmatpush1.bf16.msra.mxu0 %v20670_v23  ;;  %v9965_v31 = vmax.f32 %v9853_v16, 0.0  ;;  %v9967_v4 = vmax.f32 %v9855_v11, 0.0  ;;  %v21126_v2 = vld [vmem:[#allocation36_spill] sm:$0xff]  ;;  %v21132_v19 = vld [vmem:[#allocation38_spill] sm:$0xff] }
 0x7fe   :  { %v10009_v54 = vadd.f32 %v9961_v25, %v21121_v3  ;;  %v10011_v8 = vadd.f32 %v9963_v37, %v21123_v20  ;;  %v9929_v18 = vmax.f32 %v20612_v52, 0.0  ;;  %v9931_v43 = vmax.f32 %v20616_v6, 0.0  ;;  %v21129_v25 = vld [vmem:[#allocation31_spill] sm:$0xff]  ;;  %v21130_v37 = vld [vmem:[#allocation37_spill] sm:$0xff]  ;;  %v9635_v3 = vpop.f32.mrb[120].mxu0  ;;  %v9544_v20 = vpop.f32.mrb[101].mxu1 }
 0x7ff   :  { %v21125_v9 = vmax.f32 %v21124_v22, 0.0  ;;  %v21127_v29 = vmax.f32 %v21126_v2, 0.0  ;;  %v20704_v36 = vadd.f32 %v20325_v40, %v21128_v44  ;;  %v20708_v17 = vadd.f32 %v20328_v55, %v21129_v25  ;;  %v9637_v22 = vpop.f32.mrb[121].mxu0  ;;  %v9546_v2 = vpop.f32.mrb[102].mxu1  ;;  %v20802_v6 = vld [vmem:[#allocation10 + $0x8] sm:$0xff] }
 0x800   :  { %v21131_v16 = vmax.f32 %v21130_v37, 0.0  ;;  %v21133_v21 = vmax.f32 %v21132_v19, 0.0  ;;  %v9862_v40 = vadd.f32 %v20356_v15, %v9635_v3  ;;  %v9548_v44 = vpop.f32.mrb[103].mxu1  ;;  %v18042_v52 = vld [vmem:[#allocation12 + $0xc04] ss:$16 sps:$4 sm:$0xff]  }
 0x801   :  { %v10012_v63 = vadd.f32 %v9964_v27, %v21125_v9  ;;  %v10014_v32 = vadd.f32 %v9966_v7, %v21127_v29  ;;  %v9860_v7 = vadd.f32 %v20354_v0, %v9542_v45  ;;  %v9639_v29 = vpop.f32.mrb[122].mxu0 }
 0x802   :  { %v10013_v11 = vadd.f32 %v9965_v31, %v21131_v16  ;;  %v10015_v35 = vadd.f32 %v9967_v4, %v21133_v21  ;;  %v9861_v31 = vadd.f32 %v20358_v57, %v9544_v20  ;;  %v9863_v4 = vadd.f32 %v20360_v28, %v9637_v22  ;;  %v9641_v25 = vpop.f32.mrb[123].mxu0  ;;  %v21138_v20 = vld [vmem:[#allocation41_spill] sm:$0xff] }
 0x803   :  { %v20714_v27 = vpack.c.bf16 %v10012_v63, %v10008_v14  ;;  %v20716_v5 = vpack.c.bf16 %v10014_v32, %v10010_v38  ;;  %v9968_v14 = vmax.f32 %v9860_v7, 0.0  ;;  %v9970_v63 = vmax.f32 %v9862_v40, 0.0 }
 0x804   :  { %v20720_v55 = vpack.c.bf16 %v10013_v11, %v10009_v54  ;;  %v20722_v9 = vpack.c.bf16 %v10015_v35, %v10011_v8  ;;  %v9868_v38 = vadd.f32 %v20354_v0, %v9546_v2  ;;  %v9870_v32 = vadd.f32 %v20356_v15, %v9639_v29  ;;  %v21134_v11 = vld [vmem:[#allocation39_spill] sm:$0xff]  ;;  %v21136_v35 = vld [vmem:[#allocation40_spill] sm:$0xff] }
 0x805   :  { %v9969_v37 = vmax.f32 %v9861_v31, 0.0  ;;  %v9971_v16 = vmax.f32 %v9863_v4, 0.0  ;;  %v9869_v54 = vadd.f32 %v20358_v57, %v9548_v44  ;;  %v9871_v8 = vadd.f32 %v20360_v28, %v9641_v25  ;;  %v21140_v4 = vld [vmem:[#allocation42_spill] sm:$0xff] }
 0x806   :  { %16316 = vmatprep.subr.bf16.mxu1 %v20720_v55  ;;  %16394 = vmatprep.subr.bf16.mxu0 %v20722_v9  ;;  %v21135_v19 = vmax.f32 %v21134_v11, 0.0  ;;  %v21137_v45 = vmax.f32 %v21136_v35, 0.0  ;;  %v9972_v7 = vmax.f32 %v9868_v38, 0.0  ;;  %v9974_v40 = vmax.f32 %v9870_v32, 0.0 }
 0x807   :  { %16318 = vmatpush1.bf16.msra.mxu1 %v20714_v27  ;;  %16396 = vmatpush1.bf16.msra.mxu0 %v20716_v5  ;;  %v21139_v22 = vmax.f32 %v21138_v20, 0.0  ;;  %v21141_v2 = vmax.f32 %v21140_v4, 0.0  ;;  %v9973_v44 = vmax.f32 %v9869_v54, 0.0  ;;  %v9975_v25 = vmax.f32 %v9871_v8, 0.0  ;;  %v9552_v54 = vpop.f32.mrb[104].mxu1 }
 0x808   :  { %v10016_v21 = vadd.f32 %v9968_v14, %v21135_v19  ;;  %v10018_v3 = vadd.f32 %v9970_v63, %v21137_v45  ;;  %v9932_v11 = vmax.f32 %v20658_v34, 0.0  ;;  %v9934_v14 = vmax.f32 %v20662_v51, 0.0  ;;  %v9645_v34 = vpop.f32.mrb[124].mxu0 }
 0x809   :  { %v10017_v31 = vadd.f32 %v9969_v37, %v21139_v22  ;;  %v10019_v29 = vadd.f32 %v9971_v16, %v21141_v2  ;;  %v10020_v63 = vadd.f32 %v9972_v7, %v9924_v12  ;;  %v10022_v38 = vadd.f32 %v9974_v40, %v9926_v59  ;;  %v9554_v12 = vpop.f32.mrb[105].mxu1  ;;  %v9647_v59 = vpop.f32.mrb[125].mxu0 }
 0x80a   :  { %v9933_v32 = vmax.f32 %v20704_v36, 0.0  ;;  %v9935_v19 = vmax.f32 %v20708_v17, 0.0  ;;  %v10021_v37 = vadd.f32 %v9973_v44, %v9925_v13  ;;  %v10023_v16 = vadd.f32 %v9975_v25, %v9927_v58  ;;  %v9556_v13 = vpop.f32.mrb[106].mxu1  ;;  %v9649_v58 = vpop.f32.mrb[126].mxu0 }
 0x80b   :  { %v20754_v8 = vpack.c.bf16 %v10020_v63, %v10016_v21  ;;  %v20756_v51 = vpack.c.bf16 %v10022_v38, %v10018_v3  ;;  %v9876_v60 = vadd.f32 %v20354_v0, %v9552_v54  ;;  %v9878_v48 = vadd.f32 %v20356_v15, %v9645_v34  ;;  %v9558_v7 = vpop.f32.mrb[107].mxu1  ;;  %v9651_v40 = vpop.f32.mrb[127].mxu0  ;;  %v17430_v54 = vld [vmem:[#allocation12 + $0x604] ss:$16 sps:$4 sm:$0xff]   ;;  %v17434_v34 = vld [vmem:[#allocation12 + $0x640] ss:$16 sps:$4 sm:$0xff]  }
 0x80c   :  { %v20760_v36 = vpack.c.bf16 %v10021_v37, %v10017_v31  ;;  %v20762_v17 = vpack.c.bf16 %v10023_v16, %v10019_v29  ;;  %v9877_v53 = vadd.f32 %v20358_v57, %v9554_v12  ;;  %v9879_v33 = vadd.f32 %v20360_v28, %v9647_v59  ;;  %v17442_v12 = vld [vmem:[#allocation12 + $0x684] ss:$16 sps:$4 sm:$0xff]   ;;  %v17440_v59 = vld [vmem:[#allocation12 + $0x680] ss:$16 sps:$4 sm:$0xff]  }
 0x80d   :  { %v9976_v21 = vmax.f32 %v9876_v60, 0.0  ;;  %v9978_v35 = vmax.f32 %v9878_v48, 0.0  ;;  %v9884_v45 = vadd.f32 %v20354_v0, %v9556_v13  ;;  %v9886_v3 = vadd.f32 %v20356_v15, %v9649_v58  ;;  %v17439_v60 = vld [vmem:[#allocation12 + $0x664] ss:$16 sps:$4 sm:$0xff]   ;;  %v17437_v48 = vld [vmem:[#allocation12 + $0x660] ss:$16 sps:$4 sm:$0xff]  }
 0x80e   :  { %v9977_v20 = vmax.f32 %v9877_v53, 0.0  ;;  %v9979_v22 = vmax.f32 %v9879_v33, 0.0  ;;  %v9885_v31 = vadd.f32 %v20358_v57, %v9558_v7  ;;  %v9887_v4 = vadd.f32 %v20360_v28, %v9651_v40  ;;  %16320 = vmatprep.subr.bf16.mxu1 %v20760_v36  ;;  %16398 = vmatprep.subr.bf16.mxu0 %v20762_v17  ;;  %v17445_v53 = vld [vmem:[#allocation12 + $0x6a4] ss:$16 sps:$4 sm:$0xff]   ;;  %v17443_v33 = vld [vmem:[#allocation12 + $0x6a0] ss:$16 sps:$4 sm:$0xff]  }
 0x80f   :  { %v10024_v2 = vadd.f32 %v9976_v21, %v9928_v30  ;;  %v10026_v0 = vadd.f32 %v9978_v35, %v9930_v42  ;;  %v9980_v29 = vmax.f32 %v9884_v45, 0.0  ;;  %v9982_v15 = vmax.f32 %v9886_v3, 0.0  ;;  %16322 = vmatpush1.bf16.msra.mxu1 %v20754_v8  ;;  %16400 = vmatpush1.bf16.msra.mxu0 %v20756_v51  ;;  %v17448_v13 = vld [vmem:[#allocation12 + $0x6c4] ss:$16 sps:$4 sm:$0xff]   ;;  %v17446_v58 = vld [vmem:[#allocation12 + $0x6c0] ss:$16 sps:$4 sm:$0xff]  }
 0x810   :  { %v10025_v57 = vadd.f32 %v9977_v20, %v9929_v18  ;;  %v10027_v28 = vadd.f32 %v9979_v22, %v9931_v43  ;;  %v9981_v44 = vmax.f32 %v9885_v31, 0.0  ;;  %v9983_v25 = vmax.f32 %v9887_v4, 0.0  ;;  %v10032_v18 = vld [vmem:[#allocation10] sm:$0xff] }
 0x811   :  { %v10028_v63 = vadd.f32 %v9980_v29, %v9932_v11  ;;  %v10030_v1 = vadd.f32 %v9982_v15, %v9934_v14  ;;  %v17428_v43 = vld [vmem:[#allocation12 + $0x600] ss:$16 sps:$4 sm:$0xff]   ;;  %v17433_v11 = vld [vmem:[#allocation12 + $0x624] ss:$16 sps:$4 sm:$0xff]   ;;  %v21143_v14 = vmov 0.0  }
 0x812   :  { %v10029_v30 = vadd.f32 %v9981_v44, %v9933_v32  ;;  %v10031_v38 = vadd.f32 %v9983_v25, %v9935_v19  ;;  %v17431_v32 = vld [vmem:[#allocation12 + $0x620] ss:$16 sps:$4 sm:$0xff]   ;;  %v17436_v19 = vld [vmem:[#allocation12 + $0x644] ss:$16 sps:$4 sm:$0xff]  }
 0x813   :  { %v20782_v24 = vpack.c.bf16 %v10028_v63, %v10024_v2  ;;  %v20784_v42 = vpack.c.bf16 %v10030_v1, %v10026_v0  ;;  %v17451_v21 = vld [vmem:[#allocation12 + $0x6e4] ss:$16 sps:$4 sm:$0xff]   ;;  %v17449_v35 = vld [vmem:[#allocation12 + $0x6e0] ss:$16 sps:$4 sm:$0xff]  }
 0x814   :  { %v20786_v37 = vpack.c.bf16 %v10029_v30, %v10025_v57  ;;  %v20788_v16 = vpack.c.bf16 %v10031_v38, %v10027_v28  ;;  %v17454_v45 = vld [vmem:[#allocation12 + $0x704] ss:$16 sps:$4 sm:$0xff]   ;;  %v17452_v3 = vld [vmem:[#allocation12 + $0x700] ss:$16 sps:$4 sm:$0xff]  }
 0x815   :  { %v17457_v7 = vld [vmem:[#allocation12 + $0x724] ss:$16 sps:$4 sm:$0xff]   ;;  %v17455_v40 = vld [vmem:[#allocation12 + $0x720] ss:$16 sps:$4 sm:$0xff]  }
 0x816   :  { %16325 = vmatprep.subr.msk.bf16.mxu1 %vm19603_vm8, %v20786_v37  ;;  %16403 = vmatprep.subr.msk.bf16.mxu0 %vm19603_vm8, %v20788_v16  ;;  %v17460_v20 = vld [vmem:[#allocation12 + $0x744] ss:$16 sps:$4 sm:$0xff]   ;;  %v17458_v22 = vld [vmem:[#allocation12 + $0x740] ss:$16 sps:$4 sm:$0xff]  }
 0x817   :  { %16328 = vmatpush1.bf16.msk.msra.mxu1 %vm19603_vm8, %v20782_v24  ;;  %16406 = vmatpush1.bf16.msk.msra.mxu0 %vm19603_vm8, %v20784_v42  ;;  %v17463_v31 = vld [vmem:[#allocation12 + $0x764] ss:$16 sps:$4 sm:$0xff]   ;;  %v17461_v4 = vld [vmem:[#allocation12 + $0x760] ss:$16 sps:$4 sm:$0xff]  }
 0x818   :  { %16330 = vmatprep.subr.bf16.mxu1 %v20578_v46  ;;  %11283 = vmatprep.subr.bf16.mxu0 %v17430_v54  ;;  %v17466_v2 = vld [vmem:[#allocation12 + $0x404] ss:$16 sps:$4 sm:$0xff]   ;;  %v17464_v29 = vld [vmem:[#allocation12 + $0x400] ss:$16 sps:$4 sm:$0xff]  }
 0x819   :  { %v17469_v0 = vld [vmem:[#allocation12 + $0x784] ss:$16 sps:$4 sm:$0xff]   ;;  %v17467_v15 = vld [vmem:[#allocation12 + $0x780] ss:$16 sps:$4 sm:$0xff]  }
 0x81a   :  { %15643 = vmatmul.mubr.msk.f32.vlgmr.msra.gmra.mrb[128].mxu0 %vm3321_vm5, %v20802_v6  ;;  %15634 = vmatmul.mubr.msk.f32.vlgmr.msra.gmra.mrb[108].mxu1 %vm3321_vm5, %v10032_v18  ;;  %v17472_v57 = vld [vmem:[#allocation12 + $0x424] ss:$16 sps:$4 sm:$0xff]   ;;  %v17470_v44 = vld [vmem:[#allocation12 + $0x420] ss:$16 sps:$4 sm:$0xff]  }
 0x81b   :  { %16332 = vmatpush1.bf16.msra.mxu1 %v20572_v39  ;;  %10183 = vmatprep.mubr.f32.mxu1 %v21143_v14  ;;  %v17475_v28 = vld [vmem:[#allocation12 + $0x7a4] ss:$16 sps:$4 sm:$0xff]   ;;  %v17473_v25 = vld [vmem:[#allocation12 + $0x7a0] ss:$16 sps:$4 sm:$0xff]  }
 0x81c   :  { %16334 = vmatprep.subr.bf16.mxu1 %v20630_v49  ;;  %11284 = vmatpush1.bf16.msra.mxu0 %v17428_v43  ;;  %v17478_v63 = vld [vmem:[#allocation12 + $0x444] ss:$16 sps:$4 sm:$0xff]   ;;  %v17476_v30 = vld [vmem:[#allocation12 + $0x440] ss:$16 sps:$4 sm:$0xff]  }
 0x81d   :  { %11285 = vmatprep.subr.bf16.mxu0 %v17433_v11  ;;  %v17481_v1 = vld [vmem:[#allocation12 + $0x7c4] ss:$16 sps:$4 sm:$0xff]   ;;  %v17479_v38 = vld [vmem:[#allocation12 + $0x7c0] ss:$16 sps:$4 sm:$0xff]  }
 0x81e   :  { %v17482_v54 = vld [vmem:[#allocation12 + $0x460] ss:$16 sps:$4 sm:$0xff]   ;;  %v17490_v11 = vld [vmem:[#allocation12 + $0x484] ss:$16 sps:$4 sm:$0xff]  }
 0x81f   :  { %16336 = vmatpush1.bf16.msra.mxu1 %v20624_v50  ;;  %v17485_v43 = vld [vmem:[#allocation12 + $0x7e0] ss:$16 sps:$4 sm:$0xff]  }
 0x820   :  { %16338 = vmatprep.subr.bf16.mxu1 %v20676_v56  ;;  %11286 = vmatpush1.bf16.msra.mxu0 %v17431_v32  ;;  %v17488_v32 = vld [vmem:[#allocation12 + $0x480] ss:$16 sps:$4 sm:$0xff]  }
 0x821   :  { %11287 = vmatprep.subr.bf16.mxu0 %v17436_v19  ;;  %v17493_v19 = vld [vmem:[#allocation12 + $0x60c] ss:$16 sps:$4 sm:$0xff]  }
 0x823   :  { %16340 = vmatpush1.bf16.msra.mxu1 %v20670_v23 }
 0x824   :  { %16342 = vmatprep.subr.bf16.mxu1 %v20722_v9  ;;  %11288 = vmatpush1.bf16.msra.mxu0 %v17434_v34  ;;  %v17496_v34 = vld [vmem:[#allocation12 + $0x4a4] ss:$16 sps:$4 sm:$0xff]  }
 0x825   :  { %11289 = vmatprep.subr.bf16.mxu0 %v17439_v60  ;;  %v17494_v60 = vld [vmem:[#allocation12 + $0x4a0] ss:$16 sps:$4 sm:$0xff]  }
 0x827   :  { %16344 = vmatpush1.bf16.msra.mxu1 %v20716_v5 }
 0x828   :  { %16346 = vmatprep.subr.bf16.mxu1 %v20762_v17  ;;  %11290 = vmatpush1.bf16.msra.mxu0 %v17437_v48  ;;  %v17502_v48 = vld [vmem:[#allocation12 + $0x4c4] ss:$16 sps:$4 sm:$0xff]  }
 0x829   :  { %11291 = vmatprep.subr.bf16.mxu0 %v17442_v12  ;;  %v17500_v12 = vld [vmem:[#allocation12 + $0x4c0] ss:$16 sps:$4 sm:$0xff]  }
 0x82b   :  { %16348 = vmatpush1.bf16.msra.mxu1 %v20756_v51 }
 0x82c   :  { %16351 = vmatprep.subr.msk.bf16.mxu1 %vm19603_vm8, %v20788_v16  ;;  %11292 = vmatpush1.bf16.msra.mxu0 %v17440_v59  ;;  %v17508_v59 = vld [vmem:[#allocation12 + $0x4e4] ss:$16 sps:$4 sm:$0xff]  }
 0x82d   :  { %11293 = vmatprep.subr.bf16.mxu0 %v17445_v53  ;;  %v17506_v53 = vld [vmem:[#allocation12 + $0x4e0] ss:$16 sps:$4 sm:$0xff]  }
 0x82f   :  { %16354 = vmatpush1.bf16.msk.msra.mxu1 %vm19603_vm8, %v20784_v42 }
 0x830   :  { %16356 = vmatprep.subr.bf16.mxu1 %v20576_v62  ;;  %11294 = vmatpush1.bf16.msra.mxu0 %v17443_v33  ;;  %v17514_v33 = vld [vmem:[#allocation12 + $0x504] ss:$16 sps:$4 sm:$0xff]  }
 0x831   :  { %11295 = vmatprep.subr.bf16.mxu0 %v17448_v13  ;;  %v17512_v13 = vld [vmem:[#allocation12 + $0x500] ss:$16 sps:$4 sm:$0xff]  }
 0x832   :  { %15637 = vmatmul.mubr.msk.f32.vlgmr.msra.gmra.mrb[110].mxu1 %vm3321_vm5, %v10032_v18  ;;  %v17484_v18 = vld [vmem:[#allocation12 + $0x464] ss:$16 sps:$4 sm:$0xff]  }
 0x833   :  { %16358 = vmatpush1.bf16.msra.mxu1 %v20570_v47  ;;  %10391 = vmatprep.mubr.f32.mxu1 %v21143_v14 }
 0x834   :  { %16360 = vmatprep.subr.bf16.mxu1 %v20628_v26  ;;  %11296 = vmatpush1.bf16.msra.mxu0 %v17446_v58  ;;  %v17520_v58 = vld [vmem:[#allocation12 + $0x524] ss:$16 sps:$4 sm:$0xff]  }
 0x835   :  { %11297 = vmatprep.subr.bf16.mxu0 %v17451_v21  ;;  %v17518_v21 = vld [vmem:[#allocation12 + $0x520] ss:$16 sps:$4 sm:$0xff]  }
 0x837   :  { %16362 = vmatpush1.bf16.msra.mxu1 %v20622_v61 }
 0x838   :  { %16364 = vmatprep.subr.bf16.mxu1 %v20674_v41  ;;  %11298 = vmatpush1.bf16.msra.mxu0 %v17449_v35  ;;  %v17526_v35 = vld [vmem:[#allocation12 + $0x544] ss:$16 sps:$4 sm:$0xff]  }
 0x839   :  { %11299 = vmatprep.subr.bf16.mxu0 %v17454_v45  ;;  %v17524_v45 = vld [vmem:[#allocation12 + $0x540] ss:$16 sps:$4 sm:$0xff]  }
 0x83b   :  { %16366 = vmatpush1.bf16.msra.mxu1 %v20668_v10 }
 0x83c   :  { %16368 = vmatprep.subr.bf16.mxu1 %v20720_v55  ;;  %11300 = vmatpush1.bf16.msra.mxu0 %v17452_v3  ;;  %v17532_v3 = vld [vmem:[#allocation12 + $0x564] ss:$16 sps:$4 sm:$0xff]  }
 0x83d   :  { %11301 = vmatprep.subr.bf16.mxu0 %v17457_v7  ;;  %v17530_v7 = vld [vmem:[#allocation12 + $0x560] ss:$16 sps:$4 sm:$0xff]  }
 0x83f   :  { %16370 = vmatpush1.bf16.msra.mxu1 %v20714_v27 }
 0x840   :  { %16372 = vmatprep.subr.bf16.mxu1 %v20760_v36  ;;  %11302 = vmatpush1.bf16.msra.mxu0 %v17455_v40  ;;  %v17538_v40 = vld [vmem:[#allocation12 + $0x584] ss:$16 sps:$4 sm:$0xff]  }
 0x841   :  { %11303 = vmatprep.subr.bf16.mxu0 %v17460_v20  ;;  %v17536_v20 = vld [vmem:[#allocation12 + $0x580] ss:$16 sps:$4 sm:$0xff]  }
 0x843   :  { %16374 = vmatpush1.bf16.msra.mxu1 %v20754_v8 }
 0x844   :  { %16377 = vmatprep.subr.msk.bf16.mxu1 %vm19603_vm8, %v20786_v37  ;;  %11304 = vmatpush1.bf16.msra.mxu0 %v17458_v22  ;;  %v17544_v22 = vld [vmem:[#allocation12 + $0x5a4] ss:$16 sps:$4 sm:$0xff]  }
 0x845   :  { %11305 = vmatprep.subr.bf16.mxu0 %v17463_v31  ;;  %v17542_v31 = vld [vmem:[#allocation12 + $0x5a0] ss:$16 sps:$4 sm:$0xff]  }
 0x847   :  { %16380 = vmatpush1.bf16.msk.msra.mxu1 %vm19603_vm8, %v20782_v24 }
 0x848   :  { %11306 = vmatpush1.bf16.msra.mxu0 %v17461_v4  ;;  %11242 = vmatprep.subr.bf16.mxu1 %v17466_v2  ;;  %v17550_v4 = vld [vmem:[#allocation12 + $0x5c4] ss:$16 sps:$4 sm:$0xff]   ;;  %v17548_v2 = vld [vmem:[#allocation12 + $0x5c0] ss:$16 sps:$4 sm:$0xff]  }
 0x849   :  { %11307 = vmatprep.subr.bf16.mxu0 %v17469_v0  ;;  %v17554_v0 = vld [vmem:[#allocation12 + $0x5e0] ss:$16 sps:$4 sm:$0xff]  }
 0x84a   :  { %15640 = vmatmul.mubr.msk.f32.vlgmr.msra.gmra.mrb[112].mxu1 %vm3321_vm5, %v20802_v6  ;;  %v17487_v6 = vld [vmem:[#allocation12 + $0x7e4] ss:$16 sps:$4 sm:$0xff]  }
 0x84b   :  { %11243 = vmatpush1.bf16.msra.mxu1 %v17464_v29  ;;  %v17556_v29 = vld [vmem:[#allocation12 + $0x5e4] ss:$16 sps:$4 sm:$0xff]  }
 0x84c   :  { %11308 = vmatpush1.bf16.msra.mxu0 %v17467_v15  ;;  %11244 = vmatprep.subr.bf16.mxu1 %v17472_v57  ;;  %v17562_v15 = vld [vmem:[#allocation12 + $0x40c] ss:$16 sps:$4 sm:$0xff]  }
 0x84d   :  { %11309 = vmatprep.subr.bf16.mxu0 %v17475_v28 }
 0x84f   :  { %11245 = vmatpush1.bf16.msra.mxu1 %v17470_v44 }
 0x850   :  { %11310 = vmatpush1.bf16.msra.mxu0 %v17473_v25  ;;  %11246 = vmatprep.subr.bf16.mxu1 %v17478_v63 }
 0x851   :  { %11311 = vmatprep.subr.bf16.mxu0 %v17481_v1 }
 0x853   :  { %11247 = vmatpush1.bf16.msra.mxu1 %v17476_v30  ;;  %v17491_v30 = vld [vmem:[#allocation12 + $0x608] ss:$16 sps:$4 sm:$0xff]  }
 0x854   :  { %11312 = vmatpush1.bf16.msra.mxu0 %v17479_v38  ;;  %11248 = vmatprep.subr.bf16.mxu1 %v17484_v18  ;;  %v17499_v38 = vld [vmem:[#allocation12 + $0x62c] ss:$16 sps:$4 sm:$0xff]  }
 0x855   :  { %11313 = vmatprep.subr.bf16.mxu0 %v17487_v6  ;;  %v17505_v18 = vld [vmem:[#allocation12 + $0x64c] ss:$16 sps:$4 sm:$0xff]  }
 0x856   :  { %v17511_v6 = vld [vmem:[#allocation12 + $0x66c] ss:$16 sps:$4 sm:$0xff]  }
 0x857   :  { %11249 = vmatpush1.bf16.msra.mxu1 %v17482_v54  ;;  %v17497_v54 = vld [vmem:[#allocation12 + $0x628] ss:$16 sps:$4 sm:$0xff]  }
 0x858   :  { %11314 = vmatpush1.bf16.msra.mxu0 %v17485_v43  ;;  %11250 = vmatprep.subr.bf16.mxu1 %v17490_v11  ;;  %v17503_v43 = vld [vmem:[#allocation12 + $0x648] ss:$16 sps:$4 sm:$0xff]  }
 0x859   :  { %11365 = vmatprep.subr.bf16.mxu0 %v17493_v19  ;;  %v17509_v11 = vld [vmem:[#allocation12 + $0x668] ss:$16 sps:$4 sm:$0xff]  }
 0x85a   :  { %v17515_v19 = vld [vmem:[#allocation12 + $0x688] ss:$16 sps:$4 sm:$0xff]  }
 0x85b   :  { %11251 = vmatpush1.bf16.msra.mxu1 %v17488_v32  ;;  %v17517_v32 = vld [vmem:[#allocation12 + $0x68c] ss:$16 sps:$4 sm:$0xff]  }
 0x85c   :  { %11252 = vmatprep.subr.bf16.mxu1 %v17496_v34  ;;  %v17523_v34 = vld [vmem:[#allocation12 + $0x6ac] ss:$16 sps:$4 sm:$0xff]  }
 0x85f   :  { %11253 = vmatpush1.bf16.msra.mxu1 %v17494_v60  ;;  %v17521_v60 = vld [vmem:[#allocation12 + $0x6a8] ss:$16 sps:$4 sm:$0xff]  }
 0x860   :  { %11254 = vmatprep.subr.bf16.mxu1 %v17502_v48  ;;  %v17529_v48 = vld [vmem:[#allocation12 + $0x6cc] ss:$16 sps:$4 sm:$0xff]  }
 0x863   :  { %11255 = vmatpush1.bf16.msra.mxu1 %v17500_v12 }
 0x864   :  { %11256 = vmatprep.subr.bf16.mxu1 %v17508_v59 }
 0x867   :  { %11257 = vmatpush1.bf16.msra.mxu1 %v17506_v53  ;;  %v17527_v53 = vld [vmem:[#allocation12 + $0x6c8] ss:$16 sps:$4 sm:$0xff]  }
 0x868   :  { %11258 = vmatprep.subr.bf16.mxu1 %v17514_v33  ;;  %v17535_v33 = vld [vmem:[#allocation12 + $0x6ec] ss:$16 sps:$4 sm:$0xff]  }
 0x86b   :  { %11259 = vmatpush1.bf16.msra.mxu1 %v17512_v13  ;;  %v17533_v13 = vld [vmem:[#allocation12 + $0x6e8] ss:$16 sps:$4 sm:$0xff]  }
 0x86c   :  { %11260 = vmatprep.subr.bf16.mxu1 %v17520_v58  ;;  %v17541_v58 = vld [vmem:[#allocation12 + $0x70c] ss:$16 sps:$4 sm:$0xff]  }
 0x86f   :  { %11261 = vmatpush1.bf16.msra.mxu1 %v17518_v21  ;;  %v17539_v21 = vld [vmem:[#allocation12 + $0x708] ss:$16 sps:$4 sm:$0xff]  }
 0x870   :  { %11262 = vmatprep.subr.bf16.mxu1 %v17526_v35  ;;  %v17547_v35 = vld [vmem:[#allocation12 + $0x72c] ss:$16 sps:$4 sm:$0xff]  }
 0x873   :  { %11263 = vmatpush1.bf16.msra.mxu1 %v17524_v45  ;;  %v17545_v45 = vld [vmem:[#allocation12 + $0x728] ss:$16 sps:$4 sm:$0xff]  }
 0x874   :  { %11264 = vmatprep.subr.bf16.mxu1 %v17532_v3  ;;  %v17553_v3 = vld [vmem:[#allocation12 + $0x74c] ss:$16 sps:$4 sm:$0xff]  }
 0x877   :  { %11265 = vmatpush1.bf16.msra.mxu1 %v17530_v7  ;;  %v17551_v7 = vld [vmem:[#allocation12 + $0x748] ss:$16 sps:$4 sm:$0xff]  }
 0x878   :  { %11266 = vmatprep.subr.bf16.mxu1 %v17538_v40  ;;  %v17559_v40 = vld [vmem:[#allocation12 + $0x76c] ss:$16 sps:$4 sm:$0xff]  }
 0x87b   :  { %11267 = vmatpush1.bf16.msra.mxu1 %v17536_v20  ;;  %v17557_v20 = vld [vmem:[#allocation12 + $0x768] ss:$16 sps:$4 sm:$0xff]  }
 0x87c   :  { %11268 = vmatprep.subr.bf16.mxu1 %v17544_v22  ;;  %v17565_v22 = vld [vmem:[#allocation12 + $0x78c] ss:$16 sps:$4 sm:$0xff]  }
 0x87f   :  { %11269 = vmatpush1.bf16.msra.mxu1 %v17542_v31 }
 0x880   :  { %11270 = vmatprep.subr.bf16.mxu1 %v17550_v4 }
 0x883   :  { %11271 = vmatpush1.bf16.msra.mxu1 %v17548_v2 }
 0x884   :  { %11272 = vmatprep.subr.bf16.mxu1 %v17556_v29  ;;  %v17563_v29 = vld [vmem:[#allocation12 + $0x788] ss:$16 sps:$4 sm:$0xff]  }
 0x887   :  { %11273 = vmatpush1.bf16.msra.mxu1 %v17554_v0  ;;  %v17560_v0 = vld [vmem:[#allocation12 + $0x408] ss:$16 sps:$4 sm:$0xff]  }
 0x888   :  { %11324 = vmatprep.subr.bf16.mxu1 %v17562_v15 }
 0x8ed   :  { %v10464_v57 = vpop.f32.mrb[128].mxu0  ;;  %v20844_v28 = vpop.f32.mrb[108].mxu1 }
 0x8ee   :  { %v20846_v44 = vpack.c.bf16 %v10464_v57, %v10464_v57  ;;  %v10466_v25 = vpop.f32.mrb[129].mxu0  ;;  %v20848_v63 = vpop.f32.mrb[109].mxu1  ;;  %v17568_v57 = vld [vmem:[#allocation12 + $0x42c] ss:$16 sps:$4 sm:$0xff]  }
 0x8ef   :  { %v10472_v1 = vpack.c.bf16 %v10466_v25, %v10466_v25  ;;  %v17571_v25 = vld [vmem:[#allocation12 + $0x7ac] ss:$16 sps:$4 sm:$0xff]  }
 0x8f1   :  { %11315 = vmatprep.mubr.bf16.mxu0 %v10472_v1 }
 0x8f2   :  { %11316 = vmatmul.mubr.bf16.vlgmr.msra.gmra.mrb[132].mxu0 %v20846_v44 }
 0x8f3   :  { %11366 = vmatpush1.bf16.msra.mxu0 %v17491_v30  ;;  %11397 = vmatprep.mubr.bf16.mxu0 %v10472_v1  ;;  %v17566_v1 = vld [vmem:[#allocation12 + $0x428] ss:$16 sps:$4 sm:$0xff]  }
 0x8f4   :  { %11367 = vmatprep.subr.bf16.mxu0 %v17499_v38  ;;  %v17569_v30 = vld [vmem:[#allocation12 + $0x7a8] ss:$16 sps:$4 sm:$0xff]   ;;  %v17574_v38 = vld [vmem:[#allocation12 + $0x44c] ss:$16 sps:$4 sm:$0xff]  }
 0x8f7   :  { %11368 = vmatpush1.bf16.msra.mxu0 %v17497_v54  ;;  %v17577_v54 = vld [vmem:[#allocation12 + $0x7cc] ss:$16 sps:$4 sm:$0xff]  }
 0x8f8   :  { %11369 = vmatprep.subr.bf16.mxu0 %v17505_v18  ;;  %v17572_v18 = vld [vmem:[#allocation12 + $0x448] ss:$16 sps:$4 sm:$0xff]  }
 0x8fb   :  { %11370 = vmatpush1.bf16.msra.mxu0 %v17503_v43  ;;  %v17575_v43 = vld [vmem:[#allocation12 + $0x7c8] ss:$16 sps:$4 sm:$0xff]  }
 0x8fc   :  { %11371 = vmatprep.subr.bf16.mxu0 %v17511_v6  ;;  %v17580_v6 = vld [vmem:[#allocation12 + $0x46c] ss:$16 sps:$4 sm:$0xff]  }
 0x8ff   :  { %11372 = vmatpush1.bf16.msra.mxu0 %v17509_v11  ;;  %v17583_v11 = vld [vmem:[#allocation12 + $0x7ec] ss:$16 sps:$4 sm:$0xff]  }
 0x900   :  { %11373 = vmatprep.subr.bf16.mxu0 %v17517_v32  ;;  %v17578_v32 = vld [vmem:[#allocation12 + $0x468] ss:$16 sps:$4 sm:$0xff]  }
 0x903   :  { %11374 = vmatpush1.bf16.msra.mxu0 %v17515_v19  ;;  %v17581_v19 = vld [vmem:[#allocation12 + $0x7e8] ss:$16 sps:$4 sm:$0xff]  }
 0x904   :  { %11375 = vmatprep.subr.bf16.mxu0 %v17523_v34  ;;  %v17586_v34 = vld [vmem:[#allocation12 + $0x48c] ss:$16 sps:$4 sm:$0xff]  }
 0x905   :  { %v20851_v12 = vpop.f32.mrb[110].mxu1 }
 0x906   :  { %v20853_v59 = vpop.f32.mrb[111].mxu1 }
 0x907   :  { %11376 = vmatpush1.bf16.msra.mxu0 %v17521_v60  ;;  %v17589_v60 = vld [vmem:[#allocation12 + $0x204] ss:$16 sps:$4 sm:$0xff]  }
 0x908   :  { %11377 = vmatprep.subr.bf16.mxu0 %v17529_v48  ;;  %v17584_v48 = vld [vmem:[#allocation12 + $0x488] ss:$16 sps:$4 sm:$0xff]  }
 0x90b   :  { %11378 = vmatpush1.bf16.msra.mxu0 %v17527_v53  ;;  %v17587_v53 = vld [vmem:[#allocation12 + $0x200] ss:$16 sps:$4 sm:$0xff]  }
 0x90c   :  { %11379 = vmatprep.subr.bf16.mxu0 %v17535_v33  ;;  %v17592_v33 = vld [vmem:[#allocation12 + $0x4ac] ss:$16 sps:$4 sm:$0xff]  }
 0x90f   :  { %11380 = vmatpush1.bf16.msra.mxu0 %v17533_v13  ;;  %v17595_v13 = vld [vmem:[#allocation12 + $0x224] ss:$16 sps:$4 sm:$0xff]  }
 0x910   :  { %11381 = vmatprep.subr.bf16.mxu0 %v17541_v58  ;;  %v20860_v58 = vpack.c.bf16 %v20853_v59, %v20853_v59  ;;  %v17604_v59 = vld [vmem:[#allocation12 + $0x4ec] ss:$16 sps:$4 sm:$0xff]  }
 0x913   :  { %11382 = vmatpush1.bf16.msra.mxu0 %v17539_v21  ;;  %v17590_v21 = vld [vmem:[#allocation12 + $0x4a8] ss:$16 sps:$4 sm:$0xff]  }
 0x914   :  { %11383 = vmatprep.subr.bf16.mxu0 %v17547_v35  ;;  %v17593_v35 = vld [vmem:[#allocation12 + $0x220] ss:$16 sps:$4 sm:$0xff]  }
 0x917   :  { %11384 = vmatpush1.bf16.msra.mxu0 %v17545_v45  ;;  %v17598_v45 = vld [vmem:[#allocation12 + $0x4cc] ss:$16 sps:$4 sm:$0xff]  }
 0x918   :  { %11385 = vmatprep.subr.bf16.mxu0 %v17553_v3  ;;  %v17601_v3 = vld [vmem:[#allocation12 + $0x244] ss:$16 sps:$4 sm:$0xff]  }
 0x91b   :  { %11386 = vmatpush1.bf16.msra.mxu0 %v17551_v7  ;;  %v17596_v7 = vld [vmem:[#allocation12 + $0x4c8] ss:$16 sps:$4 sm:$0xff]  }
 0x91c   :  { %11387 = vmatprep.subr.bf16.mxu0 %v17559_v40  ;;  %v17599_v40 = vld [vmem:[#allocation12 + $0x240] ss:$16 sps:$4 sm:$0xff]  }
 0x91d   :  { %v10393_v31 = vpop.f32.mrb[112].mxu1 }
 0x91e   :  { %v10395_v4 = vpop.f32.mrb[113].mxu1  ;;  %v20855_v15 = vpack.c.bf16 %v10393_v31, %v10393_v31  ;;  %v17610_v31 = vld [vmem:[#allocation12 + $0x50c] ss:$16 sps:$4 sm:$0xff]  }
 0x91f   :  { %v10470_v2 = vpack.c.bf16 %v10395_v4, %v10395_v4  ;;  %11388 = vmatpush1.bf16.msra.mxu0 %v17557_v20  ;;  %v17607_v20 = vld [vmem:[#allocation12 + $0x264] ss:$16 sps:$4 sm:$0xff]  }
 0x920   :  { %11389 = vmatprep.subr.bf16.mxu0 %v17565_v22  ;;  %v17605_v22 = vld [vmem:[#allocation12 + $0x260] ss:$16 sps:$4 sm:$0xff]   ;;  %v17613_v4 = vld [vmem:[#allocation12 + $0x284] ss:$16 sps:$4 sm:$0xff]  }
 0x921   :  { %11274 = vmatprep.mubr.bf16.mxu1 %v10470_v2 }
 0x922   :  { %11275 = vmatmul.mubr.bf16.vlgmr.msra.gmra.mrb[116].mxu1 %v20855_v15 }
 0x923   :  { %11325 = vmatpush1.bf16.msra.mxu1 %v17560_v0  ;;  %11390 = vmatpush1.bf16.msra.mxu0 %v17563_v29  ;;  %v17611_v0 = vld [vmem:[#allocation12 + $0x280] ss:$16 sps:$4 sm:$0xff]   ;;  %v17616_v29 = vld [vmem:[#allocation12 + $0x52c] ss:$16 sps:$4 sm:$0xff]  }
 0x924   :  { %11326 = vmatprep.subr.bf16.mxu1 %v17568_v57  ;;  %11356 = vmatprep.mubr.bf16.mxu1 %v10470_v2  ;;  %v17608_v2 = vld [vmem:[#allocation12 + $0x508] ss:$16 sps:$4 sm:$0xff]   ;;  %v17619_v57 = vld [vmem:[#allocation12 + $0x2a4] ss:$16 sps:$4 sm:$0xff]  }
 0x925   :  { %11391 = vmatprep.subr.bf16.mxu0 %v17571_v25  ;;  %v17614_v25 = vld [vmem:[#allocation12 + $0x528] ss:$16 sps:$4 sm:$0xff]  }
 0x927   :  { %11327 = vmatpush1.bf16.msra.mxu1 %v17566_v1  ;;  %11392 = vmatpush1.bf16.msra.mxu0 %v17569_v30  ;;  %v17617_v1 = vld [vmem:[#allocation12 + $0x2a0] ss:$16 sps:$4 sm:$0xff]   ;;  %v17622_v30 = vld [vmem:[#allocation12 + $0x54c] ss:$16 sps:$4 sm:$0xff]  }
 0x928   :  { %11328 = vmatprep.subr.bf16.mxu1 %v17574_v38  ;;  %11393 = vmatprep.subr.bf16.mxu0 %v17577_v54  ;;  %v17625_v38 = vld [vmem:[#allocation12 + $0x2c4] ss:$16 sps:$4 sm:$0xff]   ;;  %v17620_v54 = vld [vmem:[#allocation12 + $0x548] ss:$16 sps:$4 sm:$0xff]  }
 0x92b   :  { %11329 = vmatpush1.bf16.msra.mxu1 %v17572_v18  ;;  %11394 = vmatpush1.bf16.msra.mxu0 %v17575_v43  ;;  %v17623_v18 = vld [vmem:[#allocation12 + $0x2c0] ss:$16 sps:$4 sm:$0xff]   ;;  %v17628_v43 = vld [vmem:[#allocation12 + $0x56c] ss:$16 sps:$4 sm:$0xff]  }
 0x92c   :  { %11330 = vmatprep.subr.bf16.mxu1 %v17580_v6  ;;  %11395 = vmatprep.subr.bf16.mxu0 %v17583_v11  ;;  %v17631_v6 = vld [vmem:[#allocation12 + $0x2e4] ss:$16 sps:$4 sm:$0xff]   ;;  %v17626_v11 = vld [vmem:[#allocation12 + $0x568] ss:$16 sps:$4 sm:$0xff]  }
 0x92f   :  { %11331 = vmatpush1.bf16.msra.mxu1 %v17578_v32  ;;  %11396 = vmatpush1.bf16.msra.mxu0 %v17581_v19  ;;  %v17629_v32 = vld [vmem:[#allocation12 + $0x2e0] ss:$16 sps:$4 sm:$0xff]   ;;  %v17634_v19 = vld [vmem:[#allocation12 + $0x58c] ss:$16 sps:$4 sm:$0xff]  }
 0x930   :  { %11332 = vmatprep.subr.bf16.mxu1 %v17586_v34  ;;  %12087 = vmatprep.subr.bf16.mxu0 %v17589_v60  ;;  %v17637_v34 = vld [vmem:[#allocation12 + $0x304] ss:$16 sps:$4 sm:$0xff]   ;;  %v17632_v60 = vld [vmem:[#allocation12 + $0x588] ss:$16 sps:$4 sm:$0xff]  }
 0x932   :  { %11398 = vmatmul.mubr.bf16.vlgmr.msra.gmra.mrb[136].mxu0 %v20846_v44  ;;  %v17602_v44 = vld [vmem:[#allocation12 + $0x4e8] ss:$16 sps:$4 sm:$0xff]  }
 0x933   :  { %11333 = vmatpush1.bf16.msra.mxu1 %v17584_v48  ;;  %12088 = vmatpush1.bf16.msra.mxu0 %v17587_v53  ;;  %v17635_v48 = vld [vmem:[#allocation12 + $0x300] ss:$16 sps:$4 sm:$0xff]   ;;  %v17640_v53 = vld [vmem:[#allocation12 + $0x5ac] ss:$16 sps:$4 sm:$0xff]  }
 0x934   :  { %12119 = vmatprep.mubr.bf16.mxu0 %v20860_v58  ;;  %11334 = vmatprep.subr.bf16.mxu1 %v17592_v33  ;;  %v17643_v33 = vld [vmem:[#allocation12 + $0x324] ss:$16 sps:$4 sm:$0xff]  }
 0x935   :  { %12089 = vmatprep.subr.bf16.mxu0 %v17595_v13  ;;  %v17638_v13 = vld [vmem:[#allocation12 + $0x5a8] ss:$16 sps:$4 sm:$0xff]  }
 0x937   :  { %11335 = vmatpush1.bf16.msra.mxu1 %v17590_v21  ;;  %12090 = vmatpush1.bf16.msra.mxu0 %v17593_v35  ;;  %v17641_v21 = vld [vmem:[#allocation12 + $0x320] ss:$16 sps:$4 sm:$0xff]   ;;  %v17646_v35 = vld [vmem:[#allocation12 + $0x5cc] ss:$16 sps:$4 sm:$0xff]  }
 0x938   :  { %11336 = vmatprep.subr.bf16.mxu1 %v17598_v45  ;;  %12091 = vmatprep.subr.bf16.mxu0 %v17601_v3  ;;  %v17649_v45 = vld [vmem:[#allocation12 + $0x344] ss:$16 sps:$4 sm:$0xff]   ;;  %v17644_v3 = vld [vmem:[#allocation12 + $0x5c8] ss:$16 sps:$4 sm:$0xff]  }
 0x93b   :  { %11337 = vmatpush1.bf16.msra.mxu1 %v17596_v7  ;;  %12092 = vmatpush1.bf16.msra.mxu0 %v17599_v40  ;;  %v17647_v7 = vld [vmem:[#allocation12 + $0x340] ss:$16 sps:$4 sm:$0xff]   ;;  %v17652_v40 = vld [vmem:[#allocation12 + $0x5ec] ss:$16 sps:$4 sm:$0xff]  }
 0x93c   :  { %11338 = vmatprep.subr.bf16.mxu1 %v17604_v59  ;;  %12093 = vmatprep.subr.bf16.mxu0 %v17607_v20  ;;  %v17655_v59 = vld [vmem:[#allocation12 + $0x364] ss:$16 sps:$4 sm:$0xff]   ;;  %v17650_v20 = vld [vmem:[#allocation12 + $0x5e8] ss:$16 sps:$4 sm:$0xff]  }
 0x93f   :  { %11339 = vmatpush1.bf16.msra.mxu1 %v17602_v44  ;;  %12094 = vmatpush1.bf16.msra.mxu0 %v17605_v22  ;;  %v17653_v44 = vld [vmem:[#allocation12 + $0x360] ss:$16 sps:$4 sm:$0xff]   ;;  %v17658_v22 = vld [vmem:[#allocation12 + $0x4] ss:$16 sps:$4 sm:$0xff]  }
 0x940   :  { %11340 = vmatprep.subr.bf16.mxu1 %v17610_v31  ;;  %12095 = vmatprep.subr.bf16.mxu0 %v17613_v4  ;;  %v17661_v31 = vld [vmem:[#allocation12 + $0x384] ss:$16 sps:$4 sm:$0xff]   ;;  %v17656_v4 = vld [vmem:[#allocation12] ss:$16 sps:$4 sm:$0xff]  }
 0x943   :  { %11341 = vmatpush1.bf16.msra.mxu1 %v17608_v2  ;;  %12096 = vmatpush1.bf16.msra.mxu0 %v17611_v0  ;;  %v17659_v2 = vld [vmem:[#allocation12 + $0x380] ss:$16 sps:$4 sm:$0xff]   ;;  %v17664_v0 = vld [vmem:[#allocation12 + $0x24] ss:$16 sps:$4 sm:$0xff]  }
 0x944   :  { %11342 = vmatprep.subr.bf16.mxu1 %v17616_v29  ;;  %12097 = vmatprep.subr.bf16.mxu0 %v17619_v57  ;;  %v20866_v29 = vpack.c.bf16 %v20848_v63, %v20848_v63  ;;  %v17667_v57 = vld [vmem:[#allocation12 + $0x3a4] ss:$16 sps:$4 sm:$0xff]  }
 0x945   :  { %v17676_v63 = vld [vmem:[#allocation12 + $0x64] ss:$16 sps:$4 sm:$0xff]  }
 0x947   :  { %11343 = vmatpush1.bf16.msra.mxu1 %v17614_v25  ;;  %12098 = vmatpush1.bf16.msra.mxu0 %v17617_v1  ;;  %v17662_v25 = vld [vmem:[#allocation12 + $0x20] ss:$16 sps:$4 sm:$0xff]  }
 0x948   :  { %11344 = vmatprep.subr.bf16.mxu1 %v17622_v30  ;;  %12099 = vmatprep.subr.bf16.mxu0 %v17625_v38  ;;  %v17665_v1 = vld [vmem:[#allocation12 + $0x3a0] ss:$16 sps:$4 sm:$0xff]   ;;  %v17670_v30 = vld [vmem:[#allocation12 + $0x44] ss:$16 sps:$4 sm:$0xff]  }
 0x949   :  { %v17673_v38 = vld [vmem:[#allocation12 + $0x3c4] ss:$16 sps:$4 sm:$0xff]  }
 0x94b   :  { %11345 = vmatpush1.bf16.msra.mxu1 %v17620_v54  ;;  %12100 = vmatpush1.bf16.msra.mxu0 %v17623_v18  ;;  %v17668_v54 = vld [vmem:[#allocation12 + $0x40] ss:$16 sps:$4 sm:$0xff]  }
 0x94c   :  { %11346 = vmatprep.subr.bf16.mxu1 %v17628_v43  ;;  %12101 = vmatprep.subr.bf16.mxu0 %v17631_v6  ;;  %v17671_v18 = vld [vmem:[#allocation12 + $0x3c0] ss:$16 sps:$4 sm:$0xff]   ;;  %v17679_v43 = vld [vmem:[#allocation12 + $0x3e4] ss:$16 sps:$4 sm:$0xff]  }
 0x94d   :  { %v17677_v6 = vld [vmem:[#allocation12 + $0x3e0] ss:$16 sps:$4 sm:$0xff]  }
 0x94f   :  { %11347 = vmatpush1.bf16.msra.mxu1 %v17626_v11  ;;  %12102 = vmatpush1.bf16.msra.mxu0 %v17629_v32  ;;  %v17682_v11 = vld [vmem:[#allocation12 + $0x84] ss:$16 sps:$4 sm:$0xff]   ;;  %v17685_v32 = vld [vmem:[#allocation12 + $0x20c] ss:$16 sps:$4 sm:$0xff]  }
 0x950   :  { %11348 = vmatprep.subr.bf16.mxu1 %v17634_v19  ;;  %12103 = vmatprep.subr.bf16.mxu0 %v17637_v34  ;;  %v17680_v19 = vld [vmem:[#allocation12 + $0x80] ss:$16 sps:$4 sm:$0xff]   ;;  %v17683_v34 = vld [vmem:[#allocation12 + $0x208] ss:$16 sps:$4 sm:$0xff]  }
 0x953   :  { %11349 = vmatpush1.bf16.msra.mxu1 %v17632_v60  ;;  %12104 = vmatpush1.bf16.msra.mxu0 %v17635_v48  ;;  %v20872_v60 = vpack.c.bf16 %v20851_v12, %v20851_v12  ;;  %v17688_v48 = vld [vmem:[#allocation12 + $0xa4] ss:$16 sps:$4 sm:$0xff]   ;;  %v17695_v12 = vld [vmem:[#allocation12 + $0x248] ss:$16 sps:$4 sm:$0xff]  }
 0x954   :  { %11350 = vmatprep.subr.bf16.mxu1 %v17640_v53  ;;  %12105 = vmatprep.subr.bf16.mxu0 %v17643_v33  ;;  %v17691_v53 = vld [vmem:[#allocation12 + $0x22c] ss:$16 sps:$4 sm:$0xff]   ;;  %v17686_v33 = vld [vmem:[#allocation12 + $0xa0] ss:$16 sps:$4 sm:$0xff]  }
 0x957   :  { %11351 = vmatpush1.bf16.msra.mxu1 %v17638_v13  ;;  %12106 = vmatpush1.bf16.msra.mxu0 %v17641_v21  ;;  %v17689_v13 = vld [vmem:[#allocation12 + $0x228] ss:$16 sps:$4 sm:$0xff]   ;;  %v17694_v21 = vld [vmem:[#allocation12 + $0xc4] ss:$16 sps:$4 sm:$0xff]  }
 0x958   :  { %11352 = vmatprep.subr.bf16.mxu1 %v17646_v35  ;;  %12107 = vmatprep.subr.bf16.mxu0 %v17649_v45  ;;  %v17697_v35 = vld [vmem:[#allocation12 + $0x24c] ss:$16 sps:$4 sm:$0xff]   ;;  %v17692_v45 = vld [vmem:[#allocation12 + $0xc0] ss:$16 sps:$4 sm:$0xff]  }
 0x95b   :  { %11353 = vmatpush1.bf16.msra.mxu1 %v17644_v3  ;;  %12108 = vmatpush1.bf16.msra.mxu0 %v17647_v7  ;;  %v17700_v3 = vld [vmem:[#allocation12 + $0xe4] ss:$16 sps:$4 sm:$0xff]   ;;  %v17703_v7 = vld [vmem:[#allocation12 + $0x26c] ss:$16 sps:$4 sm:$0xff]  }
 0x95c   :  { %11354 = vmatprep.subr.bf16.mxu1 %v17652_v40  ;;  %12109 = vmatprep.subr.bf16.mxu0 %v17655_v59  ;;  %v17698_v40 = vld [vmem:[#allocation12 + $0xe0] ss:$16 sps:$4 sm:$0xff]   ;;  %v17701_v59 = vld [vmem:[#allocation12 + $0x268] ss:$16 sps:$4 sm:$0xff]  }
 0x95f   :  { %11355 = vmatpush1.bf16.msra.mxu1 %v17650_v20  ;;  %12110 = vmatpush1.bf16.msra.mxu0 %v17653_v44  ;;  %v17706_v20 = vld [vmem:[#allocation12 + $0x104] ss:$16 sps:$4 sm:$0xff]   ;;  %v17704_v44 = vld [vmem:[#allocation12 + $0x100] ss:$16 sps:$4 sm:$0xff]  }
 0x960   :  { %12046 = vmatprep.subr.bf16.mxu1 %v17658_v22  ;;  %12111 = vmatprep.subr.bf16.mxu0 %v17661_v31  ;;  %v17707_v22 = vld [vmem:[#allocation12 + $0x288] ss:$16 sps:$4 sm:$0xff]   ;;  %v17712_v31 = vld [vmem:[#allocation12 + $0x124] ss:$16 sps:$4 sm:$0xff]  }
 0x962   :  { %11357 = vmatmul.mubr.bf16.vlgmr.msra.gmra.mrb[120].mxu1 %v20855_v15  ;;  %v17674_v15 = vld [vmem:[#allocation12 + $0x60] ss:$16 sps:$4 sm:$0xff]  }
 0x963   :  { %12047 = vmatpush1.bf16.msra.mxu1 %v17656_v4  ;;  %12078 = vmatprep.mubr.bf16.mxu1 %v20866_v29  ;;  %v17715_v4 = vld [vmem:[#allocation12 + $0x2ac] ss:$16 sps:$4 sm:$0xff]  }
 0x964   :  { %12112 = vmatpush1.bf16.msra.mxu0 %v17659_v2  ;;  %12048 = vmatprep.subr.bf16.mxu1 %v17664_v0  ;;  %v17710_v2 = vld [vmem:[#allocation12 + $0x120] ss:$16 sps:$4 sm:$0xff]   ;;  %v17713_v0 = vld [vmem:[#allocation12 + $0x2a8] ss:$16 sps:$4 sm:$0xff]  }
 0x965   :  { %12113 = vmatprep.subr.bf16.mxu0 %v17667_v57  ;;  %v17718_v57 = vld [vmem:[#allocation12 + $0x144] ss:$16 sps:$4 sm:$0xff]  }
 0x967   :  { %12049 = vmatpush1.bf16.msra.mxu1 %v17662_v25  ;;  %v17721_v25 = vld [vmem:[#allocation12 + $0x2cc] ss:$16 sps:$4 sm:$0xff]  }
 0x968   :  { %12114 = vmatpush1.bf16.msra.mxu0 %v17665_v1  ;;  %12050 = vmatprep.subr.bf16.mxu1 %v17670_v30  ;;  %v17716_v1 = vld [vmem:[#allocation12 + $0x140] ss:$16 sps:$4 sm:$0xff]   ;;  %v17719_v30 = vld [vmem:[#allocation12 + $0x2c8] ss:$16 sps:$4 sm:$0xff]  }
 0x969   :  { %12115 = vmatprep.subr.bf16.mxu0 %v17673_v38  ;;  %v17724_v38 = vld [vmem:[#allocation12 + $0x164] ss:$16 sps:$4 sm:$0xff]  }
 0x96b   :  { %12051 = vmatpush1.bf16.msra.mxu1 %v17668_v54  ;;  %v17727_v54 = vld [vmem:[#allocation12 + $0x2ec] ss:$16 sps:$4 sm:$0xff]  }
 0x96c   :  { %12116 = vmatpush1.bf16.msra.mxu0 %v17671_v18  ;;  %12052 = vmatprep.subr.bf16.mxu1 %v17676_v63  ;;  %v17722_v18 = vld [vmem:[#allocation12 + $0x160] ss:$16 sps:$4 sm:$0xff]   ;;  %v17725_v63 = vld [vmem:[#allocation12 + $0x2e8] ss:$16 sps:$4 sm:$0xff]  }
 0x96d   :  { %12117 = vmatprep.subr.bf16.mxu0 %v17679_v43  ;;  %v17730_v43 = vld [vmem:[#allocation12 + $0x184] ss:$16 sps:$4 sm:$0xff]  }
 0x96f   :  { %12053 = vmatpush1.bf16.msra.mxu1 %v17674_v15  ;;  %v17733_v15 = vld [vmem:[#allocation12 + $0x30c] ss:$16 sps:$4 sm:$0xff]  }
 0x970   :  { %12118 = vmatpush1.bf16.msra.mxu0 %v17677_v6  ;;  %12054 = vmatprep.subr.bf16.mxu1 %v17682_v11  ;;  %v17728_v6 = vld [vmem:[#allocation12 + $0x180] ss:$16 sps:$4 sm:$0xff]   ;;  %v17731_v11 = vld [vmem:[#allocation12 + $0x308] ss:$16 sps:$4 sm:$0xff]  }
 0x971   :  { %12169 = vmatprep.subr.bf16.mxu0 %v17685_v32  ;;  %v17736_v32 = vld [vmem:[#allocation12 + $0x1a4] ss:$16 sps:$4 sm:$0xff]  }
 0x973   :  { %12120 = vmatmul.mubr.bf16.vlgmr.msra.gmra.mrb[140].mxu0 %v20872_v60  ;;  %12055 = vmatpush1.bf16.msra.mxu1 %v17680_v19  ;;  %v17739_v19 = vld [vmem:[#allocation12 + $0x32c] ss:$16 sps:$4 sm:$0xff]  }
 0x974   :  { %12170 = vmatpush1.bf16.msra.mxu0 %v17683_v34  ;;  %12201 = vmatprep.mubr.bf16.mxu0 %v20860_v58  ;;  %v17709_v58 = vld [vmem:[#allocation12 + $0x28c] ss:$16 sps:$4 sm:$0xff]   ;;  %v17734_v34 = vld [vmem:[#allocation12 + $0x1a0] ss:$16 sps:$4 sm:$0xff]  }
 0x975   :  { %12056 = vmatprep.subr.bf16.mxu1 %v17688_v48  ;;  %12171 = vmatprep.subr.bf16.mxu0 %v17691_v53  ;;  %v17737_v48 = vld [vmem:[#allocation12 + $0x328] ss:$16 sps:$4 sm:$0xff]   ;;  %v17742_v53 = vld [vmem:[#allocation12 + $0x1c4] ss:$16 sps:$4 sm:$0xff]  }
 0x977   :  { %12057 = vmatpush1.bf16.msra.mxu1 %v17686_v33  ;;  %v17745_v33 = vld [vmem:[#allocation12 + $0x34c] ss:$16 sps:$4 sm:$0xff]  }
 0x978   :  { %12172 = vmatpush1.bf16.msra.mxu0 %v17689_v13  ;;  %12058 = vmatprep.subr.bf16.mxu1 %v17694_v21  ;;  %v17740_v13 = vld [vmem:[#allocation12 + $0x1c0] ss:$16 sps:$4 sm:$0xff]   ;;  %v17743_v21 = vld [vmem:[#allocation12 + $0x348] ss:$16 sps:$4 sm:$0xff]  }
 0x979   :  { %12173 = vmatprep.subr.bf16.mxu0 %v17697_v35  ;;  %v17748_v35 = vld [vmem:[#allocation12 + $0x1e4] ss:$16 sps:$4 sm:$0xff]  }
 0x97b   :  { %12059 = vmatpush1.bf16.msra.mxu1 %v17692_v45  ;;  %v17751_v45 = vld [vmem:[#allocation12 + $0x36c] ss:$16 sps:$4 sm:$0xff]  }
 0x97c   :  { %12174 = vmatpush1.bf16.msra.mxu0 %v17695_v12  ;;  %12060 = vmatprep.subr.bf16.mxu1 %v17700_v3  ;;  %v17746_v12 = vld [vmem:[#allocation12 + $0x1e0] ss:$16 sps:$4 sm:$0xff]   ;;  %v17749_v3 = vld [vmem:[#allocation12 + $0x368] ss:$16 sps:$4 sm:$0xff]  }
 0x97d   :  { %12175 = vmatprep.subr.bf16.mxu0 %v17703_v7  ;;  %v17754_v7 = vld [vmem:[#allocation12 + $0xc] ss:$16 sps:$4 sm:$0xff]  }
 0x97f   :  { %12061 = vmatpush1.bf16.msra.mxu1 %v17698_v40  ;;  %v17757_v40 = vld [vmem:[#allocation12 + $0x38c] ss:$16 sps:$4 sm:$0xff]  }
 0x980   :  { %12176 = vmatpush1.bf16.msra.mxu0 %v17701_v59  ;;  %12062 = vmatprep.subr.bf16.mxu1 %v17706_v20  ;;  %v17752_v59 = vld [vmem:[#allocation12 + $0x8] ss:$16 sps:$4 sm:$0xff]   ;;  %v20878_v20 = vpack.c.bf16 %v20844_v28, %v20844_v28 }
 0x981   :  { %12177 = vmatprep.subr.bf16.mxu0 %v17709_v58  ;;  %v17755_v58 = vld [vmem:[#allocation12 + $0x388] ss:$16 sps:$4 sm:$0xff]  }
 0x982   :  { %v17764_v28 = vld [vmem:[#allocation12 + $0x48] ss:$16 sps:$4 sm:$0xff]  }
 0x983   :  { %12063 = vmatpush1.bf16.msra.mxu1 %v17704_v44  ;;  %v17760_v44 = vld [vmem:[#allocation12 + $0x2c] ss:$16 sps:$4 sm:$0xff]  }
 0x984   :  { %12178 = vmatpush1.bf16.msra.mxu0 %v17707_v22  ;;  %12064 = vmatprep.subr.bf16.mxu1 %v17712_v31  ;;  %v17763_v22 = vld [vmem:[#allocation12 + $0x3ac] ss:$16 sps:$4 sm:$0xff]   ;;  %v17758_v31 = vld [vmem:[#allocation12 + $0x28] ss:$16 sps:$4 sm:$0xff]  }
 0x985   :  { %12179 = vmatprep.subr.bf16.mxu0 %v17715_v4  ;;  %v17761_v4 = vld [vmem:[#allocation12 + $0x3a8] ss:$16 sps:$4 sm:$0xff]  }
 0x987   :  { %12065 = vmatpush1.bf16.msra.mxu1 %v17710_v2  ;;  %v17766_v2 = vld [vmem:[#allocation12 + $0x4c] ss:$16 sps:$4 sm:$0xff]  }
 0x988   :  { %12180 = vmatpush1.bf16.msra.mxu0 %v17713_v0  ;;  %12066 = vmatprep.subr.bf16.mxu1 %v17718_v57  ;;  %v17769_v0 = vld [vmem:[#allocation12 + $0x3cc] ss:$16 sps:$4 sm:$0xff]   ;;  %v17767_v57 = vld [vmem:[#allocation12 + $0x3c8] ss:$16 sps:$4 sm:$0xff]  }
 0x989   :  { %12181 = vmatprep.subr.bf16.mxu0 %v17721_v25  ;;  %v17772_v25 = vld [vmem:[#allocation12 + $0x6c] ss:$16 sps:$4 sm:$0xff]  }
 0x98b   :  { %12067 = vmatpush1.bf16.msra.mxu1 %v17716_v1  ;;  %v17775_v1 = vld [vmem:[#allocation12 + $0x3ec] ss:$16 sps:$4 sm:$0xff]  }
 0x98c   :  { %12182 = vmatpush1.bf16.msra.mxu0 %v17719_v30  ;;  %12068 = vmatprep.subr.bf16.mxu1 %v17724_v38  ;;  %v17770_v30 = vld [vmem:[#allocation12 + $0x68] ss:$16 sps:$4 sm:$0xff]   ;;  %v17778_v38 = vld [vmem:[#allocation12 + $0x8c] ss:$16 sps:$4 sm:$0xff]  }
 0x98d   :  { %12183 = vmatprep.subr.bf16.mxu0 %v17727_v54  ;;  %v17776_v54 = vld [vmem:[#allocation12 + $0x88] ss:$16 sps:$4 sm:$0xff]  }
 0x98f   :  { %12069 = vmatpush1.bf16.msra.mxu1 %v17722_v18  ;;  %v17781_v18 = vld [vmem:[#allocation12 + $0xac] ss:$16 sps:$4 sm:$0xff]  }
 0x990   :  { %12184 = vmatpush1.bf16.msra.mxu0 %v17725_v63  ;;  %12070 = vmatprep.subr.bf16.mxu1 %v17730_v43  ;;  %v17779_v63 = vld [vmem:[#allocation12 + $0xa8] ss:$16 sps:$4 sm:$0xff]   ;;  %v17784_v43 = vld [vmem:[#allocation12 + $0xcc] ss:$16 sps:$4 sm:$0xff]  }
 0x991   :  { %12185 = vmatprep.subr.bf16.mxu0 %v17733_v15  ;;  %v17782_v15 = vld [vmem:[#allocation12 + $0xc8] ss:$16 sps:$4 sm:$0xff]  }
 0x993   :  { %12071 = vmatpush1.bf16.msra.mxu1 %v17728_v6  ;;  %v17787_v6 = vld [vmem:[#allocation12 + $0xec] ss:$16 sps:$4 sm:$0xff]  }
 0x994   :  { %12186 = vmatpush1.bf16.msra.mxu0 %v17731_v11  ;;  %12072 = vmatprep.subr.bf16.mxu1 %v17736_v32  ;;  %v17790_v11 = vld [vmem:[#allocation12 + $0x10c] ss:$16 sps:$4 sm:$0xff]   ;;  %v17788_v32 = vld [vmem:[#allocation12 + $0x108] ss:$16 sps:$4 sm:$0xff]  }
 0x995   :  { %12187 = vmatprep.subr.bf16.mxu0 %v17739_v19  ;;  %v17793_v19 = vld [vmem:[#allocation12 + $0x12c] ss:$16 sps:$4 sm:$0xff]  }
 0x997   :  { %12073 = vmatpush1.bf16.msra.mxu1 %v17734_v34  ;;  %v17791_v34 = vld [vmem:[#allocation12 + $0x128] ss:$16 sps:$4 sm:$0xff]  }
 0x998   :  { %12188 = vmatpush1.bf16.msra.mxu0 %v17737_v48  ;;  %12074 = vmatprep.subr.bf16.mxu1 %v17742_v53  ;;  %v17796_v48 = vld [vmem:[#allocation12 + $0x14c] ss:$16 sps:$4 sm:$0xff]  }
 0x999   :  { %12189 = vmatprep.subr.bf16.mxu0 %v17745_v33 }
 0x99b   :  { %12075 = vmatpush1.bf16.msra.mxu1 %v17740_v13  ;;  %v17794_v13 = vld [vmem:[#allocation12 + $0x148] ss:$16 sps:$4 sm:$0xff]  }
 0x99c   :  { %12190 = vmatpush1.bf16.msra.mxu0 %v17743_v21  ;;  %12076 = vmatprep.subr.bf16.mxu1 %v17748_v35  ;;  %v20904_v35 = vld [vmem:[#allocation10 + $0x10] sm:$0xff] }
 0x99d   :  { %12191 = vmatprep.subr.bf16.mxu0 %v17751_v45  ;;  %v17799_v45 = vld [vmem:[#allocation12 + $0x16c] ss:$16 sps:$4 sm:$0xff]  }
 0x99f   :  { %12077 = vmatpush1.bf16.msra.mxu1 %v17746_v12 }
 0x9a0   :  { %12192 = vmatpush1.bf16.msra.mxu0 %v17749_v3  ;;  %12128 = vmatprep.subr.bf16.mxu1 %v17754_v7  ;;  %v17812_v3 = vld [vmem:[#allocation12 + $0xa00] ss:$16 sps:$4 sm:$0xff]   ;;  %v17814_v7 = vld [vmem:[#allocation12 + $0xa04] ss:$16 sps:$4 sm:$0xff]  }
 0x9a1   :  { %12193 = vmatprep.subr.bf16.mxu0 %v17757_v40  ;;  %v17817_v40 = vld [vmem:[#allocation12 + $0xa24] ss:$16 sps:$4 sm:$0xff]  }
 0x9a2   :  { %12079 = vmatmul.mubr.bf16.vlgmr.msra.gmra.mrb[124].mxu1 %v20878_v20 }
 0x9a3   :  { %12129 = vmatpush1.bf16.msra.mxu1 %v17752_v59  ;;  %12160 = vmatprep.mubr.bf16.mxu1 %v20866_v29  ;;  %v17773_v29 = vld [vmem:[#allocation12 + $0x3e8] ss:$16 sps:$4 sm:$0xff]  }
 0x9a4   :  { %12194 = vmatpush1.bf16.msra.mxu0 %v17755_v58  ;;  %12130 = vmatprep.subr.bf16.mxu1 %v17760_v44  ;;  %v17797_v59 = vld [vmem:[#allocation12 + $0x168] ss:$16 sps:$4 sm:$0xff]   ;;  %v17802_v58 = vld [vmem:[#allocation12 + $0x18c] ss:$16 sps:$4 sm:$0xff]   ;;  %v17815_v44 = vld [vmem:[#allocation12 + $0xa20] ss:$16 sps:$4 sm:$0xff]  }
 0x9a5   :  { %12195 = vmatprep.subr.bf16.mxu0 %v17763_v22  ;;  %v17820_v22 = vld [vmem:[#allocation12 + $0xa44] ss:$16 sps:$4 sm:$0xff]  }
 0x9a7   :  { %12131 = vmatpush1.bf16.msra.mxu1 %v17758_v31  ;;  %v17800_v31 = vld [vmem:[#allocation12 + $0x188] ss:$16 sps:$4 sm:$0xff]  }
 0x9a8   :  { %12196 = vmatpush1.bf16.msra.mxu0 %v17761_v4  ;;  %12132 = vmatprep.subr.bf16.mxu1 %v17766_v2  ;;  %v17805_v4 = vld [vmem:[#allocation12 + $0x1ac] ss:$16 sps:$4 sm:$0xff]   ;;  %v17818_v2 = vld [vmem:[#allocation12 + $0xa40] ss:$16 sps:$4 sm:$0xff]  }
 0x9a9   :  { %12197 = vmatprep.subr.bf16.mxu0 %v17769_v0  ;;  %v17823_v0 = vld [vmem:[#allocation12 + $0xa64] ss:$16 sps:$4 sm:$0xff]  }
 0x9ab   :  { %12133 = vmatpush1.bf16.msra.mxu1 %v17764_v28  ;;  %v17803_v28 = vld [vmem:[#allocation12 + $0x1a8] ss:$16 sps:$4 sm:$0xff]  }
 0x9ac   :  { %12198 = vmatpush1.bf16.msra.mxu0 %v17767_v57  ;;  %12134 = vmatprep.subr.bf16.mxu1 %v17772_v25  ;;  %v17808_v57 = vld [vmem:[#allocation12 + $0x1cc] ss:$16 sps:$4 sm:$0xff]   ;;  %v17821_v25 = vld [vmem:[#allocation12 + $0xa60] ss:$16 sps:$4 sm:$0xff]  }
 0x9ad   :  { %12199 = vmatprep.subr.bf16.mxu0 %v17775_v1  ;;  %v17826_v1 = vld [vmem:[#allocation12 + $0xa84] ss:$16 sps:$4 sm:$0xff]  }
 0x9af   :  { %12135 = vmatpush1.bf16.msra.mxu1 %v17770_v30  ;;  %v17806_v30 = vld [vmem:[#allocation12 + $0x1c8] ss:$16 sps:$4 sm:$0xff]  }
 0x9b0   :  { %12200 = vmatpush1.bf16.msra.mxu0 %v17773_v29  ;;  %12136 = vmatprep.subr.bf16.mxu1 %v17778_v38  ;;  %v17811_v29 = vld [vmem:[#allocation12 + $0x1ec] ss:$16 sps:$4 sm:$0xff]   ;;  %v17824_v38 = vld [vmem:[#allocation12 + $0xa80] ss:$16 sps:$4 sm:$0xff]  }
 0x9b1   :  { %16434 = vmatprep.subr.bf16.mxu0 %v20578_v46 }
 0x9b3   :  { %12202 = vmatmul.mubr.bf16.vlgmr.msra.gmra.mrb[144].mxu0 %v20872_v60  ;;  %12137 = vmatpush1.bf16.msra.mxu1 %v17776_v54  ;;  %v17785_v60 = vld [vmem:[#allocation12 + $0xe8] ss:$16 sps:$4 sm:$0xff]  }
 0x9b4   :  { %16436 = vmatpush1.bf16.msra.mxu0 %v20572_v39  ;;  %12138 = vmatprep.subr.bf16.mxu1 %v17781_v18  ;;  %v17809_v54 = vld [vmem:[#allocation12 + $0x1e8] ss:$16 sps:$4 sm:$0xff]  }
 0x9b5   :  { %16438 = vmatprep.subr.bf16.mxu0 %v20630_v49  ;;  %12350 = vmatprep.mubr.f32.mxu0 %v21143_v14 }
 0x9b7   :  { %12139 = vmatpush1.bf16.msra.mxu1 %v17779_v63 }
 0x9b8   :  { %16440 = vmatpush1.bf16.msra.mxu0 %v20624_v50  ;;  %12140 = vmatprep.subr.bf16.mxu1 %v17784_v43 }
 0x9b9   :  { %16442 = vmatprep.subr.bf16.mxu0 %v20676_v56 }
 0x9bb   :  { %12141 = vmatpush1.bf16.msra.mxu1 %v17782_v15 }
 0x9bc   :  { %16444 = vmatpush1.bf16.msra.mxu0 %v20670_v23  ;;  %12142 = vmatprep.subr.bf16.mxu1 %v17787_v6 }
 0x9bd   :  { %16446 = vmatprep.subr.bf16.mxu0 %v20722_v9 }
 0x9bf   :  { %12143 = vmatpush1.bf16.msra.mxu1 %v17785_v60  ;;  %v17827_v60 = vld [vmem:[#allocation12 + $0xaa0] ss:$16 sps:$4 sm:$0xff]  }
 0x9c0   :  { %16448 = vmatpush1.bf16.msra.mxu0 %v20716_v5  ;;  %12144 = vmatprep.subr.bf16.mxu1 %v17790_v11  ;;  %v17829_v11 = vld [vmem:[#allocation12 + $0xaa4] ss:$16 sps:$4 sm:$0xff]  }
 0x9c1   :  { %16450 = vmatprep.subr.bf16.mxu0 %v20762_v17 }
 0x9c3   :  { %12145 = vmatpush1.bf16.msra.mxu1 %v17788_v32  ;;  %v17832_v32 = vld [vmem:[#allocation12 + $0xac4] ss:$16 sps:$4 sm:$0xff]  }
 0x9c4   :  { %16452 = vmatpush1.bf16.msra.mxu0 %v20756_v51  ;;  %12146 = vmatprep.subr.bf16.mxu1 %v17793_v19  ;;  %v17830_v19 = vld [vmem:[#allocation12 + $0xac0] ss:$16 sps:$4 sm:$0xff]  }
 0x9c5   :  { %16455 = vmatprep.subr.msk.bf16.mxu0 %vm19603_vm8, %v20788_v16  ;;  %v20897_v53 = vpop.f32.mrb[132].mxu0 }
 0x9c6   :  { %v20899_v33 = vpop.f32.mrb[133].mxu0 }
 0x9c7   :  { %12147 = vmatpush1.bf16.msra.mxu1 %v17791_v34  ;;  %v11321_v21 = vpop.f32.mrb[134].mxu0  ;;  %v17835_v34 = vld [vmem:[#allocation12 + $0xae4] ss:$16 sps:$4 sm:$0xff]  }
 0x9c8   :  { %16458 = vmatpush1.bf16.msk.msra.mxu0 %vm19603_vm8, %v20784_v42  ;;  %12148 = vmatprep.subr.bf16.mxu1 %v17796_v48  ;;  %v11322_v12 = vpop.f32.mrb[135].mxu0  ;;  %v17833_v48 = vld [vmem:[#allocation12 + $0xae0] ss:$16 sps:$4 sm:$0xff]  }
 0x9c9   :  { %13171 = vmatprep.subr.bf16.mxu0 %v17814_v7  ;;  %v17844_v7 = vld [vmem:[#allocation12 + $0xb44] ss:$16 sps:$4 sm:$0xff]  }
 0x9cb   :  { %15905 = vmatmul.mubr.msk.f32.vlgmr.msra.gmra.mrb[130].mxu0 %vm3321_vm5, %v20904_v35  ;;  %12149 = vmatpush1.bf16.msra.mxu1 %v17794_v13 }
 0x9cc   :  { %12150 = vmatprep.subr.bf16.mxu1 %v17799_v45  ;;  %13172 = vmatpush1.bf16.msra.mxu0 %v17812_v3  ;;  %v17841_v45 = vld [vmem:[#allocation12 + $0xb24] ss:$16 sps:$4 sm:$0xff]  }
 0x9cd   :  { %13173 = vmatprep.subr.bf16.mxu0 %v17817_v40  ;;  %v17848_v40 = vld [vmem:[#allocation12 + $0x800] ss:$16 sps:$4 sm:$0xff]  }
 0x9cf   :  { %12151 = vmatpush1.bf16.msra.mxu1 %v17797_v59  ;;  %v17850_v59 = vld [vmem:[#allocation12 + $0x804] ss:$16 sps:$4 sm:$0xff]  }
 0x9d0   :  { %12152 = vmatprep.subr.bf16.mxu1 %v17802_v58  ;;  %13174 = vmatpush1.bf16.msra.mxu0 %v17815_v44  ;;  %v17842_v58 = vld [vmem:[#allocation12 + $0xb40] ss:$16 sps:$4 sm:$0xff]   ;;  %v17847_v44 = vld [vmem:[#allocation12 + $0xb64] ss:$16 sps:$4 sm:$0xff]  }
 0x9d1   :  { %13175 = vmatprep.subr.bf16.mxu0 %v17820_v22  ;;  %v17856_v22 = vld [vmem:[#allocation12 + $0x824] ss:$16 sps:$4 sm:$0xff]  }
 0x9d3   :  { %12153 = vmatpush1.bf16.msra.mxu1 %v17800_v31  ;;  %v17854_v31 = vld [vmem:[#allocation12 + $0x820] ss:$16 sps:$4 sm:$0xff]  }
 0x9d4   :  { %12154 = vmatprep.subr.bf16.mxu1 %v17805_v4  ;;  %13176 = vmatpush1.bf16.msra.mxu0 %v17818_v2  ;;  %v17862_v4 = vld [vmem:[#allocation12 + $0x844] ss:$16 sps:$4 sm:$0xff]   ;;  %v17845_v2 = vld [vmem:[#allocation12 + $0xb60] ss:$16 sps:$4 sm:$0xff]  }
 0x9d5   :  { %13177 = vmatprep.subr.bf16.mxu0 %v17823_v0  ;;  %v17853_v0 = vld [vmem:[#allocation12 + $0xb84] ss:$16 sps:$4 sm:$0xff]  }
 0x9d7   :  { %12155 = vmatpush1.bf16.msra.mxu1 %v17803_v28  ;;  %v17860_v28 = vld [vmem:[#allocation12 + $0x840] ss:$16 sps:$4 sm:$0xff]  }
 0x9d8   :  { %12156 = vmatprep.subr.bf16.mxu1 %v17808_v57  ;;  %13178 = vmatpush1.bf16.msra.mxu0 %v17821_v25  ;;  %v17851_v57 = vld [vmem:[#allocation12 + $0xb80] ss:$16 sps:$4 sm:$0xff]   ;;  %v17859_v25 = vld [vmem:[#allocation12 + $0xba4] ss:$16 sps:$4 sm:$0xff]  }
 0x9d9   :  { %13179 = vmatprep.subr.bf16.mxu0 %v17826_v1  ;;  %v17857_v1 = vld [vmem:[#allocation12 + $0xba0] ss:$16 sps:$4 sm:$0xff]  }
 0x9db   :  { %12157 = vmatpush1.bf16.msra.mxu1 %v17806_v30  ;;  %v17865_v30 = vld [vmem:[#allocation12 + $0xbc4] ss:$16 sps:$4 sm:$0xff]  }
 0x9dc   :  { %12158 = vmatprep.subr.bf16.mxu1 %v17811_v29  ;;  %13180 = vmatpush1.bf16.msra.mxu0 %v17824_v38  ;;  %v17863_v29 = vld [vmem:[#allocation12 + $0xbc0] ss:$16 sps:$4 sm:$0xff]  }
 0x9dd   :  { %13181 = vmatprep.subr.bf16.mxu0 %v17829_v11  ;;  %v17866_v38 = vld [vmem:[#allocation12 + $0x860] ss:$16 sps:$4 sm:$0xff]   ;;  %v17880_v11 = vld [vmem:[#allocation12 + $0x8a4] ss:$16 sps:$4 sm:$0xff]  }
 0x9df   :  { %12159 = vmatpush1.bf16.msra.mxu1 %v17809_v54  ;;  %v17868_v54 = vld [vmem:[#allocation12 + $0x864] ss:$16 sps:$4 sm:$0xff]  }
 0x9e0   :  { %16408 = vmatprep.subr.bf16.mxu1 %v20576_v62  ;;  %13182 = vmatpush1.bf16.msra.mxu0 %v17827_v60  ;;  %v17877_v60 = vld [vmem:[#allocation12 + $0xa0c] ss:$16 sps:$4 sm:$0xff]  }
 0x9e1   :  { %13183 = vmatprep.subr.bf16.mxu0 %v17832_v32  ;;  %v17878_v32 = vld [vmem:[#allocation12 + $0x8a0] ss:$16 sps:$4 sm:$0xff]  }
 0x9e2   :  { %12161 = vmatmul.mubr.bf16.vlgmr.msra.gmra.mrb[128].mxu1 %v20878_v20 }
 0x9e3   :  { %16410 = vmatpush1.bf16.msra.mxu1 %v20570_v47  ;;  %12279 = vmatprep.mubr.f32.mxu1 %v21143_v14 }
 0x9e4   :  { %16412 = vmatprep.subr.bf16.mxu1 %v20628_v26  ;;  %13184 = vmatpush1.bf16.msra.mxu0 %v17830_v19  ;;  %v17886_v19 = vld [vmem:[#allocation12 + $0x8c4] ss:$16 sps:$4 sm:$0xff]  }
 0x9e5   :  { %13185 = vmatprep.subr.bf16.mxu0 %v17835_v34  ;;  %v17884_v34 = vld [vmem:[#allocation12 + $0x8c0] ss:$16 sps:$4 sm:$0xff]  }
 0x9e7   :  { %16414 = vmatpush1.bf16.msra.mxu1 %v20622_v61 }
 0x9e8   :  { %16416 = vmatprep.subr.bf16.mxu1 %v20674_v41  ;;  %13186 = vmatpush1.bf16.msra.mxu0 %v17833_v48  ;;  %v17892_v48 = vld [vmem:[#allocation12 + $0x8e4] ss:$16 sps:$4 sm:$0xff]  }
 0x9eb   :  { %16418 = vmatpush1.bf16.msra.mxu1 %v20668_v10 }
 0x9ec   :  { %16420 = vmatprep.subr.bf16.mxu1 %v20720_v55 }
 0x9ef   :  { %16422 = vmatpush1.bf16.msra.mxu1 %v20714_v27 }
 0x9f0   :  { %16424 = vmatprep.subr.bf16.mxu1 %v20760_v36 }
 0x9f3   :  { %16426 = vmatpush1.bf16.msra.mxu1 %v20754_v8 }
 0x9f4   :  { %16429 = vmatprep.subr.msk.bf16.mxu1 %vm19603_vm8, %v20786_v37 }
 0x9f5   :  { %v11276_v20 = vpop.f32.mrb[116].mxu1 }
 0x9f6   :  { %v20924_v18 = vadd.f32 %v20897_v53, %v11276_v20  ;;  %v11278_v63 = vpop.f32.mrb[117].mxu1  ;;  %v17838_v53 = vld [vmem:[#allocation12 + $0xb04] ss:$16 sps:$4 sm:$0xff]   ;;  %v17869_v20 = vld [vmem:[#allocation12 + $0xbe0] ss:$16 sps:$4 sm:$0xff]  }
 0x9f7   :  { %v20927_v43 = vadd.f32 %v20899_v33, %v11278_v63  ;;  %16432 = vmatpush1.bf16.msk.msra.mxu1 %vm19603_vm8, %v20782_v24  ;;  %v11280_v15 = vpop.f32.mrb[118].mxu1  ;;  %v17836_v33 = vld [vmem:[#allocation12 + $0xb00] ss:$16 sps:$4 sm:$0xff]   ;;  %13187 = vmatprep.subr.bf16.mxu0 %v17838_v53  ;;  %v17871_v63 = vld [vmem:[#allocation12 + $0xbe4] ss:$16 sps:$4 sm:$0xff]  }
 0x9f8   :  { %v11281_v6 = vpop.f32.mrb[119].mxu1  ;;  %13188 = vmatpush1.bf16.msra.mxu0 %v17836_v33  ;;  %13130 = vmatprep.subr.bf16.mxu1 %v17850_v59  ;;  %v17874_v15 = vld [vmem:[#allocation12 + $0x884] ss:$16 sps:$4 sm:$0xff]   ;;  %v17890_v53 = vld [vmem:[#allocation12 + $0x8e0] ss:$16 sps:$4 sm:$0xff]  }
 0x9f9   :  { %13189 = vmatprep.subr.bf16.mxu0 %v17841_v45  ;;  %v17872_v6 = vld [vmem:[#allocation12 + $0x880] ss:$16 sps:$4 sm:$0xff]   ;;  %v17898_v33 = vld [vmem:[#allocation12 + $0x904] ss:$16 sps:$4 sm:$0xff]  }
 0x9fa   :  { %15902 = vmatmul.mubr.msk.f32.vlgmr.msra.gmra.mrb[114].mxu1 %vm3321_vm5, %v20904_v35  ;;  %v17839_v35 = vld [vmem:[#allocation12 + $0xb20] ss:$16 sps:$4 sm:$0xff]  }
 0x9fb   :  { %13131 = vmatpush1.bf16.msra.mxu1 %v17848_v40  ;;  %v17896_v45 = vld [vmem:[#allocation12 + $0x900] ss:$16 sps:$4 sm:$0xff]  }
 0x9fc   :  { %13190 = vmatpush1.bf16.msra.mxu0 %v17839_v35  ;;  %13132 = vmatprep.subr.bf16.mxu1 %v17856_v22  ;;  %v17910_v22 = vld [vmem:[#allocation12 + $0x944] ss:$16 sps:$4 sm:$0xff]  }
 0x9fd   :  { %13191 = vmatprep.subr.bf16.mxu0 %v17844_v7 }
 0x9ff   :  { %13133 = vmatpush1.bf16.msra.mxu1 %v17854_v31  ;;  %v17908_v31 = vld [vmem:[#allocation12 + $0x940] ss:$16 sps:$4 sm:$0xff]  }
 0xa00   :  { %13192 = vmatpush1.bf16.msra.mxu0 %v17842_v58  ;;  %13134 = vmatprep.subr.bf16.mxu1 %v17862_v4  ;;  %v17902_v58 = vld [vmem:[#allocation12 + $0x920] ss:$16 sps:$4 sm:$0xff]   ;;  %v17916_v4 = vld [vmem:[#allocation12 + $0x964] ss:$16 sps:$4 sm:$0xff]  }
 0xa01   :  { %13193 = vmatprep.subr.bf16.mxu0 %v17847_v44  ;;  %v17904_v44 = vld [vmem:[#allocation12 + $0x924] ss:$16 sps:$4 sm:$0xff]  }
 0xa03   :  { %13135 = vmatpush1.bf16.msra.mxu1 %v17860_v28  ;;  %v17928_v28 = vld [vmem:[#allocation12 + $0x9a4] ss:$16 sps:$4 sm:$0xff]  }
 0xa04   :  { %13194 = vmatpush1.bf16.msra.mxu0 %v17845_v2  ;;  %13136 = vmatprep.subr.bf16.mxu1 %v17868_v54  ;;  %v17914_v2 = vld [vmem:[#allocation12 + $0x960] ss:$16 sps:$4 sm:$0xff]   ;;  %v17940_v54 = vld [vmem:[#allocation12 + $0x9e4] ss:$16 sps:$4 sm:$0xff]  }
 0xa05   :  { %v20934_v13 = vpop.f32.mrb[136].mxu0  ;;  %13195 = vmatprep.subr.bf16.mxu0 %v17853_v0  ;;  %v17920_v0 = vld [vmem:[#allocation12 + $0x980] ss:$16 sps:$4 sm:$0xff]  }
 0xa06   :  { %v20936_v21 = vpop.f32.mrb[137].mxu0 }
 0xa07   :  { %v11403_v12 = vpop.f32.mrb[138].mxu0  ;;  %13137 = vmatpush1.bf16.msra.mxu1 %v17866_v38  ;;  %v17932_v38 = vld [vmem:[#allocation12 + $0x9c0] ss:$16 sps:$4 sm:$0xff]  }
 0xa08   :  { %v11404_v3 = vpop.f32.mrb[139].mxu0  ;;  %13196 = vmatpush1.bf16.msra.mxu0 %v17851_v57  ;;  %13138 = vmatprep.subr.bf16.mxu1 %v17874_v15 }
 0xa09   :  { %13197 = vmatprep.subr.bf16.mxu0 %v17859_v25  ;;  %v17926_v25 = vld [vmem:[#allocation12 + $0x9a0] ss:$16 sps:$4 sm:$0xff]  }
 0xa0b   :  { %13139 = vmatpush1.bf16.msra.mxu1 %v17872_v6 }
 0xa0c   :  { %13198 = vmatpush1.bf16.msra.mxu0 %v17857_v1  ;;  %13140 = vmatprep.subr.bf16.mxu1 %v17880_v11 }
 0xa0d   :  { %13199 = vmatprep.subr.bf16.mxu0 %v17865_v30  ;;  %v17934_v30 = vld [vmem:[#allocation12 + $0x9c4] ss:$16 sps:$4 sm:$0xff]  }
 0xa0f   :  { %13141 = vmatpush1.bf16.msra.mxu1 %v17878_v32 }
 0xa10   :  { %13200 = vmatpush1.bf16.msra.mxu0 %v17863_v29  ;;  %13142 = vmatprep.subr.bf16.mxu1 %v17886_v19 }
 0xa11   :  { %13201 = vmatprep.subr.bf16.mxu0 %v17871_v63  ;;  %v17946_v63 = vld [vmem:[#allocation12 + $0x80c] ss:$16 sps:$4 sm:$0xff]  }
 0xa13   :  { %13143 = vmatpush1.bf16.msra.mxu1 %v17884_v34 }
 0xa14   :  { %13202 = vmatpush1.bf16.msra.mxu0 %v17869_v20  ;;  %13144 = vmatprep.subr.bf16.mxu1 %v17892_v48  ;;  %v17938_v20 = vld [vmem:[#allocation12 + $0x9e0] ss:$16 sps:$4 sm:$0xff]  }
 0xa15   :  { %13253 = vmatprep.subr.bf16.mxu0 %v17877_v60 }
 0xa17   :  { %13145 = vmatpush1.bf16.msra.mxu1 %v17890_v53 }
 0xa18   :  { %13146 = vmatprep.subr.bf16.mxu1 %v17898_v33 }
 0xa1b   :  { %13147 = vmatpush1.bf16.msra.mxu1 %v17896_v45 }
 0xa1c   :  { %13148 = vmatprep.subr.bf16.mxu1 %v17904_v44  ;;  %v17875_v44 = vld [vmem:[#allocation12 + $0xa08] ss:$16 sps:$4 sm:$0xff]  }
 0xa1f   :  { %13149 = vmatpush1.bf16.msra.mxu1 %v17902_v58 }
 0xa20   :  { %13150 = vmatprep.subr.bf16.mxu1 %v17910_v22  ;;  %v17889_v22 = vld [vmem:[#allocation12 + $0xa4c] ss:$16 sps:$4 sm:$0xff]  }
 0xa23   :  { %13151 = vmatpush1.bf16.msra.mxu1 %v17908_v31  ;;  %v17887_v31 = vld [vmem:[#allocation12 + $0xa48] ss:$16 sps:$4 sm:$0xff]  }
 0xa24   :  { %13152 = vmatprep.subr.bf16.mxu1 %v17916_v4  ;;  %v17895_v4 = vld [vmem:[#allocation12 + $0xa6c] ss:$16 sps:$4 sm:$0xff]  }
 0xa27   :  { %13153 = vmatpush1.bf16.msra.mxu1 %v17914_v2  ;;  %v17893_v2 = vld [vmem:[#allocation12 + $0xa68] ss:$16 sps:$4 sm:$0xff]  }
 0xa35   :  { %v11358_v12 = vpop.f32.mrb[120].mxu1 }
 0xa36   :  { %v20939_v35 = vadd.f32 %v20934_v13, %v11358_v12  ;;  %v11360_v3 = vpop.f32.mrb[121].mxu1  ;;  %v17922_v13 = vld [vmem:[#allocation12 + $0x984] ss:$16 sps:$4 sm:$0xff]  }
 0xa37   :  { %v20942_v7 = vadd.f32 %v20936_v21, %v11360_v3  ;;  %v11362_v40 = vpop.f32.mrb[122].mxu1  ;;  %13154 = vmatprep.subr.bf16.mxu1 %v17922_v13  ;;  %v17901_v13 = vld [vmem:[#allocation12 + $0xa8c] ss:$16 sps:$4 sm:$0xff]  }
 0xa38   :  { %v11363_v59 = vpop.f32.mrb[123].mxu1  ;;  %13155 = vmatpush1.bf16.msra.mxu1 %v17920_v0  ;;  %v17899_v0 = vld [vmem:[#allocation12 + $0xa88] ss:$16 sps:$4 sm:$0xff]  }
 0xa39   :  { %13156 = vmatprep.subr.bf16.mxu1 %v17928_v28  ;;  %v17907_v28 = vld [vmem:[#allocation12 + $0xaac] ss:$16 sps:$4 sm:$0xff]  }
 0xa3c   :  { %13157 = vmatpush1.bf16.msra.mxu1 %v17926_v25  ;;  %v17913_v25 = vld [vmem:[#allocation12 + $0xacc] ss:$16 sps:$4 sm:$0xff]  }
 0xa3d   :  { %13158 = vmatprep.subr.bf16.mxu1 %v17934_v30 }
 0xa40   :  { %13159 = vmatpush1.bf16.msra.mxu1 %v17932_v38 }
 0xa41   :  { %13160 = vmatprep.subr.bf16.mxu1 %v17940_v54 }
 0xa44   :  { %13161 = vmatpush1.bf16.msra.mxu1 %v17938_v20 }
 0xa45   :  { %13212 = vmatprep.subr.bf16.mxu1 %v17946_v63  ;;  %v17911_v63 = vld [vmem:[#allocation12 + $0xac8] ss:$16 sps:$4 sm:$0xff]  }
 0xa46   :  { %v12121_v21 = vpop.f32.mrb[140].mxu0 }
 0xa47   :  { %v12123_v57 = vpop.f32.mrb[141].mxu0 }
 0xa48   :  { %v12125_v1 = vpop.f32.mrb[142].mxu0 }
 0xa49   :  { %v12126_v29 = vpop.f32.mrb[143].mxu0 }
 0xa75   :  { %v12080_v15 = vpop.f32.mrb[124].mxu1 }
 0xa76   :  { %v12081_v6 = vadd.f32 %v12080_v15, %v20924_v18  ;;  %v12082_v60 = vpop.f32.mrb[125].mxu1  ;;  %v17883_v18 = vld [vmem:[#allocation12 + $0xa2c] ss:$16 sps:$4 sm:$0xff]  }
 0xa77   :  { %v12083_v11 = vadd.f32 %v12082_v60, %v20927_v43  ;;  %v12084_v32 = vpop.f32.mrb[126].mxu1  ;;  %v17881_v43 = vld [vmem:[#allocation12 + $0xa28] ss:$16 sps:$4 sm:$0xff]  }
 0xa78   :  { %v20946_v19 = vadd.f32 %v12121_v21, %v12081_v6  ;;  %v12085_v34 = vpop.f32.mrb[127].mxu1  ;;  %v17905_v21 = vld [vmem:[#allocation12 + $0xaa8] ss:$16 sps:$4 sm:$0xff]   ;;  %v17919_v6 = vld [vmem:[#allocation12 + $0xaec] ss:$16 sps:$4 sm:$0xff]  }
 0xa79   :  { %v20948_v48 = vadd.f32 %v12123_v57, %v12083_v11  ;;  %v17917_v60 = vld [vmem:[#allocation12 + $0xae8] ss:$16 sps:$4 sm:$0xff]   ;;  %v17925_v11 = vld [vmem:[#allocation12 + $0xb0c] ss:$16 sps:$4 sm:$0xff]  }
 0xa7a   :  { %v17923_v32 = vld [vmem:[#allocation12 + $0xb08] ss:$16 sps:$4 sm:$0xff]   ;;  %v17937_v34 = vld [vmem:[#allocation12 + $0xb4c] ss:$16 sps:$4 sm:$0xff]  }
 0xa86   :  { %v12203_v53 = vpop.f32.mrb[144].mxu0 }
 0xa87   :  { %v12205_v33 = vpop.f32.mrb[145].mxu0 }
 0xa88   :  { %v12207_v45 = vpop.f32.mrb[146].mxu0 }
 0xa89   :  { %v12208_v12 = vpop.f32.mrb[147].mxu0  ;;  %v17943_v45 = vld [vmem:[#allocation12 + $0xb6c] ss:$16 sps:$4 sm:$0xff]  }
 0xa9e   :  { %v12352_v3 = vpop.f32.mrb[130].mxu0 }
 0xa9f   :  { %v20950_v40 = vpack.c.bf16 %v12352_v3, %v12352_v3  ;;  %v12354_v59 = vpop.f32.mrb[131].mxu0  ;;  %v17949_v3 = vld [vmem:[#allocation12 + $0xb8c] ss:$16 sps:$4 sm:$0xff]  }
 0xaa0   :  { %v12360_v58 = vpack.c.bf16 %v12354_v59, %v12354_v59 }
 0xaa2   :  { %13203 = vmatprep.mubr.bf16.mxu0 %v12360_v58 }
 0xaa3   :  { %13204 = vmatmul.mubr.bf16.vlgmr.msra.gmra.mrb[148].mxu0 %v20950_v40 }
 0xaa4   :  { %13254 = vmatpush1.bf16.msra.mxu0 %v17875_v44  ;;  %13285 = vmatprep.mubr.bf16.mxu0 %v12360_v58  ;;  %v17944_v44 = vld [vmem:[#allocation12 + $0x808] ss:$16 sps:$4 sm:$0xff]  }
 0xaa5   :  { %13255 = vmatprep.subr.bf16.mxu0 %v17883_v18 }
 0xaa8   :  { %13256 = vmatpush1.bf16.msra.mxu0 %v17881_v43  ;;  %v17947_v43 = vld [vmem:[#allocation12 + $0xb88] ss:$16 sps:$4 sm:$0xff]  }
 0xaa9   :  { %13257 = vmatprep.subr.bf16.mxu0 %v17889_v22  ;;  %v17952_v22 = vld [vmem:[#allocation12 + $0x82c] ss:$16 sps:$4 sm:$0xff]  }
 0xaac   :  { %13258 = vmatpush1.bf16.msra.mxu0 %v17887_v31  ;;  %v17955_v31 = vld [vmem:[#allocation12 + $0xbac] ss:$16 sps:$4 sm:$0xff]  }
 0xaad   :  { %13259 = vmatprep.subr.bf16.mxu0 %v17895_v4  ;;  %v17950_v4 = vld [vmem:[#allocation12 + $0x828] ss:$16 sps:$4 sm:$0xff]  }
 0xab0   :  { %13260 = vmatpush1.bf16.msra.mxu0 %v17893_v2  ;;  %v17953_v2 = vld [vmem:[#allocation12 + $0xba8] ss:$16 sps:$4 sm:$0xff]  }
 0xab1   :  { %13261 = vmatprep.subr.bf16.mxu0 %v17901_v13  ;;  %v17958_v13 = vld [vmem:[#allocation12 + $0x84c] ss:$16 sps:$4 sm:$0xff]  }
 0xab4   :  { %13262 = vmatpush1.bf16.msra.mxu0 %v17899_v0  ;;  %v17961_v0 = vld [vmem:[#allocation12 + $0xbcc] ss:$16 sps:$4 sm:$0xff]  }
 0xab5   :  { %v12162_v57 = vpop.f32.mrb[128].mxu1  ;;  %13263 = vmatprep.subr.bf16.mxu0 %v17907_v28  ;;  %v17956_v28 = vld [vmem:[#allocation12 + $0x848] ss:$16 sps:$4 sm:$0xff]  }
 0xab6   :  { %v12163_v1 = vadd.f32 %v12162_v57, %v20939_v35  ;;  %v12164_v30 = vpop.f32.mrb[129].mxu1  ;;  %v17931_v35 = vld [vmem:[#allocation12 + $0xb2c] ss:$16 sps:$4 sm:$0xff]  }
 0xab7   :  { %v12165_v29 = vadd.f32 %v12164_v30, %v20942_v7  ;;  %v12166_v38 = vpop.f32.mrb[130].mxu1  ;;  %v17929_v7 = vld [vmem:[#allocation12 + $0xb28] ss:$16 sps:$4 sm:$0xff]   ;;  %v17964_v57 = vld [vmem:[#allocation12 + $0x86c] ss:$16 sps:$4 sm:$0xff]  }
 0xab8   :  { %v20955_v54 = vadd.f32 %v12203_v53, %v12163_v1  ;;  %13264 = vmatpush1.bf16.msra.mxu0 %v17905_v21  ;;  %v12167_v20 = vpop.f32.mrb[131].mxu1  ;;  %v17935_v53 = vld [vmem:[#allocation12 + $0xb48] ss:$16 sps:$4 sm:$0xff]  }
 0xab9   :  { %v20957_v15 = vadd.f32 %v12205_v33, %v12165_v29  ;;  %13265 = vmatprep.subr.bf16.mxu0 %v17913_v25  ;;  %v17941_v33 = vld [vmem:[#allocation12 + $0xb68] ss:$16 sps:$4 sm:$0xff]   ;;  %v17967_v25 = vld [vmem:[#allocation12 + $0xbec] ss:$16 sps:$4 sm:$0xff]  }
 0xaba   :  { %v17959_v21 = vld [vmem:[#allocation12 + $0xbc8] ss:$16 sps:$4 sm:$0xff]   ;;  %v17970_v29 = vld [vmem:[#allocation12 + $0x88c] ss:$16 sps:$4 sm:$0xff]  }
 0xabb   :  { %v17962_v1 = vld [vmem:[#allocation12 + $0x868] ss:$16 sps:$4 sm:$0xff]   ;;  %v17973_v20 = vld [vmem:[#allocation12 + $0x8ac] ss:$16 sps:$4 sm:$0xff]  }
 0xabc   :  { %13266 = vmatpush1.bf16.msra.mxu0 %v17911_v63  ;;  %v17965_v30 = vld [vmem:[#allocation12 + $0xbe8] ss:$16 sps:$4 sm:$0xff]  }
 0xabd   :  { %13267 = vmatprep.subr.bf16.mxu0 %v17919_v6  ;;  %v17968_v38 = vld [vmem:[#allocation12 + $0x888] ss:$16 sps:$4 sm:$0xff]   ;;  %v17976_v6 = vld [vmem:[#allocation12 + $0x8cc] ss:$16 sps:$4 sm:$0xff]  }
 0xabe   :  { %v17971_v63 = vld [vmem:[#allocation12 + $0x8a8] ss:$16 sps:$4 sm:$0xff]  }
 0xac0   :  { %13268 = vmatpush1.bf16.msra.mxu0 %v17917_v60  ;;  %v17974_v60 = vld [vmem:[#allocation12 + $0x8c8] ss:$16 sps:$4 sm:$0xff]  }
 0xac1   :  { %13269 = vmatprep.subr.bf16.mxu0 %v17925_v11  ;;  %v17979_v11 = vld [vmem:[#allocation12 + $0x8ec] ss:$16 sps:$4 sm:$0xff]  }
 0xac4   :  { %13270 = vmatpush1.bf16.msra.mxu0 %v17923_v32  ;;  %v18004_v32 = vld [vmem:[#allocation12 + $0xe00] ss:$16 sps:$4 sm:$0xff]  }
 0xac5   :  { %13271 = vmatprep.subr.bf16.mxu0 %v17931_v35  ;;  %v18009_v35 = vld [vmem:[#allocation12 + $0xe24] ss:$16 sps:$4 sm:$0xff]  }
 0xac8   :  { %13272 = vmatpush1.bf16.msra.mxu0 %v17929_v7  ;;  %v17994_v7 = vld [vmem:[#allocation12 + $0x98c] ss:$16 sps:$4 sm:$0xff]  }
 0xac9   :  { %13273 = vmatprep.subr.bf16.mxu0 %v17937_v34  ;;  %v18012_v34 = vld [vmem:[#allocation12 + $0xe44] ss:$16 sps:$4 sm:$0xff]  }
 0xacc   :  { %13274 = vmatpush1.bf16.msra.mxu0 %v17935_v53  ;;  %v17992_v53 = vld [vmem:[#allocation12 + $0x988] ss:$16 sps:$4 sm:$0xff]  }
 0xacd   :  { %v12281_v12 = vpop.f32.mrb[114].mxu1  ;;  %13275 = vmatprep.subr.bf16.mxu0 %v17943_v45  ;;  %v18010_v45 = vld [vmem:[#allocation12 + $0xe40] ss:$16 sps:$4 sm:$0xff]  }
 0xace   :  { %v12283_v59 = vpop.f32.mrb[115].mxu1  ;;  %v20959_v18 = vpack.c.bf16 %v12281_v12, %v12281_v12  ;;  %v17995_v12 = vld [vmem:[#allocation12 + $0x9a8] ss:$16 sps:$4 sm:$0xff]  }
 0xacf   :  { %v12358_v58 = vpack.c.bf16 %v12283_v59, %v12283_v59  ;;  %v18013_v59 = vld [vmem:[#allocation12 + $0xe60] ss:$16 sps:$4 sm:$0xff]  }
 0xad0   :  { %13276 = vmatpush1.bf16.msra.mxu0 %v17941_v33  ;;  %v18015_v33 = vld [vmem:[#allocation12 + $0xe64] ss:$16 sps:$4 sm:$0xff]  }
 0xad1   :  { %13162 = vmatprep.mubr.bf16.mxu1 %v12358_v58  ;;  %13277 = vmatprep.subr.bf16.mxu0 %v17949_v3  ;;  %v18000_v3 = vld [vmem:[#allocation12 + $0x9cc] ss:$16 sps:$4 sm:$0xff]  }
 0xad2   :  { %13163 = vmatmul.mubr.bf16.vlgmr.msra.gmra.mrb[132].mxu1 %v20959_v18 }
 0xad3   :  { %13213 = vmatpush1.bf16.msra.mxu1 %v17944_v44  ;;  %13244 = vmatprep.mubr.bf16.mxu1 %v12358_v58  ;;  %v18018_v58 = vld [vmem:[#allocation12 + $0xe84] ss:$16 sps:$4 sm:$0xff]   ;;  %v17998_v44 = vld [vmem:[#allocation12 + $0x9c8] ss:$16 sps:$4 sm:$0xff]  }
 0xad4   :  { %13278 = vmatpush1.bf16.msra.mxu0 %v17947_v43  ;;  %13214 = vmatprep.subr.bf16.mxu1 %v17952_v22  ;;  %v18003_v43 = vld [vmem:[#allocation12 + $0x9ec] ss:$16 sps:$4 sm:$0xff]   ;;  %v18016_v22 = vld [vmem:[#allocation12 + $0xe80] ss:$16 sps:$4 sm:$0xff]  }
 0xad5   :  { %13279 = vmatprep.subr.bf16.mxu0 %v17955_v31  ;;  %v18021_v31 = vld [vmem:[#allocation12 + $0xea4] ss:$16 sps:$4 sm:$0xff]  }
 0xad7   :  { %13215 = vmatpush1.bf16.msra.mxu1 %v17950_v4  ;;  %v18001_v4 = vld [vmem:[#allocation12 + $0x9e8] ss:$16 sps:$4 sm:$0xff]  }
 0xad8   :  { %13280 = vmatpush1.bf16.msra.mxu0 %v17953_v2  ;;  %13216 = vmatprep.subr.bf16.mxu1 %v17958_v13  ;;  %v18019_v2 = vld [vmem:[#allocation12 + $0xea0] ss:$16 sps:$4 sm:$0xff]  }
 0xad9   :  { %13281 = vmatprep.subr.bf16.mxu0 %v17961_v0  ;;  %v18046_v13 = vld [vmem:[#allocation12 + $0xc20] ss:$16 sps:$4 sm:$0xff]   ;;  %v18045_v0 = vld [vmem:[#allocation12 + $0xf84] ss:$16 sps:$4 sm:$0xff]  }
 0xadb   :  { %13217 = vmatpush1.bf16.msra.mxu1 %v17956_v28  ;;  %v18054_v28 = vld [vmem:[#allocation12 + $0xc44] ss:$16 sps:$4 sm:$0xff]  }
 0xadc   :  { %13282 = vmatpush1.bf16.msra.mxu0 %v17959_v21  ;;  %13218 = vmatprep.subr.bf16.mxu1 %v17964_v57  ;;  %v18043_v21 = vld [vmem:[#allocation12 + $0xf80] ss:$16 sps:$4 sm:$0xff]  }
 0xadd   :  { %13283 = vmatprep.subr.bf16.mxu0 %v17967_v25  ;;  %v18052_v57 = vld [vmem:[#allocation12 + $0xc40] ss:$16 sps:$4 sm:$0xff]   ;;  %v18051_v25 = vld [vmem:[#allocation12 + $0xfa4] ss:$16 sps:$4 sm:$0xff]  }
 0xadf   :  { %13219 = vmatpush1.bf16.msra.mxu1 %v17962_v1  ;;  %v18049_v1 = vld [vmem:[#allocation12 + $0xfa0] ss:$16 sps:$4 sm:$0xff]  }
 0xae0   :  { %13284 = vmatpush1.bf16.msra.mxu0 %v17965_v30  ;;  %13220 = vmatprep.subr.bf16.mxu1 %v17970_v29  ;;  %v18057_v30 = vld [vmem:[#allocation12 + $0xfc4] ss:$16 sps:$4 sm:$0xff]   ;;  %v18055_v29 = vld [vmem:[#allocation12 + $0xfc0] ss:$16 sps:$4 sm:$0xff]  }
 0xae1   :  { %16486 = vmatprep.subr.bf16.mxu0 %v20578_v46  ;;  %v17977_v46 = vld [vmem:[#allocation12 + $0x8e8] ss:$16 sps:$4 sm:$0xff]  }
 0xae3   :  { %13286 = vmatmul.mubr.bf16.vlgmr.msra.gmra.mrb[152].mxu0 %v20950_v40  ;;  %13221 = vmatpush1.bf16.msra.mxu1 %v17968_v38  ;;  %v17985_v40 = vld [vmem:[#allocation12 + $0x92c] ss:$16 sps:$4 sm:$0xff]   ;;  %v18058_v38 = vld [vmem:[#allocation12 + $0xc60] ss:$16 sps:$4 sm:$0xff]  }
 0xae4   :  { %16488 = vmatpush1.bf16.msra.mxu0 %v20572_v39  ;;  %13222 = vmatprep.subr.bf16.mxu1 %v17973_v20  ;;  %v17982_v39 = vld [vmem:[#allocation12 + $0x90c] ss:$16 sps:$4 sm:$0xff]   ;;  %v18060_v20 = vld [vmem:[#allocation12 + $0xc64] ss:$16 sps:$4 sm:$0xff]  }
 0xae5   :  { %16490 = vmatprep.subr.bf16.mxu0 %v20630_v49  ;;  %13438 = vmatprep.mubr.f32.mxu0 %v21143_v14  ;;  %v17980_v49 = vld [vmem:[#allocation12 + $0x908] ss:$16 sps:$4 sm:$0xff]  }
 0xae7   :  { %13223 = vmatpush1.bf16.msra.mxu1 %v17971_v63  ;;  %v18061_v63 = vld [vmem:[#allocation12 + $0xfe0] ss:$16 sps:$4 sm:$0xff]  }
 0xae8   :  { %16492 = vmatpush1.bf16.msra.mxu0 %v20624_v50  ;;  %13224 = vmatprep.subr.bf16.mxu1 %v17976_v6  ;;  %v17983_v50 = vld [vmem:[#allocation12 + $0x928] ss:$16 sps:$4 sm:$0xff]   ;;  %v18063_v6 = vld [vmem:[#allocation12 + $0xfe4] ss:$16 sps:$4 sm:$0xff]  }
 0xae9   :  { %16494 = vmatprep.subr.bf16.mxu0 %v20676_v56  ;;  %v17988_v56 = vld [vmem:[#allocation12 + $0x94c] ss:$16 sps:$4 sm:$0xff]  }
 0xaeb   :  { %13225 = vmatpush1.bf16.msra.mxu1 %v17974_v60  ;;  %v18066_v60 = vld [vmem:[#allocation12 + $0xc84] ss:$16 sps:$4 sm:$0xff]  }
 0xaec   :  { %16496 = vmatpush1.bf16.msra.mxu0 %v20670_v23  ;;  %13226 = vmatprep.subr.bf16.mxu1 %v17979_v11  ;;  %v18006_v23 = vld [vmem:[#allocation12 + $0xe04] ss:$16 sps:$4 sm:$0xff]   ;;  %v18064_v11 = vld [vmem:[#allocation12 + $0xc80] ss:$16 sps:$4 sm:$0xff]  }
 0xaed   :  { %16498 = vmatprep.subr.bf16.mxu0 %v20722_v9  ;;  %v17986_v9 = vld [vmem:[#allocation12 + $0x948] ss:$16 sps:$4 sm:$0xff]  }
 0xaef   :  { %13227 = vmatpush1.bf16.msra.mxu1 %v17977_v46  ;;  %v18069_v46 = vld [vmem:[#allocation12 + $0xe0c] ss:$16 sps:$4 sm:$0xff]  }
 0xaf0   :  { %16500 = vmatpush1.bf16.msra.mxu0 %v20716_v5  ;;  %13228 = vmatprep.subr.bf16.mxu1 %v17982_v39  ;;  %v13299_v5 = vld [vmem:[#allocation10 + $0x18] sm:$0xff]  ;;  %v18072_v39 = vld [vmem:[#allocation12 + $0xca4] ss:$16 sps:$4 sm:$0xff]  }
 0xaf1   :  { %16502 = vmatprep.subr.bf16.mxu0 %v20762_v17  ;;  %v17991_v17 = vld [vmem:[#allocation12 + $0x96c] ss:$16 sps:$4 sm:$0xff]  }
 0xaf3   :  { %13229 = vmatpush1.bf16.msra.mxu1 %v17980_v49  ;;  %v18070_v49 = vld [vmem:[#allocation12 + $0xca0] ss:$16 sps:$4 sm:$0xff]  }
 0xaf4   :  { %16504 = vmatpush1.bf16.msra.mxu0 %v20756_v51  ;;  %13230 = vmatprep.subr.bf16.mxu1 %v17985_v40  ;;  %v17989_v51 = vld [vmem:[#allocation12 + $0x968] ss:$16 sps:$4 sm:$0xff]   ;;  %v18078_v40 = vld [vmem:[#allocation12 + $0xcc4] ss:$16 sps:$4 sm:$0xff]  }
 0xaf5   :  { %16507 = vmatprep.subr.msk.bf16.mxu0 %vm19603_vm8, %v20788_v16  ;;  %v18007_v16 = vld [vmem:[#allocation12 + $0xe20] ss:$16 sps:$4 sm:$0xff]  }
 0xaf7   :  { %13231 = vmatpush1.bf16.msra.mxu1 %v17983_v50  ;;  %v18076_v50 = vld [vmem:[#allocation12 + $0xcc0] ss:$16 sps:$4 sm:$0xff]  }
 0xaf8   :  { %16510 = vmatpush1.bf16.msk.msra.mxu0 %vm19603_vm8, %v20784_v42  ;;  %13232 = vmatprep.subr.bf16.mxu1 %v17988_v56  ;;  %v17997_v42 = vld [vmem:[#allocation12 + $0x9ac] ss:$16 sps:$4 sm:$0xff]   ;;  %v18084_v56 = vld [vmem:[#allocation12 + $0xce4] ss:$16 sps:$4 sm:$0xff]  }
 0xaf9   :  { %14259 = vmatprep.subr.bf16.mxu0 %v18006_v23  ;;  %v18082_v23 = vld [vmem:[#allocation12 + $0xce0] ss:$16 sps:$4 sm:$0xff]  }
 0xafb   :  { %16039 = vmatmul.mubr.msk.f32.vlgmr.msra.gmra.mrb[156].mxu0 %vm3321_vm5, %v13299_v5  ;;  %13233 = vmatpush1.bf16.msra.mxu1 %v17986_v9  ;;  %v18090_v9 = vld [vmem:[#allocation12 + $0xd04] ss:$16 sps:$4 sm:$0xff]  }
 0xafc   :  { %13234 = vmatprep.subr.bf16.mxu1 %v17991_v17  ;;  %14260 = vmatpush1.bf16.msra.mxu0 %v18004_v32  ;;  %v18094_v17 = vld [vmem:[#allocation12 + $0xd20] ss:$16 sps:$4 sm:$0xff]   ;;  %v18096_v32 = vld [vmem:[#allocation12 + $0xd24] ss:$16 sps:$4 sm:$0xff]  }
 0xafd   :  { %14261 = vmatprep.subr.bf16.mxu0 %v18009_v35  ;;  %v18102_v35 = vld [vmem:[#allocation12 + $0xd44] ss:$16 sps:$4 sm:$0xff]  }
 0xaff   :  { %13235 = vmatpush1.bf16.msra.mxu1 %v17989_v51  ;;  %v18100_v51 = vld [vmem:[#allocation12 + $0xd40] ss:$16 sps:$4 sm:$0xff]  }
 0xb00   :  { %13236 = vmatprep.subr.bf16.mxu1 %v17994_v7  ;;  %14262 = vmatpush1.bf16.msra.mxu0 %v18007_v16  ;;  %v18108_v7 = vld [vmem:[#allocation12 + $0xd64] ss:$16 sps:$4 sm:$0xff]   ;;  %v18106_v16 = vld [vmem:[#allocation12 + $0xd60] ss:$16 sps:$4 sm:$0xff]  }
 0xb01   :  { %14263 = vmatprep.subr.bf16.mxu0 %v18012_v34  ;;  %v18114_v34 = vld [vmem:[#allocation12 + $0xd84] ss:$16 sps:$4 sm:$0xff]  }
 0xb03   :  { %13237 = vmatpush1.bf16.msra.mxu1 %v17992_v53  ;;  %v18112_v53 = vld [vmem:[#allocation12 + $0xd80] ss:$16 sps:$4 sm:$0xff]  }
 0xb04   :  { %13238 = vmatprep.subr.bf16.mxu1 %v17997_v42  ;;  %14264 = vmatpush1.bf16.msra.mxu0 %v18010_v45  ;;  %v18120_v42 = vld [vmem:[#allocation12 + $0xda4] ss:$16 sps:$4 sm:$0xff]  }
 0xb05   :  { %14265 = vmatprep.subr.bf16.mxu0 %v18015_v33 }
 0xb07   :  { %13239 = vmatpush1.bf16.msra.mxu1 %v17995_v12  ;;  %v18118_v12 = vld [vmem:[#allocation12 + $0xda0] ss:$16 sps:$4 sm:$0xff]  }
 0xb08   :  { %13240 = vmatprep.subr.bf16.mxu1 %v18000_v3  ;;  %14266 = vmatpush1.bf16.msra.mxu0 %v18013_v59  ;;  %v18126_v59 = vld [vmem:[#allocation12 + $0xdc4] ss:$16 sps:$4 sm:$0xff]  }
 0xb09   :  { %14267 = vmatprep.subr.bf16.mxu0 %v18018_v58 }
 0xb0b   :  { %13241 = vmatpush1.bf16.msra.mxu1 %v17998_v44  ;;  %v18124_v44 = vld [vmem:[#allocation12 + $0xdc0] ss:$16 sps:$4 sm:$0xff]  }
 0xb0c   :  { %13242 = vmatprep.subr.bf16.mxu1 %v18003_v43  ;;  %14268 = vmatpush1.bf16.msra.mxu0 %v18016_v22  ;;  %v18132_v43 = vld [vmem:[#allocation12 + $0xde4] ss:$16 sps:$4 sm:$0xff]   ;;  %v18130_v22 = vld [vmem:[#allocation12 + $0xde0] ss:$16 sps:$4 sm:$0xff]  }
 0xb0d   :  { %14269 = vmatprep.subr.bf16.mxu0 %v18021_v31  ;;  %v18138_v31 = vld [vmem:[#allocation12 + $0xc0c] ss:$16 sps:$4 sm:$0xff]  }
 0xb0f   :  { %13243 = vmatpush1.bf16.msra.mxu1 %v18001_v4 }
 0xb10   :  { %16460 = vmatprep.subr.bf16.mxu1 %v20576_v62  ;;  %14270 = vmatpush1.bf16.msra.mxu0 %v18019_v2  ;;  %v18024_v62 = vld [vmem:[#allocation12 + $0xec4] ss:$16 sps:$4 sm:$0xff]  }
 0xb11   :  { %14271 = vmatprep.subr.bf16.mxu0 %v18024_v62 }
 0xb12   :  { %13245 = vmatmul.mubr.bf16.vlgmr.msra.gmra.mrb[136].mxu1 %v20959_v18  ;;  %v18037_v18 = vld [vmem:[#allocation12 + $0xf60] ss:$16 sps:$4 sm:$0xff]  }
 0xb13   :  { %16462 = vmatpush1.bf16.msra.mxu1 %v20570_v47  ;;  %13367 = vmatprep.mubr.f32.mxu1 %v21143_v14  ;;  %v18022_v47 = vld [vmem:[#allocation12 + $0xec0] ss:$16 sps:$4 sm:$0xff]   ;;  %v18048_v14 = vld [vmem:[#allocation12 + $0xc24] ss:$16 sps:$4 sm:$0xff]  }
 0xb14   :  { %16464 = vmatprep.subr.bf16.mxu1 %v20628_v26  ;;  %14272 = vmatpush1.bf16.msra.mxu0 %v18022_v47  ;;  %v18025_v26 = vld [vmem:[#allocation12 + $0xee0] ss:$16 sps:$4 sm:$0xff]  }
 0xb17   :  { %16466 = vmatpush1.bf16.msra.mxu1 %v20622_v61  ;;  %v18027_v61 = vld [vmem:[#allocation12 + $0xee4] ss:$16 sps:$4 sm:$0xff]  }
 0xb18   :  { %16468 = vmatprep.subr.bf16.mxu1 %v20674_v41  ;;  %14273 = vmatprep.subr.bf16.mxu0 %v18027_v61  ;;  %v18028_v41 = vld [vmem:[#allocation12 + $0xf00] ss:$16 sps:$4 sm:$0xff]  }
 0xb19   :  { %14274 = vmatpush1.bf16.msra.mxu0 %v18025_v26 }
 0xb1b   :  { %16470 = vmatpush1.bf16.msra.mxu1 %v20668_v10  ;;  %v18030_v10 = vld [vmem:[#allocation12 + $0xf04] ss:$16 sps:$4 sm:$0xff]  }
 0xb1c   :  { %16472 = vmatprep.subr.bf16.mxu1 %v20720_v55  ;;  %14275 = vmatprep.subr.bf16.mxu0 %v18030_v10  ;;  %v18033_v55 = vld [vmem:[#allocation12 + $0xf24] ss:$16 sps:$4 sm:$0xff]  }
 0xb1d   :  { %14276 = vmatpush1.bf16.msra.mxu0 %v18028_v41 }
 0xb1e   :  { %14277 = vmatprep.subr.bf16.mxu0 %v18033_v55 }
 0xb1f   :  { %16474 = vmatpush1.bf16.msra.mxu1 %v20714_v27  ;;  %v18031_v27 = vld [vmem:[#allocation12 + $0xf20] ss:$16 sps:$4 sm:$0xff]  }
 0xb20   :  { %16476 = vmatprep.subr.bf16.mxu1 %v20760_v36  ;;  %v18036_v36 = vld [vmem:[#allocation12 + $0xf44] ss:$16 sps:$4 sm:$0xff]  }
 0xb21   :  { %14278 = vmatpush1.bf16.msra.mxu0 %v18031_v27 }
 0xb22   :  { %14279 = vmatprep.subr.bf16.mxu0 %v18036_v36 }
 0xb23   :  { %16478 = vmatpush1.bf16.msra.mxu1 %v20754_v8  ;;  %v18034_v8 = vld [vmem:[#allocation12 + $0xf40] ss:$16 sps:$4 sm:$0xff]  }
 0xb24   :  { %16481 = vmatprep.subr.msk.bf16.mxu1 %vm19603_vm8, %v20786_v37  ;;  %v18040_v37 = vld [vmem:[#allocation12 + $0xc00] ss:$16 sps:$4 sm:$0xff]  }
 0xb25   :  { %14280 = vmatpush1.bf16.msra.mxu0 %v18034_v8 }
 0xb27   :  { %16484 = vmatpush1.bf16.msk.msra.mxu1 %vm19603_vm8, %v20782_v24  ;;  %v18039_v24 = vld [vmem:[#allocation12 + $0xf64] ss:$16 sps:$4 sm:$0xff]  }
 0xb28   :  { %14218 = vmatprep.subr.bf16.mxu1 %v18042_v52  ;;  %14281 = vmatprep.subr.bf16.mxu0 %v18039_v24 }
 0xb29   :  { %14282 = vmatpush1.bf16.msra.mxu0 %v18037_v18  ;;  %v18067_v18 = vld [vmem:[#allocation12 + $0xe08] ss:$16 sps:$4 sm:$0xff]  }
 0xb2a   :  { %16036 = vmatmul.mubr.msk.f32.vlgmr.msra.gmra.mrb[140].mxu1 %vm3321_vm5, %v13299_v5  ;;  %14283 = vmatprep.subr.bf16.mxu0 %v18045_v0  ;;  %v18088_v5 = vld [vmem:[#allocation12 + $0xd00] ss:$16 sps:$4 sm:$0xff]   ;;  %v18079_v0 = vld [vmem:[#allocation12 + $0xe48] ss:$16 sps:$4 sm:$0xff]  }
 0xb2b   :  { %14219 = vmatpush1.bf16.msra.mxu1 %v18040_v37 }
 0xb2c   :  { %14220 = vmatprep.subr.bf16.mxu1 %v18048_v14 }
 0xb2d   :  { %14284 = vmatpush1.bf16.msra.mxu0 %v18043_v21  ;;  %v18085_v21 = vld [vmem:[#allocation12 + $0xe68] ss:$16 sps:$4 sm:$0xff]  }
 0xb2e   :  { %14285 = vmatprep.subr.bf16.mxu0 %v18051_v25  ;;  %v18091_v25 = vld [vmem:[#allocation12 + $0xe88] ss:$16 sps:$4 sm:$0xff]  }
 0xb2f   :  { %14221 = vmatpush1.bf16.msra.mxu1 %v18046_v13  ;;  %v18075_v13 = vld [vmem:[#allocation12 + $0xe2c] ss:$16 sps:$4 sm:$0xff]  }
 0xb30   :  { %14222 = vmatprep.subr.bf16.mxu1 %v18054_v28  ;;  %v18087_v28 = vld [vmem:[#allocation12 + $0xe6c] ss:$16 sps:$4 sm:$0xff]  }
 0xb31   :  { %14286 = vmatpush1.bf16.msra.mxu0 %v18049_v1  ;;  %v18099_v1 = vld [vmem:[#allocation12 + $0xeac] ss:$16 sps:$4 sm:$0xff]  }
 0xb32   :  { %14287 = vmatprep.subr.bf16.mxu0 %v18057_v30  ;;  %v18097_v30 = vld [vmem:[#allocation12 + $0xea8] ss:$16 sps:$4 sm:$0xff]  }
 0xb33   :  { %14223 = vmatpush1.bf16.msra.mxu1 %v18052_v57  ;;  %v18093_v57 = vld [vmem:[#allocation12 + $0xe8c] ss:$16 sps:$4 sm:$0xff]  }
 0xb34   :  { %14224 = vmatprep.subr.bf16.mxu1 %v18060_v20 }
 0xb35   :  { %14288 = vmatpush1.bf16.msra.mxu0 %v18055_v29 }
 0xb36   :  { %14289 = vmatprep.subr.bf16.mxu0 %v18063_v6 }
 0xb37   :  { %14225 = vmatpush1.bf16.msra.mxu1 %v18058_v38  ;;  %v18105_v38 = vld [vmem:[#allocation12 + $0xecc] ss:$16 sps:$4 sm:$0xff]  }
 0xb38   :  { %14226 = vmatprep.subr.bf16.mxu1 %v18066_v60 }
 0xb39   :  { %14290 = vmatpush1.bf16.msra.mxu0 %v18061_v63 }
 0xb3a   :  { %14341 = vmatprep.subr.bf16.mxu0 %v18069_v46 }
 0xb3b   :  { %14227 = vmatpush1.bf16.msra.mxu1 %v18064_v11 }
 0xb3c   :  { %14228 = vmatprep.subr.bf16.mxu1 %v18072_v39  ;;  %v18103_v39 = vld [vmem:[#allocation12 + $0xec8] ss:$16 sps:$4 sm:$0xff]  }
 0xb3f   :  { %14229 = vmatpush1.bf16.msra.mxu1 %v18070_v49 }
 0xb40   :  { %14230 = vmatprep.subr.bf16.mxu1 %v18078_v40  ;;  %v18111_v40 = vld [vmem:[#allocation12 + $0xeec] ss:$16 sps:$4 sm:$0xff]  }
 0xb43   :  { %14231 = vmatpush1.bf16.msra.mxu1 %v18076_v50  ;;  %v18109_v50 = vld [vmem:[#allocation12 + $0xee8] ss:$16 sps:$4 sm:$0xff]  }
 0xb44   :  { %14232 = vmatprep.subr.bf16.mxu1 %v18084_v56  ;;  %v18117_v56 = vld [vmem:[#allocation12 + $0xf0c] ss:$16 sps:$4 sm:$0xff]  }
 0xb47   :  { %14233 = vmatpush1.bf16.msra.mxu1 %v18082_v23  ;;  %v18115_v23 = vld [vmem:[#allocation12 + $0xf08] ss:$16 sps:$4 sm:$0xff]  }
 0xb48   :  { %14234 = vmatprep.subr.bf16.mxu1 %v18090_v9  ;;  %v18123_v9 = vld [vmem:[#allocation12 + $0xf2c] ss:$16 sps:$4 sm:$0xff]  }
 0xb4b   :  { %14235 = vmatpush1.bf16.msra.mxu1 %v18088_v5  ;;  %v18121_v5 = vld [vmem:[#allocation12 + $0xf28] ss:$16 sps:$4 sm:$0xff]  }
 0xb4c   :  { %14236 = vmatprep.subr.bf16.mxu1 %v18096_v32  ;;  %v18135_v32 = vld [vmem:[#allocation12 + $0xf6c] ss:$16 sps:$4 sm:$0xff]  }
 0xb4f   :  { %14237 = vmatpush1.bf16.msra.mxu1 %v18094_v17  ;;  %v18127_v17 = vld [vmem:[#allocation12 + $0xf48] ss:$16 sps:$4 sm:$0xff]  }
 0xb50   :  { %14238 = vmatprep.subr.bf16.mxu1 %v18102_v35 }
 0xb53   :  { %14239 = vmatpush1.bf16.msra.mxu1 %v18100_v51  ;;  %v18141_v51 = vld [vmem:[#allocation12 + $0xf8c] ss:$16 sps:$4 sm:$0xff]  }
 0xb54   :  { %14240 = vmatprep.subr.bf16.mxu1 %v18108_v7 }
 0xb57   :  { %14241 = vmatpush1.bf16.msra.mxu1 %v18106_v16 }
 0xb58   :  { %14242 = vmatprep.subr.bf16.mxu1 %v18114_v34  ;;  %v18136_v34 = vld [vmem:[#allocation12 + $0xc08] ss:$16 sps:$4 sm:$0xff]  }
 0xb5b   :  { %14243 = vmatpush1.bf16.msra.mxu1 %v18112_v53 }
 0xb5c   :  { %14244 = vmatprep.subr.bf16.mxu1 %v18120_v42  ;;  %v18139_v42 = vld [vmem:[#allocation12 + $0xf88] ss:$16 sps:$4 sm:$0xff]  }
 0xb5f   :  { %14245 = vmatpush1.bf16.msra.mxu1 %v18118_v12  ;;  %v18142_v12 = vld [vmem:[#allocation12 + $0xc28] ss:$16 sps:$4 sm:$0xff]  }
 0xb60   :  { %14246 = vmatprep.subr.bf16.mxu1 %v18126_v59  ;;  %v18150_v59 = vld [vmem:[#allocation12 + $0xc4c] ss:$16 sps:$4 sm:$0xff]  }
 0xb63   :  { %14247 = vmatpush1.bf16.msra.mxu1 %v18124_v44  ;;  %v18148_v44 = vld [vmem:[#allocation12 + $0xc48] ss:$16 sps:$4 sm:$0xff]  }
 0xb64   :  { %14248 = vmatprep.subr.bf16.mxu1 %v18132_v43  ;;  %v18151_v43 = vld [vmem:[#allocation12 + $0xfc8] ss:$16 sps:$4 sm:$0xff]  }
 0xb67   :  { %14249 = vmatpush1.bf16.msra.mxu1 %v18130_v22  ;;  %v18156_v22 = vld [vmem:[#allocation12 + $0xc6c] ss:$16 sps:$4 sm:$0xff]  }
 0xb68   :  { %14300 = vmatprep.subr.bf16.mxu1 %v18138_v31  ;;  %v18159_v31 = vld [vmem:[#allocation12 + $0xfec] ss:$16 sps:$4 sm:$0xff]  }
 0xb76   :  { %v13205_v45 = vpop.f32.mrb[148].mxu0 }
 0xb77   :  { %v13207_v33 = vpop.f32.mrb[149].mxu0 }
 0xb78   :  { %v13209_v3 = vpop.f32.mrb[150].mxu0 }
 0xb79   :  { %v13210_v58 = vpop.f32.mrb[151].mxu0  ;;  %v18145_v3 = vld [vmem:[#allocation12 + $0xfa8] ss:$16 sps:$4 sm:$0xff]  }
 0xb7a   :  { %v18153_v58 = vld [vmem:[#allocation12 + $0xfcc] ss:$16 sps:$4 sm:$0xff]  }
 0xba5   :  { %v13164_v4 = vpop.f32.mrb[132].mxu1 }
 0xba6   :  { %v13206_v2 = vadd.f32 %v13205_v45, %v13164_v4  ;;  %v13166_v47 = vpop.f32.mrb[133].mxu1  ;;  %v18144_v45 = vld [vmem:[#allocation12 + $0xc2c] ss:$16 sps:$4 sm:$0xff]   ;;  %v18154_v4 = vld [vmem:[#allocation12 + $0xc68] ss:$16 sps:$4 sm:$0xff]  }
 0xba7   :  { %v13208_v62 = vadd.f32 %v13207_v33, %v13166_v47  ;;  %v13168_v61 = vpop.f32.mrb[134].mxu1  ;;  %v18147_v33 = vld [vmem:[#allocation12 + $0xfac] ss:$16 sps:$4 sm:$0xff]  }
 0xba8   :  { %v21001_v26 = vadd.f32 %v13206_v2, %v20946_v19  ;;  %v13169_v10 = vpop.f32.mrb[135].mxu1  ;;  %v18073_v19 = vld [vmem:[#allocation12 + $0xe28] ss:$16 sps:$4 sm:$0xff]   ;;  %v18162_v47 = vld [vmem:[#allocation12 + $0xc8c] ss:$16 sps:$4 sm:$0xff]  }
 0xba9   :  { %v21004_v41 = vadd.f32 %v13208_v62, %v20948_v48  ;;  %v18081_v48 = vld [vmem:[#allocation12 + $0xe4c] ss:$16 sps:$4 sm:$0xff]   ;;  %v18157_v2 = vld [vmem:[#allocation12 + $0xfe8] ss:$16 sps:$4 sm:$0xff]  }
 0xbaa   :  { %v18160_v62 = vld [vmem:[#allocation12 + $0xc88] ss:$16 sps:$4 sm:$0xff]   ;;  %v18165_v61 = vld [vmem:[#allocation12 + $0xcac] ss:$16 sps:$4 sm:$0xff]  }
 0xbab   :  { %v18163_v10 = vld [vmem:[#allocation12 + $0xca8] ss:$16 sps:$4 sm:$0xff]  }
 0xbb6   :  { %v13287_v27 = vpop.f32.mrb[152].mxu0 }
 0xbb7   :  { %v13289_v55 = vpop.f32.mrb[153].mxu0 }
 0xbb8   :  { %v13291_v8 = vpop.f32.mrb[154].mxu0 }
 0xbb9   :  { %v13292_v36 = vpop.f32.mrb[155].mxu0  ;;  %v18171_v8 = vld [vmem:[#allocation12 + $0xcec] ss:$16 sps:$4 sm:$0xff]  }
 0xbba   :  { %v18169_v36 = vld [vmem:[#allocation12 + $0xce8] ss:$16 sps:$4 sm:$0xff]  }
 0xbce   :  { %v13440_v24 = vpop.f32.mrb[156].mxu0 }
 0xbcf   :  { %v21006_v37 = vpack.c.bf16 %v13440_v24, %v13440_v24  ;;  %v13442_v52 = vpop.f32.mrb[157].mxu0  ;;  %v18174_v24 = vld [vmem:[#allocation12 + $0xd0c] ss:$16 sps:$4 sm:$0xff]  }
 0xbd0   :  { %v13448_v14 = vpack.c.bf16 %v13442_v52, %v13442_v52  ;;  %v18172_v52 = vld [vmem:[#allocation12 + $0xd08] ss:$16 sps:$4 sm:$0xff]  }
 0xbd2   :  { %14291 = vmatprep.mubr.bf16.mxu0 %v13448_v14 }
 0xbd3   :  { %14292 = vmatmul.mubr.bf16.vlgmr.msra.gmra.mrb[160].mxu0 %v21006_v37 }
 0xbd4   :  { %14342 = vmatpush1.bf16.msra.mxu0 %v18067_v18  ;;  %14373 = vmatprep.mubr.bf16.mxu0 %v13448_v14  ;;  %v18177_v14 = vld [vmem:[#allocation12 + $0xd2c] ss:$16 sps:$4 sm:$0xff]   ;;  %v18175_v18 = vld [vmem:[#allocation12 + $0xd28] ss:$16 sps:$4 sm:$0xff]  }
 0xbd5   :  { %14343 = vmatprep.subr.bf16.mxu0 %v18075_v13  ;;  %v18178_v13 = vld [vmem:[#allocation12 + $0xd48] ss:$16 sps:$4 sm:$0xff]  }
 0xbd8   :  { %14344 = vmatpush1.bf16.msra.mxu0 %v18073_v19  ;;  %v18183_v19 = vld [vmem:[#allocation12 + $0xd6c] ss:$16 sps:$4 sm:$0xff]  }
 0xbd9   :  { %14345 = vmatprep.subr.bf16.mxu0 %v18081_v48  ;;  %v18181_v48 = vld [vmem:[#allocation12 + $0xd68] ss:$16 sps:$4 sm:$0xff]  }
 0xbdc   :  { %14346 = vmatpush1.bf16.msra.mxu0 %v18079_v0  ;;  %v18186_v0 = vld [vmem:[#allocation12 + $0xd8c] ss:$16 sps:$4 sm:$0xff]  }
 0xbdd   :  { %14347 = vmatprep.subr.bf16.mxu0 %v18087_v28  ;;  %v18184_v28 = vld [vmem:[#allocation12 + $0xd88] ss:$16 sps:$4 sm:$0xff]  }
 0xbe0   :  { %14348 = vmatpush1.bf16.msra.mxu0 %v18085_v21  ;;  %v18189_v21 = vld [vmem:[#allocation12 + $0xdac] ss:$16 sps:$4 sm:$0xff]  }
 0xbe1   :  { %14349 = vmatprep.subr.bf16.mxu0 %v18093_v57  ;;  %v18187_v57 = vld [vmem:[#allocation12 + $0xda8] ss:$16 sps:$4 sm:$0xff]  }
 0xbe4   :  { %14350 = vmatpush1.bf16.msra.mxu0 %v18091_v25  ;;  %v18192_v25 = vld [vmem:[#allocation12 + $0xdcc] ss:$16 sps:$4 sm:$0xff]  }
 0xbe5   :  { %v13246_v29 = vpop.f32.mrb[136].mxu1  ;;  %14351 = vmatprep.subr.bf16.mxu0 %v18099_v1  ;;  %v18190_v1 = vld [vmem:[#allocation12 + $0xdc8] ss:$16 sps:$4 sm:$0xff]  }
 0xbe6   :  { %v13288_v20 = vadd.f32 %v13287_v27, %v13246_v29  ;;  %v13248_v63 = vpop.f32.mrb[137].mxu1  ;;  %v18168_v27 = vld [vmem:[#allocation12 + $0xccc] ss:$16 sps:$4 sm:$0xff]   ;;  %v18193_v29 = vld [vmem:[#allocation12 + $0xde8] ss:$16 sps:$4 sm:$0xff]  }
 0xbe7   :  { %v13290_v6 = vadd.f32 %v13289_v55, %v13248_v63  ;;  %v13250_v60 = vpop.f32.mrb[138].mxu1  ;;  %v18166_v55 = vld [vmem:[#allocation12 + $0xcc8] ss:$16 sps:$4 sm:$0xff]   ;;  %v18198_v63 = vld [vmem:[#allocation15 + $0x48] sm:$0xff]  }
 0xbe8   :  { %v21010_v11 = vadd.f32 %v13288_v20, %v20955_v54  ;;  %14352 = vmatpush1.bf16.msra.mxu0 %v18097_v30  ;;  %v13251_v46 = vpop.f32.mrb[139].mxu1  ;;  %v18129_v54 = vld [vmem:[#allocation12 + $0xf4c] ss:$16 sps:$4 sm:$0xff]   ;;  %v18197_v20 = vld [vmem:[#allocation15] sm:$0xff]   ;;  %v18200_v60 = vld [vmem:[#allocation15 + $0x50] sm:$0xff]  }
 0xbe9   :  { %v21013_v49 = vadd.f32 %v13290_v6, %v20957_v15  ;;  %14353 = vmatprep.subr.bf16.mxu0 %v18105_v38  ;;  %v18133_v15 = vld [vmem:[#allocation12 + $0xf68] ss:$16 sps:$4 sm:$0xff]   ;;  %v18195_v30 = vld [vmem:[#allocation12 + $0xdec] ss:$16 sps:$4 sm:$0xff]  }
 0xbea   :  { %v18196_v38 = vld [vmem:[#allocation15 + $0x40] sm:$0xff]   ;;  %v18199_v6 = vld [vmem:[#allocation15 + $0x8] sm:$0xff]   ;;  %v18201_v46 = vld [vmem:[#allocation15 + $0x10] sm:$0xff]  }
 0xbec   :  { %14354 = vmatpush1.bf16.msra.mxu0 %v18103_v39  ;;  %v18202_v39 = vld [vmem:[#allocation15 + $0x58] sm:$0xff]  }
 0xbed   :  { %14355 = vmatprep.subr.bf16.mxu0 %v18111_v40  ;;  %v18203_v40 = vld [vmem:[#allocation15 + $0x18] sm:$0xff]  }
 0xbf0   :  { %14356 = vmatpush1.bf16.msra.mxu0 %v18109_v50  ;;  %v18204_v50 = vld [vmem:[#allocation15 + $0x60] sm:$0xff]  }
 0xbf1   :  { %14357 = vmatprep.subr.bf16.mxu0 %v18117_v56  ;;  %v18205_v56 = vld [vmem:[#allocation15 + $0x20] sm:$0xff]  }
 0xbf4   :  { %14358 = vmatpush1.bf16.msra.mxu0 %v18115_v23  ;;  %v18206_v23 = vld [vmem:[#allocation15 + $0x68] sm:$0xff]  }
 0xbf5   :  { %14359 = vmatprep.subr.bf16.mxu0 %v18123_v9  ;;  %v18207_v9 = vld [vmem:[#allocation15 + $0x28] sm:$0xff]  }
 0xbf8   :  { %14360 = vmatpush1.bf16.msra.mxu0 %v18121_v5  ;;  %v18208_v5 = vld [vmem:[#allocation15 + $0x70] sm:$0xff]  }
 0xbf9   :  { %14361 = vmatprep.subr.bf16.mxu0 %v18129_v54  ;;  %v18209_v54 = vld [vmem:[#allocation15 + $0x30] sm:$0xff]  }
 0xbfc   :  { %14362 = vmatpush1.bf16.msra.mxu0 %v18127_v17  ;;  %v18210_v17 = vld [vmem:[#allocation15 + $0x78] sm:$0xff]  }
 0xbfd   :  { %v13369_v35 = vpop.f32.mrb[140].mxu1  ;;  %14363 = vmatprep.subr.bf16.mxu0 %v18135_v32  ;;  %v18211_v32 = vld [vmem:[#allocation15 + $0x38] sm:$0xff]  }
 0xbfe   :  { %v13371_v7 = vpop.f32.mrb[141].mxu1  ;;  %v21015_v53 = vpack.c.bf16 %v13369_v35, %v13369_v35  ;;  %v18213_v35 = vld [vmem:[#allocation15 + $0x80] sm:$0xff]  }
 0xbff   :  { %v13446_v16 = vpack.c.bf16 %v13371_v7, %v13371_v7  ;;  %v18215_v7 = vld [vmem:[#allocation15 + $0x88] sm:$0xff]  }
 0xc00   :  { %14364 = vmatpush1.bf16.msra.mxu0 %v18133_v15  ;;  %v18212_v15 = vld [vmem:[#allocation15 + $0xc0] sm:$0xff]  }
 0xc01   :  { %14250 = vmatprep.mubr.bf16.mxu1 %v13446_v16  ;;  %14365 = vmatprep.subr.bf16.mxu0 %v18141_v51  ;;  %v18214_v51 = vld [vmem:[#allocation15 + $0xc8] sm:$0xff]  }
 0xc02   :  { %14251 = vmatmul.mubr.bf16.vlgmr.msra.gmra.mrb[144].mxu1 %v21015_v53 }
 0xc03   :  { %14301 = vmatpush1.bf16.msra.mxu1 %v18136_v34  ;;  %14332 = vmatprep.mubr.bf16.mxu1 %v13446_v16  ;;  %v18216_v16 = vld [vmem:[#allocation15 + $0xd0] sm:$0xff]  }
 0xc04   :  { %14366 = vmatpush1.bf16.msra.mxu0 %v18139_v42  ;;  %14302 = vmatprep.subr.bf16.mxu1 %v18144_v45  ;;  %v18217_v34 = vld [vmem:[#allocation15 + $0x90] sm:$0xff]   ;;  %v18219_v42 = vld [vmem:[#allocation15 + $0x98] sm:$0xff]   ;;  %v18220_v45 = vld [vmem:[#allocation15 + $0xe0] sm:$0xff]  }
 0xc05   :  { %14367 = vmatprep.subr.bf16.mxu0 %v18147_v33  ;;  %v18221_v33 = vld [vmem:[#allocation15 + $0xa0] sm:$0xff]  }
 0xc07   :  { %14303 = vmatpush1.bf16.msra.mxu1 %v18142_v12  ;;  %v18222_v12 = vld [vmem:[#allocation15 + $0xe8] sm:$0xff]  }
 0xc08   :  { %14368 = vmatpush1.bf16.msra.mxu0 %v18145_v3  ;;  %14304 = vmatprep.subr.bf16.mxu1 %v18150_v59  ;;  %v18223_v3 = vld [vmem:[#allocation15 + $0xa8] sm:$0xff]   ;;  %v18224_v59 = vld [vmem:[#allocation15 + $0xf0] sm:$0xff]  }
 0xc09   :  { %14369 = vmatprep.subr.bf16.mxu0 %v18153_v58  ;;  %v18225_v58 = vld [vmem:[#allocation15 + $0xb0] sm:$0xff]  }
 0xc0b   :  { %14305 = vmatpush1.bf16.msra.mxu1 %v18148_v44  ;;  %v18226_v44 = vld [vmem:[#allocation15 + $0xf8] sm:$0xff]  }
 0xc0c   :  { %14370 = vmatpush1.bf16.msra.mxu0 %v18151_v43  ;;  %14306 = vmatprep.subr.bf16.mxu1 %v18156_v22  ;;  %v18227_v43 = vld [vmem:[#allocation15 + $0xb8] sm:$0xff]  }
 0xc0d   :  { %14371 = vmatprep.subr.bf16.mxu0 %v18159_v31 }
 0xc0f   :  { %14307 = vmatpush1.bf16.msra.mxu1 %v18154_v4 }
 0xc10   :  { %14372 = vmatpush1.bf16.msra.mxu0 %v18157_v2  ;;  %14308 = vmatprep.subr.bf16.mxu1 %v18162_v47  ;;  %v14386_v47 = vld [vmem:[#allocation13] sm:$0xf] }
 0xc11   :  { %16223 = vmatprep.subr.bf16.mxu0 %v18212_v15 }
 0xc13   :  { %14374 = vmatmul.mubr.bf16.vlgmr.msra.gmra.mrb[164].mxu0 %v21006_v37  ;;  %14309 = vmatpush1.bf16.msra.mxu1 %v18160_v62  ;;  %v18180_v37 = vld [vmem:[#allocation12 + $0xd4c] ss:$16 sps:$4 sm:$0xff]  }
 0xc14   :  { %14310 = vmatprep.subr.bf16.mxu1 %v18165_v61  ;;  %16224 = vmatpush3.bf16.msra.mxu0 %v18213_v35 }
 0xc15   :  { %16225 = vmatprep.subr.bf16.mxu0 %v18214_v51 }
 0xc17   :  { %14311 = vmatpush1.bf16.msra.mxu1 %v18163_v10  ;;  %v21144_v10 = vld [vmem:[#allocation25_spill] sm:$0xff] }
 0xc18   :  { %14312 = vmatprep.subr.bf16.mxu1 %v18168_v27  ;;  %16226 = vmatpush3.bf16.msra.mxu0 %v18215_v7  ;;  %v14391_v27 = vrot.slane %v14386_v47, %v21144_v10 }
 0xc19   :  { %16227 = vmatprep.subr.bf16.mxu0 %v18216_v16  ;;  %v16168_v16 = vld [vmem:[#allocation16] ss:$0 sm:$0xff] }
 0xc1b   :  { %14313 = vmatpush1.bf16.msra.mxu1 %v18166_v55 }
 0xc1c   :  { %14314 = vmatprep.subr.bf16.mxu1 %v18171_v8  ;;  %16228 = vmatpush3.bf16.msra.mxu0 %v18217_v34  ;;  %v21148_v34 = vlaneseq }
 0xc1f   :  { %14315 = vmatpush1.bf16.msra.mxu1 %v18169_v36  ;;  %v21145_v36 = vld [vmem:[#allocation26_spill] sm:$0xff] }
 0xc20   :  { %14316 = vmatprep.subr.bf16.mxu1 %v18174_v24  ;;  %v14395_v24 = vrot.slane %v14386_v47, %v21145_v36 }
 0xc23   :  { %14317 = vmatpush1.bf16.msra.mxu1 %v18172_v52 }
 0xc24   :  { %14318 = vmatprep.subr.bf16.mxu1 %v18177_v14 }
 0xc27   :  { %14319 = vmatpush1.bf16.msra.mxu1 %v18175_v18 }
 0xc28   :  { %14320 = vmatprep.subr.bf16.mxu1 %v18180_v37 }
 0xc2b   :  { %14321 = vmatpush1.bf16.msra.mxu1 %v18178_v13 }
 0xc2c   :  { %14322 = vmatprep.subr.bf16.mxu1 %v18183_v19 }
 0xc2f   :  { %14323 = vmatpush1.bf16.msra.mxu1 %v18181_v48 }
 0xc30   :  { %14324 = vmatprep.subr.bf16.mxu1 %v18186_v0 }
 0xc33   :  { %14325 = vmatpush1.bf16.msra.mxu1 %v18184_v28 }
 0xc34   :  { %14326 = vmatprep.subr.bf16.mxu1 %v18189_v21 }
 0xc37   :  { %14327 = vmatpush1.bf16.msra.mxu1 %v18187_v57 }
 0xc38   :  { %14328 = vmatprep.subr.bf16.mxu1 %v18192_v25 }
 0xc3b   :  { %14329 = vmatpush1.bf16.msra.mxu1 %v18190_v1 }
 0xc3c   :  { %14330 = vmatprep.subr.bf16.mxu1 %v18195_v30 }
 0xc3f   :  { %14331 = vmatpush1.bf16.msra.mxu1 %v18193_v29 }
 0xc40   :  { %16201 = vmatprep.subr.bf16.mxu1 %v18196_v38 }
 0xc42   :  { %14333 = vmatmul.mubr.bf16.vlgmr.msra.gmra.mrb[148].mxu1 %v21015_v53  ;;  %v18218_v53 = vld [vmem:[#allocation15 + $0xd8] sm:$0xff]  }
 0xc43   :  { %16202 = vmatpush3.bf16.msra.mxu1 %v18197_v20  ;;  %16229 = vmatprep.subr.bf16.mxu0 %v18218_v53  ;;  %v21146_v20 = vld [vmem:[#allocation27_spill] sm:$0xff]  ;;  %v14764_v53 = vand.u32 127, %v21148_v34 }
 0xc44   :  { %16203 = vmatprep.subr.bf16.mxu1 %v18198_v63  ;;  %16230 = vmatpush3.bf16.msra.mxu0 %v18219_v42  ;;  %v14399_v63 = vrot.slane %v14386_v47, %v21146_v20 }
 0xc45   :  { %16231 = vmatprep.subr.bf16.mxu0 %v18220_v45  ;;  %vm14765_vm9 = vcmp.lt.s32.totalorder %v14764_v53, 10 }
 0xc47   :  { %16204 = vmatpush3.bf16.msra.mxu1 %v18199_v6 }
 0xc48   :  { %16205 = vmatprep.subr.bf16.mxu1 %v18200_v60  ;;  %16232 = vmatpush3.bf16.msra.mxu0 %v18221_v33  ;;  %v21147_v60 = vld [vmem:[#allocation28_spill] sm:$0xff] }
 0xc49   :  { %16233 = vmatprep.subr.bf16.mxu0 %v18222_v12 }
 0xc4b   :  { %16206 = vmatpush3.bf16.msra.mxu1 %v18201_v46 }
 0xc4c   :  { %16207 = vmatprep.subr.bf16.mxu1 %v18202_v39  ;;  %16234 = vmatpush3.bf16.msra.mxu0 %v18223_v3 }
 0xc4d   :  { %16235 = vmatprep.subr.bf16.mxu0 %v18224_v59 }
 0xc4f   :  { %16208 = vmatpush3.bf16.msra.mxu1 %v18203_v40 }
 0xc50   :  { %16209 = vmatprep.subr.bf16.mxu1 %v18204_v50  ;;  %16236 = vmatpush3.bf16.msra.mxu0 %v18225_v58 }
 0xc51   :  { %16237 = vmatprep.subr.bf16.mxu0 %v18226_v44 }
 0xc53   :  { %16210 = vmatpush3.bf16.msra.mxu1 %v18205_v56 }
 0xc54   :  { %16211 = vmatprep.subr.bf16.mxu1 %v18206_v23  ;;  %16238 = vmatpush3.bf16.msra.mxu0 %v18227_v43 }
 0xc57   :  { %16212 = vmatpush3.bf16.msra.mxu1 %v18207_v9 }
 0xc58   :  { %16213 = vmatprep.subr.bf16.mxu1 %v18208_v5 }
 0xc5b   :  { %16214 = vmatpush3.bf16.msra.mxu1 %v18209_v54 }
 0xc5c   :  { %16215 = vmatprep.subr.bf16.mxu1 %v18210_v17 }
 0xc5f   :  { %16216 = vmatpush3.bf16.msra.mxu1 %v18211_v32 }
 0xca6   :  { %v14293_v22 = vpop.f32.mrb[160].mxu0 }
 0xca7   :  { %v14295_v31 = vpop.f32.mrb[161].mxu0 }
 0xca8   :  { %v14297_v4 = vpop.f32.mrb[162].mxu0 }
 0xca9   :  { %v14298_v2 = vpop.f32.mrb[163].mxu0 }
 0xcd5   :  { %v14252_v62 = vpop.f32.mrb[144].mxu1 }
 0xcd6   :  { %v14294_v61 = vadd.f32 %v14293_v22, %v14252_v62  ;;  %v14254_v55 = vpop.f32.mrb[145].mxu1 }
 0xcd7   :  { %v14296_v8 = vadd.f32 %v14295_v31, %v14254_v55  ;;  %v14256_v52 = vpop.f32.mrb[146].mxu1 }
 0xcd8   :  { %v14382_v14 = vadd.f32 %v14294_v61, %v21001_v26  ;;  %v14257_v18 = vpop.f32.mrb[147].mxu1 }
 0xcd9   :  { %v14383_v37 = vadd.f32 %v14296_v8, %v21004_v41  ;;  %v14403_v41 = vrot.slane %v14386_v47, %v21147_v60 }
 0xcda   :  { %v14408_v13 = vadd.f32 %v14391_v27, %v14382_v14 }
 0xcdb   :  { %v14409_v19 = vadd.f32 %v14395_v24, %v14383_v37 }
 0xcdc   :  { %v14412_v48 = vmax.f32 %v14408_v13, 0.0 }
 0xcdd   :  { %v14413_v0 = vmax.f32 %v14409_v19, 0.0 }
 0xcde   :  { %v14416_v21 = vpack.c.bf16 %v14412_v48, %v14412_v48 }
 0xcdf   :  { %v14417_v28 = vpack.c.bf16 %v14413_v0, %v14413_v0 }
 0xce1   :  { %14715 = vmatprep.mubr.bf16.mxu1 %v14417_v28 }
 0xce2   :  { %14716 = vmatmul.mubr.bf16.vlgmr.msra.gmra.mrb[152].mxu1 %v14416_v21 }
 0xce6   :  { %v14375_v57 = vpop.f32.mrb[164].mxu0 }
 0xce7   :  { %v14377_v25 = vpop.f32.mrb[165].mxu0 }
 0xce8   :  { %v14379_v1 = vpop.f32.mrb[166].mxu0 }
 0xce9   :  { %v14380_v30 = vpop.f32.mrb[167].mxu0 }
 0xd15   :  { %v14334_v29 = vpop.f32.mrb[148].mxu1 }
 0xd16   :  { %v14376_v38 = vadd.f32 %v14375_v57, %v14334_v29  ;;  %v14336_v26 = vpop.f32.mrb[149].mxu1 }
 0xd17   :  { %v14378_v6 = vadd.f32 %v14377_v25, %v14336_v26  ;;  %v14338_v46 = vpop.f32.mrb[150].mxu1 }
 0xd18   :  { %v14384_v39 = vadd.f32 %v14376_v38, %v21010_v11  ;;  %v14339_v40 = vpop.f32.mrb[151].mxu1 }
 0xd19   :  { %v14385_v50 = vadd.f32 %v14378_v6, %v21013_v49 }
 0xd1a   :  { %v14410_v56 = vadd.f32 %v14399_v63, %v14384_v39 }
 0xd1b   :  { %v14411_v23 = vadd.f32 %v14403_v41, %v14385_v50 }
 0xd1c   :  { %v14414_v9 = vmax.f32 %v14410_v56, 0.0 }
 0xd1d   :  { %v14415_v5 = vmax.f32 %v14411_v23, 0.0 }
 0xd1e   :  { %v14418_v17 = vpack.c.bf16 %v14414_v9, %v14414_v9 }
 0xd1f   :  { %v14419_v54 = vpack.c.bf16 %v14415_v5, %v14415_v5 }
 0xd21   :  { %14755 = vmatprep.mubr.bf16.mxu0 %v14419_v54 }
 0xd22   :  { %14756 = vmatmul.mubr.bf16.vlgmr.msra.gmra.mrb[168].mxu0 %v14418_v17 }
 0xdb5   :  { %v16217_v32 = vpop.f32.mrb[152].mxu1 }
 0xdb6   :  { %v16218_v15 = vpop.f32.mrb[153].mxu1 }
 0xdb7   :  { %v16219_v35 = vadd.f32 %v16218_v15, %v16217_v32  ;;  %v16220_v51 = vpop.f32.mrb[154].mxu1 }
 0xdb8   :  { %v16221_v7 = vpop.f32.mrb[155].mxu1 }
 0xdb9   :  { %v14718_v45 = vadd.f32 %v16219_v35, %v16168_v16 }
 0xdf5   :  { %v16239_v11 = vpop.f32.mrb[168].mxu0 }
 0xdf6   :  { %v16240_v42 = vpop.f32.mrb[169].mxu0 }
 0xdf7   :  { %v16241_v49 = vadd.f32 %v16240_v42, %v16239_v11  ;;  %v16242_v33 = vpop.f32.mrb[170].mxu0 }
 0xdf8   :  { %v16243_v12 = vpop.f32.mrb[171].mxu0 }
 0xdf9   :  { %v14758_v3 = vadd.f32 %v16241_v49, %v14718_v45 }
 0xdfb   :  { %v14766_v59 = vsel %vm14765_vm9, %v14758_v3, -1e+30 }
 0xdfc   :  { %14767 = vmax.xlane.f32.xlu0 %v14766_v59 }
 0xe89   :  { %v14768_v58 = vpop.xlane.xlu0 %14767 }
 0xe8a   :  { %v14769_v44 = vsub.f32 %v14766_v59, %v14768_v58 }
 0xe8c   :  { %v14770_v43 = vmul.f32 1.442695, %v14769_v44 }
 0xe8e   :  { %18228 = vpow2.f32 %v14770_v43 }
 0xe98   :  { %v18229_v22 = vpop.eup %18228 }
 0xe99   :  { %14772 = vadd.xlane.f32.xlu0 %v18229_v22 }
 0xf26   :  { %v14773_v31 = vpop.xlane.xlu0 %14772 }
 0xf27   :  { %18230 = vlog2.f32 %v14773_v31 }
 0xf31   :  { %v18231_v4 = vpop.eup %18230 }
 0xf32   :  { %v14775_v2 = vmul.f32 0.6931472, %v18231_v4 }
 0xf34   :  { %v14776_v47 = vsub.f32 %v14769_v44, %v14775_v2 }
 0xf36   :  { %14777 = vst [vmem:[%s21043_s11] sm:$0xff] %v14776_v47 }
 0xf37   :  { %14782 = vsyncpa [#allocation3], 1 }
 0xf38   :  { %14783 = vsyncpa [#allocation5], 1 }
 0xf39   :  { %14784 = vsyncpa [#allocation8], 1 }
 0xf3a   :  { %14785 = vsyncpa [#allocation11], 1 }
 0xf3b   :  { %14786 = vsyncpa [#allocation14], 1 }
 0xf3c   :  { %14787 = vsyncpa [#allocation17], 1 }

</bundles_post_ra>
